<compile_context>
chip_gen: v7x
topology: tpu7x:2x2x1
jax: 0.10.0
libtpu: 0.0.40
codegen_flags: <defaults>
</compile_context>

<pallas_src>
import functools
import math

import jax
import jax.numpy as jnp
from jax.experimental import pallas as pl
from jax.experimental.pallas import tpu as pltpu

_LANES = 128
_ACT_DTYPE = jnp.bfloat16


def _round_up(x, m):
    return ((x + m - 1) // m) * m


@functools.lru_cache(maxsize=None)
def _vmem_limit():
    # ~60% of physical VMEM: ~76 MiB on v5e/v6e (128 MiB), ~38 MiB on v7x (64 MiB).
    try:
        cap = int(pltpu.get_tpu_info().vmem_capacity_bytes)
        return max(32 << 20, min((cap * 3) // 5, 96 << 20))
    except Exception:
        return 32 << 20


# ---------------------------------------------------------------------------
# Pallas kernels
# ---------------------------------------------------------------------------
def _conv_s1_kernel(offsets, act, x_ref, w_ref, b_ref, o_ref):
    """Fused stride-1 conv for one image (flattened spatial rows).

    x_ref: (S, Cin_p)  bf16  spatially padded, flattened input
    w_ref: (KK, Cin_p, Cout_p) bf16  per-tap weight matrices
    b_ref: (1, Cout_p) f32
    o_ref: (M, Cout_p) bf16  flattened output rows (wrap columns discarded later)

    The im2col window for tap (i, j) is the contiguous slice starting at
    offset i*Wp + j, so no patch matrix ever touches HBM.
    """
    m_out, coutp = o_ref.shape
    acc = jnp.zeros((m_out, coutp), jnp.float32)
    for q, off in enumerate(offsets):
        acc = acc + jnp.dot(
            x_ref[pl.ds(off, m_out), :], w_ref[q],
            preferred_element_type=jnp.float32)
    acc = acc + b_ref[...]
    if act == "relu":
        acc = jnp.maximum(acc, 0.0)
    o_ref[...] = acc.astype(o_ref.dtype)


def _matmul_bias_relu_kernel(x_ref, w_ref, b_ref, o_ref):
    # Used only for the 11x11 / stride-4 stem (im2col built by XLA glue).
    acc = jnp.dot(x_ref[...], w_ref[...], preferred_element_type=jnp.float32)
    acc = jnp.maximum(acc + b_ref[...], 0.0)
    o_ref[...] = acc.astype(o_ref.dtype)


def _maxpool3x3s2_kernel(ee_ref, eo_ref, oe_ref, oo_ref, o_ref):
    # Inputs are the even/odd (row, col) phase tensors of the feature map;
    # all in-kernel accesses are contiguous slices (pure VPU max).
    oh, ow, _ = o_ref.shape
    m = jnp.maximum(ee_ref[pl.ds(0, oh), pl.ds(0, ow), :],
                    ee_ref[pl.ds(0, oh), pl.ds(1, ow), :])
    m = jnp.maximum(m, ee_ref[pl.ds(1, oh), pl.ds(0, ow), :])
    m = jnp.maximum(m, ee_ref[pl.ds(1, oh), pl.ds(1, ow), :])
    m = jnp.maximum(m, eo_ref[pl.ds(0, oh), :, :])
    m = jnp.maximum(m, eo_ref[pl.ds(1, oh), :, :])
    m = jnp.maximum(m, oe_ref[:, pl.ds(0, ow), :])
    m = jnp.maximum(m, oe_ref[:, pl.ds(1, ow), :])
    m = jnp.maximum(m, oo_ref[...])
    o_ref[...] = m


# ---------------------------------------------------------------------------
# Pallas-backed ops
# ---------------------------------------------------------------------------
def conv2d_s1(x, w_taps, b, *, kh, kw, pads, act="relu"):
    """Stride-1 conv. x: (N, H, W, Cin_p) bf16 (channels padded to 128).

    w_taps: (kh*kw, Cin_p, Cout_p) bf16, b: (1, Cout_p) f32.
    pads = (top, bottom, left, right) zero padding.
    Returns (N, oh, ow, Cout_p) bf16 (channel-padded, lane-dense)."""
    N, H, W, cinp = x.shape
    kk, cinp_w, coutp = w_taps.shape
    assert kk == kh * kw and cinp_w == cinp
    pt, pb, plft, prt = pads
    Hp, Wp = H + pt + pb, W + plft + prt
    oh, ow = Hp - kh + 1, Wp - kw + 1
    assert oh > 0 and ow > 0

    xp = jnp.pad(x, ((0, 0), (pt, pb), (plft, prt), (0, 0)))
    xf = xp.reshape(N, Hp * Wp, cinp)
    xf = jnp.pad(xf, ((0, 0), (0, kw - 1), (0, 0)))   # tail pad for last window
    S = Hp * Wp + kw - 1
    m_out = oh * Wp                                   # incl. (kw-1) wrap cols/row
    offsets = tuple(i * Wp + j for i in range(kh) for j in range(kw))

    out = pl.pallas_call(
        functools.partial(_conv_s1_kernel, offsets, act),
        out_shape=jax.ShapeDtypeStruct((N, m_out, coutp), _ACT_DTYPE),
        grid=(N,),
        in_specs=[
            pl.BlockSpec((None, S, cinp), lambda n: (n, 0, 0)),
            pl.BlockSpec((kk, cinp, coutp), lambda n: (0, 0, 0)),
            pl.BlockSpec((1, coutp), lambda n: (0, 0)),
        ],
        out_specs=pl.BlockSpec((None, m_out, coutp), lambda n: (n, 0, 0)),
        compiler_params=pltpu.CompilerParams(
            dimension_semantics=("parallel",),
            vmem_limit_bytes=_vmem_limit(),
        ),
    )(xf, w_taps, b)
    return out.reshape(N, oh, Wp, coutp)[:, :, :ow, :]


def maxpool2d_3x3s2(x):
    """MaxPool2d(kernel=3, stride=2), PyTorch semantics. x: (N,H,W,Cp) bf16."""
    N, H, W, C = x.shape
    oh = (H - 3) // 2 + 1
    ow = (W - 3) // 2 + 1
    ee = x[:, 0:2 * oh + 1:2, 0:2 * ow + 1:2, :]      # (N, oh+1, ow+1, C)
    eo = x[:, 0:2 * oh + 1:2, 1:2 * ow:2, :]          # (N, oh+1, ow,   C)
    oe = x[:, 1:2 * oh:2, 0:2 * ow + 1:2, :]          # (N, oh,   ow+1, C)
    oo = x[:, 1:2 * oh:2, 1:2 * ow:2, :]              # (N, oh,   ow,   C)
    return pl.pallas_call(
        _maxpool3x3s2_kernel,
        out_shape=jax.ShapeDtypeStruct((N, oh, ow, C), x.dtype),
        grid=(N,),
        in_specs=[
            pl.BlockSpec((None, oh + 1, ow + 1, C), lambda n: (n, 0, 0, 0)),
            pl.BlockSpec((None, oh + 1, ow, C), lambda n: (n, 0, 0, 0)),
            pl.BlockSpec((None, oh, ow + 1, C), lambda n: (n, 0, 0, 0)),
            pl.BlockSpec((None, oh, ow, C), lambda n: (n, 0, 0, 0)),
        ],
        out_specs=pl.BlockSpec((None, oh, ow, C), lambda n: (n, 0, 0, 0)),
        compiler_params=pltpu.CompilerParams(
            dimension_semantics=("parallel",),
            vmem_limit_bytes=_vmem_limit(),
        ),
    )(ee, eo, oe, oo)


def stem_conv(x, wm, b):
    """Fused rgb+d stem: Conv2d(4->128, k=11, s=4, p=2) + ReLU.

    x: (N, H, W, 4) bf16. wm: (Kp, 128) bf16 im2col weight, b: (1, 128) f32."""
    N, H, W, Cin = x.shape
    k, s, p = 11, 4, 2
    xp = jnp.pad(x, ((0, 0), (p, p), (p, p), (0, 0)))
    Hp, Wp = H + 2 * p, W + 2 * p
    oh = (Hp - k) // s + 1
    ow = (Wp - k) // s + 1
    cols = []
    for i in range(k):
        for j in range(k):
            cols.append(xp[:, i:i + s * (oh - 1) + 1:s,
                              j:j + s * (ow - 1) + 1:s, :])
    patches = jnp.stack(cols, axis=3).reshape(N * oh * ow, k * k * Cin)

    M, K = patches.shape
    Kp, coutp = wm.shape
    tm = min(512, _round_up(M, 8))
    Mp = _round_up(M, tm)
    patches = jnp.pad(patches, ((0, Mp - M), (0, Kp - K)))

    out = pl.pallas_call(
        _matmul_bias_relu_kernel,
        out_shape=jax.ShapeDtypeStruct((Mp, coutp), _ACT_DTYPE),
        grid=(Mp // tm,),
        in_specs=[
            pl.BlockSpec((tm, Kp), lambda i: (i, 0)),
            pl.BlockSpec((Kp, coutp), lambda i: (0, 0)),
            pl.BlockSpec((1, coutp), lambda i: (0, 0)),
        ],
        out_specs=pl.BlockSpec((tm, coutp), lambda i: (i, 0)),
        compiler_params=pltpu.CompilerParams(
            dimension_semantics=("parallel",),
            vmem_limit_bytes=_vmem_limit(),
        ),
    )(patches, wm, b)
    return out[:M].reshape(N, oh, ow, coutp)


# ---------------------------------------------------------------------------
# ConvTranspose2d (sub-pixel decomposition) forward wrapper
# ---------------------------------------------------------------------------
def _convt_geometry(k, s, p):
    lo = k - 1 - p
    i0 = [(lo - phi) % s for phi in range(s)]
    ntap = [-(-(k - i0[phi]) // s) for phi in range(s)]
    coff = [(phi + i0[phi] - lo) // s for phi in range(s)]
    L = max(0, -min(coff))
    U = max(ntap[phi] + coff[phi] for phi in range(s)) + L
    return lo, L, U


def conv_transpose2d(x, w_taps, b, *, k, s, p, op, cout, act):
    """PyTorch-semantics ConvTranspose2d on channel-padded NHWC input.

    w_taps/b are the phase-expanded per-tap weights from prepare_params():
    one stride-1 conv (kernel U x U, s*s*cout channels), pixel shuffle, crop."""
    N, H, W, _ = x.shape
    _, L, U = _convt_geometry(k, s, p)
    OH = (H - 1) * s - 2 * p + k + op
    OW = (W - 1) * s - 2 * p + k + op
    tmax_h = max(-(-(OH - phi) // s) for phi in range(s))
    tmax_w = max(-(-(OW - phi) // s) for phi in range(s))
    Rh = max(0, tmax_h - 1 + U - (H + L))
    Rw = max(0, tmax_w - 1 + U - (W + L))

    y = conv2d_s1(x, w_taps, b, kh=U, kw=U, pads=(L, Rh, L, Rw), act=act)
    y = y[..., :s * s * cout]                       # drop padded phase channels
    Nb, hh, ww, _ = y.shape
    y = y.reshape(Nb, hh, ww, s, s, cout)
    y = y.transpose(0, 1, 3, 2, 4, 5).reshape(Nb, hh * s, ww * s, cout)
    return y[:, :OH, :OW, :]


# ---------------------------------------------------------------------------
# Weight packing (hoisted out of the jitted forward)
# ---------------------------------------------------------------------------
def _pad_channels(x, cp=_LANES):
    c = x.shape[-1]
    if c == cp:
        return x
    return jnp.pad(x, ((0, 0),) * (x.ndim - 1) + ((0, cp - c),))


def _pack_taps(w_oihw, b):
    """(Cout, Cin, kh, kw) f32 -> ((kh*kw, 128, Cout_p) bf16, (1, Cout_p) f32)."""
    cout, cin, kh, kw = w_oihw.shape
    coutp = _round_up(cout, _LANES)
    wt = jnp.zeros((kh * kw, _LANES, coutp), jnp.float32)
    wt = wt.at[:, :cin, :cout].set(
        w_oihw.transpose(2, 3, 1, 0).reshape(kh * kw, cin, cout))
    bt = jnp.zeros((1, coutp), jnp.float32).at[0, :cout].set(b)
    return wt.astype(_ACT_DTYPE), bt


def _pack_convt_taps(w_iohw, b, *, s, p):
    """ConvTranspose weight (Cin, Cout, k, k) -> phase-expanded per-tap pack."""
    cin, cout, k, _ = w_iohw.shape
    lo, L, U = _convt_geometry(k, s, p)
    wf = jnp.flip(w_iohw, axis=(2, 3)).transpose(1, 0, 2, 3)   # (Cout, Cin, k, k)
    lpad = max(0, (s - 1) + L * s - lo)
    rpad = max(0, lo - L * s + (U - 1) * s - (k - 1))
    wf = jnp.pad(wf, ((0, 0), (0, 0), (lpad, rpad), (lpad, rpad)))
    phases = []
    for py in range(s):
        sy = lo - py - L * s + lpad
        for px in range(s):
            sx = lo - px - L * s + lpad
            phases.append(wf[:, :, sy:sy + (U - 1) * s + 1:s,
                                   sx:sx + (U - 1) * s + 1:s])  # (Cout, Cin, U, U)
    w_eff = jnp.stack(phases, axis=0).reshape(s * s * cout, cin, U, U)
    b_eff = jnp.tile(b, s * s)
    return _pack_taps(w_eff, b_eff)


def prepare_params(p):
    """One-time weight re-layout: fused stems/heads, tap packing, bf16 cast."""
    prep = {}
    # Fused rgb+d stem: 4-channel input, block-diagonal 128-channel output.
    # Depth replicated 3x in the original == summed weight on one channel.
    w_d_sum = p["d_w"].sum(axis=1, keepdims=True)                # (64,1,11,11)
    stem_w = jnp.zeros((128, 4, 11, 11), jnp.float32)
    stem_w = stem_w.at[:64, :3].set(p["rgb_w"])
    stem_w = stem_w.at[64:, 3:].set(w_d_sum)
    stem_b = jnp.concatenate([p["rgb_b"], p["d_b"]])
    wm = stem_w.transpose(2, 3, 1, 0).reshape(11 * 11 * 4, 128)  # im2col layout
    kp = _round_up(wm.shape[0], _LANES)
    prep["stem_wm"] = jnp.pad(wm, ((0, kp - wm.shape[0]), (0, 0))).astype(_ACT_DTYPE)
    prep["stem_b"] = stem_b.reshape(1, 128).astype(jnp.float32)

    for name in ("f1", "f2", "f3", "f4", "f6"):
        prep[name + "_w"], prep[name + "_b"] = _pack_taps(p[name + "_w"],
                                                          p[name + "_b"])
    prep["f5_w"], prep["f5_b"] = _pack_convt_taps(p["f5_w"], p["f5_b"], s=2, p=0)
    prep["f7_w"], prep["f7_b"] = _pack_convt_taps(p["f7_w"], p["f7_b"], s=2, p=1)
    # Fused grasp + confidence head (Cout = 5 + 1).
    gc_w = jnp.concatenate([p["g_w"], p["c_w"]], axis=1)         # (16, 6, 11, 11)
    gc_b = jnp.concatenate([p["g_b"], p["c_b"]])
    prep["gc_w"], prep["gc_b"] = _pack_convt_taps(gc_w, gc_b, s=4, p=0)
    return prep


# ---------------------------------------------------------------------------
# Parameter initialization (deterministic, synthetic)
# ---------------------------------------------------------------------------
def _xavier_uniform(key, shape):
    recept = shape[2] * shape[3]
    fan_in, fan_out = shape[1] * recept, shape[0] * recept
    bound = math.sqrt(6.0 / (fan_in + fan_out))
    return jax.random.uniform(key, shape, jnp.float32, -bound, bound)


def _normal(key, shape, scale=0.05):
    return scale * jax.random.normal(key, shape, jnp.float32)


def init_params(key):
    ks = jax.random.split(key, 24)
    p = {}
    # AlexNet features[:3] backbones (pretrained weights replaced by synthetic init)
    p["rgb_w"] = _normal(ks[0], (64, 3, 11, 11)); p["rgb_b"] = _normal(ks[1], (64,))
    p["d_w"] = _normal(ks[2], (64, 3, 11, 11)); p["d_b"] = _normal(ks[3], (64,))
    # self.features
    p["f1_w"] = _xavier_uniform(ks[4], (32, 128, 5, 5)); p["f1_b"] = _normal(ks[5], (32,))
    p["f2_w"] = _xavier_uniform(ks[6], (64, 32, 3, 3));  p["f2_b"] = _normal(ks[7], (64,))
    p["f3_w"] = _xavier_uniform(ks[8], (64, 64, 3, 3));  p["f3_b"] = _normal(ks[9], (64,))
    p["f4_w"] = _xavier_uniform(ks[10], (64, 64, 3, 3)); p["f4_b"] = _normal(ks[11], (64,))
    p["f5_w"] = _xavier_uniform(ks[12], (64, 32, 3, 3)); p["f5_b"] = _normal(ks[13], (32,))  # ConvT
    p["f6_w"] = _xavier_uniform(ks[14], (32, 32, 5, 5)); p["f6_b"] = _normal(ks[15], (32,))
    p["f7_w"] = _xavier_uniform(ks[16], (32, 16, 3, 3)); p["f7_b"] = _normal(ks[17], (16,))  # ConvT
    # heads
    p["g_w"] = _xavier_uniform(ks[18], (16, 5, 11, 11)); p["g_b"] = _normal(ks[19], (5,))    # ConvT
    p["c_w"] = _xavier_uniform(ks[20], (16, 1, 11, 11)); p["c_b"] = _normal(ks[21], (1,))    # ConvT
    return p


# ---------------------------------------------------------------------------
# Forward pass (mirrors AlexnetMap_v3.forward, inference mode)
# ---------------------------------------------------------------------------
def alexnetmap_v3_forward(prep, x):
    # x: NCHW f32 at the boundary; NHWC bf16 (128-channel padded) internally.
    x = x.transpose(0, 2, 3, 1).astype(_ACT_DTYPE)            # (N, H, W, 4)

    # Fused rgb_features / d_features stem + single 128-channel maxpool.
    h = stem_conv(x, prep["stem_wm"], prep["stem_b"])          # (N, H1, W1, 128)
    h = maxpool2d_3x3s2(h)

    # self.features  (Dropout(0.3) layers are identity in inference mode)
    # TODO(synk): train-mode stochastic Dropout not implemented (eval semantics).
    h = conv2d_s1(h, prep["f1_w"], prep["f1_b"], kh=5, kw=5, pads=(2, 2, 2, 2), act="relu")
    h = maxpool2d_3x3s2(h)
    h = conv2d_s1(h, prep["f2_w"], prep["f2_b"], kh=3, kw=3, pads=(1, 1, 1, 1), act="relu")
    h = conv2d_s1(h, prep["f3_w"], prep["f3_b"], kh=3, kw=3, pads=(1, 1, 1, 1), act="relu")
    h = conv2d_s1(h, prep["f4_w"], prep["f4_b"], kh=3, kw=3, pads=(1, 1, 1, 1), act="relu")
    h = conv_transpose2d(h, prep["f5_w"], prep["f5_b"],
                         k=3, s=2, p=0, op=0, cout=32, act="relu")
    h = _pad_channels(h)                                       # 32 -> 128
    h = conv2d_s1(h, prep["f6_w"], prep["f6_b"], kh=5, kw=5, pads=(2, 2, 2, 2), act="relu")
    h = conv_transpose2d(h, prep["f7_w"], prep["f7_b"],
                         k=3, s=2, p=1, op=1, cout=16, act="relu")
    h = _pad_channels(h)                                       # 16 -> 128

    # Fused grasp + confidence head (single ConvTranspose, Cout = 5 + 1).
    out = conv_transpose2d(h, prep["gc_w"], prep["gc_b"],
                           k=11, s=4, p=0, op=1, cout=6, act="none")
    out = out.astype(jnp.float32)
    grasp = jnp.tanh(out[..., :5])
    conf = jax.nn.sigmoid(out[..., 5:6])
    out = jnp.concatenate([grasp, conf], axis=-1)              # (N, H, W, 6) NHWC
    return out.transpose(0, 3, 1, 2)                           # NCHW at the boundary


# ---------------------------------------------------------------------------
if __name__ == "__main__":
    key = jax.random.PRNGKey(0)
    k_params, k_x = jax.random.split(key)

    params = init_params(k_params)
    prep = prepare_params(params)                              # one-time weight packing
    x = jax.random.normal(k_x, (2, 4, 32, 32), jnp.float32)    # NCHW RGB-D input

    fwd = jax.jit(alexnetmap_v3_forward)
    out = jax.block_until_ready(fwd(prep, x))

    assert out.shape == (2, 6, 32, 32), out.shape
    assert bool(jnp.all(jnp.isfinite(out)))
    print("KERNEL_OK")
</pallas_src>

<mosaic_0001>
module attributes {stable_mosaic.version = 11 : i64} {
  func.func @_matmul_bias_relu_kernel(%arg0: i32, %arg1: memref<104x512xbf16, #tpu.memory_space<vmem>>, %arg2: memref<512x128xbf16, #tpu.memory_space<vmem>>, %arg3: memref<1x128xf32, #tpu.memory_space<vmem>>, %arg4: memref<104x128xbf16, #tpu.memory_space<vmem>>) attributes {dimension_semantics = [#tpu.dimension_semantics<parallel>], iteration_bounds = array<i64: 1>, scalar_prefetch = 0 : i64, scratch_operands = 0 : i64, tpu.core_type = #tpu.core_type<tc>, window_params = [{transform_indices = @transform_0, window_bounds = array<i64: 104, 512>}, {pipeline_mode = #tpu.pipeline_mode<synchronous>, transform_indices = @transform_1, window_bounds = array<i64: 512, 128>}, {pipeline_mode = #tpu.pipeline_mode<synchronous>, transform_indices = @transform_2, window_bounds = array<i64: 1, 128>}, {transform_indices = @transform_3, window_bounds = array<i64: 104, 128>}]} {
    %c0 = arith.constant 0 : index
    %c0_0 = arith.constant 0 : index
    %0 = vector.load %arg1[%c0, %c0_0] : memref<104x512xbf16, #tpu.memory_space<vmem>>, vector<104x512xbf16>
    %c0_1 = arith.constant 0 : index
    %c0_2 = arith.constant 0 : index
    %1 = vector.load %arg2[%c0_1, %c0_2] : memref<512x128xbf16, #tpu.memory_space<vmem>>, vector<512x128xbf16>
    %cst = arith.constant dense<0.000000e+00> : vector<104x128xf32>
    %2 = tpu.matmul %0, %1, %cst {dimension_numbers = #tpu.dot_dimension_numbers<[1], [0], [0], [1], [0, 0, 1, 1], [], []>} : vector<104x512xbf16>, vector<512x128xbf16>, vector<104x128xf32> -> vector<104x128xf32>
    %c0_3 = arith.constant 0 : index
    %c0_4 = arith.constant 0 : index
    %3 = vector.load %arg3[%c0_3, %c0_4] : memref<1x128xf32, #tpu.memory_space<vmem>>, vector<1x128xf32>
    %4 = vector.broadcast %3 : vector<1x128xf32> to vector<104x128xf32>
    %5 = arith.addf %2, %4 : vector<104x128xf32>
    %cst_5 = arith.constant 0.000000e+00 : f32
    %6 = vector.broadcast %cst_5 : f32 to vector<104x128xf32>
    %7 = arith.maximumf %5, %6 : vector<104x128xf32>
    %8 = arith.truncf %7 : vector<104x128xf32> to vector<104x128xbf16>
    %c0_6 = arith.constant 0 : index
    %c0_7 = arith.constant 0 : index
    %9 = vector.load %arg4[%c0_6, %c0_7] : memref<104x128xbf16, #tpu.memory_space<vmem>>, vector<104x128xbf16>
    tpu.vector_store %arg4[%c0_6, %c0_7], %8 {strides = array<i32>} : memref<104x128xbf16, #tpu.memory_space<vmem>>, vector<104x128xbf16>,
    return
  }
  func.func @transform_0(%arg0: i32) -> (i32, i32) {
    %c0_i32 = arith.constant 0 : i32
    %c0_i32_0 = arith.constant 0 : i32
    return %arg0, %c0_i32 : i32, i32
  }
  func.func @transform_1(%arg0: i32) -> (i32, i32) {
    %c0_i32 = arith.constant 0 : i32
    %c0_i32_0 = arith.constant 0 : i32
    %c0_i32_1 = arith.constant 0 : i32
    return %c0_i32, %c0_i32_0 : i32, i32
  }
  func.func @transform_2(%arg0: i32) -> (i32, i32) {
    %c0_i32 = arith.constant 0 : i32
    %c0_i32_0 = arith.constant 0 : i32
    %c0_i32_1 = arith.constant 0 : i32
    return %c0_i32, %c0_i32_0 : i32, i32
  }
  func.func @transform_3(%arg0: i32) -> (i32, i32) {
    %c0_i32 = arith.constant 0 : i32
    %c0_i32_0 = arith.constant 0 : i32
    return %arg0, %c0_i32 : i32, i32
  }
}

module attributes {stable_mosaic.version = 11 : i64} {
  func.func @_maxpool3x3s2_kernel(%arg0: i32, %arg1: memref<1x4x4x128xbf16, #tpu.memory_space<vmem>>, %arg2: memref<1x4x3x128xbf16, #tpu.memory_space<vmem>>, %arg3: memref<1x3x4x128xbf16, #tpu.memory_space<vmem>>, %arg4: memref<1x3x3x128xbf16, #tpu.memory_space<vmem>>, %arg5: memref<1x3x3x128xbf16, #tpu.memory_space<vmem>>) attributes {dimension_semantics = [#tpu.dimension_semantics<parallel>], iteration_bounds = array<i64: 2>, scalar_prefetch = 0 : i64, scratch_operands = 0 : i64, tpu.core_type = #tpu.core_type<tc>, window_params = [{transform_indices = @transform_0, window_bounds = array<i64: 1, 4, 4, 128>}, {transform_indices = @transform_1, window_bounds = array<i64: 1, 4, 3, 128>}, {transform_indices = @transform_2, window_bounds = array<i64: 1, 3, 4, 128>}, {transform_indices = @transform_3, window_bounds = array<i64: 1, 3, 3, 128>}, {transform_indices = @transform_4, window_bounds = array<i64: 1, 3, 3, 128>}]} {
    %c0 = arith.constant 0 : index
    %c0_0 = arith.constant 0 : index
    %c0_1 = arith.constant 0 : index
    %c0_2 = arith.constant 0 : index
    %0 = vector.load %arg1[%c0, %c0_0, %c0_1, %c0_2] : memref<1x4x4x128xbf16, #tpu.memory_space<vmem>>, vector<1x3x3x128xbf16>
    %1 = vector.shape_cast %0 : vector<1x3x3x128xbf16> to vector<3x3x128xbf16>
    %c0_3 = arith.constant 0 : index
    %c0_4 = arith.constant 0 : index
    %c1 = arith.constant 1 : index
    %c0_5 = arith.constant 0 : index
    %2 = vector.load %arg1[%c0_3, %c0_4, %c1, %c0_5] : memref<1x4x4x128xbf16, #tpu.memory_space<vmem>>, vector<1x3x3x128xbf16>
    %3 = vector.shape_cast %2 : vector<1x3x3x128xbf16> to vector<3x3x128xbf16>
    %4 = arith.maximumf %1, %3 : vector<3x3x128xbf16>
    %c0_6 = arith.constant 0 : index
    %c1_7 = arith.constant 1 : index
    %c0_8 = arith.constant 0 : index
    %c0_9 = arith.constant 0 : index
    %5 = vector.load %arg1[%c0_6, %c1_7, %c0_8, %c0_9] : memref<1x4x4x128xbf16, #tpu.memory_space<vmem>>, vector<1x3x3x128xbf16>
    %6 = vector.shape_cast %5 : vector<1x3x3x128xbf16> to vector<3x3x128xbf16>
    %7 = arith.maximumf %4, %6 : vector<3x3x128xbf16>
    %c0_10 = arith.constant 0 : index
    %c1_11 = arith.constant 1 : index
    %c1_12 = arith.constant 1 : index
    %c0_13 = arith.constant 0 : index
    %8 = vector.load %arg1[%c0_10, %c1_11, %c1_12, %c0_13] : memref<1x4x4x128xbf16, #tpu.memory_space<vmem>>, vector<1x3x3x128xbf16>
    %9 = vector.shape_cast %8 : vector<1x3x3x128xbf16> to vector<3x3x128xbf16>
    %10 = arith.maximumf %7, %9 : vector<3x3x128xbf16>
    %c0_14 = arith.constant 0 : index
    %c0_15 = arith.constant 0 : index
    %c0_16 = arith.constant 0 : index
    %c0_17 = arith.constant 0 : index
    %11 = vector.load %arg2[%c0_14, %c0_15, %c0_16, %c0_17] : memref<1x4x3x128xbf16, #tpu.memory_space<vmem>>, vector<1x3x3x128xbf16>
    %12 = vector.shape_cast %11 : vector<1x3x3x128xbf16> to vector<3x3x128xbf16>
    %13 = arith.maximumf %10, %12 : vector<3x3x128xbf16>
    %c0_18 = arith.constant 0 : index
    %c1_19 = arith.constant 1 : index
    %c0_20 = arith.constant 0 : index
    %c0_21 = arith.constant 0 : index
    %14 = vector.load %arg2[%c0_18, %c1_19, %c0_20, %c0_21] : memref<1x4x3x128xbf16, #tpu.memory_space<vmem>>, vector<1x3x3x128xbf16>
    %15 = vector.shape_cast %14 : vector<1x3x3x128xbf16> to vector<3x3x128xbf16>
    %16 = arith.maximumf %13, %15 : vector<3x3x128xbf16>
    %c0_22 = arith.constant 0 : index
    %c0_23 = arith.constant 0 : index
    %c0_24 = arith.constant 0 : index
    %c0_25 = arith.constant 0 : index
    %17 = vector.load %arg3[%c0_22, %c0_23, %c0_24, %c0_25] : memref<1x3x4x128xbf16, #tpu.memory_space<vmem>>, vector<1x3x3x128xbf16>
    %18 = vector.shape_cast %17 : vector<1x3x3x128xbf16> to vector<3x3x128xbf16>
    %19 = arith.maximumf %16, %18 : vector<3x3x128xbf16>
    %c0_26 = arith.constant 0 : index
    %c0_27 = arith.constant 0 : index
    %c1_28 = arith.constant 1 : index
    %c0_29 = arith.constant 0 : index
    %20 = vector.load %arg3[%c0_26, %c0_27, %c1_28, %c0_29] : memref<1x3x4x128xbf16, #tpu.memory_space<vmem>>, vector<1x3x3x128xbf16>
    %21 = vector.shape_cast %20 : vector<1x3x3x128xbf16> to vector<3x3x128xbf16>
    %22 = arith.maximumf %19, %21 : vector<3x3x128xbf16>
    %c0_30 = arith.constant 0 : index
    %c0_31 = arith.constant 0 : index
    %c0_32 = arith.constant 0 : index
    %c0_33 = arith.constant 0 : index
    %23 = vector.load %arg4[%c0_30, %c0_31, %c0_32, %c0_33] : memref<1x3x3x128xbf16, #tpu.memory_space<vmem>>, vector<1x3x3x128xbf16>
    %24 = vector.shape_cast %23 : vector<1x3x3x128xbf16> to vector<3x3x128xbf16>
    %25 = arith.maximumf %22, %24 : vector<3x3x128xbf16>
    %c0_34 = arith.constant 0 : index
    %c0_35 = arith.constant 0 : index
    %c0_36 = arith.constant 0 : index
    %c0_37 = arith.constant 0 : index
    %26 = vector.load %arg5[%c0_34, %c0_35, %c0_36, %c0_37] : memref<1x3x3x128xbf16, #tpu.memory_space<vmem>>, vector<1x3x3x128xbf16>
    %27 = vector.shape_cast %26 : vector<1x3x3x128xbf16> to vector<3x3x128xbf16>
    %28 = vector.shape_cast %25 : vector<3x3x128xbf16> to vector<1x3x3x128xbf16>
    tpu.vector_store %arg5[%c0_34, %c0_35, %c0_36, %c0_37], %28 {strides = array<i32>} : memref<1x3x3x128xbf16, #tpu.memory_space<vmem>>, vector<1x3x3x128xbf16>,
    return
  }
  func.func @transform_0(%arg0: i32) -> (i32, i32, i32, i32) {
    %c0_i32 = arith.constant 0 : i32
    %c0_i32_0 = arith.constant 0 : i32
    %c0_i32_1 = arith.constant 0 : i32
    %c0_i32_2 = arith.constant 0 : i32
    return %arg0, %c0_i32, %c0_i32_0, %c0_i32_1 : i32, i32, i32, i32
  }
  func.func @transform_1(%arg0: i32) -> (i32, i32, i32, i32) {
    %c0_i32 = arith.constant 0 : i32
    %c0_i32_0 = arith.constant 0 : i32
    %c0_i32_1 = arith.constant 0 : i32
    %c0_i32_2 = arith.constant 0 : i32
    return %arg0, %c0_i32, %c0_i32_0, %c0_i32_1 : i32, i32, i32, i32
  }
  func.func @transform_2(%arg0: i32) -> (i32, i32, i32, i32) {
    %c0_i32 = arith.constant 0 : i32
    %c0_i32_0 = arith.constant 0 : i32
    %c0_i32_1 = arith.constant 0 : i32
    %c0_i32_2 = arith.constant 0 : i32
    return %arg0, %c0_i32, %c0_i32_0, %c0_i32_1 : i32, i32, i32, i32
  }
  func.func @transform_3(%arg0: i32) -> (i32, i32, i32, i32) {
    %c0_i32 = arith.constant 0 : i32
    %c0_i32_0 = arith.constant 0 : i32
    %c0_i32_1 = arith.constant 0 : i32
    %c0_i32_2 = arith.constant 0 : i32
    return %arg0, %c0_i32, %c0_i32_0, %c0_i32_1 : i32, i32, i32, i32
  }
  func.func @transform_4(%arg0: i32) -> (i32, i32, i32, i32) {
    %c0_i32 = arith.constant 0 : i32
    %c0_i32_0 = arith.constant 0 : i32
    %c0_i32_1 = arith.constant 0 : i32
    %c0_i32_2 = arith.constant 0 : i32
    return %arg0, %c0_i32, %c0_i32_0, %c0_i32_1 : i32, i32, i32, i32
  }
}

module attributes {stable_mosaic.version = 11 : i64} {
  func.func @_conv_s1_kernel(%arg0: i32, %arg1: memref<1x53x128xbf16, #tpu.memory_space<vmem>>, %arg2: memref<25x128x128xbf16, #tpu.memory_space<vmem>>, %arg3: memref<1x128xf32, #tpu.memory_space<vmem>>, %arg4: memref<1x21x128xbf16, #tpu.memory_space<vmem>>) attributes {dimension_semantics = [#tpu.dimension_semantics<parallel>], iteration_bounds = array<i64: 2>, scalar_prefetch = 0 : i64, scratch_operands = 0 : i64, tpu.core_type = #tpu.core_type<tc>, window_params = [{transform_indices = @transform_0, window_bounds = array<i64: 1, 53, 128>}, {pipeline_mode = #tpu.pipeline_mode<synchronous>, transform_indices = @transform_1, window_bounds = array<i64: 25, 128, 128>}, {pipeline_mode = #tpu.pipeline_mode<synchronous>, transform_indices = @transform_2, window_bounds = array<i64: 1, 128>}, {transform_indices = @transform_3, window_bounds = array<i64: 1, 21, 128>}]} {
    %cst = arith.constant 0.000000e+00 : f32
    %0 = vector.broadcast %cst : f32 to vector<21x128xf32>
    %c0 = arith.constant 0 : index
    %c0_0 = arith.constant 0 : index
    %c0_1 = arith.constant 0 : index
    %1 = vector.load %arg1[%c0, %c0_0, %c0_1] : memref<1x53x128xbf16, #tpu.memory_space<vmem>>, vector<1x21x128xbf16>
    %2 = vector.shape_cast %1 : vector<1x21x128xbf16> to vector<21x128xbf16>
    %c0_2 = arith.constant 0 : index
    %c0_3 = arith.constant 0 : index
    %c0_4 = arith.constant 0 : index
    %3 = vector.load %arg2[%c0_2, %c0_3, %c0_4] : memref<25x128x128xbf16, #tpu.memory_space<vmem>>, vector<1x128x128xbf16>
    %4 = vector.shape_cast %3 : vector<1x128x128xbf16> to vector<128x128xbf16>
    %cst_5 = arith.constant dense<0.000000e+00> : vector<21x128xf32>
    %5 = tpu.matmul %2, %4, %cst_5 {dimension_numbers = #tpu.dot_dimension_numbers<[1], [0], [0], [1], [0, 0, 1, 1], [], []>} : vector<21x128xbf16>, vector<128x128xbf16>, vector<21x128xf32> -> vector<21x128xf32>
    %6 = arith.addf %0, %5 : vector<21x128xf32>
    %c0_6 = arith.constant 0 : index
    %c1 = arith.constant 1 : index
    %c0_7 = arith.constant 0 : index
    %7 = vector.load %arg1[%c0_6, %c1, %c0_7] : memref<1x53x128xbf16, #tpu.memory_space<vmem>>, vector<1x21x128xbf16>
    %8 = vector.shape_cast %7 : vector<1x21x128xbf16> to vector<21x128xbf16>
    %c1_8 = arith.constant 1 : index
    %c0_9 = arith.constant 0 : index
    %c0_10 = arith.constant 0 : index
    %9 = vector.load %arg2[%c1_8, %c0_9, %c0_10] : memref<25x128x128xbf16, #tpu.memory_space<vmem>>, vector<1x128x128xbf16>
    %10 = vector.shape_cast %9 : vector<1x128x128xbf16> to vector<128x128xbf16>
    %cst_11 = arith.constant dense<0.000000e+00> : vector<21x128xf32>
    %11 = tpu.matmul %8, %10, %cst_11 {dimension_numbers = #tpu.dot_dimension_numbers<[1], [0], [0], [1], [0, 0, 1, 1], [], []>} : vector<21x128xbf16>, vector<128x128xbf16>, vector<21x128xf32> -> vector<21x128xf32>
    %12 = arith.addf %6, %11 : vector<21x128xf32>
    %c0_12 = arith.constant 0 : index
    %c2 = arith.constant 2 : index
    %c0_13 = arith.constant 0 : index
    %13 = vector.load %arg1[%c0_12, %c2, %c0_13] : memref<1x53x128xbf16, #tpu.memory_space<vmem>>, vector<1x21x128xbf16>
    %14 = vector.shape_cast %13 : vector<1x21x128xbf16> to vector<21x128xbf16>
    %c2_14 = arith.constant 2 : index
    %c0_15 = arith.constant 0 : index
    %c0_16 = arith.constant 0 : index
    %15 = vector.load %arg2[%c2_14, %c0_15, %c0_16] : memref<25x128x128xbf16, #tpu.memory_space<vmem>>, vector<1x128x128xbf16>
    %16 = vector.shape_cast %15 : vector<1x128x128xbf16> to vector<128x128xbf16>
    %cst_17 = arith.constant dense<0.000000e+00> : vector<21x128xf32>
    %17 = tpu.matmul %14, %16, %cst_17 {dimension_numbers = #tpu.dot_dimension_numbers<[1], [0], [0], [1], [0, 0, 1, 1], [], []>} : vector<21x128xbf16>, vector<128x128xbf16>, vector<21x128xf32> -> vector<21x128xf32>
    %18 = arith.addf %12, %17 : vector<21x128xf32>
    %c0_18 = arith.constant 0 : index
    %c3 = arith.constant 3 : index
    %c0_19 = arith.constant 0 : index
    %19 = vector.load %arg1[%c0_18, %c3, %c0_19] : memref<1x53x128xbf16, #tpu.memory_space<vmem>>, vector<1x21x128xbf16>
    %20 = vector.shape_cast %19 : vector<1x21x128xbf16> to vector<21x128xbf16>
    %c3_20 = arith.constant 3 : index
    %c0_21 = arith.constant 0 : index
    %c0_22 = arith.constant 0 : index
    %21 = vector.load %arg2[%c3_20, %c0_21, %c0_22] : memref<25x128x128xbf16, #tpu.memory_space<vmem>>, vector<1x128x128xbf16>
    %22 = vector.shape_cast %21 : vector<1x128x128xbf16> to vector<128x128xbf16>
    %cst_23 = arith.constant dense<0.000000e+00> : vector<21x128xf32>
    %23 = tpu.matmul %20, %22, %cst_23 {dimension_numbers = #tpu.dot_dimension_numbers<[1], [0], [0], [1], [0, 0, 1, 1], [], []>} : vector<21x128xbf16>, vector<128x128xbf16>, vector<21x128xf32> -> vector<21x128xf32>
    %24 = arith.addf %18, %23 : vector<21x128xf32>
    %c0_24 = arith.constant 0 : index
    %c4 = arith.constant 4 : index
    %c0_25 = arith.constant 0 : index
    %25 = vector.load %arg1[%c0_24, %c4, %c0_25] : memref<1x53x128xbf16, #tpu.memory_space<vmem>>, vector<1x21x128xbf16>
    %26 = vector.shape_cast %25 : vector<1x21x128xbf16> to vector<21x128xbf16>
    %c4_26 = arith.constant 4 : index
    %c0_27 = arith.constant 0 : index
    %c0_28 = arith.constant 0 : index
    %27 = vector.load %arg2[%c4_26, %c0_27, %c0_28] : memref<25x128x128xbf16, #tpu.memory_space<vmem>>, vector<1x128x128xbf16>
    %28 = vector.shape_cast %27 : vector<1x128x128xbf16> to vector<128x128xbf16>
    %cst_29 = arith.constant dense<0.000000e+00> : vector<21x128xf32>
    %29 = tpu.matmul %26, %28, %cst_29 {dimension_numbers = #tpu.dot_dimension_numbers<[1], [0], [0], [1], [0, 0, 1, 1], [], []>} : vector<21x128xbf16>, vector<128x128xbf16>, vector<21x128xf32> -> vector<21x128xf32>
    %30 = arith.addf %24, %29 : vector<21x128xf32>
    %c0_30 = arith.constant 0 : index
    %c7 = arith.constant 7 : index
    %c0_31 = arith.constant 0 : index
    %31 = vector.load %arg1[%c0_30, %c7, %c0_31] : memref<1x53x128xbf16, #tpu.memory_space<vmem>>, vector<1x21x128xbf16>
    %32 = vector.shape_cast %31 : vector<1x21x128xbf16> to vector<21x128xbf16>
    %c5 = arith.constant 5 : index
    %c0_32 = arith.constant 0 : index
    %c0_33 = arith.constant 0 : index
    %33 = vector.load %arg2[%c5, %c0_32, %c0_33] : memref<25x128x128xbf16, #tpu.memory_space<vmem>>, vector<1x128x128xbf16>
    %34 = vector.shape_cast %33 : vector<1x128x128xbf16> to vector<128x128xbf16>
    %cst_34 = arith.constant dense<0.000000e+00> : vector<21x128xf32>
    %35 = tpu.matmul %32, %34, %cst_34 {dimension_numbers = #tpu.dot_dimension_numbers<[1], [0], [0], [1], [0, 0, 1, 1], [], []>} : vector<21x128xbf16>, vector<128x128xbf16>, vector<21x128xf32> -> vector<21x128xf32>
    %36 = arith.addf %30, %35 : vector<21x128xf32>
    %c0_35 = arith.constant 0 : index
    %c8 = arith.constant 8 : index
    %c0_36 = arith.constant 0 : index
    %37 = vector.load %arg1[%c0_35, %c8, %c0_36] : memref<1x53x128xbf16, #tpu.memory_space<vmem>>, vector<1x21x128xbf16>
    %38 = vector.shape_cast %37 : vector<1x21x128xbf16> to vector<21x128xbf16>
    %c6 = arith.constant 6 : index
    %c0_37 = arith.constant 0 : index
    %c0_38 = arith.constant 0 : index
    %39 = vector.load %arg2[%c6, %c0_37, %c0_38] : memref<25x128x128xbf16, #tpu.memory_space<vmem>>, vector<1x128x128xbf16>
    %40 = vector.shape_cast %39 : vector<1x128x128xbf16> to vector<128x128xbf16>
    %cst_39 = arith.constant dense<0.000000e+00> : vector<21x128xf32>
    %41 = tpu.matmul %38, %40, %cst_39 {dimension_numbers = #tpu.dot_dimension_numbers<[1], [0], [0], [1], [0, 0, 1, 1], [], []>} : vector<21x128xbf16>, vector<128x128xbf16>, vector<21x128xf32> -> vector<21x128xf32>
    %42 = arith.addf %36, %41 : vector<21x128xf32>
    %c0_40 = arith.constant 0 : index
    %c9 = arith.constant 9 : index
    %c0_41 = arith.constant 0 : index
    %43 = vector.load %arg1[%c0_40, %c9, %c0_41] : memref<1x53x128xbf16, #tpu.memory_space<vmem>>, vector<1x21x128xbf16>
    %44 = vector.shape_cast %43 : vector<1x21x128xbf16> to vector<21x128xbf16>
    %c7_42 = arith.constant 7 : index
    %c0_43 = arith.constant 0 : index
    %c0_44 = arith.constant 0 : index
    %45 = vector.load %arg2[%c7_42, %c0_43, %c0_44] : memref<25x128x128xbf16, #tpu.memory_space<vmem>>, vector<1x128x128xbf16>
    %46 = vector.shape_cast %45 : vector<1x128x128xbf16> to vector<128x128xbf16>
    %cst_45 = arith.constant dense<0.000000e+00> : vector<21x128xf32>
    %47 = tpu.matmul %44, %46, %cst_45 {dimension_numbers = #tpu.dot_dimension_numbers<[1], [0], [0], [1], [0, 0, 1, 1], [], []>} : vector<21x128xbf16>, vector<128x128xbf16>, vector<21x128xf32> -> vector<21x128xf32>
    %48 = arith.addf %42, %47 : vector<21x128xf32>
    %c0_46 = arith.constant 0 : index
    %c10 = arith.constant 10 : index
    %c0_47 = arith.constant 0 : index
    %49 = vector.load %arg1[%c0_46, %c10, %c0_47] : memref<1x53x128xbf16, #tpu.memory_space<vmem>>, vector<1x21x128xbf16>
    %50 = vector.shape_cast %49 : vector<1x21x128xbf16> to vector<21x128xbf16>
    %c8_48 = arith.constant 8 : index
    %c0_49 = arith.constant 0 : index
    %c0_50 = arith.constant 0 : index
    %51 = vector.load %arg2[%c8_48, %c0_49, %c0_50] : memref<25x128x128xbf16, #tpu.memory_space<vmem>>, vector<1x128x128xbf16>
    %52 = vector.shape_cast %51 : vector<1x128x128xbf16> to vector<128x128xbf16>
    %cst_51 = arith.constant dense<0.000000e+00> : vector<21x128xf32>
    %53 = tpu.matmul %50, %52, %cst_51 {dimension_numbers = #tpu.dot_dimension_numbers<[1], [0], [0], [1], [0, 0, 1, 1], [], []>} : vector<21x128xbf16>, vector<128x128xbf16>, vector<21x128xf32> -> vector<21x128xf32>
    %54 = arith.addf %48, %53 : vector<21x128xf32>
    %c0_52 = arith.constant 0 : index
    %c11 = arith.constant 11 : index
    %c0_53 = arith.constant 0 : index
    %55 = vector.load %arg1[%c0_52, %c11, %c0_53] : memref<1x53x128xbf16, #tpu.memory_space<vmem>>, vector<1x21x128xbf16>
    %56 = vector.shape_cast %55 : vector<1x21x128xbf16> to vector<21x128xbf16>
    %c9_54 = arith.constant 9 : index
    %c0_55 = arith.constant 0 : index
    %c0_56 = arith.constant 0 : index
    %57 = vector.load %arg2[%c9_54, %c0_55, %c0_56] : memref<25x128x128xbf16, #tpu.memory_space<vmem>>, vector<1x128x128xbf16>
    %58 = vector.shape_cast %57 : vector<1x128x128xbf16> to vector<128x128xbf16>
    %cst_57 = arith.constant dense<0.000000e+00> : vector<21x128xf32>
    %59 = tpu.matmul %56, %58, %cst_57 {dimension_numbers = #tpu.dot_dimension_numbers<[1], [0], [0], [1], [0, 0, 1, 1], [], []>} : vector<21x128xbf16>, vector<128x128xbf16>, vector<21x128xf32> -> vector<21x128xf32>
    %60 = arith.addf %54, %59 : vector<21x128xf32>
    %c0_58 = arith.constant 0 : index
    %c14 = arith.constant 14 : index
    %c0_59 = arith.constant 0 : index
    %61 = vector.load %arg1[%c0_58, %c14, %c0_59] : memref<1x53x128xbf16, #tpu.memory_space<vmem>>, vector<1x21x128xbf16>
    %62 = vector.shape_cast %61 : vector<1x21x128xbf16> to vector<21x128xbf16>
    %c10_60 = arith.constant 10 : index
    %c0_61 = arith.constant 0 : index
    %c0_62 = arith.constant 0 : index
    %63 = vector.load %arg2[%c10_60, %c0_61, %c0_62] : memref<25x128x128xbf16, #tpu.memory_space<vmem>>, vector<1x128x128xbf16>
    %64 = vector.shape_cast %63 : vector<1x128x128xbf16> to vector<128x128xbf16>
    %cst_63 = arith.constant dense<0.000000e+00> : vector<21x128xf32>
    %65 = tpu.matmul %62, %64, %cst_63 {dimension_numbers = #tpu.dot_dimension_numbers<[1], [0], [0], [1], [0, 0, 1, 1], [], []>} : vector<21x128xbf16>, vector<128x128xbf16>, vector<21x128xf32> -> vector<21x128xf32>
    %66 = arith.addf %60, %65 : vector<21x128xf32>
    %c0_64 = arith.constant 0 : index
    %c15 = arith.constant 15 : index
    %c0_65 = arith.constant 0 : index
    %67 = vector.load %arg1[%c0_64, %c15, %c0_65] : memref<1x53x128xbf16, #tpu.memory_space<vmem>>, vector<1x21x128xbf16>
    %68 = vector.shape_cast %67 : vector<1x21x128xbf16> to vector<21x128xbf16>
    %c11_66 = arith.constant 11 : index
    %c0_67 = arith.constant 0 : index
    %c0_68 = arith.constant 0 : index
    %69 = vector.load %arg2[%c11_66, %c0_67, %c0_68] : memref<25x128x128xbf16, #tpu.memory_space<vmem>>, vector<1x128x128xbf16>
    %70 = vector.shape_cast %69 : vector<1x128x128xbf16> to vector<128x128xbf16>
    %cst_69 = arith.constant dense<0.000000e+00> : vector<21x128xf32>
    %71 = tpu.matmul %68, %70, %cst_69 {dimension_numbers = #tpu.dot_dimension_numbers<[1], [0], [0], [1], [0, 0, 1, 1], [], []>} : vector<21x128xbf16>, vector<128x128xbf16>, vector<21x128xf32> -> vector<21x128xf32>
    %72 = arith.addf %66, %71 : vector<21x128xf32>
    %c0_70 = arith.constant 0 : index
    %c16 = arith.constant 16 : index
    %c0_71 = arith.constant 0 : index
    %73 = vector.load %arg1[%c0_70, %c16, %c0_71] : memref<1x53x128xbf16, #tpu.memory_space<vmem>>, vector<1x21x128xbf16>
    %74 = vector.shape_cast %73 : vector<1x21x128xbf16> to vector<21x128xbf16>
    %c12 = arith.constant 12 : index
    %c0_72 = arith.constant 0 : index
    %c0_73 = arith.constant 0 : index
    %75 = vector.load %arg2[%c12, %c0_72, %c0_73] : memref<25x128x128xbf16, #tpu.memory_space<vmem>>, vector<1x128x128xbf16>
    %76 = vector.shape_cast %75 : vector<1x128x128xbf16> to vector<128x128xbf16>
    %cst_74 = arith.constant dense<0.000000e+00> : vector<21x128xf32>
    %77 = tpu.matmul %74, %76, %cst_74 {dimension_numbers = #tpu.dot_dimension_numbers<[1], [0], [0], [1], [0, 0, 1, 1], [], []>} : vector<21x128xbf16>, vector<128x128xbf16>, vector<21x128xf32> -> vector<21x128xf32>
    %78 = arith.addf %72, %77 : vector<21x128xf32>
    %c0_75 = arith.constant 0 : index
    %c17 = arith.constant 17 : index
    %c0_76 = arith.constant 0 : index
    %79 = vector.load %arg1[%c0_75, %c17, %c0_76] : memref<1x53x128xbf16, #tpu.memory_space<vmem>>, vector<1x21x128xbf16>
    %80 = vector.shape_cast %79 : vector<1x21x128xbf16> to vector<21x128xbf16>
    %c13 = arith.constant 13 : index
    %c0_77 = arith.constant 0 : index
    %c0_78 = arith.constant 0 : index
    %81 = vector.load %arg2[%c13, %c0_77, %c0_78] : memref<25x128x128xbf16, #tpu.memory_space<vmem>>, vector<1x128x128xbf16>
    %82 = vector.shape_cast %81 : vector<1x128x128xbf16> to vector<128x128xbf16>
    %cst_79 = arith.constant dense<0.000000e+00> : vector<21x128xf32>
    %83 = tpu.matmul %80, %82, %cst_79 {dimension_numbers = #tpu.dot_dimension_numbers<[1], [0], [0], [1], [0, 0, 1, 1], [], []>} : vector<21x128xbf16>, vector<128x128xbf16>, vector<21x128xf32> -> vector<21x128xf32>
    %84 = arith.addf %78, %83 : vector<21x128xf32>
    %c0_80 = arith.constant 0 : index
    %c18 = arith.constant 18 : index
    %c0_81 = arith.constant 0 : index
    %85 = vector.load %arg1[%c0_80, %c18, %c0_81] : memref<1x53x128xbf16, #tpu.memory_space<vmem>>, vector<1x21x128xbf16>
    %86 = vector.shape_cast %85 : vector<1x21x128xbf16> to vector<21x128xbf16>
    %c14_82 = arith.constant 14 : index
    %c0_83 = arith.constant 0 : index
    %c0_84 = arith.constant 0 : index
    %87 = vector.load %arg2[%c14_82, %c0_83, %c0_84] : memref<25x128x128xbf16, #tpu.memory_space<vmem>>, vector<1x128x128xbf16>
    %88 = vector.shape_cast %87 : vector<1x128x128xbf16> to vector<128x128xbf16>
    %cst_85 = arith.constant dense<0.000000e+00> : vector<21x128xf32>
    %89 = tpu.matmul %86, %88, %cst_85 {dimension_numbers = #tpu.dot_dimension_numbers<[1], [0], [0], [1], [0, 0, 1, 1], [], []>} : vector<21x128xbf16>, vector<128x128xbf16>, vector<21x128xf32> -> vector<21x128xf32>
    %90 = arith.addf %84, %89 : vector<21x128xf32>
    %c0_86 = arith.constant 0 : index
    %c21 = arith.constant 21 : index
    %c0_87 = arith.constant 0 : index
    %91 = vector.load %arg1[%c0_86, %c21, %c0_87] : memref<1x53x128xbf16, #tpu.memory_space<vmem>>, vector<1x21x128xbf16>
    %92 = vector.shape_cast %91 : vector<1x21x128xbf16> to vector<21x128xbf16>
    %c15_88 = arith.constant 15 : index
    %c0_89 = arith.constant 0 : index
    %c0_90 = arith.constant 0 : index
    %93 = vector.load %arg2[%c15_88, %c0_89, %c0_90] : memref<25x128x128xbf16, #tpu.memory_space<vmem>>, vector<1x128x128xbf16>
    %94 = vector.shape_cast %93 : vector<1x128x128xbf16> to vector<128x128xbf16>
    %cst_91 = arith.constant dense<0.000000e+00> : vector<21x128xf32>
    %95 = tpu.matmul %92, %94, %cst_91 {dimension_numbers = #tpu.dot_dimension_numbers<[1], [0], [0], [1], [0, 0, 1, 1], [], []>} : vector<21x128xbf16>, vector<128x128xbf16>, vector<21x128xf32> -> vector<21x128xf32>
    %96 = arith.addf %90, %95 : vector<21x128xf32>
    %c0_92 = arith.constant 0 : index
    %c22 = arith.constant 22 : index
    %c0_93 = arith.constant 0 : index
    %97 = vector.load %arg1[%c0_92, %c22, %c0_93] : memref<1x53x128xbf16, #tpu.memory_space<vmem>>, vector<1x21x128xbf16>
    %98 = vector.shape_cast %97 : vector<1x21x128xbf16> to vector<21x128xbf16>
    %c16_94 = arith.constant 16 : index
    %c0_95 = arith.constant 0 : index
    %c0_96 = arith.constant 0 : index
    %99 = vector.load %arg2[%c16_94, %c0_95, %c0_96] : memref<25x128x128xbf16, #tpu.memory_space<vmem>>, vector<1x128x128xbf16>
    %100 = vector.shape_cast %99 : vector<1x128x128xbf16> to vector<128x128xbf16>
    %cst_97 = arith.constant dense<0.000000e+00> : vector<21x128xf32>
    %101 = tpu.matmul %98, %100, %cst_97 {dimension_numbers = #tpu.dot_dimension_numbers<[1], [0], [0], [1], [0, 0, 1, 1], [], []>} : vector<21x128xbf16>, vector<128x128xbf16>, vector<21x128xf32> -> vector<21x128xf32>
    %102 = arith.addf %96, %101 : vector<21x128xf32>
    %c0_98 = arith.constant 0 : index
    %c23 = arith.constant 23 : index
    %c0_99 = arith.constant 0 : index
    %103 = vector.load %arg1[%c0_98, %c23, %c0_99] : memref<1x53x128xbf16, #tpu.memory_space<vmem>>, vector<1x21x128xbf16>
    %104 = vector.shape_cast %103 : vector<1x21x128xbf16> to vector<21x128xbf16>
    %c17_100 = arith.constant 17 : index
    %c0_101 = arith.constant 0 : index
    %c0_102 = arith.constant 0 : index
    %105 = vector.load %arg2[%c17_100, %c0_101, %c0_102] : memref<25x128x128xbf16, #tpu.memory_space<vmem>>, vector<1x128x128xbf16>
    %106 = vector.shape_cast %105 : vector<1x128x128xbf16> to vector<128x128xbf16>
    %cst_103 = arith.constant dense<0.000000e+00> : vector<21x128xf32>
    %107 = tpu.matmul %104, %106, %cst_103 {dimension_numbers = #tpu.dot_dimension_numbers<[1], [0], [0], [1], [0, 0, 1, 1], [], []>} : vector<21x128xbf16>, vector<128x128xbf16>, vector<21x128xf32> -> vector<21x128xf32>
    %108 = arith.addf %102, %107 : vector<21x128xf32>
    %c0_104 = arith.constant 0 : index
    %c24 = arith.constant 24 : index
    %c0_105 = arith.constant 0 : index
    %109 = vector.load %arg1[%c0_104, %c24, %c0_105] : memref<1x53x128xbf16, #tpu.memory_space<vmem>>, vector<1x21x128xbf16>
    %110 = vector.shape_cast %109 : vector<1x21x128xbf16> to vector<21x128xbf16>
    %c18_106 = arith.constant 18 : index
    %c0_107 = arith.constant 0 : index
    %c0_108 = arith.constant 0 : index
    %111 = vector.load %arg2[%c18_106, %c0_107, %c0_108] : memref<25x128x128xbf16, #tpu.memory_space<vmem>>, vector<1x128x128xbf16>
    %112 = vector.shape_cast %111 : vector<1x128x128xbf16> to vector<128x128xbf16>
    %cst_109 = arith.constant dense<0.000000e+00> : vector<21x128xf32>
    %113 = tpu.matmul %110, %112, %cst_109 {dimension_numbers = #tpu.dot_dimension_numbers<[1], [0], [0], [1], [0, 0, 1, 1], [], []>} : vector<21x128xbf16>, vector<128x128xbf16>, vector<21x128xf32> -> vector<21x128xf32>
    %114 = arith.addf %108, %113 : vector<21x128xf32>
    %c0_110 = arith.constant 0 : index
    %c25 = arith.constant 25 : index
    %c0_111 = arith.constant 0 : index
    %115 = vector.load %arg1[%c0_110, %c25, %c0_111] : memref<1x53x128xbf16, #tpu.memory_space<vmem>>, vector<1x21x128xbf16>
    %116 = vector.shape_cast %115 : vector<1x21x128xbf16> to vector<21x128xbf16>
    %c19 = arith.constant 19 : index
    %c0_112 = arith.constant 0 : index
    %c0_113 = arith.constant 0 : index
    %117 = vector.load %arg2[%c19, %c0_112, %c0_113] : memref<25x128x128xbf16, #tpu.memory_space<vmem>>, vector<1x128x128xbf16>
    %118 = vector.shape_cast %117 : vector<1x128x128xbf16> to vector<128x128xbf16>
    %cst_114 = arith.constant dense<0.000000e+00> : vector<21x128xf32>
    %119 = tpu.matmul %116, %118, %cst_114 {dimension_numbers = #tpu.dot_dimension_numbers<[1], [0], [0], [1], [0, 0, 1, 1], [], []>} : vector<21x128xbf16>, vector<128x128xbf16>, vector<21x128xf32> -> vector<21x128xf32>
    %120 = arith.addf %114, %119 : vector<21x128xf32>
    %c0_115 = arith.constant 0 : index
    %c28 = arith.constant 28 : index
    %c0_116 = arith.constant 0 : index
    %121 = vector.load %arg1[%c0_115, %c28, %c0_116] : memref<1x53x128xbf16, #tpu.memory_space<vmem>>, vector<1x21x128xbf16>
    %122 = vector.shape_cast %121 : vector<1x21x128xbf16> to vector<21x128xbf16>
    %c20 = arith.constant 20 : index
    %c0_117 = arith.constant 0 : index
    %c0_118 = arith.constant 0 : index
    %123 = vector.load %arg2[%c20, %c0_117, %c0_118] : memref<25x128x128xbf16, #tpu.memory_space<vmem>>, vector<1x128x128xbf16>
    %124 = vector.shape_cast %123 : vector<1x128x128xbf16> to vector<128x128xbf16>
    %cst_119 = arith.constant dense<0.000000e+00> : vector<21x128xf32>
    %125 = tpu.matmul %122, %124, %cst_119 {dimension_numbers = #tpu.dot_dimension_numbers<[1], [0], [0], [1], [0, 0, 1, 1], [], []>} : vector<21x128xbf16>, vector<128x128xbf16>, vector<21x128xf32> -> vector<21x128xf32>
    %126 = arith.addf %120, %125 : vector<21x128xf32>
    %c0_120 = arith.constant 0 : index
    %c29 = arith.constant 29 : index
    %c0_121 = arith.constant 0 : index
    %127 = vector.load %arg1[%c0_120, %c29, %c0_121] : memref<1x53x128xbf16, #tpu.memory_space<vmem>>, vector<1x21x128xbf16>
    %128 = vector.shape_cast %127 : vector<1x21x128xbf16> to vector<21x128xbf16>
    %c21_122 = arith.constant 21 : index
    %c0_123 = arith.constant 0 : index
    %c0_124 = arith.constant 0 : index
    %129 = vector.load %arg2[%c21_122, %c0_123, %c0_124] : memref<25x128x128xbf16, #tpu.memory_space<vmem>>, vector<1x128x128xbf16>
    %130 = vector.shape_cast %129 : vector<1x128x128xbf16> to vector<128x128xbf16>
    %cst_125 = arith.constant dense<0.000000e+00> : vector<21x128xf32>
    %131 = tpu.matmul %128, %130, %cst_125 {dimension_numbers = #tpu.dot_dimension_numbers<[1], [0], [0], [1], [0, 0, 1, 1], [], []>} : vector<21x128xbf16>, vector<128x128xbf16>, vector<21x128xf32> -> vector<21x128xf32>
    %132 = arith.addf %126, %131 : vector<21x128xf32>
    %c0_126 = arith.constant 0 : index
    %c30 = arith.constant 30 : index
    %c0_127 = arith.constant 0 : index
    %133 = vector.load %arg1[%c0_126, %c30, %c0_127] : memref<1x53x128xbf16, #tpu.memory_space<vmem>>, vector<1x21x128xbf16>
    %134 = vector.shape_cast %133 : vector<1x21x128xbf16> to vector<21x128xbf16>
    %c22_128 = arith.constant 22 : index
    %c0_129 = arith.constant 0 : index
    %c0_130 = arith.constant 0 : index
    %135 = vector.load %arg2[%c22_128, %c0_129, %c0_130] : memref<25x128x128xbf16, #tpu.memory_space<vmem>>, vector<1x128x128xbf16>
    %136 = vector.shape_cast %135 : vector<1x128x128xbf16> to vector<128x128xbf16>
    %cst_131 = arith.constant dense<0.000000e+00> : vector<21x128xf32>
    %137 = tpu.matmul %134, %136, %cst_131 {dimension_numbers = #tpu.dot_dimension_numbers<[1], [0], [0], [1], [0, 0, 1, 1], [], []>} : vector<21x128xbf16>, vector<128x128xbf16>, vector<21x128xf32> -> vector<21x128xf32>
    %138 = arith.addf %132, %137 : vector<21x128xf32>
    %c0_132 = arith.constant 0 : index
    %c31 = arith.constant 31 : index
    %c0_133 = arith.constant 0 : index
    %139 = vector.load %arg1[%c0_132, %c31, %c0_133] : memref<1x53x128xbf16, #tpu.memory_space<vmem>>, vector<1x21x128xbf16>
    %140 = vector.shape_cast %139 : vector<1x21x128xbf16> to vector<21x128xbf16>
    %c23_134 = arith.constant 23 : index
    %c0_135 = arith.constant 0 : index
    %c0_136 = arith.constant 0 : index
    %141 = vector.load %arg2[%c23_134, %c0_135, %c0_136] : memref<25x128x128xbf16, #tpu.memory_space<vmem>>, vector<1x128x128xbf16>
    %142 = vector.shape_cast %141 : vector<1x128x128xbf16> to vector<128x128xbf16>
    %cst_137 = arith.constant dense<0.000000e+00> : vector<21x128xf32>
    %143 = tpu.matmul %140, %142, %cst_137 {dimension_numbers = #tpu.dot_dimension_numbers<[1], [0], [0], [1], [0, 0, 1, 1], [], []>} : vector<21x128xbf16>, vector<128x128xbf16>, vector<21x128xf32> -> vector<21x128xf32>
    %144 = arith.addf %138, %143 : vector<21x128xf32>
    %c0_138 = arith.constant 0 : index
    %c32 = arith.constant 32 : index
    %c0_139 = arith.constant 0 : index
    %145 = vector.load %arg1[%c0_138, %c32, %c0_139] : memref<1x53x128xbf16, #tpu.memory_space<vmem>>, vector<1x21x128xbf16>
    %146 = vector.shape_cast %145 : vector<1x21x128xbf16> to vector<21x128xbf16>
    %c24_140 = arith.constant 24 : index
    %c0_141 = arith.constant 0 : index
    %c0_142 = arith.constant 0 : index
    %147 = vector.load %arg2[%c24_140, %c0_141, %c0_142] : memref<25x128x128xbf16, #tpu.memory_space<vmem>>, vector<1x128x128xbf16>
    %148 = vector.shape_cast %147 : vector<1x128x128xbf16> to vector<128x128xbf16>
    %cst_143 = arith.constant dense<0.000000e+00> : vector<21x128xf32>
    %149 = tpu.matmul %146, %148, %cst_143 {dimension_numbers = #tpu.dot_dimension_numbers<[1], [0], [0], [1], [0, 0, 1, 1], [], []>} : vector<21x128xbf16>, vector<128x128xbf16>, vector<21x128xf32> -> vector<21x128xf32>
    %150 = arith.addf %144, %149 : vector<21x128xf32>
    %c0_144 = arith.constant 0 : index
    %c0_145 = arith.constant 0 : index
    %151 = vector.load %arg3[%c0_144, %c0_145] : memref<1x128xf32, #tpu.memory_space<vmem>>, vector<1x128xf32>
    %152 = vector.broadcast %151 : vector<1x128xf32> to vector<21x128xf32>
    %153 = arith.addf %150, %152 : vector<21x128xf32>
    %cst_146 = arith.constant 0.000000e+00 : f32
    %154 = vector.broadcast %cst_146 : f32 to vector<21x128xf32>
    %155 = arith.maximumf %153, %154 : vector<21x128xf32>
    %156 = arith.truncf %155 : vector<21x128xf32> to vector<21x128xbf16>
    %c0_147 = arith.constant 0 : index
    %c0_148 = arith.constant 0 : index
    %c0_149 = arith.constant 0 : index
    %157 = vector.load %arg4[%c0_147, %c0_148, %c0_149] : memref<1x21x128xbf16, #tpu.memory_space<vmem>>, vector<1x21x128xbf16>
    %158 = vector.shape_cast %157 : vector<1x21x128xbf16> to vector<21x128xbf16>
    %159 = vector.shape_cast %156 : vector<21x128xbf16> to vector<1x21x128xbf16>
    tpu.vector_store %arg4[%c0_147, %c0_148, %c0_149], %159 {strides = array<i32>} : memref<1x21x128xbf16, #tpu.memory_space<vmem>>, vector<1x21x128xbf16>,
    return
  }
  func.func @transform_0(%arg0: i32) -> (i32, i32, i32) {
    %c0_i32 = arith.constant 0 : i32
    %c0_i32_0 = arith.constant 0 : i32
    %c0_i32_1 = arith.constant 0 : i32
    return %arg0, %c0_i32, %c0_i32_0 : i32, i32, i32
  }
  func.func @transform_1(%arg0: i32) -> (i32, i32, i32) {
    %c0_i32 = arith.constant 0 : i32
    %c0_i32_0 = arith.constant 0 : i32
    %c0_i32_1 = arith.constant 0 : i32
    %c0_i32_2 = arith.constant 0 : i32
    return %c0_i32, %c0_i32_0, %c0_i32_1 : i32, i32, i32
  }
  func.func @transform_2(%arg0: i32) -> (i32, i32) {
    %c0_i32 = arith.constant 0 : i32
    %c0_i32_0 = arith.constant 0 : i32
    %c0_i32_1 = arith.constant 0 : i32
    return %c0_i32, %c0_i32_0 : i32, i32
  }
  func.func @transform_3(%arg0: i32) -> (i32, i32, i32) {
    %c0_i32 = arith.constant 0 : i32
    %c0_i32_0 = arith.constant 0 : i32
    %c0_i32_1 = arith.constant 0 : i32
    return %arg0, %c0_i32, %c0_i32_0 : i32, i32, i32
  }
}

module attributes {stable_mosaic.version = 11 : i64} {
  func.func @_maxpool3x3s2_kernel(%arg0: i32, %arg1: memref<1x2x2x128xbf16, #tpu.memory_space<vmem>>, %arg2: memref<1x2x1x128xbf16, #tpu.memory_space<vmem>>, %arg3: memref<1x1x2x128xbf16, #tpu.memory_space<vmem>>, %arg4: memref<1x1x1x128xbf16, #tpu.memory_space<vmem>>, %arg5: memref<1x1x1x128xbf16, #tpu.memory_space<vmem>>) attributes {dimension_semantics = [#tpu.dimension_semantics<parallel>], iteration_bounds = array<i64: 2>, scalar_prefetch = 0 : i64, scratch_operands = 0 : i64, tpu.core_type = #tpu.core_type<tc>, window_params = [{transform_indices = @transform_0, window_bounds = array<i64: 1, 2, 2, 128>}, {transform_indices = @transform_1, window_bounds = array<i64: 1, 2, 1, 128>}, {transform_indices = @transform_2, window_bounds = array<i64: 1, 1, 2, 128>}, {transform_indices = @transform_3, window_bounds = array<i64: 1, 1, 1, 128>}, {transform_indices = @transform_4, window_bounds = array<i64: 1, 1, 1, 128>}]} {
    %c0 = arith.constant 0 : index
    %c0_0 = arith.constant 0 : index
    %c0_1 = arith.constant 0 : index
    %c0_2 = arith.constant 0 : index
    %0 = vector.load %arg1[%c0, %c0_0, %c0_1, %c0_2] : memref<1x2x2x128xbf16, #tpu.memory_space<vmem>>, vector<1x1x1x128xbf16>
    %1 = vector.shape_cast %0 : vector<1x1x1x128xbf16> to vector<1x1x128xbf16>
    %c0_3 = arith.constant 0 : index
    %c0_4 = arith.constant 0 : index
    %c1 = arith.constant 1 : index
    %c0_5 = arith.constant 0 : index
    %2 = vector.load %arg1[%c0_3, %c0_4, %c1, %c0_5] : memref<1x2x2x128xbf16, #tpu.memory_space<vmem>>, vector<1x1x1x128xbf16>
    %3 = vector.shape_cast %2 : vector<1x1x1x128xbf16> to vector<1x1x128xbf16>
    %4 = arith.maximumf %1, %3 : vector<1x1x128xbf16>
    %c0_6 = arith.constant 0 : index
    %c1_7 = arith.constant 1 : index
    %c0_8 = arith.constant 0 : index
    %c0_9 = arith.constant 0 : index
    %5 = vector.load %arg1[%c0_6, %c1_7, %c0_8, %c0_9] : memref<1x2x2x128xbf16, #tpu.memory_space<vmem>>, vector<1x1x1x128xbf16>
    %6 = vector.shape_cast %5 : vector<1x1x1x128xbf16> to vector<1x1x128xbf16>
    %7 = arith.maximumf %4, %6 : vector<1x1x128xbf16>
    %c0_10 = arith.constant 0 : index
    %c1_11 = arith.constant 1 : index
    %c1_12 = arith.constant 1 : index
    %c0_13 = arith.constant 0 : index
    %8 = vector.load %arg1[%c0_10, %c1_11, %c1_12, %c0_13] : memref<1x2x2x128xbf16, #tpu.memory_space<vmem>>, vector<1x1x1x128xbf16>
    %9 = vector.shape_cast %8 : vector<1x1x1x128xbf16> to vector<1x1x128xbf16>
    %10 = arith.maximumf %7, %9 : vector<1x1x128xbf16>
    %c0_14 = arith.constant 0 : index
    %c0_15 = arith.constant 0 : index
    %c0_16 = arith.constant 0 : index
    %c0_17 = arith.constant 0 : index
    %11 = vector.load %arg2[%c0_14, %c0_15, %c0_16, %c0_17] : memref<1x2x1x128xbf16, #tpu.memory_space<vmem>>, vector<1x1x1x128xbf16>
    %12 = vector.shape_cast %11 : vector<1x1x1x128xbf16> to vector<1x1x128xbf16>
    %13 = arith.maximumf %10, %12 : vector<1x1x128xbf16>
    %c0_18 = arith.constant 0 : index
    %c1_19 = arith.constant 1 : index
    %c0_20 = arith.constant 0 : index
    %c0_21 = arith.constant 0 : index
    %14 = vector.load %arg2[%c0_18, %c1_19, %c0_20, %c0_21] : memref<1x2x1x128xbf16, #tpu.memory_space<vmem>>, vector<1x1x1x128xbf16>
    %15 = vector.shape_cast %14 : vector<1x1x1x128xbf16> to vector<1x1x128xbf16>
    %16 = arith.maximumf %13, %15 : vector<1x1x128xbf16>
    %c0_22 = arith.constant 0 : index
    %c0_23 = arith.constant 0 : index
    %c0_24 = arith.constant 0 : index
    %c0_25 = arith.constant 0 : index
    %17 = vector.load %arg3[%c0_22, %c0_23, %c0_24, %c0_25] : memref<1x1x2x128xbf16, #tpu.memory_space<vmem>>, vector<1x1x1x128xbf16>
    %18 = vector.shape_cast %17 : vector<1x1x1x128xbf16> to vector<1x1x128xbf16>
    %19 = arith.maximumf %16, %18 : vector<1x1x128xbf16>
    %c0_26 = arith.constant 0 : index
    %c0_27 = arith.constant 0 : index
    %c1_28 = arith.constant 1 : index
    %c0_29 = arith.constant 0 : index
    %20 = vector.load %arg3[%c0_26, %c0_27, %c1_28, %c0_29] : memref<1x1x2x128xbf16, #tpu.memory_space<vmem>>, vector<1x1x1x128xbf16>
    %21 = vector.shape_cast %20 : vector<1x1x1x128xbf16> to vector<1x1x128xbf16>
    %22 = arith.maximumf %19, %21 : vector<1x1x128xbf16>
    %c0_30 = arith.constant 0 : index
    %c0_31 = arith.constant 0 : index
    %c0_32 = arith.constant 0 : index
    %c0_33 = arith.constant 0 : index
    %23 = vector.load %arg4[%c0_30, %c0_31, %c0_32, %c0_33] : memref<1x1x1x128xbf16, #tpu.memory_space<vmem>>, vector<1x1x1x128xbf16>
    %24 = vector.shape_cast %23 : vector<1x1x1x128xbf16> to vector<1x1x128xbf16>
    %25 = arith.maximumf %22, %24 : vector<1x1x128xbf16>
    %c0_34 = arith.constant 0 : index
    %c0_35 = arith.constant 0 : index
    %c0_36 = arith.constant 0 : index
    %c0_37 = arith.constant 0 : index
    %26 = vector.load %arg5[%c0_34, %c0_35, %c0_36, %c0_37] : memref<1x1x1x128xbf16, #tpu.memory_space<vmem>>, vector<1x1x1x128xbf16>
    %27 = vector.shape_cast %26 : vector<1x1x1x128xbf16> to vector<1x1x128xbf16>
    %28 = vector.shape_cast %25 : vector<1x1x128xbf16> to vector<1x1x1x128xbf16>
    tpu.vector_store %arg5[%c0_34, %c0_35, %c0_36, %c0_37], %28 {strides = array<i32>} : memref<1x1x1x128xbf16, #tpu.memory_space<vmem>>, vector<1x1x1x128xbf16>,
    return
  }
  func.func @transform_0(%arg0: i32) -> (i32, i32, i32, i32) {
    %c0_i32 = arith.constant 0 : i32
    %c0_i32_0 = arith.constant 0 : i32
    %c0_i32_1 = arith.constant 0 : i32
    %c0_i32_2 = arith.constant 0 : i32
    return %arg0, %c0_i32, %c0_i32_0, %c0_i32_1 : i32, i32, i32, i32
  }
  func.func @transform_1(%arg0: i32) -> (i32, i32, i32, i32) {
    %c0_i32 = arith.constant 0 : i32
    %c0_i32_0 = arith.constant 0 : i32
    %c0_i32_1 = arith.constant 0 : i32
    %c0_i32_2 = arith.constant 0 : i32
    return %arg0, %c0_i32, %c0_i32_0, %c0_i32_1 : i32, i32, i32, i32
  }
  func.func @transform_2(%arg0: i32) -> (i32, i32, i32, i32) {
    %c0_i32 = arith.constant 0 : i32
    %c0_i32_0 = arith.constant 0 : i32
    %c0_i32_1 = arith.constant 0 : i32
    %c0_i32_2 = arith.constant 0 : i32
    return %arg0, %c0_i32, %c0_i32_0, %c0_i32_1 : i32, i32, i32, i32
  }
  func.func @transform_3(%arg0: i32) -> (i32, i32, i32, i32) {
    %c0_i32 = arith.constant 0 : i32
    %c0_i32_0 = arith.constant 0 : i32
    %c0_i32_1 = arith.constant 0 : i32
    %c0_i32_2 = arith.constant 0 : i32
    return %arg0, %c0_i32, %c0_i32_0, %c0_i32_1 : i32, i32, i32, i32
  }
  func.func @transform_4(%arg0: i32) -> (i32, i32, i32, i32) {
    %c0_i32 = arith.constant 0 : i32
    %c0_i32_0 = arith.constant 0 : i32
    %c0_i32_1 = arith.constant 0 : i32
    %c0_i32_2 = arith.constant 0 : i32
    return %arg0, %c0_i32, %c0_i32_0, %c0_i32_1 : i32, i32, i32, i32
  }
}

module attributes {stable_mosaic.version = 11 : i64} {
  func.func @_conv_s1_kernel(%arg0: i32, %arg1: memref<1x11x128xbf16, #tpu.memory_space<vmem>>, %arg2: memref<9x128x128xbf16, #tpu.memory_space<vmem>>, %arg3: memref<1x128xf32, #tpu.memory_space<vmem>>, %arg4: memref<1x3x128xbf16, #tpu.memory_space<vmem>>) attributes {dimension_semantics = [#tpu.dimension_semantics<parallel>], iteration_bounds = array<i64: 2>, scalar_prefetch = 0 : i64, scratch_operands = 0 : i64, tpu.core_type = #tpu.core_type<tc>, window_params = [{transform_indices = @transform_0, window_bounds = array<i64: 1, 11, 128>}, {pipeline_mode = #tpu.pipeline_mode<synchronous>, transform_indices = @transform_1, window_bounds = array<i64: 9, 128, 128>}, {pipeline_mode = #tpu.pipeline_mode<synchronous>, transform_indices = @transform_2, window_bounds = array<i64: 1, 128>}, {transform_indices = @transform_3, window_bounds = array<i64: 1, 3, 128>}]} {
    %cst = arith.constant 0.000000e+00 : f32
    %0 = vector.broadcast %cst : f32 to vector<3x128xf32>
    %c0 = arith.constant 0 : index
    %c0_0 = arith.constant 0 : index
    %c0_1 = arith.constant 0 : index
    %1 = vector.load %arg1[%c0, %c0_0, %c0_1] : memref<1x11x128xbf16, #tpu.memory_space<vmem>>, vector<1x3x128xbf16>
    %2 = vector.shape_cast %1 : vector<1x3x128xbf16> to vector<3x128xbf16>
    %c0_2 = arith.constant 0 : index
    %c0_3 = arith.constant 0 : index
    %c0_4 = arith.constant 0 : index
    %3 = vector.load %arg2[%c0_2, %c0_3, %c0_4] : memref<9x128x128xbf16, #tpu.memory_space<vmem>>, vector<1x128x128xbf16>
    %4 = vector.shape_cast %3 : vector<1x128x128xbf16> to vector<128x128xbf16>
    %cst_5 = arith.constant dense<0.000000e+00> : vector<3x128xf32>
    %5 = tpu.matmul %2, %4, %cst_5 {dimension_numbers = #tpu.dot_dimension_numbers<[1], [0], [0], [1], [0, 0, 1, 1], [], []>} : vector<3x128xbf16>, vector<128x128xbf16>, vector<3x128xf32> -> vector<3x128xf32>
    %6 = arith.addf %0, %5 : vector<3x128xf32>
    %c0_6 = arith.constant 0 : index
    %c1 = arith.constant 1 : index
    %c0_7 = arith.constant 0 : index
    %7 = vector.load %arg1[%c0_6, %c1, %c0_7] : memref<1x11x128xbf16, #tpu.memory_space<vmem>>, vector<1x3x128xbf16>
    %8 = vector.shape_cast %7 : vector<1x3x128xbf16> to vector<3x128xbf16>
    %c1_8 = arith.constant 1 : index
    %c0_9 = arith.constant 0 : index
    %c0_10 = arith.constant 0 : index
    %9 = vector.load %arg2[%c1_8, %c0_9, %c0_10] : memref<9x128x128xbf16, #tpu.memory_space<vmem>>, vector<1x128x128xbf16>
    %10 = vector.shape_cast %9 : vector<1x128x128xbf16> to vector<128x128xbf16>
    %cst_11 = arith.constant dense<0.000000e+00> : vector<3x128xf32>
    %11 = tpu.matmul %8, %10, %cst_11 {dimension_numbers = #tpu.dot_dimension_numbers<[1], [0], [0], [1], [0, 0, 1, 1], [], []>} : vector<3x128xbf16>, vector<128x128xbf16>, vector<3x128xf32> -> vector<3x128xf32>
    %12 = arith.addf %6, %11 : vector<3x128xf32>
    %c0_12 = arith.constant 0 : index
    %c2 = arith.constant 2 : index
    %c0_13 = arith.constant 0 : index
    %13 = vector.load %arg1[%c0_12, %c2, %c0_13] : memref<1x11x128xbf16, #tpu.memory_space<vmem>>, vector<1x3x128xbf16>
    %14 = vector.shape_cast %13 : vector<1x3x128xbf16> to vector<3x128xbf16>
    %c2_14 = arith.constant 2 : index
    %c0_15 = arith.constant 0 : index
    %c0_16 = arith.constant 0 : index
    %15 = vector.load %arg2[%c2_14, %c0_15, %c0_16] : memref<9x128x128xbf16, #tpu.memory_space<vmem>>, vector<1x128x128xbf16>
    %16 = vector.shape_cast %15 : vector<1x128x128xbf16> to vector<128x128xbf16>
    %cst_17 = arith.constant dense<0.000000e+00> : vector<3x128xf32>
    %17 = tpu.matmul %14, %16, %cst_17 {dimension_numbers = #tpu.dot_dimension_numbers<[1], [0], [0], [1], [0, 0, 1, 1], [], []>} : vector<3x128xbf16>, vector<128x128xbf16>, vector<3x128xf32> -> vector<3x128xf32>
    %18 = arith.addf %12, %17 : vector<3x128xf32>
    %c0_18 = arith.constant 0 : index
    %c3 = arith.constant 3 : index
    %c0_19 = arith.constant 0 : index
    %19 = vector.load %arg1[%c0_18, %c3, %c0_19] : memref<1x11x128xbf16, #tpu.memory_space<vmem>>, vector<1x3x128xbf16>
    %20 = vector.shape_cast %19 : vector<1x3x128xbf16> to vector<3x128xbf16>
    %c3_20 = arith.constant 3 : index
    %c0_21 = arith.constant 0 : index
    %c0_22 = arith.constant 0 : index
    %21 = vector.load %arg2[%c3_20, %c0_21, %c0_22] : memref<9x128x128xbf16, #tpu.memory_space<vmem>>, vector<1x128x128xbf16>
    %22 = vector.shape_cast %21 : vector<1x128x128xbf16> to vector<128x128xbf16>
    %cst_23 = arith.constant dense<0.000000e+00> : vector<3x128xf32>
    %23 = tpu.matmul %20, %22, %cst_23 {dimension_numbers = #tpu.dot_dimension_numbers<[1], [0], [0], [1], [0, 0, 1, 1], [], []>} : vector<3x128xbf16>, vector<128x128xbf16>, vector<3x128xf32> -> vector<3x128xf32>
    %24 = arith.addf %18, %23 : vector<3x128xf32>
    %c0_24 = arith.constant 0 : index
    %c4 = arith.constant 4 : index
    %c0_25 = arith.constant 0 : index
    %25 = vector.load %arg1[%c0_24, %c4, %c0_25] : memref<1x11x128xbf16, #tpu.memory_space<vmem>>, vector<1x3x128xbf16>
    %26 = vector.shape_cast %25 : vector<1x3x128xbf16> to vector<3x128xbf16>
    %c4_26 = arith.constant 4 : index
    %c0_27 = arith.constant 0 : index
    %c0_28 = arith.constant 0 : index
    %27 = vector.load %arg2[%c4_26, %c0_27, %c0_28] : memref<9x128x128xbf16, #tpu.memory_space<vmem>>, vector<1x128x128xbf16>
    %28 = vector.shape_cast %27 : vector<1x128x128xbf16> to vector<128x128xbf16>
    %cst_29 = arith.constant dense<0.000000e+00> : vector<3x128xf32>
    %29 = tpu.matmul %26, %28, %cst_29 {dimension_numbers = #tpu.dot_dimension_numbers<[1], [0], [0], [1], [0, 0, 1, 1], [], []>} : vector<3x128xbf16>, vector<128x128xbf16>, vector<3x128xf32> -> vector<3x128xf32>
    %30 = arith.addf %24, %29 : vector<3x128xf32>
    %c0_30 = arith.constant 0 : index
    %c5 = arith.constant 5 : index
    %c0_31 = arith.constant 0 : index
    %31 = vector.load %arg1[%c0_30, %c5, %c0_31] : memref<1x11x128xbf16, #tpu.memory_space<vmem>>, vector<1x3x128xbf16>
    %32 = vector.shape_cast %31 : vector<1x3x128xbf16> to vector<3x128xbf16>
    %c5_32 = arith.constant 5 : index
    %c0_33 = arith.constant 0 : index
    %c0_34 = arith.constant 0 : index
    %33 = vector.load %arg2[%c5_32, %c0_33, %c0_34] : memref<9x128x128xbf16, #tpu.memory_space<vmem>>, vector<1x128x128xbf16>
    %34 = vector.shape_cast %33 : vector<1x128x128xbf16> to vector<128x128xbf16>
    %cst_35 = arith.constant dense<0.000000e+00> : vector<3x128xf32>
    %35 = tpu.matmul %32, %34, %cst_35 {dimension_numbers = #tpu.dot_dimension_numbers<[1], [0], [0], [1], [0, 0, 1, 1], [], []>} : vector<3x128xbf16>, vector<128x128xbf16>, vector<3x128xf32> -> vector<3x128xf32>
    %36 = arith.addf %30, %35 : vector<3x128xf32>
    %c0_36 = arith.constant 0 : index
    %c6 = arith.constant 6 : index
    %c0_37 = arith.constant 0 : index
    %37 = vector.load %arg1[%c0_36, %c6, %c0_37] : memref<1x11x128xbf16, #tpu.memory_space<vmem>>, vector<1x3x128xbf16>
    %38 = vector.shape_cast %37 : vector<1x3x128xbf16> to vector<3x128xbf16>
    %c6_38 = arith.constant 6 : index
    %c0_39 = arith.constant 0 : index
    %c0_40 = arith.constant 0 : index
    %39 = vector.load %arg2[%c6_38, %c0_39, %c0_40] : memref<9x128x128xbf16, #tpu.memory_space<vmem>>, vector<1x128x128xbf16>
    %40 = vector.shape_cast %39 : vector<1x128x128xbf16> to vector<128x128xbf16>
    %cst_41 = arith.constant dense<0.000000e+00> : vector<3x128xf32>
    %41 = tpu.matmul %38, %40, %cst_41 {dimension_numbers = #tpu.dot_dimension_numbers<[1], [0], [0], [1], [0, 0, 1, 1], [], []>} : vector<3x128xbf16>, vector<128x128xbf16>, vector<3x128xf32> -> vector<3x128xf32>
    %42 = arith.addf %36, %41 : vector<3x128xf32>
    %c0_42 = arith.constant 0 : index
    %c7 = arith.constant 7 : index
    %c0_43 = arith.constant 0 : index
    %43 = vector.load %arg1[%c0_42, %c7, %c0_43] : memref<1x11x128xbf16, #tpu.memory_space<vmem>>, vector<1x3x128xbf16>
    %44 = vector.shape_cast %43 : vector<1x3x128xbf16> to vector<3x128xbf16>
    %c7_44 = arith.constant 7 : index
    %c0_45 = arith.constant 0 : index
    %c0_46 = arith.constant 0 : index
    %45 = vector.load %arg2[%c7_44, %c0_45, %c0_46] : memref<9x128x128xbf16, #tpu.memory_space<vmem>>, vector<1x128x128xbf16>
    %46 = vector.shape_cast %45 : vector<1x128x128xbf16> to vector<128x128xbf16>
    %cst_47 = arith.constant dense<0.000000e+00> : vector<3x128xf32>
    %47 = tpu.matmul %44, %46, %cst_47 {dimension_numbers = #tpu.dot_dimension_numbers<[1], [0], [0], [1], [0, 0, 1, 1], [], []>} : vector<3x128xbf16>, vector<128x128xbf16>, vector<3x128xf32> -> vector<3x128xf32>
    %48 = arith.addf %42, %47 : vector<3x128xf32>
    %c0_48 = arith.constant 0 : index
    %c8 = arith.constant 8 : index
    %c0_49 = arith.constant 0 : index
    %49 = vector.load %arg1[%c0_48, %c8, %c0_49] : memref<1x11x128xbf16, #tpu.memory_space<vmem>>, vector<1x3x128xbf16>
    %50 = vector.shape_cast %49 : vector<1x3x128xbf16> to vector<3x128xbf16>
    %c8_50 = arith.constant 8 : index
    %c0_51 = arith.constant 0 : index
    %c0_52 = arith.constant 0 : index
    %51 = vector.load %arg2[%c8_50, %c0_51, %c0_52] : memref<9x128x128xbf16, #tpu.memory_space<vmem>>, vector<1x128x128xbf16>
    %52 = vector.shape_cast %51 : vector<1x128x128xbf16> to vector<128x128xbf16>
    %cst_53 = arith.constant dense<0.000000e+00> : vector<3x128xf32>
    %53 = tpu.matmul %50, %52, %cst_53 {dimension_numbers = #tpu.dot_dimension_numbers<[1], [0], [0], [1], [0, 0, 1, 1], [], []>} : vector<3x128xbf16>, vector<128x128xbf16>, vector<3x128xf32> -> vector<3x128xf32>
    %54 = arith.addf %48, %53 : vector<3x128xf32>
    %c0_54 = arith.constant 0 : index
    %c0_55 = arith.constant 0 : index
    %55 = vector.load %arg3[%c0_54, %c0_55] : memref<1x128xf32, #tpu.memory_space<vmem>>, vector<1x128xf32>
    %56 = vector.broadcast %55 : vector<1x128xf32> to vector<3x128xf32>
    %57 = arith.addf %54, %56 : vector<3x128xf32>
    %cst_56 = arith.constant 0.000000e+00 : f32
    %58 = vector.broadcast %cst_56 : f32 to vector<3x128xf32>
    %59 = arith.maximumf %57, %58 : vector<3x128xf32>
    %60 = arith.truncf %59 : vector<3x128xf32> to vector<3x128xbf16>
    %c0_57 = arith.constant 0 : index
    %c0_58 = arith.constant 0 : index
    %c0_59 = arith.constant 0 : index
    %61 = vector.load %arg4[%c0_57, %c0_58, %c0_59] : memref<1x3x128xbf16, #tpu.memory_space<vmem>>, vector<1x3x128xbf16>
    %62 = vector.shape_cast %61 : vector<1x3x128xbf16> to vector<3x128xbf16>
    %63 = vector.shape_cast %60 : vector<3x128xbf16> to vector<1x3x128xbf16>
    tpu.vector_store %arg4[%c0_57, %c0_58, %c0_59], %63 {strides = array<i32>} : memref<1x3x128xbf16, #tpu.memory_space<vmem>>, vector<1x3x128xbf16>,
    return
  }
  func.func @transform_0(%arg0: i32) -> (i32, i32, i32) {
    %c0_i32 = arith.constant 0 : i32
    %c0_i32_0 = arith.constant 0 : i32
    %c0_i32_1 = arith.constant 0 : i32
    return %arg0, %c0_i32, %c0_i32_0 : i32, i32, i32
  }
  func.func @transform_1(%arg0: i32) -> (i32, i32, i32) {
    %c0_i32 = arith.constant 0 : i32
    %c0_i32_0 = arith.constant 0 : i32
    %c0_i32_1 = arith.constant 0 : i32
    %c0_i32_2 = arith.constant 0 : i32
    return %c0_i32, %c0_i32_0, %c0_i32_1 : i32, i32, i32
  }
  func.func @transform_2(%arg0: i32) -> (i32, i32) {
    %c0_i32 = arith.constant 0 : i32
    %c0_i32_0 = arith.constant 0 : i32
    %c0_i32_1 = arith.constant 0 : i32
    return %c0_i32, %c0_i32_0 : i32, i32
  }
  func.func @transform_3(%arg0: i32) -> (i32, i32, i32) {
    %c0_i32 = arith.constant 0 : i32
    %c0_i32_0 = arith.constant 0 : i32
    %c0_i32_1 = arith.constant 0 : i32
    return %arg0, %c0_i32, %c0_i32_0 : i32, i32, i32
  }
}

module attributes {stable_mosaic.version = 11 : i64} {
  func.func @_conv_s1_kernel(%arg0: i32, %arg1: memref<1x10x128xbf16, #tpu.memory_space<vmem>>, %arg2: memref<4x128x128xbf16, #tpu.memory_space<vmem>>, %arg3: memref<1x128xf32, #tpu.memory_space<vmem>>, %arg4: memref<1x6x128xbf16, #tpu.memory_space<vmem>>) attributes {dimension_semantics = [#tpu.dimension_semantics<parallel>], iteration_bounds = array<i64: 2>, scalar_prefetch = 0 : i64, scratch_operands = 0 : i64, tpu.core_type = #tpu.core_type<tc>, window_params = [{transform_indices = @transform_0, window_bounds = array<i64: 1, 10, 128>}, {pipeline_mode = #tpu.pipeline_mode<synchronous>, transform_indices = @transform_1, window_bounds = array<i64: 4, 128, 128>}, {pipeline_mode = #tpu.pipeline_mode<synchronous>, transform_indices = @transform_2, window_bounds = array<i64: 1, 128>}, {transform_indices = @transform_3, window_bounds = array<i64: 1, 6, 128>}]} {
    %cst = arith.constant 0.000000e+00 : f32
    %0 = vector.broadcast %cst : f32 to vector<6x128xf32>
    %c0 = arith.constant 0 : index
    %c0_0 = arith.constant 0 : index
    %c0_1 = arith.constant 0 : index
    %1 = vector.load %arg1[%c0, %c0_0, %c0_1] : memref<1x10x128xbf16, #tpu.memory_space<vmem>>, vector<1x6x128xbf16>
    %2 = vector.shape_cast %1 : vector<1x6x128xbf16> to vector<6x128xbf16>
    %c0_2 = arith.constant 0 : index
    %c0_3 = arith.constant 0 : index
    %c0_4 = arith.constant 0 : index
    %3 = vector.load %arg2[%c0_2, %c0_3, %c0_4] : memref<4x128x128xbf16, #tpu.memory_space<vmem>>, vector<1x128x128xbf16>
    %4 = vector.shape_cast %3 : vector<1x128x128xbf16> to vector<128x128xbf16>
    %cst_5 = arith.constant dense<0.000000e+00> : vector<6x128xf32>
    %5 = tpu.matmul %2, %4, %cst_5 {dimension_numbers = #tpu.dot_dimension_numbers<[1], [0], [0], [1], [0, 0, 1, 1], [], []>} : vector<6x128xbf16>, vector<128x128xbf16>, vector<6x128xf32> -> vector<6x128xf32>
    %6 = arith.addf %0, %5 : vector<6x128xf32>
    %c0_6 = arith.constant 0 : index
    %c1 = arith.constant 1 : index
    %c0_7 = arith.constant 0 : index
    %7 = vector.load %arg1[%c0_6, %c1, %c0_7] : memref<1x10x128xbf16, #tpu.memory_space<vmem>>, vector<1x6x128xbf16>
    %8 = vector.shape_cast %7 : vector<1x6x128xbf16> to vector<6x128xbf16>
    %c1_8 = arith.constant 1 : index
    %c0_9 = arith.constant 0 : index
    %c0_10 = arith.constant 0 : index
    %9 = vector.load %arg2[%c1_8, %c0_9, %c0_10] : memref<4x128x128xbf16, #tpu.memory_space<vmem>>, vector<1x128x128xbf16>
    %10 = vector.shape_cast %9 : vector<1x128x128xbf16> to vector<128x128xbf16>
    %cst_11 = arith.constant dense<0.000000e+00> : vector<6x128xf32>
    %11 = tpu.matmul %8, %10, %cst_11 {dimension_numbers = #tpu.dot_dimension_numbers<[1], [0], [0], [1], [0, 0, 1, 1], [], []>} : vector<6x128xbf16>, vector<128x128xbf16>, vector<6x128xf32> -> vector<6x128xf32>
    %12 = arith.addf %6, %11 : vector<6x128xf32>
    %c0_12 = arith.constant 0 : index
    %c3 = arith.constant 3 : index
    %c0_13 = arith.constant 0 : index
    %13 = vector.load %arg1[%c0_12, %c3, %c0_13] : memref<1x10x128xbf16, #tpu.memory_space<vmem>>, vector<1x6x128xbf16>
    %14 = vector.shape_cast %13 : vector<1x6x128xbf16> to vector<6x128xbf16>
    %c2 = arith.constant 2 : index
    %c0_14 = arith.constant 0 : index
    %c0_15 = arith.constant 0 : index
    %15 = vector.load %arg2[%c2, %c0_14, %c0_15] : memref<4x128x128xbf16, #tpu.memory_space<vmem>>, vector<1x128x128xbf16>
    %16 = vector.shape_cast %15 : vector<1x128x128xbf16> to vector<128x128xbf16>
    %cst_16 = arith.constant dense<0.000000e+00> : vector<6x128xf32>
    %17 = tpu.matmul %14, %16, %cst_16 {dimension_numbers = #tpu.dot_dimension_numbers<[1], [0], [0], [1], [0, 0, 1, 1], [], []>} : vector<6x128xbf16>, vector<128x128xbf16>, vector<6x128xf32> -> vector<6x128xf32>
    %18 = arith.addf %12, %17 : vector<6x128xf32>
    %c0_17 = arith.constant 0 : index
    %c4 = arith.constant 4 : index
    %c0_18 = arith.constant 0 : index
    %19 = vector.load %arg1[%c0_17, %c4, %c0_18] : memref<1x10x128xbf16, #tpu.memory_space<vmem>>, vector<1x6x128xbf16>
    %20 = vector.shape_cast %19 : vector<1x6x128xbf16> to vector<6x128xbf16>
    %c3_19 = arith.constant 3 : index
    %c0_20 = arith.constant 0 : index
    %c0_21 = arith.constant 0 : index
    %21 = vector.load %arg2[%c3_19, %c0_20, %c0_21] : memref<4x128x128xbf16, #tpu.memory_space<vmem>>, vector<1x128x128xbf16>
    %22 = vector.shape_cast %21 : vector<1x128x128xbf16> to vector<128x128xbf16>
    %cst_22 = arith.constant dense<0.000000e+00> : vector<6x128xf32>
    %23 = tpu.matmul %20, %22, %cst_22 {dimension_numbers = #tpu.dot_dimension_numbers<[1], [0], [0], [1], [0, 0, 1, 1], [], []>} : vector<6x128xbf16>, vector<128x128xbf16>, vector<6x128xf32> -> vector<6x128xf32>
    %24 = arith.addf %18, %23 : vector<6x128xf32>
    %c0_23 = arith.constant 0 : index
    %c0_24 = arith.constant 0 : index
    %25 = vector.load %arg3[%c0_23, %c0_24] : memref<1x128xf32, #tpu.memory_space<vmem>>, vector<1x128xf32>
    %26 = vector.broadcast %25 : vector<1x128xf32> to vector<6x128xf32>
    %27 = arith.addf %24, %26 : vector<6x128xf32>
    %cst_25 = arith.constant 0.000000e+00 : f32
    %28 = vector.broadcast %cst_25 : f32 to vector<6x128xf32>
    %29 = arith.maximumf %27, %28 : vector<6x128xf32>
    %30 = arith.truncf %29 : vector<6x128xf32> to vector<6x128xbf16>
    %c0_26 = arith.constant 0 : index
    %c0_27 = arith.constant 0 : index
    %c0_28 = arith.constant 0 : index
    %31 = vector.load %arg4[%c0_26, %c0_27, %c0_28] : memref<1x6x128xbf16, #tpu.memory_space<vmem>>, vector<1x6x128xbf16>
    %32 = vector.shape_cast %31 : vector<1x6x128xbf16> to vector<6x128xbf16>
    %33 = vector.shape_cast %30 : vector<6x128xbf16> to vector<1x6x128xbf16>
    tpu.vector_store %arg4[%c0_26, %c0_27, %c0_28], %33 {strides = array<i32>} : memref<1x6x128xbf16, #tpu.memory_space<vmem>>, vector<1x6x128xbf16>,
    return
  }
  func.func @transform_0(%arg0: i32) -> (i32, i32, i32) {
    %c0_i32 = arith.constant 0 : i32
    %c0_i32_0 = arith.constant 0 : i32
    %c0_i32_1 = arith.constant 0 : i32
    return %arg0, %c0_i32, %c0_i32_0 : i32, i32, i32
  }
  func.func @transform_1(%arg0: i32) -> (i32, i32, i32) {
    %c0_i32 = arith.constant 0 : i32
    %c0_i32_0 = arith.constant 0 : i32
    %c0_i32_1 = arith.constant 0 : i32
    %c0_i32_2 = arith.constant 0 : i32
    return %c0_i32, %c0_i32_0, %c0_i32_1 : i32, i32, i32
  }
  func.func @transform_2(%arg0: i32) -> (i32, i32) {
    %c0_i32 = arith.constant 0 : i32
    %c0_i32_0 = arith.constant 0 : i32
    %c0_i32_1 = arith.constant 0 : i32
    return %c0_i32, %c0_i32_0 : i32, i32
  }
  func.func @transform_3(%arg0: i32) -> (i32, i32, i32) {
    %c0_i32 = arith.constant 0 : i32
    %c0_i32_0 = arith.constant 0 : i32
    %c0_i32_1 = arith.constant 0 : i32
    return %arg0, %c0_i32, %c0_i32_0 : i32, i32, i32
  }
}

module attributes {stable_mosaic.version = 11 : i64} {
  func.func @_conv_s1_kernel(%arg0: i32, %arg1: memref<1x17x128xbf16, #tpu.memory_space<vmem>>, %arg2: memref<4x128x128xbf16, #tpu.memory_space<vmem>>, %arg3: memref<1x128xf32, #tpu.memory_space<vmem>>, %arg4: memref<1x12x128xbf16, #tpu.memory_space<vmem>>) attributes {dimension_semantics = [#tpu.dimension_semantics<parallel>], iteration_bounds = array<i64: 2>, scalar_prefetch = 0 : i64, scratch_operands = 0 : i64, tpu.core_type = #tpu.core_type<tc>, window_params = [{transform_indices = @transform_0, window_bounds = array<i64: 1, 17, 128>}, {pipeline_mode = #tpu.pipeline_mode<synchronous>, transform_indices = @transform_1, window_bounds = array<i64: 4, 128, 128>}, {pipeline_mode = #tpu.pipeline_mode<synchronous>, transform_indices = @transform_2, window_bounds = array<i64: 1, 128>}, {transform_indices = @transform_3, window_bounds = array<i64: 1, 12, 128>}]} {
    %cst = arith.constant 0.000000e+00 : f32
    %0 = vector.broadcast %cst : f32 to vector<12x128xf32>
    %c0 = arith.constant 0 : index
    %c0_0 = arith.constant 0 : index
    %c0_1 = arith.constant 0 : index
    %1 = vector.load %arg1[%c0, %c0_0, %c0_1] : memref<1x17x128xbf16, #tpu.memory_space<vmem>>, vector<1x12x128xbf16>
    %2 = vector.shape_cast %1 : vector<1x12x128xbf16> to vector<12x128xbf16>
    %c0_2 = arith.constant 0 : index
    %c0_3 = arith.constant 0 : index
    %c0_4 = arith.constant 0 : index
    %3 = vector.load %arg2[%c0_2, %c0_3, %c0_4] : memref<4x128x128xbf16, #tpu.memory_space<vmem>>, vector<1x128x128xbf16>
    %4 = vector.shape_cast %3 : vector<1x128x128xbf16> to vector<128x128xbf16>
    %cst_5 = arith.constant dense<0.000000e+00> : vector<12x128xf32>
    %5 = tpu.matmul %2, %4, %cst_5 {dimension_numbers = #tpu.dot_dimension_numbers<[1], [0], [0], [1], [0, 0, 1, 1], [], []>} : vector<12x128xbf16>, vector<128x128xbf16>, vector<12x128xf32> -> vector<12x128xf32>
    %6 = arith.addf %0, %5 : vector<12x128xf32>
    %c0_6 = arith.constant 0 : index
    %c1 = arith.constant 1 : index
    %c0_7 = arith.constant 0 : index
    %7 = vector.load %arg1[%c0_6, %c1, %c0_7] : memref<1x17x128xbf16, #tpu.memory_space<vmem>>, vector<1x12x128xbf16>
    %8 = vector.shape_cast %7 : vector<1x12x128xbf16> to vector<12x128xbf16>
    %c1_8 = arith.constant 1 : index
    %c0_9 = arith.constant 0 : index
    %c0_10 = arith.constant 0 : index
    %9 = vector.load %arg2[%c1_8, %c0_9, %c0_10] : memref<4x128x128xbf16, #tpu.memory_space<vmem>>, vector<1x128x128xbf16>
    %10 = vector.shape_cast %9 : vector<1x128x128xbf16> to vector<128x128xbf16>
    %cst_11 = arith.constant dense<0.000000e+00> : vector<12x128xf32>
    %11 = tpu.matmul %8, %10, %cst_11 {dimension_numbers = #tpu.dot_dimension_numbers<[1], [0], [0], [1], [0, 0, 1, 1], [], []>} : vector<12x128xbf16>, vector<128x128xbf16>, vector<12x128xf32> -> vector<12x128xf32>
    %12 = arith.addf %6, %11 : vector<12x128xf32>
    %c0_12 = arith.constant 0 : index
    %c4 = arith.constant 4 : index
    %c0_13 = arith.constant 0 : index
    %13 = vector.load %arg1[%c0_12, %c4, %c0_13] : memref<1x17x128xbf16, #tpu.memory_space<vmem>>, vector<1x12x128xbf16>
    %14 = vector.shape_cast %13 : vector<1x12x128xbf16> to vector<12x128xbf16>
    %c2 = arith.constant 2 : index
    %c0_14 = arith.constant 0 : index
    %c0_15 = arith.constant 0 : index
    %15 = vector.load %arg2[%c2, %c0_14, %c0_15] : memref<4x128x128xbf16, #tpu.memory_space<vmem>>, vector<1x128x128xbf16>
    %16 = vector.shape_cast %15 : vector<1x128x128xbf16> to vector<128x128xbf16>
    %cst_16 = arith.constant dense<0.000000e+00> : vector<12x128xf32>
    %17 = tpu.matmul %14, %16, %cst_16 {dimension_numbers = #tpu.dot_dimension_numbers<[1], [0], [0], [1], [0, 0, 1, 1], [], []>} : vector<12x128xbf16>, vector<128x128xbf16>, vector<12x128xf32> -> vector<12x128xf32>
    %18 = arith.addf %12, %17 : vector<12x128xf32>
    %c0_17 = arith.constant 0 : index
    %c5 = arith.constant 5 : index
    %c0_18 = arith.constant 0 : index
    %19 = vector.load %arg1[%c0_17, %c5, %c0_18] : memref<1x17x128xbf16, #tpu.memory_space<vmem>>, vector<1x12x128xbf16>
    %20 = vector.shape_cast %19 : vector<1x12x128xbf16> to vector<12x128xbf16>
    %c3 = arith.constant 3 : index
    %c0_19 = arith.constant 0 : index
    %c0_20 = arith.constant 0 : index
    %21 = vector.load %arg2[%c3, %c0_19, %c0_20] : memref<4x128x128xbf16, #tpu.memory_space<vmem>>, vector<1x128x128xbf16>
    %22 = vector.shape_cast %21 : vector<1x128x128xbf16> to vector<128x128xbf16>
    %cst_21 = arith.constant dense<0.000000e+00> : vector<12x128xf32>
    %23 = tpu.matmul %20, %22, %cst_21 {dimension_numbers = #tpu.dot_dimension_numbers<[1], [0], [0], [1], [0, 0, 1, 1], [], []>} : vector<12x128xbf16>, vector<128x128xbf16>, vector<12x128xf32> -> vector<12x128xf32>
    %24 = arith.addf %18, %23 : vector<12x128xf32>
    %c0_22 = arith.constant 0 : index
    %c0_23 = arith.constant 0 : index
    %25 = vector.load %arg3[%c0_22, %c0_23] : memref<1x128xf32, #tpu.memory_space<vmem>>, vector<1x128xf32>
    %26 = vector.broadcast %25 : vector<1x128xf32> to vector<12x128xf32>
    %27 = arith.addf %24, %26 : vector<12x128xf32>
    %cst_24 = arith.constant 0.000000e+00 : f32
    %28 = vector.broadcast %cst_24 : f32 to vector<12x128xf32>
    %29 = arith.maximumf %27, %28 : vector<12x128xf32>
    %30 = arith.truncf %29 : vector<12x128xf32> to vector<12x128xbf16>
    %c0_25 = arith.constant 0 : index
    %c0_26 = arith.constant 0 : index
    %c0_27 = arith.constant 0 : index
    %31 = vector.load %arg4[%c0_25, %c0_26, %c0_27] : memref<1x12x128xbf16, #tpu.memory_space<vmem>>, vector<1x12x128xbf16>
    %32 = vector.shape_cast %31 : vector<1x12x128xbf16> to vector<12x128xbf16>
    %33 = vector.shape_cast %30 : vector<12x128xbf16> to vector<1x12x128xbf16>
    tpu.vector_store %arg4[%c0_25, %c0_26, %c0_27], %33 {strides = array<i32>} : memref<1x12x128xbf16, #tpu.memory_space<vmem>>, vector<1x12x128xbf16>,
    return
  }
  func.func @transform_0(%arg0: i32) -> (i32, i32, i32) {
    %c0_i32 = arith.constant 0 : i32
    %c0_i32_0 = arith.constant 0 : i32
    %c0_i32_1 = arith.constant 0 : i32
    return %arg0, %c0_i32, %c0_i32_0 : i32, i32, i32
  }
  func.func @transform_1(%arg0: i32) -> (i32, i32, i32) {
    %c0_i32 = arith.constant 0 : i32
    %c0_i32_0 = arith.constant 0 : i32
    %c0_i32_1 = arith.constant 0 : i32
    %c0_i32_2 = arith.constant 0 : i32
    return %c0_i32, %c0_i32_0, %c0_i32_1 : i32, i32, i32
  }
  func.func @transform_2(%arg0: i32) -> (i32, i32) {
    %c0_i32 = arith.constant 0 : i32
    %c0_i32_0 = arith.constant 0 : i32
    %c0_i32_1 = arith.constant 0 : i32
    return %c0_i32, %c0_i32_0 : i32, i32
  }
  func.func @transform_3(%arg0: i32) -> (i32, i32, i32) {
    %c0_i32 = arith.constant 0 : i32
    %c0_i32_0 = arith.constant 0 : i32
    %c0_i32_1 = arith.constant 0 : i32
    return %arg0, %c0_i32, %c0_i32_0 : i32, i32, i32
  }
}

module attributes {stable_mosaic.version = 11 : i64} {
  func.func @_conv_s1_kernel(%arg0: i32, %arg1: memref<1x102x128xbf16, #tpu.memory_space<vmem>>, %arg2: memref<9x128x128xbf16, #tpu.memory_space<vmem>>, %arg3: memref<1x128xf32, #tpu.memory_space<vmem>>, %arg4: memref<1x80x128xbf16, #tpu.memory_space<vmem>>) attributes {dimension_semantics = [#tpu.dimension_semantics<parallel>], iteration_bounds = array<i64: 2>, scalar_prefetch = 0 : i64, scratch_operands = 0 : i64, tpu.core_type = #tpu.core_type<tc>, window_params = [{transform_indices = @transform_0, window_bounds = array<i64: 1, 102, 128>}, {pipeline_mode = #tpu.pipeline_mode<synchronous>, transform_indices = @transform_1, window_bounds = array<i64: 9, 128, 128>}, {pipeline_mode = #tpu.pipeline_mode<synchronous>, transform_indices = @transform_2, window_bounds = array<i64: 1, 128>}, {transform_indices = @transform_3, window_bounds = array<i64: 1, 80, 128>}]} {
    %cst = arith.constant 0.000000e+00 : f32
    %0 = vector.broadcast %cst : f32 to vector<80x128xf32>
    %c0 = arith.constant 0 : index
    %c0_0 = arith.constant 0 : index
    %c0_1 = arith.constant 0 : index
    %1 = vector.load %arg1[%c0, %c0_0, %c0_1] : memref<1x102x128xbf16, #tpu.memory_space<vmem>>, vector<1x80x128xbf16>
    %2 = vector.shape_cast %1 : vector<1x80x128xbf16> to vector<80x128xbf16>
    %c0_2 = arith.constant 0 : index
    %c0_3 = arith.constant 0 : index
    %c0_4 = arith.constant 0 : index
    %3 = vector.load %arg2[%c0_2, %c0_3, %c0_4] : memref<9x128x128xbf16, #tpu.memory_space<vmem>>, vector<1x128x128xbf16>
    %4 = vector.shape_cast %3 : vector<1x128x128xbf16> to vector<128x128xbf16>
    %cst_5 = arith.constant dense<0.000000e+00> : vector<80x128xf32>
    %5 = tpu.matmul %2, %4, %cst_5 {dimension_numbers = #tpu.dot_dimension_numbers<[1], [0], [0], [1], [0, 0, 1, 1], [], []>} : vector<80x128xbf16>, vector<128x128xbf16>, vector<80x128xf32> -> vector<80x128xf32>
    %6 = arith.addf %0, %5 : vector<80x128xf32>
    %c0_6 = arith.constant 0 : index
    %c1 = arith.constant 1 : index
    %c0_7 = arith.constant 0 : index
    %7 = vector.load %arg1[%c0_6, %c1, %c0_7] : memref<1x102x128xbf16, #tpu.memory_space<vmem>>, vector<1x80x128xbf16>
    %8 = vector.shape_cast %7 : vector<1x80x128xbf16> to vector<80x128xbf16>
    %c1_8 = arith.constant 1 : index
    %c0_9 = arith.constant 0 : index
    %c0_10 = arith.constant 0 : index
    %9 = vector.load %arg2[%c1_8, %c0_9, %c0_10] : memref<9x128x128xbf16, #tpu.memory_space<vmem>>, vector<1x128x128xbf16>
    %10 = vector.shape_cast %9 : vector<1x128x128xbf16> to vector<128x128xbf16>
    %cst_11 = arith.constant dense<0.000000e+00> : vector<80x128xf32>
    %11 = tpu.matmul %8, %10, %cst_11 {dimension_numbers = #tpu.dot_dimension_numbers<[1], [0], [0], [1], [0, 0, 1, 1], [], []>} : vector<80x128xbf16>, vector<128x128xbf16>, vector<80x128xf32> -> vector<80x128xf32>
    %12 = arith.addf %6, %11 : vector<80x128xf32>
    %c0_12 = arith.constant 0 : index
    %c2 = arith.constant 2 : index
    %c0_13 = arith.constant 0 : index
    %13 = vector.load %arg1[%c0_12, %c2, %c0_13] : memref<1x102x128xbf16, #tpu.memory_space<vmem>>, vector<1x80x128xbf16>
    %14 = vector.shape_cast %13 : vector<1x80x128xbf16> to vector<80x128xbf16>
    %c2_14 = arith.constant 2 : index
    %c0_15 = arith.constant 0 : index
    %c0_16 = arith.constant 0 : index
    %15 = vector.load %arg2[%c2_14, %c0_15, %c0_16] : memref<9x128x128xbf16, #tpu.memory_space<vmem>>, vector<1x128x128xbf16>
    %16 = vector.shape_cast %15 : vector<1x128x128xbf16> to vector<128x128xbf16>
    %cst_17 = arith.constant dense<0.000000e+00> : vector<80x128xf32>
    %17 = tpu.matmul %14, %16, %cst_17 {dimension_numbers = #tpu.dot_dimension_numbers<[1], [0], [0], [1], [0, 0, 1, 1], [], []>} : vector<80x128xbf16>, vector<128x128xbf16>, vector<80x128xf32> -> vector<80x128xf32>
    %18 = arith.addf %12, %17 : vector<80x128xf32>
    %c0_18 = arith.constant 0 : index
    %c10 = arith.constant 10 : index
    %c0_19 = arith.constant 0 : index
    %19 = vector.load %arg1[%c0_18, %c10, %c0_19] : memref<1x102x128xbf16, #tpu.memory_space<vmem>>, vector<1x80x128xbf16>
    %20 = vector.shape_cast %19 : vector<1x80x128xbf16> to vector<80x128xbf16>
    %c3 = arith.constant 3 : index
    %c0_20 = arith.constant 0 : index
    %c0_21 = arith.constant 0 : index
    %21 = vector.load %arg2[%c3, %c0_20, %c0_21] : memref<9x128x128xbf16, #tpu.memory_space<vmem>>, vector<1x128x128xbf16>
    %22 = vector.shape_cast %21 : vector<1x128x128xbf16> to vector<128x128xbf16>
    %cst_22 = arith.constant dense<0.000000e+00> : vector<80x128xf32>
    %23 = tpu.matmul %20, %22, %cst_22 {dimension_numbers = #tpu.dot_dimension_numbers<[1], [0], [0], [1], [0, 0, 1, 1], [], []>} : vector<80x128xbf16>, vector<128x128xbf16>, vector<80x128xf32> -> vector<80x128xf32>
    %24 = arith.addf %18, %23 : vector<80x128xf32>
    %c0_23 = arith.constant 0 : index
    %c11 = arith.constant 11 : index
    %c0_24 = arith.constant 0 : index
    %25 = vector.load %arg1[%c0_23, %c11, %c0_24] : memref<1x102x128xbf16, #tpu.memory_space<vmem>>, vector<1x80x128xbf16>
    %26 = vector.shape_cast %25 : vector<1x80x128xbf16> to vector<80x128xbf16>
    %c4 = arith.constant 4 : index
    %c0_25 = arith.constant 0 : index
    %c0_26 = arith.constant 0 : index
    %27 = vector.load %arg2[%c4, %c0_25, %c0_26] : memref<9x128x128xbf16, #tpu.memory_space<vmem>>, vector<1x128x128xbf16>
    %28 = vector.shape_cast %27 : vector<1x128x128xbf16> to vector<128x128xbf16>
    %cst_27 = arith.constant dense<0.000000e+00> : vector<80x128xf32>
    %29 = tpu.matmul %26, %28, %cst_27 {dimension_numbers = #tpu.dot_dimension_numbers<[1], [0], [0], [1], [0, 0, 1, 1], [], []>} : vector<80x128xbf16>, vector<128x128xbf16>, vector<80x128xf32> -> vector<80x128xf32>
    %30 = arith.addf %24, %29 : vector<80x128xf32>
    %c0_28 = arith.constant 0 : index
    %c12 = arith.constant 12 : index
    %c0_29 = arith.constant 0 : index
    %31 = vector.load %arg1[%c0_28, %c12, %c0_29] : memref<1x102x128xbf16, #tpu.memory_space<vmem>>, vector<1x80x128xbf16>
    %32 = vector.shape_cast %31 : vector<1x80x128xbf16> to vector<80x128xbf16>
    %c5 = arith.constant 5 : index
    %c0_30 = arith.constant 0 : index
    %c0_31 = arith.constant 0 : index
    %33 = vector.load %arg2[%c5, %c0_30, %c0_31] : memref<9x128x128xbf16, #tpu.memory_space<vmem>>, vector<1x128x128xbf16>
    %34 = vector.shape_cast %33 : vector<1x128x128xbf16> to vector<128x128xbf16>
    %cst_32 = arith.constant dense<0.000000e+00> : vector<80x128xf32>
    %35 = tpu.matmul %32, %34, %cst_32 {dimension_numbers = #tpu.dot_dimension_numbers<[1], [0], [0], [1], [0, 0, 1, 1], [], []>} : vector<80x128xbf16>, vector<128x128xbf16>, vector<80x128xf32> -> vector<80x128xf32>
    %36 = arith.addf %30, %35 : vector<80x128xf32>
    %c0_33 = arith.constant 0 : index
    %c20 = arith.constant 20 : index
    %c0_34 = arith.constant 0 : index
    %37 = vector.load %arg1[%c0_33, %c20, %c0_34] : memref<1x102x128xbf16, #tpu.memory_space<vmem>>, vector<1x80x128xbf16>
    %38 = vector.shape_cast %37 : vector<1x80x128xbf16> to vector<80x128xbf16>
    %c6 = arith.constant 6 : index
    %c0_35 = arith.constant 0 : index
    %c0_36 = arith.constant 0 : index
    %39 = vector.load %arg2[%c6, %c0_35, %c0_36] : memref<9x128x128xbf16, #tpu.memory_space<vmem>>, vector<1x128x128xbf16>
    %40 = vector.shape_cast %39 : vector<1x128x128xbf16> to vector<128x128xbf16>
    %cst_37 = arith.constant dense<0.000000e+00> : vector<80x128xf32>
    %41 = tpu.matmul %38, %40, %cst_37 {dimension_numbers = #tpu.dot_dimension_numbers<[1], [0], [0], [1], [0, 0, 1, 1], [], []>} : vector<80x128xbf16>, vector<128x128xbf16>, vector<80x128xf32> -> vector<80x128xf32>
    %42 = arith.addf %36, %41 : vector<80x128xf32>
    %c0_38 = arith.constant 0 : index
    %c21 = arith.constant 21 : index
    %c0_39 = arith.constant 0 : index
    %43 = vector.load %arg1[%c0_38, %c21, %c0_39] : memref<1x102x128xbf16, #tpu.memory_space<vmem>>, vector<1x80x128xbf16>
    %44 = vector.shape_cast %43 : vector<1x80x128xbf16> to vector<80x128xbf16>
    %c7 = arith.constant 7 : index
    %c0_40 = arith.constant 0 : index
    %c0_41 = arith.constant 0 : index
    %45 = vector.load %arg2[%c7, %c0_40, %c0_41] : memref<9x128x128xbf16, #tpu.memory_space<vmem>>, vector<1x128x128xbf16>
    %46 = vector.shape_cast %45 : vector<1x128x128xbf16> to vector<128x128xbf16>
    %cst_42 = arith.constant dense<0.000000e+00> : vector<80x128xf32>
    %47 = tpu.matmul %44, %46, %cst_42 {dimension_numbers = #tpu.dot_dimension_numbers<[1], [0], [0], [1], [0, 0, 1, 1], [], []>} : vector<80x128xbf16>, vector<128x128xbf16>, vector<80x128xf32> -> vector<80x128xf32>
    %48 = arith.addf %42, %47 : vector<80x128xf32>
    %c0_43 = arith.constant 0 : index
    %c22 = arith.constant 22 : index
    %c0_44 = arith.constant 0 : index
    %49 = vector.load %arg1[%c0_43, %c22, %c0_44] : memref<1x102x128xbf16, #tpu.memory_space<vmem>>, vector<1x80x128xbf16>
    %50 = vector.shape_cast %49 : vector<1x80x128xbf16> to vector<80x128xbf16>
    %c8 = arith.constant 8 : index
    %c0_45 = arith.constant 0 : index
    %c0_46 = arith.constant 0 : index
    %51 = vector.load %arg2[%c8, %c0_45, %c0_46] : memref<9x128x128xbf16, #tpu.memory_space<vmem>>, vector<1x128x128xbf16>
    %52 = vector.shape_cast %51 : vector<1x128x128xbf16> to vector<128x128xbf16>
    %cst_47 = arith.constant dense<0.000000e+00> : vector<80x128xf32>
    %53 = tpu.matmul %50, %52, %cst_47 {dimension_numbers = #tpu.dot_dimension_numbers<[1], [0], [0], [1], [0, 0, 1, 1], [], []>} : vector<80x128xbf16>, vector<128x128xbf16>, vector<80x128xf32> -> vector<80x128xf32>
    %54 = arith.addf %48, %53 : vector<80x128xf32>
    %c0_48 = arith.constant 0 : index
    %c0_49 = arith.constant 0 : index
    %55 = vector.load %arg3[%c0_48, %c0_49] : memref<1x128xf32, #tpu.memory_space<vmem>>, vector<1x128xf32>
    %56 = vector.broadcast %55 : vector<1x128xf32> to vector<80x128xf32>
    %57 = arith.addf %54, %56 : vector<80x128xf32>
    %58 = arith.truncf %57 : vector<80x128xf32> to vector<80x128xbf16>
    %c0_50 = arith.constant 0 : index
    %c0_51 = arith.constant 0 : index
    %c0_52 = arith.constant 0 : index
    %59 = vector.load %arg4[%c0_50, %c0_51, %c0_52] : memref<1x80x128xbf16, #tpu.memory_space<vmem>>, vector<1x80x128xbf16>
    %60 = vector.shape_cast %59 : vector<1x80x128xbf16> to vector<80x128xbf16>
    %61 = vector.shape_cast %58 : vector<80x128xbf16> to vector<1x80x128xbf16>
    tpu.vector_store %arg4[%c0_50, %c0_51, %c0_52], %61 {strides = array<i32>} : memref<1x80x128xbf16, #tpu.memory_space<vmem>>, vector<1x80x128xbf16>,
    return
  }
  func.func @transform_0(%arg0: i32) -> (i32, i32, i32) {
    %c0_i32 = arith.constant 0 : i32
    %c0_i32_0 = arith.constant 0 : i32
    %c0_i32_1 = arith.constant 0 : i32
    return %arg0, %c0_i32, %c0_i32_0 : i32, i32, i32
  }
  func.func @transform_1(%arg0: i32) -> (i32, i32, i32) {
    %c0_i32 = arith.constant 0 : i32
    %c0_i32_0 = arith.constant 0 : i32
    %c0_i32_1 = arith.constant 0 : i32
    %c0_i32_2 = arith.constant 0 : i32
    return %c0_i32, %c0_i32_0, %c0_i32_1 : i32, i32, i32
  }
  func.func @transform_2(%arg0: i32) -> (i32, i32) {
    %c0_i32 = arith.constant 0 : i32
    %c0_i32_0 = arith.constant 0 : i32
    %c0_i32_1 = arith.constant 0 : i32
    return %c0_i32, %c0_i32_0 : i32, i32
  }
  func.func @transform_3(%arg0: i32) -> (i32, i32, i32) {
    %c0_i32 = arith.constant 0 : i32
    %c0_i32_0 = arith.constant 0 : i32
    %c0_i32_1 = arith.constant 0 : i32
    return %arg0, %c0_i32, %c0_i32_0 : i32, i32, i32
  }
}

</mosaic_0001>

<bundles_post_ra>
// kernel: alexnetmap_v3_forward.12
= control target key start
LH: loop header
LB: loop body
LE: loop exit
PB: predicated region body
PF: predicated region fallthrough
CT: control target
= control target key end

     0   :  { %s559_s15 = smov 0   ;;  %s652_s0 = inlined_call_operand.vmem [shape: bf16[2,4,4,128], index: 0, kind: input, shape index: {}]   ;;  %s653_s1 = inlined_call_operand.vmem [shape: bf16[2,4,3,128], index: 1, kind: input, shape index: {}]   ;;  %s654_s2 = inlined_call_operand.vmem [shape: bf16[2,3,4,128], index: 2, kind: input, shape index: {}]   ;;  %s655_s3 = inlined_call_operand.vmem [shape: bf16[2,3,3,128], index: 3, kind: input, shape index: {}]   ;;  %s656_s4 = inlined_call_operand.vmem [shape: bf16[2,3,3,128], index: 4, kind: output, shape index: {}]  }
   0x1 LB: > { %s495_s16 = sadd.s32 4294967295, %s532_s15   ;;  %p499_p0 = scmp.ge.s32.totalorder %s532_s15, 1  ;;  %s532_s15 = sphi %s559_s15, %s14_s15  }
   0x2   : > { %p192_p1 = scmp.lt.s32.totalorder %s532_s15, 3 }
   0x4   : > { %p193_p2 = pnand %p499_p0, %p192_p1 }
   0x5   : > { %p233_p3 = scmp.lt.s32.totalorder (!%p193_p2), %s495_s16, 1  ;;  %vm392_vm0 = vcmask (!%p193_p2), 1041408   ;;  %vm393_vm1 = vsmask.f32 (!%p193_p2), 1280 }
   0x6   : > { %196 = sbr.rel (%p193_p2) target bundleno = 50 (0x32), region = 36  ;;  %vm629_vm2 = vmand (!%p193_p2), %vm392_vm0, %vm393_vm1 }
   0xd   : > { %s660_s16 = smov (!%p233_p3, %s495_s16), 1 }
   0xe   : > { %s515_s17 = sshll.u32 %s660_s16, 3  ;;  %s571_s18 = smul.u32 6, %s660_s16 }
   0xf   : > { %s578_s21 = scalar_lea.vmem %s652_s0, %s515_s17  ;;  %s606_s27 = scalar_lea.vmem %s653_s1, %s515_s17 }
  0x10   : > { %s584_s24 = scalar_lea.vmem %s654_s2, %s571_s18  ;;  %v258_v0 = vld [vmem:[%s578_s21] sm:$0x3]  ;;  %v507_v1 = vld [vmem:[%s578_s21 + $0x2] sm:$0x3]  ;;  %v508_v16 = vld [vmem:[%s578_s21 + $0x4] sm:$0x3]  ;;  %s617_s30 = scalar_lea.vmem %s655_s3, %s571_s18 }
  0x11   : > { %v262_v2 = vshrl.u32 %v258_v0, 16  ;;  %v265_v3 = vshll.u32 %v258_v0, 16  ;;  %v302_v4 = vshrl.u32 %v507_v1, 16  ;;  %v305_v5 = vshll.u32 %v507_v1, 16  ;;  %v589_v6 = vld [vmem:[%s584_s24] sm:$0x3]  ;;  %s624_s7 = scalar_lea.vmem %s656_s4, %s571_s18 }
  0x12   : > { %v259_v11 = vld [vmem:[%s578_s21 + $0x2] sm:$0x3]  ;;  %v354_v12 = vshrl.u32 %v589_v6, 16  ;;  %v357_v13 = vshll.u32 %v589_v6, 16  ;;  %v311_v19 = vshrl.u32 %v508_v16, 16  ;;  %v314_v20 = vshll.u32 %v508_v16, 16 }
  0x13   : > { %v264_v7 = vrot.slane %v262_v2, 6  ;;  %v267_v8 = vrot.slane %v265_v3, 7  ;;  %v304_v9 = vrot.slane %v302_v4, 6  ;;  %v307_v10 = vrot.slane %v305_v5, 7  ;;  %v596_v25 = vld [vmem:[%s584_s24 + $0x2] sm:$0x3] }
  0x14   : > { %v271_v14 = vshrl.u32 %v259_v11, 16  ;;  %v274_v15 = vshll.u32 %v259_v11, 16  ;;  %v356_v21 = vrot.slane %v354_v12, 6  ;;  %v359_v22 = vrot.slane %v357_v13, 7  ;;  %v260_v33 = vld [vmem:[%s578_s21 + $0x4] sm:$0x3] }
  0x15   : > { %v268_v17 = vor.u32 %v267_v8, %v264_v7  ;;  %v308_v18 = vor.u32 %v307_v10, %v304_v9  ;;  %v313_v27 = vrot.slane %v311_v19, 6  ;;  %v316_v28 = vrot.slane %v314_v20, 7  ;;  %v509_v38 = vld [vmem:[%s578_s21 + $0x6] sm:$0x3]  ;;  %v349_v46 = vld [vmem:[%s584_s24 + $0x4] sm:$0x3] }
  0x16   : > { %v273_v23 = vrot.slane %v271_v14, 6  ;;  %v276_v24 = vrot.slane %v274_v15, 7  ;;  %v363_v31 = vshrl.u32 %v596_v25, 16  ;;  %v366_v32 = vshll.u32 %v596_v25, 16  ;;  %v334_v47 = vld [vmem:[%s606_s27] sm:$0x3] }
  0x17   : > { %v269_v26 = vrot.slane %v268_v17, 2  ;;  %v309_v29 = vrot.slane %v308_v18, 2  ;;  %v317_v35 = vor.u32 %v316_v28, %v313_v27  ;;  %v280_v36 = vshrl.u32 %v260_v33, 16  ;;  %v510_v56 = vld [vmem:[%s606_s27 + $0x2] sm:$0x3] }
  0x18   : > { %v277_v30 = vor.u32 %v276_v24, %v273_v23  ;;  %v283_v37 = vshll.u32 %v260_v33, 16  ;;  %v360_v39 = vor.u32 %v359_v22, %v356_v21  ;;  %v365_v41 = vrot.slane %v363_v31, 6  ;;  %v335_v61 = vld [vmem:[%s606_s27 + $0x2] sm:$0x3]  ;;  %v511_v4 = vld [vmem:[%s606_s27 + $0x4] sm:$0x3] }
  0x19   : > { %v291_v34 = vmax.bf16 %v269_v26, %v258_v0  ;;  %v368_v43 = vrot.slane %v366_v32, 7  ;;  %v282_v44 = vrot.slane %v280_v36, 6  ;;  %v318_v49 = vrot.slane %v317_v35, 2  ;;  %v386_v13 = vld [vmem:[%s617_s30] sm:$0x3] }
  0x1a   : > { %v278_v40 = vrot.slane %v277_v30, 2  ;;  %v285_v45 = vrot.slane %v283_v37, 7  ;;  %v320_v50 = vshrl.u32 %v509_v38, 16  ;;  %v323_v51 = vshll.u32 %v509_v38, 16  ;;  %v395_v21 = vld [vmem:[%s624_s7] sm:$0x3] }
  0x1b   : > { %v298_v42 = vmax.bf16 %v507_v1, %v291_v34  ;;  %v372_v54 = vshrl.u32 %v349_v46, 16  ;;  %v375_v55 = vshll.u32 %v349_v46, 16  ;;  %v361_v63 = vrot.slane %v360_v39, 2  ;;  %v512_v22 = vld [vmem:[%s606_s27 + $0x6] sm:$0x3] }
  0x1c   : > { %v292_v48 = vmax.bf16 %v278_v40, %v259_v11  ;;  %v286_v53 = vor.u32 %v285_v45, %v282_v44  ;;  %v322_v58 = vrot.slane %v320_v50, 6  ;;  %v325_v59 = vrot.slane %v323_v51, 7  ;;  %v387_v24 = vld [vmem:[%s617_s30 + $0x2] sm:$0x3]  ;;  %v401_v36 = vld [vmem:[%s624_s7 + $0x4] sm:$0x3] }
  0x1d   : > { %v331_v52 = vmax.bf16 %v309_v29, %v298_v42  ;;  %v369_v1 = vor.u32 %v368_v43, %v365_v41  ;;  %v374_v7 = vrot.slane %v372_v54, 6  ;;  %v377_v8 = vrot.slane %v375_v55, 7  ;;  %v398_v29 = vld [vmem:[%s624_s7 + $0x2] sm:$0x3] }
  0x1e   : > { %v299_v57 = vmax.bf16 %v508_v16, %v292_v48  ;;  %v287_v62 = vrot.slane %v286_v53, 2  ;;  %v326_v2 = vor.u32 %v325_v59, %v322_v58  ;;  %v336_v16 = vld [vmem:[%s606_s27 + $0x4] sm:$0x3] }
  0x1f   : > { %v337_v60 = vmax.bf16 %v334_v47, %v331_v52  ;;  %v370_v15 = vrot.slane %v369_v1, 2  ;;  %v378_v19 = vor.u32 %v377_v8, %v374_v7 }
  0x20   : > { %v332_v0 = vmax.bf16 %v318_v49, %v299_v57  ;;  %v293_v5 = vmax.bf16 %v287_v62, %v260_v33  ;;  %v327_v10 = vrot.slane %v326_v2, 2 }
  0x21   : > { %v344_v3 = vmax.bf16 %v510_v56, %v337_v60  ;;  %v379_v31 = vrot.slane %v378_v19, 2 }
  0x22   : > { %v338_v9 = vmax.bf16 %v335_v61, %v332_v0  ;;  %v300_v12 = vmax.bf16 %v509_v38, %v293_v5 }
  0x23   : > { %v350_v11 = vmax.bf16 %v589_v6, %v344_v3 }
  0x24   : > { %v345_v14 = vmax.bf16 %v511_v4, %v338_v9  ;;  %v333_v18 = vmax.bf16 %v327_v10, %v300_v12 }
  0x25   : > { %v383_v17 = vmax.bf16 %v361_v63, %v350_v11 }
  0x26   : > { %v351_v6 = vmax.bf16 %v596_v25, %v345_v14  ;;  %v339_v26 = vmax.bf16 %v336_v16, %v333_v18  ;;  %v388_v25 = vld [vmem:[%s617_s30 + $0x4] sm:$0x3] }
  0x27   : > { %v389_v23 = vmax.bf16 %v386_v13, %v383_v17 }
  0x28   : > { %v384_v27 = vmax.bf16 %v370_v15, %v351_v6  ;;  %v346_v30 = vmax.bf16 %v512_v22, %v339_v26 }
  0x29   : > { %v396_v28 = vsel %vm629_vm2, %v389_v23, %v395_v21 }
  0x2a   : > { %397 = vst [vmem:[%s624_s7] sm:$0x3] %v396_v28  ;;  %v390_v32 = vmax.bf16 %v387_v24, %v384_v27  ;;  %v352_v33 = vmax.bf16 %v349_v46, %v346_v30 }
  0x2c   : > { %v399_v34 = vsel %vm629_vm2, %v390_v32, %v398_v29  ;;  %v385_v35 = vmax.bf16 %v379_v31, %v352_v33 }
  0x2d   : > { %400 = vst [vmem:[%s624_s7 + $0x2] sm:$0x3] %v399_v34 }
  0x2e   : > { %v391_v37 = vmax.bf16 %v388_v25, %v385_v35 }
  0x30   : > { %v402_v38 = vsel %vm629_vm2, %v391_v37, %v401_v36 }
  0x31   : > { %403 = vst [vmem:[%s624_s7 + $0x4] sm:$0x3] %v402_v38 }
  0x32 PF: > { %s14_s15 = sadd.s32 1, %s532_s15  }
  0x33   : > { %p11_p4 = scmp.ge.s32.totalorder %s14_s15, 4  }
  0x35   :  { %13 = sbr.rel (!%p11_p4) target bundleno = 1 (0x1), region = 77 }

// kernel: alexnetmap_v3_forward.11
= control target key start
LH: loop header
LB: loop body
LE: loop exit
PB: predicated region body
PF: predicated region fallthrough
CT: control target
= control target key end

     0   :  { %s1240_s1 = inlined_call_operand.vmem [shape: bf16[512,128], index: 1, kind: input, shape index: {}]   ;;  %s1241_s0 = inlined_call_operand.vmem [shape: bf16[104,512], index: 0, kind: input, shape index: {}]   ;;  %s1242_s2 = inlined_call_operand.vmem [shape: f32[1,128], index: 2, kind: input, shape index: {}]   ;;  %s1243_s3 = inlined_call_operand.vmem [shape: bf16[104,128], index: 3, kind: output, shape index: {}]  }
   0x1   :  { %v935_v0 = vld [vmem:[%s1240_s1 + $0x40] sm:$0xff]   ;;  %v939_v4 = vld [vmem:[%s1240_s1 + $0x48] sm:$0xff]   ;;  %v943_v8 = vld [vmem:[%s1240_s1 + $0x50] sm:$0xff]  }
   0x2   :  { %v936_v1 = vld [vmem:[%s1240_s1 + $0xc0] sm:$0xff]   ;;  %819 = vmatprep.subr.bf16.mxu0 %v935_v0  ;;  %v940_v5 = vld [vmem:[%s1240_s1 + $0xc8] sm:$0xff]   ;;  %v944_v9 = vld [vmem:[%s1240_s1 + $0xd0] sm:$0xff]  }
   0x3   :  { %v937_v2 = vld [vmem:[%s1240_s1] sm:$0xff]   ;;  %877 = vmatprep.subr.bf16.mxu1 %v936_v1  ;;  %v941_v6 = vld [vmem:[%s1240_s1 + $0x8] sm:$0xff]   ;;  %v945_v10 = vld [vmem:[%s1240_s1 + $0x10] sm:$0xff]  }
   0x4   :  { %v938_v3 = vld [vmem:[%s1240_s1 + $0x80] sm:$0xff]   ;;  %820 = vmatpush3.bf16.msra.mxu0 %v937_v2  ;;  %v942_v7 = vld [vmem:[%s1240_s1 + $0x88] sm:$0xff]   ;;  %v946_v11 = vld [vmem:[%s1240_s1 + $0x90] sm:$0xff]  }
   0x5   :  { %878 = vmatpush3.bf16.msra.mxu1 %v938_v3  ;;  %821 = vmatprep.subr.bf16.mxu0 %v939_v4  ;;  %v947_v12 = vld [vmem:[%s1240_s1 + $0x58] sm:$0xff]   ;;  %v951_v16 = vld [vmem:[%s1240_s1 + $0x60] sm:$0xff]   ;;  %v955_v20 = vld [vmem:[%s1240_s1 + $0x68] sm:$0xff]  }
   0x6   :  { %879 = vmatprep.subr.bf16.mxu1 %v940_v5  ;;  %v948_v13 = vld [vmem:[%s1240_s1 + $0xd8] sm:$0xff]   ;;  %v952_v17 = vld [vmem:[%s1240_s1 + $0xe0] sm:$0xff]   ;;  %v956_v21 = vld [vmem:[%s1240_s1 + $0xe8] sm:$0xff]  }
   0x7   :  { %v949_v14 = vld [vmem:[%s1240_s1 + $0x18] sm:$0xff]   ;;  %v953_v18 = vld [vmem:[%s1240_s1 + $0x20] sm:$0xff]   ;;  %v957_v22 = vld [vmem:[%s1240_s1 + $0x28] sm:$0xff]  }
   0x8   :  { %822 = vmatpush3.bf16.msra.mxu0 %v941_v6  ;;  %v950_v15 = vld [vmem:[%s1240_s1 + $0x98] sm:$0xff]   ;;  %v954_v19 = vld [vmem:[%s1240_s1 + $0xa0] sm:$0xff]   ;;  %v958_v23 = vld [vmem:[%s1240_s1 + $0xa8] sm:$0xff]  }
   0x9   :  { %880 = vmatpush3.bf16.msra.mxu1 %v942_v7  ;;  %823 = vmatprep.subr.bf16.mxu0 %v943_v8  ;;  %v959_v24 = vld [vmem:[%s1240_s1 + $0x70] sm:$0xff]   ;;  %v963_v28 = vld [vmem:[%s1240_s1 + $0x78] sm:$0xff]   ;;  %v39_v54 = vld [vmem:[%s1241_s0 + $0xc0] sm:$0xff] }
   0xa   :  { %881 = vmatprep.subr.bf16.mxu1 %v944_v9  ;;  %v960_v25 = vld [vmem:[%s1240_s1 + $0xf0] sm:$0xff]   ;;  %v964_v29 = vld [vmem:[%s1240_s1 + $0xf8] sm:$0xff]   ;;  %v40_v55 = vld [vmem:[%s1241_s0 + $0xc8] sm:$0xff]  ;;  %v723_v58 = vcombine.high %v39_v54, %v39_v54  ;;  %v722_v60 = vcombine.low %v39_v54, %v39_v54 }
   0xb   :  { %v961_v26 = vld [vmem:[%s1240_s1 + $0x30] sm:$0xff]   ;;  %v965_v30 = vld [vmem:[%s1240_s1 + $0x38] sm:$0xff]   ;;  %v725_v59 = vcombine.high %v40_v55, %v40_v55  ;;  %v724_v61 = vcombine.low %v40_v55, %v40_v55  ;;  %v1204_v0 = vld [vmem:[%s1242_s2] ss:$0 sm:$0xff] }
   0xc   :  { %824 = vmatpush3.bf16.msra.mxu0 %v945_v10  ;;  %v962_v27 = vld [vmem:[%s1240_s1 + $0xb0] sm:$0xff]   ;;  %v966_v31 = vld [vmem:[%s1240_s1 + $0xb8] sm:$0xff]  }
   0xd   :  { %882 = vmatpush3.bf16.msra.mxu1 %v946_v11  ;;  %825 = vmatprep.subr.bf16.mxu0 %v947_v12  ;;  %v967_v32 = vld [vmem:[%s1241_s0] ss:$16 sps:$4 sm:$0xff]   ;;  %v969_v33 = vld [vmem:[%s1241_s0 + $0x4] ss:$16 sps:$4 sm:$0xff]   ;;  %v970_v34 = vld [vmem:[%s1241_s0 + $0x8] ss:$16 sps:$4 sm:$0xff]  }
   0xe   :  { %883 = vmatprep.subr.bf16.mxu1 %v948_v13  ;;  %v972_v35 = vld [vmem:[%s1241_s0 + $0xc] ss:$16 sps:$4 sm:$0xff]   ;;  %470 = vmatprep.mubr.bf16.mxu0 %v969_v33  ;;  %v973_v36 = vld [vmem:[%s1241_s0 + $0x24] ss:$16 sps:$4 sm:$0xff]   ;;  %v977_v38 = vld [vmem:[%s1241_s0 + $0x20] ss:$16 sps:$4 sm:$0xff]  }
   0xf   :  { %558 = vmatprep.mubr.bf16.mxu1 %v972_v35  ;;  %v975_v37 = vld [vmem:[%s1241_s0 + $0x2c] ss:$16 sps:$4 sm:$0xff]   ;;  %v978_v39 = vld [vmem:[%s1241_s0 + $0x28] ss:$16 sps:$4 sm:$0xff]   ;;  %v979_v40 = vld [vmem:[%s1241_s0 + $0x44] ss:$16 sps:$4 sm:$0xff]  }
  0x10   :  { %826 = vmatpush3.bf16.msra.mxu0 %v949_v14  ;;  %v981_v41 = vld [vmem:[%s1241_s0 + $0x4c] ss:$16 sps:$4 sm:$0xff]   ;;  %v983_v42 = vld [vmem:[%s1241_s0 + $0x40] ss:$16 sps:$4 sm:$0xff]   ;;  %v984_v43 = vld [vmem:[%s1241_s0 + $0x48] ss:$16 sps:$4 sm:$0xff]  }
  0x11   :  { %884 = vmatpush3.bf16.msra.mxu1 %v950_v15  ;;  %827 = vmatprep.subr.bf16.mxu0 %v951_v16  ;;  %v985_v44 = vld [vmem:[%s1241_s0 + $0x64] ss:$16 sps:$4 sm:$0xff]   ;;  %v987_v45 = vld [vmem:[%s1241_s0 + $0x6c] ss:$16 sps:$4 sm:$0xff]   ;;  %v989_v46 = vld [vmem:[%s1241_s0 + $0x60] ss:$16 sps:$4 sm:$0xff]  }
  0x12   :  { %885 = vmatprep.subr.bf16.mxu1 %v952_v17  ;;  %v990_v47 = vld [vmem:[%s1241_s0 + $0x68] ss:$16 sps:$4 sm:$0xff]   ;;  %v991_v48 = vld [vmem:[%s1241_s0 + $0x84] ss:$16 sps:$4 sm:$0xff]   ;;  %v993_v49 = vld [vmem:[%s1241_s0 + $0x8c] ss:$16 sps:$4 sm:$0xff]  }
  0x13   :  { %v995_v50 = vld [vmem:[%s1241_s0 + $0x80] ss:$16 sps:$4 sm:$0xff]   ;;  %v996_v51 = vld [vmem:[%s1241_s0 + $0x88] ss:$16 sps:$4 sm:$0xff]   ;;  %v997_v52 = vld [vmem:[%s1241_s0 + $0xa4] ss:$16 sps:$4 sm:$0xff]  }
  0x14   :  { %828 = vmatpush3.bf16.msra.mxu0 %v953_v18  ;;  %v999_v53 = vld [vmem:[%s1241_s0 + $0xac] ss:$16 sps:$4 sm:$0xff]   ;;  %v1001_v56 = vld [vmem:[%s1241_s0 + $0xa0] ss:$16 sps:$4 sm:$0xff]   ;;  %v1002_v57 = vld [vmem:[%s1241_s0 + $0xa8] ss:$16 sps:$4 sm:$0xff]  }
  0x15   :  { %886 = vmatpush3.bf16.msra.mxu1 %v954_v19  ;;  %829 = vmatprep.subr.bf16.mxu0 %v955_v20 }
  0x16   :  { %887 = vmatprep.subr.bf16.mxu1 %v956_v21 }
  0x18   :  { %830 = vmatpush3.bf16.msra.mxu0 %v957_v22 }
  0x19   :  { %888 = vmatpush3.bf16.msra.mxu1 %v958_v23  ;;  %831 = vmatprep.subr.bf16.mxu0 %v959_v24 }
  0x1a   :  { %889 = vmatprep.subr.bf16.mxu1 %v960_v25 }
  0x1c   :  { %832 = vmatpush3.bf16.msra.mxu0 %v961_v26 }
  0x1d   :  { %890 = vmatpush3.bf16.msra.mxu1 %v962_v27  ;;  %833 = vmatprep.subr.bf16.mxu0 %v963_v28 }
  0x1e   :  { %891 = vmatprep.subr.bf16.mxu1 %v964_v29 }
  0x20   :  { %834 = vmatpush3.bf16.msra.mxu0 %v965_v30 }
  0x21   :  { %892 = vmatpush3.bf16.msra.mxu1 %v966_v31 }
  0x23   :  { %471 = vmatmul.mubr.bf16.vlgmr.msra.gmra.mrb[0].mxu0 %v967_v32 }
  0x24   :  { %559 = vmatmul.mubr.bf16.vlgmr.msra.gmra.mrb[0].mxu1 %v970_v34  ;;  %478 = vmatprep.mubr.bf16.mxu0 %v973_v36 }
  0x25   :  { %566 = vmatprep.mubr.bf16.mxu1 %v975_v37 }
  0x2b   :  { %479 = vmatmul.mubr.bf16.gmra.mrb[4].mxu0 %v977_v38 }
  0x2c   :  { %567 = vmatmul.mubr.bf16.gmra.mrb[4].mxu1 %v978_v39  ;;  %486 = vmatprep.mubr.bf16.mxu0 %v979_v40 }
  0x2d   :  { %574 = vmatprep.mubr.bf16.mxu1 %v981_v41 }
  0x33   :  { %487 = vmatmul.mubr.bf16.gmra.mrb[8].mxu0 %v983_v42 }
  0x34   :  { %575 = vmatmul.mubr.bf16.gmra.mrb[8].mxu1 %v984_v43  ;;  %494 = vmatprep.mubr.bf16.mxu0 %v985_v44 }
  0x35   :  { %582 = vmatprep.mubr.bf16.mxu1 %v987_v45 }
  0x3b   :  { %495 = vmatmul.mubr.bf16.gmra.mrb[12].mxu0 %v989_v46 }
  0x3c   :  { %583 = vmatmul.mubr.bf16.gmra.mrb[12].mxu1 %v990_v47  ;;  %502 = vmatprep.mubr.bf16.mxu0 %v991_v48 }
  0x3d   :  { %590 = vmatprep.mubr.bf16.mxu1 %v993_v49 }
  0x43   :  { %503 = vmatmul.mubr.bf16.gmra.mrb[16].mxu0 %v995_v50 }
  0x44   :  { %591 = vmatmul.mubr.bf16.gmra.mrb[16].mxu1 %v996_v51  ;;  %510 = vmatprep.mubr.bf16.mxu0 %v997_v52 }
  0x45   :  { %598 = vmatprep.mubr.bf16.mxu1 %v999_v53 }
  0x4b   :  { %511 = vmatmul.mubr.bf16.gmra.mrb[20].mxu0 %v1001_v56 }
  0x4c   :  { %599 = vmatmul.mubr.bf16.gmra.mrb[20].mxu1 %v1002_v57  ;;  %518 = vmatprep.mubr.bf16.mxu0 %v723_v58 }
  0x4d   :  { %606 = vmatprep.mubr.bf16.mxu1 %v725_v59 }
  0x53   :  { %519 = vmatmul.mubr.bf16.gmra.mrb[24].mxu0 %v722_v60 }
  0x54   :  { %607 = vmatmul.mubr.bf16.gmra.mrb[24].mxu1 %v724_v61 }
  0xf6   :  { %v835_v62 = vpop.f32.mrb[0].mxu0 }
  0xf7   :  { %v893_v63 = vpop.f32.mrb[0].mxu1  ;;  %v836_v1 = vpop.f32.mrb[1].mxu0 }
  0xf8   :  { %v837_v2 = vadd.f32 %v836_v1, %v835_v62  ;;  %v894_v3 = vpop.f32.mrb[1].mxu1  ;;  %v838_v4 = vpop.f32.mrb[2].mxu0 }
  0xf9   :  { %v895_v5 = vadd.f32 %v894_v3, %v893_v63  ;;  %v896_v6 = vpop.f32.mrb[2].mxu1  ;;  %v839_v7 = vpop.f32.mrb[3].mxu0 }
  0xfa   :  { %v473_v8 = vadd.f32 %v837_v2, %v1204_v0  ;;  %v840_v9 = vadd.f32 %v839_v7, %v838_v4  ;;  %v897_v10 = vpop.f32.mrb[3].mxu1 }
  0xfb   :  { %v898_v11 = vadd.f32 %v897_v10, %v896_v6 }
  0xfc   :  { %v561_v12 = vadd.f32 %v895_v5, %v473_v8  ;;  %v476_v13 = vadd.f32 %v840_v9, %v1204_v0 }
  0xfe   :  { %v564_v14 = vadd.f32 %v898_v11, %v476_v13  ;;  %v841_v15 = vpop.f32.mrb[4].mxu0  ;;  %v614_v18 = vmax.f32 %v561_v12, 0.0 }
  0xff   :  { %v899_v16 = vpop.f32.mrb[4].mxu1  ;;  %v842_v17 = vpop.f32.mrb[5].mxu0 }
 0x100   :  { %v615_v19 = vmax.f32 %v564_v14, 0.0  ;;  %v843_v20 = vadd.f32 %v842_v17, %v841_v15  ;;  %v900_v21 = vpop.f32.mrb[5].mxu1  ;;  %v844_v22 = vpop.f32.mrb[6].mxu0 }
 0x101   :  { %v901_v23 = vadd.f32 %v900_v21, %v899_v16  ;;  %v902_v24 = vpop.f32.mrb[6].mxu1  ;;  %v845_v25 = vpop.f32.mrb[7].mxu0 }
 0x102   :  { %v787_v26 = vpack.c.bf16 %v615_v19, %v614_v18  ;;  %v481_v27 = vadd.f32 %v843_v20, %v1204_v0  ;;  %v846_v28 = vadd.f32 %v845_v25, %v844_v22  ;;  %v903_v29 = vpop.f32.mrb[7].mxu1 }
 0x103   :  { %v904_v30 = vadd.f32 %v903_v29, %v902_v24 }
 0x104   :  { %788 = vst [vmem:[%s1243_s3] sm:$0xff] %v787_v26   ;;  %v569_v31 = vadd.f32 %v901_v23, %v481_v27  ;;  %v484_v32 = vadd.f32 %v846_v28, %v1204_v0 }
 0x106   :  { %v572_v33 = vadd.f32 %v904_v30, %v484_v32  ;;  %v847_v34 = vpop.f32.mrb[8].mxu0  ;;  %v616_v37 = vmax.f32 %v569_v31, 0.0 }
 0x107   :  { %v905_v35 = vpop.f32.mrb[8].mxu1  ;;  %v848_v36 = vpop.f32.mrb[9].mxu0 }
 0x108   :  { %v617_v38 = vmax.f32 %v572_v33, 0.0  ;;  %v849_v39 = vadd.f32 %v848_v36, %v847_v34  ;;  %v906_v40 = vpop.f32.mrb[9].mxu1  ;;  %v850_v41 = vpop.f32.mrb[10].mxu0 }
 0x109   :  { %v907_v42 = vadd.f32 %v906_v40, %v905_v35  ;;  %v908_v43 = vpop.f32.mrb[10].mxu1  ;;  %v851_v44 = vpop.f32.mrb[11].mxu0 }
 0x10a   :  { %v792_v45 = vpack.c.bf16 %v617_v38, %v616_v37  ;;  %v489_v46 = vadd.f32 %v849_v39, %v1204_v0  ;;  %v852_v47 = vadd.f32 %v851_v44, %v850_v41  ;;  %v909_v48 = vpop.f32.mrb[11].mxu1 }
 0x10b   :  { %v910_v49 = vadd.f32 %v909_v48, %v908_v43 }
 0x10c   :  { %814 = vst [vmem:[%s1243_s3 + $0x8] sm:$0xff] %v792_v45   ;;  %v577_v50 = vadd.f32 %v907_v42, %v489_v46  ;;  %v492_v51 = vadd.f32 %v852_v47, %v1204_v0 }
 0x10e   :  { %v580_v52 = vadd.f32 %v910_v49, %v492_v51  ;;  %v853_v53 = vpop.f32.mrb[12].mxu0  ;;  %v618_v56 = vmax.f32 %v577_v50, 0.0 }
 0x10f   :  { %v911_v54 = vpop.f32.mrb[12].mxu1  ;;  %v854_v55 = vpop.f32.mrb[13].mxu0 }
 0x110   :  { %v619_v57 = vmax.f32 %v580_v52, 0.0  ;;  %v855_v58 = vadd.f32 %v854_v55, %v853_v53  ;;  %v912_v59 = vpop.f32.mrb[13].mxu1  ;;  %v856_v60 = vpop.f32.mrb[14].mxu0 }
 0x111   :  { %v913_v61 = vadd.f32 %v912_v59, %v911_v54  ;;  %v914_v62 = vpop.f32.mrb[14].mxu1  ;;  %v857_v63 = vpop.f32.mrb[15].mxu0 }
 0x112   :  { %v797_v1 = vpack.c.bf16 %v619_v57, %v618_v56  ;;  %v497_v2 = vadd.f32 %v855_v58, %v1204_v0  ;;  %v858_v3 = vadd.f32 %v857_v63, %v856_v60  ;;  %v915_v4 = vpop.f32.mrb[15].mxu1 }
 0x113   :  { %v916_v5 = vadd.f32 %v915_v4, %v914_v62 }
 0x114   :  { %815 = vst [vmem:[%s1243_s3 + $0x10] sm:$0xff] %v797_v1   ;;  %v585_v6 = vadd.f32 %v913_v61, %v497_v2  ;;  %v500_v7 = vadd.f32 %v858_v3, %v1204_v0 }
 0x116   :  { %v588_v8 = vadd.f32 %v916_v5, %v500_v7  ;;  %v859_v9 = vpop.f32.mrb[16].mxu0  ;;  %v620_v12 = vmax.f32 %v585_v6, 0.0 }
 0x117   :  { %v917_v10 = vpop.f32.mrb[16].mxu1  ;;  %v860_v11 = vpop.f32.mrb[17].mxu0 }
 0x118   :  { %v621_v13 = vmax.f32 %v588_v8, 0.0  ;;  %v861_v14 = vadd.f32 %v860_v11, %v859_v9  ;;  %v918_v15 = vpop.f32.mrb[17].mxu1  ;;  %v862_v16 = vpop.f32.mrb[18].mxu0 }
 0x119   :  { %v919_v17 = vadd.f32 %v918_v15, %v917_v10  ;;  %v920_v18 = vpop.f32.mrb[18].mxu1  ;;  %v863_v19 = vpop.f32.mrb[19].mxu0 }
 0x11a   :  { %v802_v20 = vpack.c.bf16 %v621_v13, %v620_v12  ;;  %v505_v21 = vadd.f32 %v861_v14, %v1204_v0  ;;  %v864_v22 = vadd.f32 %v863_v19, %v862_v16  ;;  %v921_v23 = vpop.f32.mrb[19].mxu1 }
 0x11b   :  { %v922_v24 = vadd.f32 %v921_v23, %v920_v18 }
 0x11c   :  { %816 = vst [vmem:[%s1243_s3 + $0x18] sm:$0xff] %v802_v20   ;;  %v593_v25 = vadd.f32 %v919_v17, %v505_v21  ;;  %v508_v26 = vadd.f32 %v864_v22, %v1204_v0 }
 0x11e   :  { %v596_v27 = vadd.f32 %v922_v24, %v508_v26  ;;  %v865_v28 = vpop.f32.mrb[20].mxu0  ;;  %v622_v31 = vmax.f32 %v593_v25, 0.0 }
 0x11f   :  { %v923_v29 = vpop.f32.mrb[20].mxu1  ;;  %v866_v30 = vpop.f32.mrb[21].mxu0 }
 0x120   :  { %v623_v32 = vmax.f32 %v596_v27, 0.0  ;;  %v867_v33 = vadd.f32 %v866_v30, %v865_v28  ;;  %v924_v34 = vpop.f32.mrb[21].mxu1  ;;  %v868_v35 = vpop.f32.mrb[22].mxu0 }
 0x121   :  { %v925_v36 = vadd.f32 %v924_v34, %v923_v29  ;;  %v926_v37 = vpop.f32.mrb[22].mxu1  ;;  %v869_v38 = vpop.f32.mrb[23].mxu0 }
 0x122   :  { %v807_v39 = vpack.c.bf16 %v623_v32, %v622_v31  ;;  %v513_v40 = vadd.f32 %v867_v33, %v1204_v0  ;;  %v870_v41 = vadd.f32 %v869_v38, %v868_v35  ;;  %v927_v42 = vpop.f32.mrb[23].mxu1 }
 0x123   :  { %v928_v43 = vadd.f32 %v927_v42, %v926_v37 }
 0x124   :  { %817 = vst [vmem:[%s1243_s3 + $0x20] sm:$0xff] %v807_v39   ;;  %v601_v44 = vadd.f32 %v925_v36, %v513_v40  ;;  %v516_v45 = vadd.f32 %v870_v41, %v1204_v0 }
 0x126   :  { %v604_v46 = vadd.f32 %v928_v43, %v516_v45  ;;  %v871_v47 = vpop.f32.mrb[24].mxu0  ;;  %v624_v50 = vmax.f32 %v601_v44, 0.0 }
 0x127   :  { %v929_v48 = vpop.f32.mrb[24].mxu1  ;;  %v872_v49 = vpop.f32.mrb[25].mxu0 }
 0x128   :  { %v625_v51 = vmax.f32 %v604_v46, 0.0  ;;  %v873_v52 = vadd.f32 %v872_v49, %v871_v47  ;;  %v930_v53 = vpop.f32.mrb[25].mxu1  ;;  %v874_v54 = vpop.f32.mrb[26].mxu0 }
 0x129   :  { %v931_v55 = vadd.f32 %v930_v53, %v929_v48  ;;  %v932_v56 = vpop.f32.mrb[26].mxu1  ;;  %v875_v57 = vpop.f32.mrb[27].mxu0 }
 0x12a   :  { %v812_v58 = vpack.c.bf16 %v625_v51, %v624_v50  ;;  %v521_v59 = vadd.f32 %v873_v52, %v1204_v0  ;;  %v933_v60 = vpop.f32.mrb[27].mxu1 }
 0x12c   :  { %818 = vst [vmem:[%s1243_s3 + $0x28] sm:$0xff] %v812_v58   ;;  %v609_v61 = vadd.f32 %v931_v55, %v521_v59 }
 0x12e   :  { %v626_v62 = vmax.f32 %v609_v61, 0.0 }
 0x130   :  { %v783_v63 = vpack.c.bf16 %v626_v62, %v626_v62 }
 0x132   :  { %692 = vst [vmem:[%s1243_s3 + $0x30] sm:$0xf] %v783_v63 }

// kernel: alexnetmap_v3_forward.14
= control target key start
LH: loop header
LB: loop body
LE: loop exit
PB: predicated region body
PF: predicated region fallthrough
CT: control target
= control target key end

     0   :  { %s408_s15 = smov 0   ;;  %s434_s0 = inlined_call_operand.vmem [shape: bf16[2,2,2,128], index: 0, kind: input, shape index: {}]   ;;  %s435_s1 = inlined_call_operand.vmem [shape: bf16[2,2,1,128], index: 1, kind: input, shape index: {}]   ;;  %s436_s2 = inlined_call_operand.vmem [shape: bf16[2,1,2,128], index: 2, kind: input, shape index: {}]   ;;  %s437_s3 = inlined_call_operand.vmem [shape: bf16[2,1,1,128], index: 3, kind: input, shape index: {}]   ;;  %s438_s4 = inlined_call_operand.vmem [shape: bf16[2,1,1,128], index: 4, kind: output, shape index: {}]  }
   0x1 LB: > { %s353_s16 = sadd.s32 4294967295, %s381_s15   ;;  %p357_p0 = scmp.ge.s32.totalorder %s381_s15, 1  ;;  %s381_s15 = sphi %s408_s15, %s14_s15  }
   0x2   : > { %p186_p1 = scmp.lt.s32.totalorder %s381_s15, 3 }
   0x4   : > { %p187_p2 = pnand %p357_p0, %p186_p1 }
   0x5   : > { %p219_p3 = scmp.lt.s32.totalorder (!%p187_p2), %s353_s16, 1  ;;  %vm270_vm0 = vcmask (!%p187_p2), 1040384   ;;  %vm271_vm1 = vsmask.f32 (!%p187_p2), 256 }
   0x6   : > { %190 = sbr.rel (%p187_p2) target bundleno = 37 (0x25), region = 36  ;;  %vm272_vm2 = vmand (!%p187_p2), %vm270_vm0, %vm271_vm1 }
   0xd   : > { %s440_s16 = smov (!%p219_p3, %s353_s16), 1 }
   0xe   : > { %s358_s17 = sshll.u32 %s440_s16, 1  ;;  %s229_s26 = scalar_lea.vmem %s436_s2, %s440_s16 }
   0xf   : > { %s222_s20 = scalar_lea.vmem %s434_s0, %s358_s17  ;;  %s226_s23 = scalar_lea.vmem %s435_s1, %s358_s17  ;;  %v259_v9 = vld [vmem:[%s229_s26] sm:$0x1] }
  0x10   : > { %v236_v0 = vld [vmem:[%s222_s20] sm:$0x1]  ;;  %v361_v1 = vld [vmem:[%s222_s20 + $0x1] sm:$0x1]  ;;  %s232_s29 = scalar_lea.vmem %s437_s3, %s440_s16  ;;  %v262_v12 = vshrl.u32 %v259_v9, 16  ;;  %s235_s6 = scalar_lea.vmem %s438_s4, %s440_s16 }
  0x11   : > { %v238_v2 = vshrl.u32 %v236_v0, 16  ;;  %v248_v4 = vshrl.u32 %v361_v1, 16  ;;  %v254_v6 = vld [vmem:[%s226_s23] sm:$0x1]  ;;  %v363_v8 = vld [vmem:[%s226_s23 + $0x1] sm:$0x1] }
  0x12   : > { %v268_v14 = vld [vmem:[%s232_s29] sm:$0x1] }
  0x13   : > { %v243_v3 = vmax.bf16 %v238_v2, %v236_v0  ;;  %v273_v16 = vld [vmem:[%s235_s6] sm:$0x1] }
  0x15   : > { %v246_v5 = vmax.bf16 %v361_v1, %v243_v3 }
  0x17   : > { %v253_v7 = vmax.bf16 %v248_v4, %v246_v5 }
  0x19   : > { %v255_v10 = vmax.bf16 %v254_v6, %v253_v7 }
  0x1b   : > { %v258_v11 = vmax.bf16 %v363_v8, %v255_v10 }
  0x1d   : > { %v260_v13 = vmax.bf16 %v259_v9, %v258_v11 }
  0x1f   : > { %v267_v15 = vmax.bf16 %v262_v12, %v260_v13 }
  0x21   : > { %v269_v17 = vmax.bf16 %v268_v14, %v267_v15 }
  0x23   : > { %v274_v18 = vsel %vm272_vm2, %v269_v17, %v273_v16 }
  0x24   : > { %275 = vst [vmem:[%s235_s6] sm:$0x1] %v274_v18 }
  0x25 PF: > { %s14_s15 = sadd.s32 1, %s381_s15  }
  0x26   : > { %p11_p4 = scmp.ge.s32.totalorder %s14_s15, 4  }
  0x28   :  { %13 = sbr.rel (!%p11_p4) target bundleno = 1 (0x1), region = 77 }

// kernel: alexnetmap_v3_forward.15
= control target key start
LH: loop header
LB: loop body
LE: loop exit
PB: predicated region body
PF: predicated region fallthrough
CT: control target
= control target key end

     0   :  { %s1844_s12 = smov 0   ;;  %s2181_s0 = inlined_call_operand.vmem [shape: bf16[2,11,128], index: 0, kind: input, shape index: {}]   ;;  %s2182_s1 = inlined_call_operand.vmem [shape: bf16[9,128,128], index: 1, kind: input, shape index: {}]   ;;  %s2183_s2 = inlined_call_operand.vmem [shape: f32[1,128], index: 2, kind: input, shape index: {}]   ;;  %s2184_s3 = inlined_call_operand.vmem [shape: bf16[2,3,128], index: 3, kind: output, shape index: {}]  }
   0x1 LB: > { %s1251_s13 = sadd.s32 4294967295, %s1820_s12   ;;  %p1255_p0 = scmp.ge.s32.totalorder %s1820_s12, 1  ;;  %s1820_s12 = sphi %s1844_s12, %s13_s12  }
   0x2   : > { %p137_p1 = scmp.lt.s32.totalorder %s1820_s12, 3 }
   0x4   : > { %p138_p2 = pnand %p1255_p0, %p137_p1 }
   0x5   : > { %v1738_v0 = vld [vmem:[%s2182_s1 + $0x40] sm:$0xff] (!%p138_p2)   ;;  %v1822_v1 = vmov (!%p138_p2), 0.0   ;;  %v1740_v3 = vld [vmem:[%s2182_s1 + $0x48] sm:$0xff] (!%p138_p2)   ;;  %vm1823_vm0 = vmmov (!%p138_p2), 0   ;;  %p160_p3 = scmp.lt.s32.totalorder (!%p138_p2), %s1251_s13, 1  ;;  %v1742_v5 = vld [vmem:[%s2182_s1 + $0x50] sm:$0xff] (!%p138_p2)  }
   0x6   : > { %141 = sbr.rel (%p138_p2) target bundleno = 388 (0x184), region = 32  ;;  %1548 = vmatprep.subr.bf16.mxu0 (!%p138_p2), %v1822_v1  ;;  %1568 = vmatprep.subr.bf16.mxu1 (!%p138_p2), %v1822_v1  ;;  %v1739_v2 = vld [vmem:[%s2182_s1] sm:$0xff] (!%p138_p2)   ;;  %v1741_v4 = vld [vmem:[%s2182_s1 + $0x8] sm:$0xff] (!%p138_p2)   ;;  %v1743_v6 = vld [vmem:[%s2182_s1 + $0x10] sm:$0xff] (!%p138_p2)   ;;  %vm1192_vm1 = vcmask (!%p138_p2), 1041408  }
   0x7   : > { %1549 = vmatpush3.bf16.msra.mxu0 (!%p138_p2), %v1738_v0  ;;  %1564 = vmatprep.mubr.msk.bf16.mxu0 (!%p138_p2), %vm1823_vm0, %v1822_v1  ;;  %v1744_v7 = vld [vmem:[%s2182_s1 + $0x58] sm:$0xff] (!%p138_p2)   ;;  %v1746_v9 = vld [vmem:[%s2182_s1 + $0x60] sm:$0xff] (!%p138_p2)   ;;  %v1748_v13 = vld [vmem:[%s2182_s1 + $0x68] sm:$0xff] (!%p138_p2)   ;;  %vm1193_vm2 = vsmask.f32 (!%p138_p2), 1280 }
   0x8   : > { %1569 = vmatpush3.bf16.msra.mxu1 (!%p138_p2), %v1739_v2  ;;  %1550 = vmatprep.subr.bf16.mxu0 (!%p138_p2), %v1822_v1  ;;  %v1745_v8 = vld [vmem:[%s2182_s1 + $0x18] sm:$0xff] (!%p138_p2)   ;;  %v1747_v10 = vld [vmem:[%s2182_s1 + $0x20] sm:$0xff] (!%p138_p2)   ;;  %v1749_v14 = vld [vmem:[%s2182_s1 + $0x28] sm:$0xff] (!%p138_p2)  }
   0x9   : > { %1570 = vmatprep.subr.bf16.mxu1 (!%p138_p2), %v1822_v1  ;;  %1584 = vmatprep.mubr.msk.bf16.mxu1 (!%p138_p2), %vm1823_vm0, %v1822_v1  ;;  %v1750_v16 = vld [vmem:[%s2182_s1 + $0x70] sm:$0xff] (!%p138_p2)   ;;  %v1752_v20 = vld [vmem:[%s2182_s1 + $0x78] sm:$0xff] (!%p138_p2)   ;;  %v1755_v23 = vld [vmem:[%s2182_s1 + $0x80] sm:$0xff] (!%p138_p2)  }
   0xa   : > { %v1751_v17 = vld [vmem:[%s2182_s1 + $0x30] sm:$0xff] (!%p138_p2)   ;;  %v1753_v21 = vld [vmem:[%s2182_s1 + $0x38] sm:$0xff] (!%p138_p2)   ;;  %v1756_v24 = vld [vmem:[%s2182_s1 + $0xc0] sm:$0xff] (!%p138_p2)  }
   0xb   : > { %1551 = vmatpush3.bf16.msra.mxu0 (!%p138_p2), %v1740_v3  ;;  %v1757_v25 = vld [vmem:[%s2182_s1 + $0x88] sm:$0xff] (!%p138_p2)   ;;  %v1759_v27 = vld [vmem:[%s2182_s1 + $0x90] sm:$0xff] (!%p138_p2)   ;;  %v1761_v29 = vld [vmem:[%s2182_s1 + $0x98] sm:$0xff] (!%p138_p2)  }
   0xc   : > { %1571 = vmatpush3.bf16.msra.mxu1 (!%p138_p2), %v1741_v4  ;;  %1552 = vmatprep.subr.bf16.mxu0 (!%p138_p2), %v1822_v1  ;;  %v1758_v26 = vld [vmem:[%s2182_s1 + $0xc8] sm:$0xff] (!%p138_p2)   ;;  %v1760_v28 = vld [vmem:[%s2182_s1 + $0xd0] sm:$0xff] (!%p138_p2)   ;;  %v1762_v30 = vld [vmem:[%s2182_s1 + $0xd8] sm:$0xff] (!%p138_p2)  }
   0xd   : > { %s2186_s13 = smov (!%p160_p3, %s1251_s13), 1  ;;  %1572 = vmatprep.subr.bf16.mxu1 %v1822_v1  ;;  %v1763_v31 = vld [vmem:[%s2182_s1 + $0xa0] sm:$0xff]   ;;  %v1765_v34 = vld [vmem:[%s2182_s1 + $0xa8] sm:$0xff]   ;;  %v1767_v36 = vld [vmem:[%s2182_s1 + $0xb0] sm:$0xff]  }
   0xe   : > { %s1466_s28 = sshll.u32 %s2186_s13, 3  ;;  %v1764_v32 = vld [vmem:[%s2182_s1 + $0xe0] sm:$0xff]   ;;  %v1766_v35 = vld [vmem:[%s2182_s1 + $0xe8] sm:$0xff]   ;;  %v1768_v39 = vld [vmem:[%s2182_s1 + $0xf0] sm:$0xff]  }
   0xf   : > { %1553 = vmatpush3.bf16.msra.mxu0 %v1742_v5  ;;  %s1894_s6 = scalar_lea.vmem %s2181_s0, %s1466_s28  ;;  %v1769_v40 = vld [vmem:[%s2182_s1 + $0xb8] sm:$0xff]   ;;  %v1772_v45 = vld [vmem:[%s2182_s1 + $0x100] sm:$0xff]   ;;  %v1774_v48 = vld [vmem:[%s2182_s1 + $0x108] sm:$0xff]  }
  0x10   : > { %1573 = vmatpush3.bf16.msra.mxu1 %v1743_v6  ;;  %1554 = vmatprep.subr.bf16.mxu0 %v1822_v1  ;;  %v170_v11 = vld [vmem:[%s1894_s6] sm:$0x3]  ;;  %v1770_v43 = vld [vmem:[%s2182_s1 + $0xf8] sm:$0xff]   ;;  %v1775_v49 = vld [vmem:[%s2182_s1 + $0x148] sm:$0xff]  }
  0x11   : > { %1574 = vmatprep.subr.bf16.mxu1 %v1822_v1  ;;  %v1275_v12 = vcombine.low %v170_v11, %v170_v11  ;;  %v1771_v33 = vld [vmem:[%s1894_s6] ss:$0 sps:$4 sm:$0x66]   ;;  %v1776_v50 = vld [vmem:[%s2182_s1 + $0x110] sm:$0xff]   ;;  %v1778_v52 = vld [vmem:[%s2182_s1 + $0x118] sm:$0xff]  }
  0x12   : > { %v521_v37 = vshrl.u32 %v1771_v33, 16  ;;  %v524_v38 = vshll.u32 %v1771_v33, 16  ;;  %v412_v44 = vrot.slane %v1771_v33, 1  ;;  %v1773_v47 = vld [vmem:[%s2182_s1 + $0x140] sm:$0xff]   ;;  %v1777_v51 = vld [vmem:[%s2182_s1 + $0x150] sm:$0xff]   ;;  %v1779_v53 = vld [vmem:[%s2182_s1 + $0x158] sm:$0xff]  }
  0x13   : > { %1555 = vmatpush3.bf16.msra.mxu0 %v1744_v7  ;;  %v210_v15 = vshll.u32 %v1275_v12, 16  ;;  %v208_v18 = vshrl.u32 %v1275_v12, 16  ;;  %v1780_v54 = vld [vmem:[%s2182_s1 + $0x120] sm:$0xff]   ;;  %v1782_v56 = vld [vmem:[%s2182_s1 + $0x128] sm:$0xff]   ;;  %v1784_v59 = vld [vmem:[%s2182_s1 + $0x130] sm:$0xff]  }
  0x14   : > { %1575 = vmatpush3.bf16.msra.mxu1 %v1745_v8  ;;  %1556 = vmatprep.subr.bf16.mxu0 %v1822_v1  ;;  %v523_v41 = vrot.slane %v521_v37, 1  ;;  %v526_v42 = vrot.slane %v524_v38, 2  ;;  %v1781_v55 = vld [vmem:[%s2182_s1 + $0x160] sm:$0xff]   ;;  %v1783_v58 = vld [vmem:[%s2182_s1 + $0x168] sm:$0xff]   ;;  %v1785_v62 = vld [vmem:[%s2182_s1 + $0x170] sm:$0xff]  }
  0x15   : > { %1576 = vmatprep.subr.bf16.mxu1 %v1822_v1  ;;  %v212_v19 = vrot.slane %v210_v15, 1  ;;  %v1788_v57 = vld [vmem:[%s1894_s6] ss:$0 sps:$4 sm:$0xcc]   ;;  %v1786_v63 = vld [vmem:[%s2182_s1 + $0x138] sm:$0xff]   ;;  %v1791_v8 = vld [vmem:[%s2182_s1 + $0x188] sm:$0xff]  }
  0x16   : > { %v527_v46 = vor.u32 %v526_v42, %v523_v41  ;;  %v748_v60 = vshrl.u32 %v1788_v57, 16  ;;  %v751_v61 = vshll.u32 %v1788_v57, 16  ;;  %v1787_v3 = vld [vmem:[%s2182_s1 + $0x178] sm:$0xff]   ;;  %v639_v4 = vrot.slane %v1788_v57, 2  ;;  %v1789_v5 = vld [vmem:[%s2182_s1 + $0x180] sm:$0xff]   ;;  %vm1194_vm3 = vmand %vm1192_vm1, %vm1193_vm2 }
  0x17   : > { %1557 = vmatpush3.bf16.msra.mxu0 %v1746_v9  ;;  %v213_v22 = vor.u32 %v212_v19, %v208_v18  ;;  %v1790_v7 = vld [vmem:[%s2182_s1 + $0x1c0] sm:$0xff]   ;;  %v1792_v9 = vld [vmem:[%s2182_s1 + $0x1c8] sm:$0xff]   ;;  %v1795_v12 = vld [vmem:[%s2182_s1 + $0x198] sm:$0xff]  }
  0x18   : > { %1577 = vmatpush3.bf16.msra.mxu1 %v1747_v10  ;;  %1558 = vmatprep.subr.bf16.mxu0 %v1822_v1  ;;  %v750_v0 = vrot.slane %v748_v60, 2  ;;  %v753_v2 = vrot.slane %v751_v61, 3  ;;  %v1793_v10 = vld [vmem:[%s2182_s1 + $0x190] sm:$0xff]   ;;  %v1798_v15 = vld [vmem:[%s2182_s1 + $0x1e0] sm:$0xff]   ;;  %v1800_v18 = vld [vmem:[%s2182_s1 + $0x1e8] sm:$0xff]  }
  0x19   : > { %1578 = vmatprep.subr.bf16.mxu1 %v1822_v1  ;;  %v1801_v19 = vld [vmem:[%s2182_s1 + $0x1b0] sm:$0xff]   ;;  %v1810_v33 = vld [vmem:[%s2182_s1 + $0x220] sm:$0xff]  }
  0x1a   : > { %v754_v6 = vor.u32 %v753_v2, %v750_v0  ;;  %v1075_v37 = vld [vmem:[%s1894_s6 + $0x4] sm:$0x3] }
  0x1b   : > { %1559 = vmatpush3.bf16.msra.mxu0 %v1748_v13  ;;  %v1796_v13 = vld [vmem:[%s2182_s1 + $0x1d8] sm:$0xff]  }
  0x1c   : > { %1579 = vmatpush3.bf16.msra.mxu1 %v1749_v14  ;;  %1560 = vmatprep.subr.bf16.mxu0 %v1822_v1  ;;  %v1797_v14 = vld [vmem:[%s2182_s1 + $0x1a0] sm:$0xff]  }
  0x1d   : > { %1580 = vmatprep.subr.bf16.mxu1 %v1822_v1 }
  0x1f   : > { %1561 = vmatpush3.bf16.msra.mxu0 %v1750_v16  ;;  %v1799_v16 = vld [vmem:[%s2182_s1 + $0x1a8] sm:$0xff]  }
  0x20   : > { %1581 = vmatpush3.bf16.msra.mxu1 %v1751_v17  ;;  %1562 = vmatprep.subr.bf16.mxu0 %v1822_v1  ;;  %v1805_v17 = vld [vmem:[%s1894_s6] sm:$0x18]   ;;  %s1258_s6 = sshll.u32 %s2186_s13, 1 }
  0x21   : > { %1582 = vmatprep.subr.bf16.mxu1 %v1822_v1  ;;  %s168_s21 = scalar_lea.vmem %s2184_s3, %s1258_s6 }
  0x23   : > { %1563 = vmatpush3.bf16.msra.mxu0 %v1752_v20  ;;  %v978_v20 = vshrl.u32 %v1805_v17, 16 }
  0x24   : > { %1583 = vmatpush3.bf16.msra.mxu1 %v1753_v21  ;;  %1588 = vmatprep.subr.bf16.mxu0 %v1822_v1  ;;  %v981_v21 = vshll.u32 %v1805_v17, 16 }
  0x25   : > { %1608 = vmatprep.subr.bf16.mxu1 %v1822_v1 }
  0x26   : > { %1565 = vmatmul.mubr.bf16.vlgmr.msra.gmra.mrb[0].mxu0 %v213_v22  ;;  %v1802_v22 = vld [vmem:[%s2182_s1 + $0x1f0] sm:$0xff]  }
  0x27   : > { %1585 = vmatmul.mubr.bf16.vlgmr.msra.gmra.mrb[0].mxu1 %v170_v11  ;;  %1589 = vmatpush3.bf16.msra.mxu0 %v1755_v23  ;;  %v1794_v11 = vld [vmem:[%s2182_s1 + $0x1d0] sm:$0xff]   ;;  %v1803_v23 = vld [vmem:[%s2182_s1 + $0x1b8] sm:$0xff]  }
  0x28   : > { %1609 = vmatpush3.bf16.msra.mxu1 %v1756_v24  ;;  %1590 = vmatprep.subr.bf16.mxu0 %v1822_v1  ;;  %v980_v24 = vrot.slane %v978_v20, 3 }
  0x29   : > { %1610 = vmatprep.subr.bf16.mxu1 %v1822_v1  ;;  %1604 = vmatprep.mubr.msk.bf16.mxu0 %vm1823_vm0, %v1822_v1 }
  0x2a   : > { %1624 = vmatprep.mubr.msk.bf16.mxu1 %vm1823_vm0, %v1822_v1 }
  0x2b   : > { %1591 = vmatpush3.bf16.msra.mxu0 %v1757_v25  ;;  %v983_v25 = vrot.slane %v981_v21, 4  ;;  %v1195_v21 = vld [vmem:[%s168_s21] sm:$0x3] }
  0x2c   : > { %1611 = vmatpush3.bf16.msra.mxu1 %v1758_v26  ;;  %1592 = vmatprep.subr.bf16.mxu0 %v1822_v1  ;;  %v1804_v26 = vld [vmem:[%s2182_s1 + $0x1f8] sm:$0xff]  }
  0x2d   : > { %1612 = vmatprep.subr.bf16.mxu1 %v1822_v1 }
  0x2f   : > { %1593 = vmatpush3.bf16.msra.mxu0 %v1759_v27  ;;  %v869_v27 = vrot.slane %v1805_v17, 3 }
  0x30   : > { %1613 = vmatpush3.bf16.msra.mxu1 %v1760_v28  ;;  %1594 = vmatprep.subr.bf16.mxu0 %v1822_v1  ;;  %v1806_v28 = vld [vmem:[%s2182_s1 + $0x200] sm:$0xff]  }
  0x31   : > { %1614 = vmatprep.subr.bf16.mxu1 %v1822_v1 }
  0x33   : > { %1595 = vmatpush3.bf16.msra.mxu0 %v1761_v29  ;;  %v984_v29 = vor.u32 %v983_v25, %v980_v24 }
  0x34   : > { %1615 = vmatpush3.bf16.msra.mxu1 %v1762_v30  ;;  %1596 = vmatprep.subr.bf16.mxu0 %v1822_v1  ;;  %v1807_v30 = vld [vmem:[%s2182_s1 + $0x208] sm:$0xff]  }
  0x35   : > { %1616 = vmatprep.subr.bf16.mxu1 %v1822_v1 }
  0x37   : > { %1597 = vmatpush3.bf16.msra.mxu0 %v1763_v31  ;;  %v1808_v31 = vld [vmem:[%s2182_s1 + $0x210] sm:$0xff]  }
  0x38   : > { %1617 = vmatpush3.bf16.msra.mxu1 %v1764_v32  ;;  %1598 = vmatprep.subr.bf16.mxu0 %v1822_v1  ;;  %v1809_v32 = vld [vmem:[%s2182_s1 + $0x218] sm:$0xff]  }
  0x39   : > { %1618 = vmatprep.subr.bf16.mxu1 %v1822_v1 }
  0x3b   : > { %1599 = vmatpush3.bf16.msra.mxu0 %v1765_v34  ;;  %v1811_v34 = vld [vmem:[%s2182_s1 + $0x228] sm:$0xff]  }
  0x3c   : > { %1619 = vmatpush3.bf16.msra.mxu1 %v1766_v35  ;;  %1600 = vmatprep.subr.bf16.mxu0 %v1822_v1  ;;  %v1812_v35 = vld [vmem:[%s2182_s1 + $0x230] sm:$0xff]  }
  0x3d   : > { %1620 = vmatprep.subr.bf16.mxu1 %v1822_v1 }
  0x3f   : > { %1601 = vmatpush3.bf16.msra.mxu0 %v1767_v36  ;;  %v1813_v36 = vld [vmem:[%s2182_s1 + $0x238] sm:$0xff]  }
  0x40   : > { %1621 = vmatpush3.bf16.msra.mxu1 %v1768_v39  ;;  %1602 = vmatprep.subr.bf16.mxu0 %v1822_v1 }
  0x41   : > { %1622 = vmatprep.subr.bf16.mxu1 %v1822_v1 }
  0x43   : > { %1603 = vmatpush3.bf16.msra.mxu0 %v1769_v40 }
  0x44   : > { %1623 = vmatpush3.bf16.msra.mxu1 %v1770_v43  ;;  %1628 = vmatprep.subr.bf16.mxu0 %v1822_v1 }
  0x45   : > { %1648 = vmatprep.subr.bf16.mxu1 %v1822_v1 }
  0x46   : > { %1605 = vmatmul.mubr.bf16.vlgmr.msra.gmra.mrb[4].mxu0 %v412_v44 }
  0x47   : > { %1629 = vmatpush3.bf16.msra.mxu0 %v1772_v45  ;;  %1625 = vmatmul.mubr.bf16.vlgmr.msra.gmra.mrb[4].mxu1 %v527_v46 }
  0x48   : > { %1649 = vmatpush3.bf16.msra.mxu1 %v1773_v47  ;;  %1630 = vmatprep.subr.bf16.mxu0 %v1822_v1 }
  0x49   : > { %1650 = vmatprep.subr.bf16.mxu1 %v1822_v1  ;;  %1644 = vmatprep.mubr.msk.bf16.mxu0 %vm1823_vm0, %v1822_v1 }
  0x4a   : > { %1664 = vmatprep.mubr.msk.bf16.mxu1 %vm1823_vm0, %v1822_v1 }
  0x4b   : > { %1631 = vmatpush3.bf16.msra.mxu0 %v1774_v48 }
  0x4c   : > { %1651 = vmatpush3.bf16.msra.mxu1 %v1775_v49  ;;  %1632 = vmatprep.subr.bf16.mxu0 %v1822_v1 }
  0x4d   : > { %1652 = vmatprep.subr.bf16.mxu1 %v1822_v1 }
  0x4f   : > { %1633 = vmatpush3.bf16.msra.mxu0 %v1776_v50 }
  0x50   : > { %1653 = vmatpush3.bf16.msra.mxu1 %v1777_v51  ;;  %1634 = vmatprep.subr.bf16.mxu0 %v1822_v1 }
  0x51   : > { %1654 = vmatprep.subr.bf16.mxu1 %v1822_v1 }
  0x53   : > { %1635 = vmatpush3.bf16.msra.mxu0 %v1778_v52 }
  0x54   : > { %1655 = vmatpush3.bf16.msra.mxu1 %v1779_v53  ;;  %1636 = vmatprep.subr.bf16.mxu0 %v1822_v1 }
  0x55   : > { %1656 = vmatprep.subr.bf16.mxu1 %v1822_v1 }
  0x57   : > { %1637 = vmatpush3.bf16.msra.mxu0 %v1780_v54 }
  0x58   : > { %1657 = vmatpush3.bf16.msra.mxu1 %v1781_v55  ;;  %1638 = vmatprep.subr.bf16.mxu0 %v1822_v1 }
  0x59   : > { %1658 = vmatprep.subr.bf16.mxu1 %v1822_v1 }
  0x5b   : > { %1639 = vmatpush3.bf16.msra.mxu0 %v1782_v56 }
  0x5c   : > { %1659 = vmatpush3.bf16.msra.mxu1 %v1783_v58  ;;  %1640 = vmatprep.subr.bf16.mxu0 %v1822_v1 }
  0x5d   : > { %1660 = vmatprep.subr.bf16.mxu1 %v1822_v1 }
  0x5f   : > { %1641 = vmatpush3.bf16.msra.mxu0 %v1784_v59 }
  0x60   : > { %1661 = vmatpush3.bf16.msra.mxu1 %v1785_v62  ;;  %1642 = vmatprep.subr.bf16.mxu0 %v1822_v1 }
  0x61   : > { %1662 = vmatprep.subr.bf16.mxu1 %v1822_v1 }
  0x63   : > { %1643 = vmatpush3.bf16.msra.mxu0 %v1786_v63 }
  0x64   : > { %1663 = vmatpush3.bf16.msra.mxu1 %v1787_v3  ;;  %1668 = vmatprep.subr.bf16.mxu0 %v1822_v1 }
  0x65   : > { %1688 = vmatprep.subr.bf16.mxu1 %v1822_v1 }
  0x66   : > { %1645 = vmatmul.mubr.bf16.vlgmr.msra.gmra.mrb[8].mxu0 %v639_v4 }
  0x67   : > { %1669 = vmatpush3.bf16.msra.mxu0 %v1789_v5  ;;  %1665 = vmatmul.mubr.bf16.vlgmr.msra.gmra.mrb[8].mxu1 %v754_v6 }
  0x68   : > { %1689 = vmatpush3.bf16.msra.mxu1 %v1790_v7  ;;  %1670 = vmatprep.subr.bf16.mxu0 %v1822_v1 }
  0x69   : > { %1690 = vmatprep.subr.bf16.mxu1 %v1822_v1  ;;  %1684 = vmatprep.mubr.msk.bf16.mxu0 %vm1823_vm0, %v1822_v1 }
  0x6a   : > { %1704 = vmatprep.mubr.msk.bf16.mxu1 %vm1823_vm0, %v1822_v1 }
  0x6b   : > { %1671 = vmatpush3.bf16.msra.mxu0 %v1791_v8 }
  0x6c   : > { %1691 = vmatpush3.bf16.msra.mxu1 %v1792_v9  ;;  %1672 = vmatprep.subr.bf16.mxu0 %v1822_v1 }
  0x6d   : > { %1692 = vmatprep.subr.bf16.mxu1 %v1822_v1 }
  0x6f   : > { %1673 = vmatpush3.bf16.msra.mxu0 %v1793_v10 }
  0x70   : > { %1693 = vmatpush3.bf16.msra.mxu1 %v1794_v11  ;;  %1674 = vmatprep.subr.bf16.mxu0 %v1822_v1 }
  0x71   : > { %1694 = vmatprep.subr.bf16.mxu1 %v1822_v1 }
  0x73   : > { %1675 = vmatpush3.bf16.msra.mxu0 %v1795_v12 }
  0x74   : > { %1695 = vmatpush3.bf16.msra.mxu1 %v1796_v13  ;;  %1676 = vmatprep.subr.bf16.mxu0 %v1822_v1 }
  0x75   : > { %1696 = vmatprep.subr.bf16.mxu1 %v1822_v1 }
  0x77   : > { %1677 = vmatpush3.bf16.msra.mxu0 %v1797_v14  ;;  %v1463_v14 = vld [vmem:[%s2183_s2] ss:$0 sm:$0xff] }
  0x78   : > { %1697 = vmatpush3.bf16.msra.mxu1 %v1798_v15  ;;  %1678 = vmatprep.subr.bf16.mxu0 %v1822_v1 }
  0x79   : > { %1698 = vmatprep.subr.bf16.mxu1 %v1822_v1 }
  0x7b   : > { %1679 = vmatpush3.bf16.msra.mxu0 %v1799_v16 }
  0x7c   : > { %1699 = vmatpush3.bf16.msra.mxu1 %v1800_v18  ;;  %1680 = vmatprep.subr.bf16.mxu0 %v1822_v1 }
  0x7d   : > { %1700 = vmatprep.subr.bf16.mxu1 %v1822_v1 }
  0x7f   : > { %1681 = vmatpush3.bf16.msra.mxu0 %v1801_v19 }
  0x80   : > { %1701 = vmatpush3.bf16.msra.mxu1 %v1802_v22  ;;  %1682 = vmatprep.subr.bf16.mxu0 %v1822_v1 }
  0x81   : > { %1702 = vmatprep.subr.bf16.mxu1 %v1822_v1 }
  0x83   : > { %1683 = vmatpush3.bf16.msra.mxu0 %v1803_v23 }
  0x84   : > { %1703 = vmatpush3.bf16.msra.mxu1 %v1804_v26  ;;  %1708 = vmatprep.subr.bf16.mxu0 %v1822_v1 }
  0x86   : > { %1685 = vmatmul.mubr.bf16.vlgmr.msra.gmra.mrb[12].mxu0 %v869_v27 }
  0x87   : > { %1709 = vmatpush3.bf16.msra.mxu0 %v1806_v28  ;;  %1705 = vmatmul.mubr.bf16.vlgmr.msra.gmra.mrb[12].mxu1 %v984_v29 }
  0x88   : > { %1710 = vmatprep.subr.bf16.mxu0 %v1822_v1  ;;  %1724 = vmatprep.mubr.msk.bf16.mxu0 %vm1823_vm0, %v1822_v1 }
  0x8b   : > { %1711 = vmatpush3.bf16.msra.mxu0 %v1807_v30 }
  0x8c   : > { %1712 = vmatprep.subr.bf16.mxu0 %v1822_v1 }
  0x8f   : > { %1713 = vmatpush3.bf16.msra.mxu0 %v1808_v31 }
  0x90   : > { %1714 = vmatprep.subr.bf16.mxu0 %v1822_v1 }
  0x93   : > { %1715 = vmatpush3.bf16.msra.mxu0 %v1809_v32 }
  0x94   : > { %1716 = vmatprep.subr.bf16.mxu0 %v1822_v1 }
  0x97   : > { %1717 = vmatpush3.bf16.msra.mxu0 %v1810_v33 }
  0x98   : > { %1718 = vmatprep.subr.bf16.mxu0 %v1822_v1 }
  0x9b   : > { %1719 = vmatpush3.bf16.msra.mxu0 %v1811_v34 }
  0x9c   : > { %1720 = vmatprep.subr.bf16.mxu0 %v1822_v1 }
  0x9f   : > { %1721 = vmatpush3.bf16.msra.mxu0 %v1812_v35 }
  0xa0   : > { %1722 = vmatprep.subr.bf16.mxu0 %v1822_v1 }
  0xa3   : > { %1723 = vmatpush3.bf16.msra.mxu0 %v1813_v36 }
  0xa6   : > { %1725 = vmatmul.mubr.bf16.vlgmr.msra.gmra.mrb[16].mxu0 %v1075_v37 }
  0xf9   : > { %v297_v38 = vpop.f32.mrb[0].mxu0 }
  0xfa   : > { %v1566_v39 = vpop.f32.mrb[1].mxu0  ;;  %v385_v40 = vpop.f32.mrb[0].mxu1 }
  0xfb   : > { %v386_v41 = vadd.f32 %v385_v40, %v297_v38  ;;  %v300_v42 = vpop.f32.mrb[2].mxu0  ;;  %v1586_v43 = vpop.f32.mrb[1].mxu1 }
  0xfc   : > { %v1567_v44 = vpop.f32.mrb[3].mxu0  ;;  %v388_v45 = vpop.f32.mrb[2].mxu1 }
  0xfd   : > { %v1587_v46 = vpop.f32.mrb[3].mxu1 }
 0x119   : > { %v496_v47 = vpop.f32.mrb[4].mxu0 }
 0x11a   : > { %v502_v48 = vadd.f32 %v496_v47, %v386_v41  ;;  %v1606_v49 = vpop.f32.mrb[5].mxu0  ;;  %v611_v50 = vpop.f32.mrb[4].mxu1 }
 0x11b   : > { %v499_v51 = vpop.f32.mrb[6].mxu0  ;;  %v1626_v52 = vpop.f32.mrb[5].mxu1 }
 0x11c   : > { %v617_v53 = vadd.f32 %v611_v50, %v502_v48  ;;  %v1607_v1 = vpop.f32.mrb[7].mxu0  ;;  %v614_v54 = vpop.f32.mrb[6].mxu1 }
 0x11d   : > { %v1627_v55 = vpop.f32.mrb[7].mxu1 }
 0x139   : > { %v723_v56 = vpop.f32.mrb[8].mxu0 }
 0x13a   : > { %v729_v57 = vadd.f32 %v723_v56, %v617_v53  ;;  %v1646_v58 = vpop.f32.mrb[9].mxu0  ;;  %v838_v59 = vpop.f32.mrb[8].mxu1 }
 0x13b   : > { %v726_v60 = vpop.f32.mrb[10].mxu0  ;;  %v1666_v61 = vpop.f32.mrb[9].mxu1 }
 0x13c   : > { %v844_v62 = vadd.f32 %v838_v59, %v729_v57  ;;  %v1647_v63 = vpop.f32.mrb[11].mxu0  ;;  %v841_v0 = vpop.f32.mrb[10].mxu1 }
 0x13d   : > { %v1667_v2 = vpop.f32.mrb[11].mxu1 }
 0x159   : > { %v953_v3 = vpop.f32.mrb[12].mxu0 }
 0x15a   : > { %v959_v4 = vadd.f32 %v953_v3, %v844_v62  ;;  %v1686_v5 = vpop.f32.mrb[13].mxu0  ;;  %v1068_v6 = vpop.f32.mrb[12].mxu1 }
 0x15b   : > { %v956_v7 = vpop.f32.mrb[14].mxu0  ;;  %v1706_v8 = vpop.f32.mrb[13].mxu1 }
 0x15c   : > { %v1074_v9 = vadd.f32 %v1068_v6, %v959_v4  ;;  %v1687_v10 = vpop.f32.mrb[15].mxu0  ;;  %v1071_v11 = vpop.f32.mrb[14].mxu1 }
 0x15d   : > { %v1707_v12 = vpop.f32.mrb[15].mxu1 }
 0x179   : > { %v1175_v13 = vpop.f32.mrb[16].mxu0 }
 0x17a   : > { %v1181_v15 = vadd.f32 %v1175_v13, %v1074_v9  ;;  %v1726_v16 = vpop.f32.mrb[17].mxu0 }
 0x17b   : > { %v1178_v17 = vpop.f32.mrb[18].mxu0 }
 0x17c   : > { %v1189_v18 = vadd.f32 %v1463_v14, %v1181_v15  ;;  %v1727_v19 = vpop.f32.mrb[19].mxu0 }
 0x17e   : > { %v1190_v20 = vmax.f32 %v1189_v18, 0.0 }
 0x180   : > { %v1191_v22 = vpack.c.bf16 %v1190_v20, %v1190_v20 }
 0x182   : > { %v1196_v23 = vsel %vm1194_vm3, %v1191_v22, %v1195_v21 }
 0x183   : > { %1197 = vst [vmem:[%s168_s21] sm:$0x3] %v1196_v23 }
 0x184 PF: > { %s13_s12 = sadd.s32 1, %s1820_s12  }
 0x185   : > { %p10_p4 = scmp.ge.s32.totalorder %s13_s12, 4  }
 0x187   :  { %12 = sbr.rel (!%p10_p4) target bundleno = 1 (0x1), region = 70 }

// kernel: alexnetmap_v3_forward.18
= control target key start
LH: loop header
LB: loop body
LE: loop exit
PB: predicated region body
PF: predicated region fallthrough
CT: control target
= control target key end

     0   :  { %s976_s12 = smov 0   ;;  %s1143_s0 = inlined_call_operand.vmem [shape: bf16[2,10,128], index: 0, kind: input, shape index: {}]   ;;  %s1144_s1 = inlined_call_operand.vmem [shape: bf16[4,128,128], index: 1, kind: input, shape index: {}]   ;;  %s1145_s2 = inlined_call_operand.vmem [shape: f32[1,128], index: 2, kind: input, shape index: {}]   ;;  %s1146_s3 = inlined_call_operand.vmem [shape: bf16[2,6,128], index: 3, kind: output, shape index: {}]  }
   0x1 LB: > { %s690_s13 = sadd.s32 4294967295, %s952_s12   ;;  %p694_p0 = scmp.ge.s32.totalorder %s952_s12, 1  ;;  %s952_s12 = sphi %s976_s12, %s13_s12  }
   0x2   : > { %p137_p1 = scmp.lt.s32.totalorder %s952_s12, 3 }
   0x4   : > { %p138_p2 = pnand %p694_p0, %p137_p1 }
   0x5   : > { %v911_v0 = vld [vmem:[%s1144_s1 + $0x40] sm:$0xff] (!%p138_p2)   ;;  %v954_v1 = vmov (!%p138_p2), 0.0   ;;  %v913_v3 = vld [vmem:[%s1144_s1 + $0x48] sm:$0xff] (!%p138_p2)   ;;  %vm955_vm0 = vmmov (!%p138_p2), 0   ;;  %p160_p3 = scmp.lt.s32.totalorder (!%p138_p2), %s690_s13, 1  ;;  %v915_v5 = vld [vmem:[%s1144_s1 + $0x50] sm:$0xff] (!%p138_p2)  }
   0x6   : > { %141 = sbr.rel (%p138_p2) target bundleno = 293 (0x125), region = 32  ;;  %821 = vmatprep.subr.bf16.mxu0 (!%p138_p2), %v954_v1  ;;  %841 = vmatprep.subr.bf16.mxu1 (!%p138_p2), %v954_v1  ;;  %v912_v2 = vld [vmem:[%s1144_s1] sm:$0xff] (!%p138_p2)   ;;  %v914_v4 = vld [vmem:[%s1144_s1 + $0x8] sm:$0xff] (!%p138_p2)   ;;  %v916_v6 = vld [vmem:[%s1144_s1 + $0x10] sm:$0xff] (!%p138_p2)  }
   0x7   : > { %822 = vmatpush3.bf16.msra.mxu0 (!%p138_p2), %v911_v0  ;;  %837 = vmatprep.mubr.msk.bf16.mxu0 (!%p138_p2), %vm955_vm0, %v954_v1  ;;  %v917_v7 = vld [vmem:[%s1144_s1 + $0x58] sm:$0xff] (!%p138_p2)   ;;  %v919_v9 = vld [vmem:[%s1144_s1 + $0x60] sm:$0xff] (!%p138_p2)   ;;  %v921_v12 = vld [vmem:[%s1144_s1 + $0x68] sm:$0xff] (!%p138_p2)  }
   0x8   : > { %842 = vmatpush3.bf16.msra.mxu1 (!%p138_p2), %v912_v2  ;;  %823 = vmatprep.subr.bf16.mxu0 (!%p138_p2), %v954_v1  ;;  %v918_v8 = vld [vmem:[%s1144_s1 + $0x18] sm:$0xff] (!%p138_p2)   ;;  %v920_v10 = vld [vmem:[%s1144_s1 + $0x20] sm:$0xff] (!%p138_p2)   ;;  %v922_v13 = vld [vmem:[%s1144_s1 + $0x28] sm:$0xff] (!%p138_p2)  }
   0x9   : > { %843 = vmatprep.subr.bf16.mxu1 (!%p138_p2), %v954_v1  ;;  %857 = vmatprep.mubr.msk.bf16.mxu1 (!%p138_p2), %vm955_vm0, %v954_v1  ;;  %v923_v15 = vld [vmem:[%s1144_s1 + $0x70] sm:$0xff] (!%p138_p2)   ;;  %v925_v19 = vld [vmem:[%s1144_s1 + $0x78] sm:$0xff] (!%p138_p2)   ;;  %v928_v23 = vld [vmem:[%s1144_s1 + $0x80] sm:$0xff] (!%p138_p2)  }
   0xa   : > { %v924_v16 = vld [vmem:[%s1144_s1 + $0x30] sm:$0xff] (!%p138_p2)   ;;  %v926_v20 = vld [vmem:[%s1144_s1 + $0x38] sm:$0xff] (!%p138_p2)   ;;  %v929_v24 = vld [vmem:[%s1144_s1 + $0xc0] sm:$0xff] (!%p138_p2)  }
   0xb   : > { %824 = vmatpush3.bf16.msra.mxu0 (!%p138_p2), %v913_v3  ;;  %v930_v25 = vld [vmem:[%s1144_s1 + $0x88] sm:$0xff] (!%p138_p2)   ;;  %v932_v27 = vld [vmem:[%s1144_s1 + $0x90] sm:$0xff] (!%p138_p2)   ;;  %v934_v29 = vld [vmem:[%s1144_s1 + $0x98] sm:$0xff] (!%p138_p2)  }
   0xc   : > { %844 = vmatpush3.bf16.msra.mxu1 (!%p138_p2), %v914_v4  ;;  %825 = vmatprep.subr.bf16.mxu0 (!%p138_p2), %v954_v1  ;;  %v931_v26 = vld [vmem:[%s1144_s1 + $0xc8] sm:$0xff] (!%p138_p2)   ;;  %v933_v28 = vld [vmem:[%s1144_s1 + $0xd0] sm:$0xff] (!%p138_p2)   ;;  %v935_v30 = vld [vmem:[%s1144_s1 + $0xd8] sm:$0xff] (!%p138_p2)  }
   0xd   : > { %s1148_s13 = smov (!%p160_p3, %s690_s13), 1  ;;  %845 = vmatprep.subr.bf16.mxu1 %v954_v1  ;;  %v936_v31 = vld [vmem:[%s1144_s1 + $0xa0] sm:$0xff]   ;;  %v938_v36 = vld [vmem:[%s1144_s1 + $0xa8] sm:$0xff]   ;;  %v940_v40 = vld [vmem:[%s1144_s1 + $0xb0] sm:$0xff]  }
   0xe   : > { %s784_s30 = sshll.u32 %s1148_s13, 3  ;;  %v937_v34 = vld [vmem:[%s1144_s1 + $0xe0] sm:$0xff]   ;;  %v939_v37 = vld [vmem:[%s1144_s1 + $0xe8] sm:$0xff]   ;;  %v941_v41 = vld [vmem:[%s1144_s1 + $0xf0] sm:$0xff]   ;;  %s697_s7 = sshll.u32 %s1148_s13, 2 }
   0xf   : > { %826 = vmatpush3.bf16.msra.mxu0 %v915_v5  ;;  %s1029_s8 = scalar_lea.vmem %s1143_s0, %s784_s30  ;;  %v942_v45 = vld [vmem:[%s1144_s1 + $0xb8] sm:$0xff]   ;;  %v781_v63 = vld [vmem:[%s1145_s2] ss:$0 sm:$0xff]  ;;  %s168_s11 = scalar_lea.vmem %s1146_s3, %s697_s7 }
  0x10   : > { %846 = vmatpush3.bf16.msra.mxu1 %v916_v6  ;;  %827 = vmatprep.subr.bf16.mxu0 %v954_v1  ;;  %v927_v11 = vld [vmem:[%s1029_s8] ss:$0 sps:$4 sm:$0xff]   ;;  %v392_v32 = vld [vmem:[%s1029_s8] sm:$0xe]  ;;  %v393_v33 = vld [vmem:[%s1029_s8 + $0x4] sm:$0x1] }
  0x11   : > { %847 = vmatprep.subr.bf16.mxu1 %v954_v1  ;;  %v211_v14 = vshll.u32 %v927_v11, 16  ;;  %v209_v17 = vshrl.u32 %v927_v11, 16  ;;  %v170_v22 = vld [vmem:[%s1029_s8] sm:$0x7]  ;;  %v747_v35 = vcombine.low %v392_v32, %v393_v33  ;;  %v943_v47 = vld [vmem:[%s1144_s1 + $0xf8] sm:$0xff]  }
  0x12   : > { %v514_v42 = vld [vmem:[%s1029_s8] sm:$0xc] }
  0x13   : > { %828 = vmatpush3.bf16.msra.mxu0 %v917_v7  ;;  %v213_v18 = vrot.slane %v211_v14, 1  ;;  %v417_v38 = vshrl.u32 %v747_v35, 16  ;;  %v420_v39 = vshll.u32 %v747_v35, 16  ;;  %v772_v46 = vcombine.low %v514_v42, %v393_v33 }
  0x14   : > { %848 = vmatpush3.bf16.msra.mxu1 %v918_v8  ;;  %829 = vmatprep.subr.bf16.mxu0 %v954_v1 }
  0x15   : > { %849 = vmatprep.subr.bf16.mxu1 %v954_v1  ;;  %v214_v21 = vor.u32 %v213_v18, %v209_v17  ;;  %v419_v43 = vrot.slane %v417_v38, 1  ;;  %v422_v44 = vrot.slane %v420_v39, 2  ;;  %v535_v49 = vrot.slane %v772_v46, 2 }
  0x17   : > { %830 = vmatpush3.bf16.msra.mxu0 %v919_v9  ;;  %v423_v48 = vor.u32 %v422_v44, %v419_v43 }
  0x18   : > { %850 = vmatpush3.bf16.msra.mxu1 %v920_v10  ;;  %831 = vmatprep.subr.bf16.mxu0 %v954_v1 }
  0x19   : > { %851 = vmatprep.subr.bf16.mxu1 %v954_v1 }
  0x1b   : > { %832 = vmatpush3.bf16.msra.mxu0 %v921_v12 }
  0x1c   : > { %852 = vmatpush3.bf16.msra.mxu1 %v922_v13  ;;  %833 = vmatprep.subr.bf16.mxu0 %v954_v1 }
  0x1d   : > { %853 = vmatprep.subr.bf16.mxu1 %v954_v1 }
  0x1f   : > { %834 = vmatpush3.bf16.msra.mxu0 %v923_v15 }
  0x20   : > { %854 = vmatpush3.bf16.msra.mxu1 %v924_v16  ;;  %835 = vmatprep.subr.bf16.mxu0 %v954_v1 }
  0x21   : > { %855 = vmatprep.subr.bf16.mxu1 %v954_v1 }
  0x23   : > { %836 = vmatpush3.bf16.msra.mxu0 %v925_v19 }
  0x24   : > { %856 = vmatpush3.bf16.msra.mxu1 %v926_v20  ;;  %861 = vmatprep.subr.bf16.mxu0 %v954_v1 }
  0x25   : > { %881 = vmatprep.subr.bf16.mxu1 %v954_v1 }
  0x26   : > { %838 = vmatmul.mubr.bf16.vlgmr.msra.gmra.mrb[0].mxu0 %v214_v21 }
  0x27   : > { %858 = vmatmul.mubr.bf16.vlgmr.msra.gmra.mrb[0].mxu1 %v170_v22  ;;  %862 = vmatpush3.bf16.msra.mxu0 %v928_v23 }
  0x28   : > { %882 = vmatpush3.bf16.msra.mxu1 %v929_v24  ;;  %863 = vmatprep.subr.bf16.mxu0 %v954_v1 }
  0x29   : > { %883 = vmatprep.subr.bf16.mxu1 %v954_v1  ;;  %877 = vmatprep.mubr.msk.bf16.mxu0 %vm955_vm0, %v954_v1 }
  0x2a   : > { %897 = vmatprep.mubr.msk.bf16.mxu1 %vm955_vm0, %v954_v1 }
  0x2b   : > { %864 = vmatpush3.bf16.msra.mxu0 %v930_v25 }
  0x2c   : > { %884 = vmatpush3.bf16.msra.mxu1 %v931_v26  ;;  %865 = vmatprep.subr.bf16.mxu0 %v954_v1 }
  0x2d   : > { %885 = vmatprep.subr.bf16.mxu1 %v954_v1 }
  0x2f   : > { %866 = vmatpush3.bf16.msra.mxu0 %v932_v27 }
  0x30   : > { %886 = vmatpush3.bf16.msra.mxu1 %v933_v28  ;;  %867 = vmatprep.subr.bf16.mxu0 %v954_v1 }
  0x31   : > { %887 = vmatprep.subr.bf16.mxu1 %v954_v1 }
  0x33   : > { %868 = vmatpush3.bf16.msra.mxu0 %v934_v29 }
  0x34   : > { %888 = vmatpush3.bf16.msra.mxu1 %v935_v30  ;;  %869 = vmatprep.subr.bf16.mxu0 %v954_v1 }
  0x35   : > { %889 = vmatprep.subr.bf16.mxu1 %v954_v1 }
  0x37   : > { %870 = vmatpush3.bf16.msra.mxu0 %v936_v31 }
  0x38   : > { %890 = vmatpush3.bf16.msra.mxu1 %v937_v34  ;;  %871 = vmatprep.subr.bf16.mxu0 %v954_v1 }
  0x39   : > { %891 = vmatprep.subr.bf16.mxu1 %v954_v1 }
  0x3b   : > { %872 = vmatpush3.bf16.msra.mxu0 %v938_v36 }
  0x3c   : > { %892 = vmatpush3.bf16.msra.mxu1 %v939_v37  ;;  %873 = vmatprep.subr.bf16.mxu0 %v954_v1 }
  0x3d   : > { %893 = vmatprep.subr.bf16.mxu1 %v954_v1 }
  0x3f   : > { %874 = vmatpush3.bf16.msra.mxu0 %v940_v40 }
  0x40   : > { %894 = vmatpush3.bf16.msra.mxu1 %v941_v41  ;;  %875 = vmatprep.subr.bf16.mxu0 %v954_v1 }
  0x41   : > { %895 = vmatprep.subr.bf16.mxu1 %v954_v1 }
  0x43   : > { %876 = vmatpush3.bf16.msra.mxu0 %v942_v45 }
  0x44   : > { %896 = vmatpush3.bf16.msra.mxu1 %v943_v47 }
  0x46   : > { %878 = vmatmul.mubr.bf16.vlgmr.msra.gmra.mrb[4].mxu0 %v423_v48 }
  0x47   : > { %898 = vmatmul.mubr.bf16.vlgmr.msra.gmra.mrb[4].mxu1 %v535_v49 }
  0xf9   : > { %v298_v50 = vpop.f32.mrb[0].mxu0 }
  0xfa   : > { %v386_v51 = vpop.f32.mrb[0].mxu1  ;;  %v839_v52 = vpop.f32.mrb[1].mxu0 }
  0xfb   : > { %v387_v53 = vadd.f32 %v386_v51, %v298_v50  ;;  %v859_v54 = vpop.f32.mrb[1].mxu1  ;;  %v301_v55 = vpop.f32.mrb[2].mxu0 }
  0xfc   : > { %v389_v56 = vpop.f32.mrb[2].mxu1  ;;  %v840_v57 = vpop.f32.mrb[3].mxu0 }
  0xfd   : > { %v860_v58 = vpop.f32.mrb[3].mxu1 }
 0x119   : > { %v507_v59 = vpop.f32.mrb[4].mxu0 }
 0x11a   : > { %v513_v60 = vadd.f32 %v507_v59, %v387_v53  ;;  %v619_v61 = vpop.f32.mrb[4].mxu1  ;;  %v879_v62 = vpop.f32.mrb[5].mxu0 }
 0x11b   : > { %v899_v0 = vpop.f32.mrb[5].mxu1  ;;  %v510_v1 = vpop.f32.mrb[6].mxu0 }
 0x11c   : > { %v625_v2 = vadd.f32 %v619_v61, %v513_v60  ;;  %v622_v3 = vpop.f32.mrb[6].mxu1  ;;  %v880_v4 = vpop.f32.mrb[7].mxu0 }
 0x11d   : > { %v900_v5 = vpop.f32.mrb[7].mxu1 }
 0x11e   : > { %v633_v6 = vadd.f32 %v781_v63, %v625_v2 }
 0x120   : > { %v634_v7 = vmax.f32 %v633_v6, 0.0 }
 0x122   : > { %v635_v8 = vpack.c.bf16 %v634_v7, %v634_v7 }
 0x124   : > { %636 = vst [vmem:[%s168_s11] sm:$0x7] %v635_v8 }
 0x125 PF: > { %s13_s12 = sadd.s32 1, %s952_s12  }
 0x126   : > { %p10_p4 = scmp.ge.s32.totalorder %s13_s12, 4  }
 0x128   :  { %12 = sbr.rel (!%p10_p4) target bundleno = 1 (0x1), region = 65 }

// kernel: alexnetmap_v3_forward.13
= control target key start
LH: loop header
LB: loop body
LE: loop exit
PB: predicated region body
PF: predicated region fallthrough
CT: control target
= control target key end

     0   :  { %s5219_s12 = smov 0   ;;  %s6113_s0 = inlined_call_operand.vmem [shape: bf16[2,53,128], index: 0, kind: input, shape index: {}]   ;;  %s6114_s1 = inlined_call_operand.vmem [shape: bf16[25,128,128], index: 1, kind: input, shape index: {}]   ;;  %s6115_s2 = inlined_call_operand.vmem [shape: f32[1,128], index: 2, kind: input, shape index: {}]   ;;  %s6116_s3 = inlined_call_operand.vmem [shape: bf16[2,21,128], index: 3, kind: output, shape index: {}]  }
   0x1 LB: > { %s3566_s13 = sadd.s32 4294967295, %s5197_s12   ;;  %p3570_p0 = scmp.ge.s32.totalorder %s5197_s12, 1  ;;  %s5197_s12 = sphi %s5219_s12, %s13_s12  }
   0x2   : > { %p137_p1 = scmp.lt.s32.totalorder %s5197_s12, 3 }
   0x4   : > { %p138_p2 = pnand %p3570_p0, %p137_p1 }
   0x5   : > { %v4961_v0 = vld [vmem:[%s6114_s1 + $0x40] sm:$0xff] (!%p138_p2)   ;;  %p161_p3 = scmp.lt.s32.totalorder (!%p138_p2), %s3566_s13, 1  ;;  %v4963_v2 = vld [vmem:[%s6114_s1 + $0x48] sm:$0xff] (!%p138_p2)   ;;  %v4965_v4 = vld [vmem:[%s6114_s1 + $0x50] sm:$0xff] (!%p138_p2)   ;;  %vm216_vm0 = vsmask.f32 (!%p138_p2), 7424 }
   0x6   : > { %141 = sbr.rel (%p138_p2) target bundleno = 646 (0x286), region = 32  ;;  %v4962_v1 = vld [vmem:[%s6114_s1] sm:$0xff] (!%p138_p2)   ;;  %4451 = vmatprep.subr.bf16.mxu0 (!%p138_p2), %v4961_v0  ;;  %v4964_v3 = vld [vmem:[%s6114_s1 + $0x8] sm:$0xff] (!%p138_p2)   ;;  %v4966_v5 = vld [vmem:[%s6114_s1 + $0x10] sm:$0xff] (!%p138_p2)   ;;  %vm453_vm1 = vcmask (!%p138_p2), 1046528   ;;  %vm725_vm3 = vcmask (!%p138_p2), 1045504  }
   0x7   : > { %4471 = vmatprep.subr.bf16.mxu1 (!%p138_p2), %v4962_v1  ;;  %4452 = vmatpush3.bf16.msra.mxu0 (!%p138_p2), %v4961_v0  ;;  %v4967_v6 = vld [vmem:[%s6114_s1 + $0x58] sm:$0xff] (!%p138_p2)   ;;  %v4969_v8 = vld [vmem:[%s6114_s1 + $0x60] sm:$0xff] (!%p138_p2)   ;;  %v4971_v10 = vld [vmem:[%s6114_s1 + $0x68] sm:$0xff] (!%p138_p2)   ;;  %vm575_vm2 = vsmask.f32 (!%p138_p2), 6400  ;;  %vm1525_vm5 = vcmask (!%p138_p2), 1044480  }
   0x8   : > { %4472 = vmatpush3.bf16.msra.mxu1 (!%p138_p2), %v4962_v1  ;;  %4453 = vmatprep.subr.bf16.mxu0 (!%p138_p2), %v4963_v2  ;;  %v4968_v7 = vld [vmem:[%s6114_s1 + $0x18] sm:$0xff] (!%p138_p2)   ;;  %v4970_v9 = vld [vmem:[%s6114_s1 + $0x20] sm:$0xff] (!%p138_p2)   ;;  %v4972_v13 = vld [vmem:[%s6114_s1 + $0x28] sm:$0xff] (!%p138_p2)   ;;  %vm855_vm4 = vsmask.f32 (!%p138_p2), 4352  ;;  %vm3505_vm7 = vcmask (!%p138_p2), 1042432  }
   0x9   : > { %4473 = vmatprep.subr.bf16.mxu1 (!%p138_p2), %v4964_v3  ;;  %v4973_v16 = vld [vmem:[%s6114_s1 + $0x70] sm:$0xff] (!%p138_p2)   ;;  %v4975_v24 = vld [vmem:[%s6114_s1 + $0x78] sm:$0xff] (!%p138_p2)   ;;  %v4979_v28 = vld [vmem:[%s6114_s1 + $0x80] sm:$0xff] (!%p138_p2)   ;;  %vm2181_vm6 = vsmask.f32 (!%p138_p2), 5376 }
   0xa   : > { %v4974_v20 = vld [vmem:[%s6114_s1 + $0x30] sm:$0xff] (!%p138_p2)   ;;  %v4976_v25 = vld [vmem:[%s6114_s1 + $0x38] sm:$0xff] (!%p138_p2)   ;;  %v4980_v29 = vld [vmem:[%s6114_s1 + $0xc0] sm:$0xff] (!%p138_p2)   ;;  %vm3506_vm8 = vsmask.f32 (!%p138_p2), 2304 }
   0xb   : > { %4454 = vmatpush3.bf16.msra.mxu0 (!%p138_p2), %v4963_v2  ;;  %v4981_v31 = vld [vmem:[%s6114_s1 + $0x88] sm:$0xff] (!%p138_p2)   ;;  %v4983_v36 = vld [vmem:[%s6114_s1 + $0x90] sm:$0xff] (!%p138_p2)   ;;  %v4985_v44 = vld [vmem:[%s6114_s1 + $0x98] sm:$0xff] (!%p138_p2)  }
   0xc   : > { %4474 = vmatpush3.bf16.msra.mxu1 (!%p138_p2), %v4964_v3  ;;  %4455 = vmatprep.subr.bf16.mxu0 (!%p138_p2), %v4965_v4  ;;  %v4982_v32 = vld [vmem:[%s6114_s1 + $0xc8] sm:$0xff] (!%p138_p2)   ;;  %v4984_v37 = vld [vmem:[%s6114_s1 + $0xd0] sm:$0xff] (!%p138_p2)   ;;  %v4986_v45 = vld [vmem:[%s6114_s1 + $0xd8] sm:$0xff] (!%p138_p2)  }
   0xd   : > { %s6118_s13 = smov (!%p161_p3, %s3566_s13), 1  ;;  %4475 = vmatprep.subr.bf16.mxu1 %v4966_v5  ;;  %v4987_v53 = vld [vmem:[%s6114_s1 + $0xa0] sm:$0xff]   ;;  %v4989_v56 = vld [vmem:[%s6114_s1 + $0xa8] sm:$0xff]   ;;  %v4991_v58 = vld [vmem:[%s6114_s1 + $0xb0] sm:$0xff]  }
   0xe   : > { %s4951_s30 = smul.u32 28, %s6118_s13  ;;  %v4988_v55 = vld [vmem:[%s6114_s1 + $0xe0] sm:$0xff]   ;;  %v4990_v57 = vld [vmem:[%s6114_s1 + $0xe8] sm:$0xff]   ;;  %v4992_v59 = vld [vmem:[%s6114_s1 + $0xf0] sm:$0xff]  }
   0xf   : > { %4456 = vmatpush3.bf16.msra.mxu0 %v4965_v4  ;;  %v4993_v2 = vld [vmem:[%s6114_s1 + $0xb8] sm:$0xff]   ;;  %vm3507_vm9 = vmand %vm3505_vm7, %vm3506_vm8 }
  0x10   : > { %4476 = vmatpush3.bf16.msra.mxu1 %v4966_v5  ;;  %4457 = vmatprep.subr.bf16.mxu0 %v4967_v6  ;;  %s5263_s10 = scalar_lea.vmem %s6113_s0, %s4951_s30  ;;  %v4994_v5 = vld [vmem:[%s6114_s1 + $0xf8] sm:$0xff]  }
  0x11   : > { %4477 = vmatprep.subr.bf16.mxu1 %v4968_v7  ;;  %v172_v11 = vld [vmem:[%s5263_s10] sm:$0xf]  ;;  %v173_v12 = vld [vmem:[%s5263_s10 + $0x4] sm:$0xf]  ;;  %v5301_v35 = vld [vmem:[%s5263_s10 + $0x8] ss:$0 sps:$4 sm:$0xff]  }
  0x12   : > { %v3589_v14 = vcombine.low %v172_v11, %v173_v12  ;;  %v4978_v15 = vld [vmem:[%s5263_s10 + $0x8] ss:$0 sps:$4 sm:$0x77]   ;;  %v428_v33 = vld [vmem:[%s5263_s10] sm:$0xe]  ;;  %v455_v39 = vrot.slane %v5301_v35, 1 }
  0x13   : > { %4458 = vmatpush3.bf16.msra.mxu0 %v4967_v6  ;;  %v225_v19 = vshll.u32 %v4978_v15, 16  ;;  %v229_v27 = vshrl.u32 %v4978_v15, 16  ;;  %v3623_v34 = vcombine.low %v428_v33, %v173_v12  ;;  %v585_v42 = vshrl.u32 %v5301_v35, 16  ;;  %v5344_v60 = vld [vmem:[%s5263_s10 + $0x4] sm:$0xf]  ;;  %v5008_v33 = vld [vmem:[%s6114_s1 + $0x168] sm:$0xff]  }
  0x14   : > { %4478 = vmatpush3.bf16.msra.mxu1 %v4968_v7  ;;  %4459 = vmatprep.subr.bf16.mxu0 %v4969_v8  ;;  %v218_v17 = vshrl.u32 %v3589_v14, 16  ;;  %v220_v18 = vshll.u32 %v3589_v14, 16  ;;  %v588_v43 = vshll.u32 %v5301_v35, 16  ;;  %v5347_v61 = vld [vmem:[%s5263_s10 + $0x8] sm:$0xf]  ;;  %v4997_v12 = vld [vmem:[%s6114_s1 + $0x100] sm:$0xff]  }
  0x15   : > { %4479 = vmatprep.subr.bf16.mxu1 %v4970_v9  ;;  %4487 = vmatprep.mubr.bf16.mxu1 %v3589_v14  ;;  %v227_v22 = vrot.slane %v225_v19, 1  ;;  %v454_v38 = vrot.slane %v3623_v34, 1  ;;  %v577_v40 = vshrl.u32 %v3623_v34, 16  ;;  %v580_v41 = vshll.u32 %v3623_v34, 16  ;;  %v694_v62 = vld [vmem:[%s5263_s10] sm:$0xc] }
  0x16   : > { %v222_v21 = vrot.slane %v220_v18, 1  ;;  %v587_v49 = vrot.slane %v585_v42, 1  ;;  %v590_v50 = vrot.slane %v588_v43, 2  ;;  %v697_v63 = vld [vmem:[%s5263_s10 + $0xc] sm:$0x1]  ;;  %v3673_v6 = vcombine.low %v694_v62, %v5344_v60  ;;  %v5009_v35 = vld [vmem:[%s6114_s1 + $0x130] sm:$0xff]  }
  0x17   : > { %4460 = vmatpush3.bf16.msra.mxu0 %v4969_v8  ;;  %v231_v30 = vor.u32 %v229_v27, %v227_v22  ;;  %v456_v46 = vsel %vm453_vm1, %v454_v38, %v455_v39  ;;  %v579_v47 = vrot.slane %v577_v40, 1  ;;  %v582_v48 = vrot.slane %v580_v41, 2  ;;  %v830_v0 = vld [vmem:[%s5263_s10] sm:$0x8]  ;;  %v831_v1 = vld [vmem:[%s5263_s10 + $0xc] sm:$0x3] }
  0x18   : > { %4480 = vmatpush3.bf16.msra.mxu1 %v4970_v9  ;;  %4461 = vmatprep.subr.bf16.mxu0 %v4971_v10  ;;  %v223_v23 = vor.u32 %v222_v21, %v218_v17  ;;  %v5321_v52 = vor.u32 %v590_v50, %v587_v49  ;;  %v3699_v3 = vcombine.low %v830_v0, %v5344_v60  ;;  %v726_v18 = vrot.slane %v3673_v6, 2  ;;  %v5002_v27 = vld [vmem:[%s6114_s1 + $0x150] sm:$0xff]   ;;  %v5011_v38 = vld [vmem:[%s6114_s1 + $0x138] sm:$0xff]   ;;  %v1230_v41 = vld [vmem:[%s5263_s10 + $0x4] sm:$0xe] }
  0x19   : > { %4481 = vmatprep.subr.bf16.mxu1 %v4972_v13  ;;  %v583_v51 = vor.u32 %v582_v48, %v579_v47  ;;  %v3700_v4 = vcombine.low %v5347_v61, %v831_v1  ;;  %v3674_v7 = vcombine.low %v5347_v61, %v697_v63  ;;  %v3725_v34 = vcombine.low %v5344_v60, %v5347_v61  ;;  %v5012_v40 = vld [vmem:[%s6114_s1 + $0x178] sm:$0xff]   ;;  %v5432_v43 = vld [vmem:[%s5263_s10 + $0xc] ss:$0 sps:$4 sm:$0xff]   ;;  %v5015_v49 = vld [vmem:[%s6114_s1 + $0x180] sm:$0xff]  }
  0x1a   : > { %v228_v26 = vsel %vm216_vm0, %v223_v23, %v227_v22  ;;  %v857_v8 = vshrl.u32 %v3699_v3, 16  ;;  %v860_v9 = vshll.u32 %v3699_v3, 16  ;;  %v5000_v23 = vld [vmem:[%s6114_s1 + $0x148] sm:$0xff]   ;;  %v5429_v42 = vcombine.low %v1230_v41, %v5347_v61  ;;  %v5018_v50 = vld [vmem:[%s6114_s1 + $0x1c0] sm:$0xff]   ;;  %v5021_v1 = vld [vmem:[%s6114_s1 + $0x190] sm:$0xff]  }
  0x1b   : > { %4462 = vmatpush3.bf16.msra.mxu0 %v4971_v10  ;;  %4467 = vmatprep.mubr.bf16.mxu0 %v228_v26  ;;  %v592_v54 = vsel %vm575_vm2, %v583_v51, %v5321_v52  ;;  %v865_v10 = vshrl.u32 %v3700_v4, 16  ;;  %v868_v11 = vshll.u32 %v3700_v4, 16  ;;  %v5369_v19 = vrot.slane %v3674_v7, 2  ;;  %v5001_v26 = vld [vmem:[%s6114_s1 + $0x110] sm:$0xff]   ;;  %v5019_v60 = vld [vmem:[%s6114_s1 + $0x188] sm:$0xff]   ;;  %v5023_v3 = vld [vmem:[%s6114_s1 + $0x198] sm:$0xff]  }
  0x1c   : > { %4482 = vmatpush3.bf16.msra.mxu1 %v4972_v13  ;;  %4463 = vmatprep.subr.bf16.mxu0 %v4973_v16  ;;  %v859_v13 = vrot.slane %v857_v8, 3  ;;  %v862_v14 = vrot.slane %v860_v9, 4  ;;  %v1377_v47 = vshrl.u32 %v5429_v42, 16  ;;  %v1380_v48 = vshll.u32 %v5429_v42, 16  ;;  %v5020_v62 = vld [vmem:[%s6114_s1 + $0x1c8] sm:$0xff]   ;;  %v5024_v4 = vld [vmem:[%s6114_s1 + $0x1d8] sm:$0xff]  }
  0x1d   : > { %4483 = vmatprep.subr.bf16.mxu1 %v4974_v20  ;;  %v870_v17 = vrot.slane %v868_v11, 4  ;;  %v1385_v51 = vshrl.u32 %v5432_v43, 16  ;;  %v5026_v6 = vld [vmem:[%s6114_s1 + $0x1e0] sm:$0xff]   ;;  %v5027_v7 = vld [vmem:[%s6114_s1 + $0x1a8] sm:$0xff]   ;;  %v5029_v9 = vld [vmem:[%s6114_s1 + $0x1b0] sm:$0xff]  }
  0x1e   : > { %v863_v21 = vor.u32 %v862_v14, %v859_v13  ;;  %v5028_v8 = vld [vmem:[%s6114_s1 + $0x1e8] sm:$0xff]   ;;  %v5031_v11 = vld [vmem:[%s6114_s1 + $0x1b8] sm:$0xff]   ;;  %v5035_v14 = vld [vmem:[%s6114_s1 + $0x200] sm:$0xff]  }
  0x1f   : > { %4464 = vmatpush3.bf16.msra.mxu0 %v4973_v16  ;;  %v4998_v16 = vld [vmem:[%s6114_s1 + $0x140] sm:$0xff]  }
  0x20   : > { %4484 = vmatpush3.bf16.msra.mxu1 %v4974_v20  ;;  %4465 = vmatprep.subr.bf16.mxu0 %v4975_v24  ;;  %v4999_v20 = vld [vmem:[%s6114_s1 + $0x108] sm:$0xff]  }
  0x21   : > { %4485 = vmatprep.subr.bf16.mxu1 %v4976_v25 }
  0x23   : > { %4466 = vmatpush3.bf16.msra.mxu0 %v4975_v24  ;;  %v728_v24 = vsel %vm725_vm3, %v726_v18, %v5369_v19 }
  0x24   : > { %4486 = vmatpush3.bf16.msra.mxu1 %v4976_v25  ;;  %4491 = vmatprep.subr.bf16.mxu0 %v4979_v28 }
  0x25   : > { %4511 = vmatprep.subr.bf16.mxu1 %v4980_v29 }
  0x26   : > { %4468 = vmatmul.mubr.bf16.vlgmr.msra.gmra.mrb[0].mxu0 %v231_v30  ;;  %v5005_v30 = vld [vmem:[%s6114_s1 + $0x120] sm:$0xff]  }
  0x27   : > { %4488 = vmatmul.mubr.bf16.vlgmr.msra.gmra.mrb[0].mxu1 %v4978_v15  ;;  %4492 = vmatpush3.bf16.msra.mxu0 %v4979_v28  ;;  %v867_v15 = vrot.slane %v865_v10, 3  ;;  %v5003_v28 = vld [vmem:[%s6114_s1 + $0x118] sm:$0xff]   ;;  %v5030_v10 = vld [vmem:[%s6114_s1 + $0x1f0] sm:$0xff]  }
  0x28   : > { %4512 = vmatpush3.bf16.msra.mxu1 %v4980_v29  ;;  %4493 = vmatprep.subr.bf16.mxu0 %v4981_v31  ;;  %v5004_v29 = vld [vmem:[%s6114_s1 + $0x158] sm:$0xff]  }
  0x29   : > { %4513 = vmatprep.subr.bf16.mxu1 %v4982_v32  ;;  %4507 = vmatprep.mubr.bf16.mxu0 %v456_v46  ;;  %v5374_v22 = vor.u32 %v870_v17, %v867_v15  ;;  %v5036_v15 = vld [vmem:[%s6114_s1 + $0x240] sm:$0xff]   ;;  %v1256_v17 = vrot.slane %v5432_v43, 1 }
  0x2a   : > { %4527 = vmatprep.mubr.bf16.mxu1 %v592_v54  ;;  %v1382_v54 = vrot.slane %v1380_v48, 2 }
  0x2b   : > { %4494 = vmatpush3.bf16.msra.mxu0 %v4981_v31  ;;  %v872_v25 = vsel %vm855_vm4, %v863_v21, %v5374_v22  ;;  %v5006_v31 = vld [vmem:[%s6114_s1 + $0x160] sm:$0xff]  }
  0x2c   : > { %4514 = vmatpush3.bf16.msra.mxu1 %v4982_v32  ;;  %4495 = vmatprep.subr.bf16.mxu0 %v4983_v36  ;;  %v5007_v32 = vld [vmem:[%s6114_s1 + $0x128] sm:$0xff]  }
  0x2d   : > { %4515 = vmatprep.subr.bf16.mxu1 %v4984_v37 }
  0x2f   : > { %4496 = vmatpush3.bf16.msra.mxu0 %v4983_v36  ;;  %v5416_v36 = vld [vmem:[%s5263_s10 + $0xc] ss:$0 sps:$4 sm:$0x77]  }
  0x30   : > { %4516 = vmatpush3.bf16.msra.mxu1 %v4984_v37  ;;  %4497 = vmatprep.subr.bf16.mxu0 %v4985_v44  ;;  %v5010_v37 = vld [vmem:[%s6114_s1 + $0x170] sm:$0xff]   ;;  %v1126_v13 = vshrl.u32 %v5416_v36, 16 }
  0x31   : > { %4517 = vmatprep.subr.bf16.mxu1 %v4986_v45 }
  0x33   : > { %4498 = vmatpush3.bf16.msra.mxu0 %v4985_v44  ;;  %v1122_v44 = vshll.u32 %v5416_v36, 16 }
  0x34   : > { %4518 = vmatpush3.bf16.msra.mxu1 %v4986_v45  ;;  %4499 = vmatprep.subr.bf16.mxu0 %v4987_v53  ;;  %v1115_v45 = vshrl.u32 %v3725_v34, 16 }
  0x35   : > { %4519 = vmatprep.subr.bf16.mxu1 %v4988_v55 }
  0x37   : > { %4500 = vmatpush3.bf16.msra.mxu0 %v4987_v53  ;;  %v1379_v53 = vrot.slane %v1377_v47, 1 }
  0x38   : > { %4520 = vmatpush3.bf16.msra.mxu1 %v4988_v55  ;;  %4501 = vmatprep.subr.bf16.mxu0 %v4989_v56  ;;  %v5445_v55 = vrot.slane %v1122_v44, 1  ;;  %v5050_v44 = vld [vmem:[%s6114_s1 + $0x278] sm:$0xff]  }
  0x39   : > { %4521 = vmatprep.subr.bf16.mxu1 %v4990_v57 }
  0x3a   : > { %v1128_v18 = vor.u32 %v1126_v13, %v5445_v55 }
  0x3b   : > { %4502 = vmatpush3.bf16.msra.mxu0 %v4989_v56  ;;  %v1387_v56 = vrot.slane %v1385_v51, 1 }
  0x3c   : > { %4522 = vmatpush3.bf16.msra.mxu1 %v4990_v57  ;;  %4503 = vmatprep.subr.bf16.mxu0 %v4991_v58 }
  0x3d   : > { %4523 = vmatprep.subr.bf16.mxu1 %v4992_v59 }
  0x3f   : > { %4504 = vmatpush3.bf16.msra.mxu0 %v4991_v58 }
  0x40   : > { %4524 = vmatpush3.bf16.msra.mxu1 %v4992_v59  ;;  %4505 = vmatprep.subr.bf16.mxu0 %v4993_v2  ;;  %v1383_v59 = vor.u32 %v1382_v54, %v1379_v53 }
  0x41   : > { %4525 = vmatprep.subr.bf16.mxu1 %v4994_v5 }
  0x43   : > { %4506 = vmatpush3.bf16.msra.mxu0 %v4993_v2  ;;  %v5022_v2 = vld [vmem:[%s6114_s1 + $0x1d0] sm:$0xff]  }
  0x44   : > { %4526 = vmatpush3.bf16.msra.mxu1 %v4994_v5  ;;  %4531 = vmatprep.subr.bf16.mxu0 %v4997_v12  ;;  %v5025_v5 = vld [vmem:[%s6114_s1 + $0x1a0] sm:$0xff]  }
  0x45   : > { %4551 = vmatprep.subr.bf16.mxu1 %v4998_v16 }
  0x46   : > { %4508 = vmatmul.mubr.bf16.vlgmr.msra.gmra.mrb[4].mxu0 %v455_v39  ;;  %v1117_v39 = vshll.u32 %v3725_v34, 16 }
  0x47   : > { %4532 = vmatpush3.bf16.msra.mxu0 %v4997_v12  ;;  %4528 = vmatmul.mubr.bf16.vlgmr.msra.gmra.mrb[4].mxu1 %v5321_v52  ;;  %v1388_v52 = vshll.u32 %v5432_v43, 16  ;;  %v5032_v12 = vld [vmem:[%s6114_s1 + $0x1f8] sm:$0xff]   ;;  %v5058_v43 = vld [vmem:[%s6114_s1 + $0x2d0] sm:$0xff]  }
  0x48   : > { %4552 = vmatpush3.bf16.msra.mxu1 %v4998_v16  ;;  %4533 = vmatprep.subr.bf16.mxu0 %v4999_v20  ;;  %v1119_v46 = vrot.slane %v1117_v39, 1  ;;  %v1255_v16 = vrot.slane %v5429_v42, 1  ;;  %v5049_v42 = vld [vmem:[%s6114_s1 + $0x238] sm:$0xff]  }
  0x49   : > { %4553 = vmatprep.subr.bf16.mxu1 %v5000_v23  ;;  %4547 = vmatprep.mubr.bf16.mxu0 %v728_v24  ;;  %v1390_v57 = vrot.slane %v1388_v52, 2  ;;  %v5041_v24 = vld [vmem:[%s6114_s1 + $0x218] sm:$0xff]  }
  0x4a   : > { %4567 = vmatprep.mubr.bf16.mxu1 %v872_v25  ;;  %v1120_v58 = vor.u32 %v1119_v46, %v1115_v45  ;;  %v1257_v21 = vsel %vm453_vm1, %v1255_v16, %v1256_v17  ;;  %v5042_v25 = vld [vmem:[%s6114_s1 + $0x258] sm:$0xff]   ;;  %v5072_v16 = vld [vmem:[%s6114_s1 + $0x340] sm:$0xff]  }
  0x4b   : > { %4534 = vmatpush3.bf16.msra.mxu0 %v4999_v20  ;;  %v5450_v61 = vor.u32 %v1390_v57, %v1387_v56  ;;  %v5038_v20 = vld [vmem:[%s6114_s1 + $0x248] sm:$0xff]  }
  0x4c   : > { %4554 = vmatpush3.bf16.msra.mxu1 %v5000_v23  ;;  %4535 = vmatprep.subr.bf16.mxu0 %v5001_v26  ;;  %v1125_v0 = vsel %vm216_vm0, %v1120_v58, %v5445_v55  ;;  %v5040_v23 = vld [vmem:[%s6114_s1 + $0x250] sm:$0xff]   ;;  %v5055_v55 = vld [vmem:[%s6114_s1 + $0x288] sm:$0xff]  }
  0x4d   : > { %4555 = vmatprep.subr.bf16.mxu1 %v5002_v27  ;;  %v5458_v63 = vsel %vm575_vm2, %v1383_v59, %v5450_v61  ;;  %v5056_v56 = vld [vmem:[%s6114_s1 + $0x2c8] sm:$0xff]   ;;  %v5057_v59 = vld [vmem:[%s6114_s1 + $0x290] sm:$0xff]  }
  0x4f   : > { %4536 = vmatpush3.bf16.msra.mxu0 %v5001_v26  ;;  %v5043_v26 = vld [vmem:[%s6114_s1 + $0x220] sm:$0xff]  }
  0x50   : > { %4556 = vmatpush3.bf16.msra.mxu1 %v5002_v27  ;;  %4537 = vmatprep.subr.bf16.mxu0 %v5003_v28  ;;  %v5044_v27 = vld [vmem:[%s6114_s1 + $0x260] sm:$0xff]  }
  0x51   : > { %4557 = vmatprep.subr.bf16.mxu1 %v5004_v29 }
  0x53   : > { %4538 = vmatpush3.bf16.msra.mxu0 %v5003_v28  ;;  %v1494_v28 = vld [vmem:[%s5263_s10 + $0x4] sm:$0x8] }
  0x54   : > { %4558 = vmatpush3.bf16.msra.mxu1 %v5004_v29  ;;  %4539 = vmatprep.subr.bf16.mxu0 %v5005_v30  ;;  %v5540_v29 = vld [vmem:[%s5263_s10 + $0x8] sm:$0xf] }
  0x55   : > { %4559 = vmatprep.subr.bf16.mxu1 %v5006_v31 }
  0x57   : > { %4540 = vmatpush3.bf16.msra.mxu0 %v5005_v30  ;;  %v5045_v30 = vld [vmem:[%s6114_s1 + $0x228] sm:$0xff]  }
  0x58   : > { %4560 = vmatpush3.bf16.msra.mxu1 %v5006_v31  ;;  %4541 = vmatprep.subr.bf16.mxu0 %v5007_v32  ;;  %v5546_v31 = vld [vmem:[%s5263_s10 + $0xc] sm:$0xf] }
  0x59   : > { %4561 = vmatprep.subr.bf16.mxu1 %v5008_v33 }
  0x5b   : > { %4542 = vmatpush3.bf16.msra.mxu0 %v5007_v32  ;;  %v1497_v32 = vld [vmem:[%s5263_s10 + $0x10] sm:$0x3] }
  0x5c   : > { %4562 = vmatpush3.bf16.msra.mxu1 %v5008_v33  ;;  %4543 = vmatprep.subr.bf16.mxu0 %v5009_v35  ;;  %v5046_v33 = vld [vmem:[%s6114_s1 + $0x268] sm:$0xff]  }
  0x5d   : > { %4563 = vmatprep.subr.bf16.mxu1 %v5010_v37 }
  0x5f   : > { %4544 = vmatpush3.bf16.msra.mxu0 %v5009_v35  ;;  %v5554_v35 = vcombine.low %v5546_v31, %v1497_v32  ;;  %v2153_v32 = vld [vmem:[%s5263_s10 + $0x14] sm:$0x1] }
  0x60   : > { %4564 = vmatpush3.bf16.msra.mxu1 %v5010_v37  ;;  %4545 = vmatprep.subr.bf16.mxu0 %v5011_v38  ;;  %v5048_v37 = vld [vmem:[%s6114_s1 + $0x270] sm:$0xff]  }
  0x61   : > { %4565 = vmatprep.subr.bf16.mxu1 %v5012_v40  ;;  %v1659_v41 = vshll.u32 %v5554_v35, 16  ;;  %v1527_v52 = vrot.slane %v5554_v35, 3 }
  0x63   : > { %4546 = vmatpush3.bf16.msra.mxu0 %v5011_v38  ;;  %v1661_v48 = vrot.slane %v1659_v41, 4 }
  0x64   : > { %4566 = vmatpush3.bf16.msra.mxu1 %v5012_v40  ;;  %4571 = vmatprep.subr.bf16.mxu0 %v5015_v49  ;;  %v1656_v40 = vshrl.u32 %v5554_v35, 16  ;;  %v5083_v35 = vld [vmem:[%s6114_s1 + $0x330] sm:$0xff]  }
  0x65   : > { %4591 = vmatprep.subr.bf16.mxu1 %v5018_v50 }
  0x66   : > { %4548 = vmatmul.mubr.bf16.vlgmr.msra.gmra.mrb[8].mxu0 %v5369_v19  ;;  %v5037_v19 = vld [vmem:[%s6114_s1 + $0x208] sm:$0xff]   ;;  %v1658_v47 = vrot.slane %v1656_v40, 3 }
  0x67   : > { %4572 = vmatpush3.bf16.msra.mxu0 %v5015_v49  ;;  %4568 = vmatmul.mubr.bf16.vlgmr.msra.gmra.mrb[8].mxu1 %v5374_v22  ;;  %v5039_v22 = vld [vmem:[%s6114_s1 + $0x210] sm:$0xff]   ;;  %v5053_v49 = vld [vmem:[%s6114_s1 + $0x280] sm:$0xff]  }
  0x68   : > { %4592 = vmatpush3.bf16.msra.mxu1 %v5018_v50  ;;  %4573 = vmatprep.subr.bf16.mxu0 %v5019_v60  ;;  %v5054_v50 = vld [vmem:[%s6114_s1 + $0x2c0] sm:$0xff]   ;;  %v5577_v54 = vor.u32 %v1661_v48, %v1658_v47  ;;  %v5708_v47 = vld [vmem:[%s5263_s10 + $0x10] ss:$0 sps:$4 sm:$0xff]  }
  0x69   : > { %4593 = vmatprep.subr.bf16.mxu1 %v5020_v62  ;;  %4587 = vmatprep.mubr.bf16.mxu0 %v3725_v34  ;;  %v3825_v34 = vcombine.low %v1494_v28, %v5540_v29  ;;  %v5081_v28 = vld [vmem:[%s6114_s1 + $0x328] sm:$0xff]  }
  0x6a   : > { %4607 = vmatprep.mubr.bf16.mxu1 %v1125_v0  ;;  %v5063_v0 = vld [vmem:[%s6114_s1 + $0x2a8] sm:$0xff]  }
  0x6b   : > { %4574 = vmatpush3.bf16.msra.mxu0 %v5019_v60  ;;  %v1648_v38 = vshrl.u32 %v3825_v34, 16  ;;  %v1651_v39 = vshll.u32 %v3825_v34, 16  ;;  %v1526_v51 = vrot.slane %v3825_v34, 3  ;;  %v5059_v60 = vld [vmem:[%s6114_s1 + $0x298] sm:$0xff]  }
  0x6c   : > { %4594 = vmatpush3.bf16.msra.mxu1 %v5020_v62  ;;  %4575 = vmatprep.subr.bf16.mxu0 %v5021_v1  ;;  %v5061_v62 = vld [vmem:[%s6114_s1 + $0x2a0] sm:$0xff]  }
  0x6d   : > { %4595 = vmatprep.subr.bf16.mxu1 %v5022_v2  ;;  %v1650_v45 = vrot.slane %v1648_v38, 3  ;;  %v1653_v46 = vrot.slane %v1651_v39, 4  ;;  %v1528_v57 = vsel %vm1525_vm5, %v1526_v51, %v1527_v52 }
  0x6f   : > { %4576 = vmatpush3.bf16.msra.mxu0 %v5021_v1  ;;  %v1654_v53 = vor.u32 %v1653_v46, %v1650_v45  ;;  %v5064_v1 = vld [vmem:[%s6114_s1 + $0x2e8] sm:$0xff]  }
  0x70   : > { %4596 = vmatpush3.bf16.msra.mxu1 %v5022_v2  ;;  %4577 = vmatprep.subr.bf16.mxu0 %v5023_v3  ;;  %v5065_v2 = vld [vmem:[%s6114_s1 + $0x2b0] sm:$0xff]  }
  0x71   : > { %4597 = vmatprep.subr.bf16.mxu1 %v5024_v4  ;;  %v1663_v58 = vsel %vm855_vm4, %v1654_v53, %v5577_v54  ;;  %v5090_v53 = vld [vmem:[%s6114_s1 + $0x3c0] sm:$0xff]  }
  0x73   : > { %4578 = vmatpush3.bf16.msra.mxu0 %v5023_v3  ;;  %v3875_v3 = vcombine.low %v5540_v29, %v5546_v31  ;;  %v5082_v29 = vld [vmem:[%s6114_s1 + $0x368] sm:$0xff]  }
  0x74   : > { %4598 = vmatpush3.bf16.msra.mxu1 %v5024_v4  ;;  %4579 = vmatprep.subr.bf16.mxu0 %v5025_v5  ;;  %v5066_v4 = vld [vmem:[%s6114_s1 + $0x2f0] sm:$0xff]  }
  0x75   : > { %4599 = vmatprep.subr.bf16.mxu1 %v5026_v6 }
  0x77   : > { %4580 = vmatpush3.bf16.msra.mxu0 %v5025_v5  ;;  %v5626_v5 = vld [vmem:[%s5263_s10 + $0x10] ss:$0 sps:$4 sm:$0x77]  }
  0x78   : > { %4600 = vmatpush3.bf16.msra.mxu1 %v5026_v6  ;;  %4581 = vmatprep.subr.bf16.mxu0 %v5027_v7  ;;  %v5067_v6 = vld [vmem:[%s6114_s1 + $0x2b8] sm:$0xff]   ;;  %v1913_v13 = vshll.u32 %v5626_v5, 16  ;;  %v1917_v45 = vshrl.u32 %v5626_v5, 16 }
  0x79   : > { %4601 = vmatprep.subr.bf16.mxu1 %v5028_v8 }
  0x7b   : > { %4582 = vmatpush3.bf16.msra.mxu0 %v5027_v7  ;;  %v5068_v7 = vld [vmem:[%s6114_s1 + $0x2f8] sm:$0xff]  }
  0x7c   : > { %4602 = vmatpush3.bf16.msra.mxu1 %v5028_v8  ;;  %4583 = vmatprep.subr.bf16.mxu0 %v5029_v9  ;;  %v1908_v8 = vshll.u32 %v3875_v3, 16 }
  0x7d   : > { %4603 = vmatprep.subr.bf16.mxu1 %v5030_v10 }
  0x7f   : > { %4584 = vmatpush3.bf16.msra.mxu0 %v5029_v9  ;;  %v1906_v9 = vshrl.u32 %v3875_v3, 16 }
  0x80   : > { %4604 = vmatpush3.bf16.msra.mxu1 %v5030_v10  ;;  %4585 = vmatprep.subr.bf16.mxu0 %v5031_v11  ;;  %v5635_v10 = vld [vmem:[%s5263_s10 + $0xc] sm:$0xf] }
  0x81   : > { %4605 = vmatprep.subr.bf16.mxu1 %v5032_v12 }
  0x83   : > { %4586 = vmatpush3.bf16.msra.mxu0 %v5031_v11  ;;  %v5638_v11 = vld [vmem:[%s5263_s10 + $0x10] sm:$0xf] }
  0x84   : > { %4606 = vmatpush3.bf16.msra.mxu1 %v5032_v12  ;;  %4611 = vmatprep.subr.bf16.mxu0 %v5035_v14  ;;  %v1910_v12 = vrot.slane %v1908_v8, 1  ;;  %v3952_v34 = vcombine.low %v5638_v11, %v2153_v32 }
  0x85   : > { %4631 = vmatprep.subr.bf16.mxu1 %v5036_v15 }
  0x86   : > { %4588 = vmatmul.mubr.bf16.vlgmr.msra.gmra.mrb[12].mxu0 %v5416_v36  ;;  %v5047_v36 = vld [vmem:[%s6114_s1 + $0x230] sm:$0xff]   ;;  %v2191_v40 = vshrl.u32 %v3952_v34, 16  ;;  %v2194_v41 = vshll.u32 %v3952_v34, 16  ;;  %v5107_v34 = vld [vmem:[%s6114_s1 + $0x400] sm:$0xff]  }
  0x87   : > { %4612 = vmatpush3.bf16.msra.mxu0 %v5035_v14  ;;  %4608 = vmatmul.mubr.bf16.vlgmr.msra.gmra.mrb[12].mxu1 %v1128_v18  ;;  %v5643_v14 = vcombine.low %v5635_v10, %v5638_v11  ;;  %v1911_v18 = vor.u32 %v1910_v12, %v1906_v9  ;;  %v5101_v9 = vld [vmem:[%s6114_s1 + $0x3b0] sm:$0xff]  }
  0x88   : > { %4632 = vmatpush3.bf16.msra.mxu1 %v5036_v15  ;;  %4613 = vmatprep.subr.bf16.mxu0 %v5037_v19  ;;  %v5071_v15 = vld [vmem:[%s6114_s1 + $0x300] sm:$0xff]   ;;  %v2196_v51 = vrot.slane %v2194_v41, 3  ;;  %v5112_v41 = vld [vmem:[%s6114_s1 + $0x448] sm:$0xff]  }
  0x89   : > { %4633 = vmatprep.subr.bf16.mxu1 %v5038_v20  ;;  %4627 = vmatprep.mubr.bf16.mxu0 %v1257_v21  ;;  %v5075_v21 = vld [vmem:[%s6114_s1 + $0x310] sm:$0xff]  }
  0x8a   : > { %4647 = vmatprep.mubr.bf16.mxu1 %v5458_v63  ;;  %v5062_v63 = vld [vmem:[%s6114_s1 + $0x2e0] sm:$0xff]  }
  0x8b   : > { %4614 = vmatpush3.bf16.msra.mxu0 %v5037_v19  ;;  %v5654_v19 = vrot.slane %v1913_v13, 1  ;;  %v5102_v13 = vld [vmem:[%s6114_s1 + $0x3f0] sm:$0xff]  }
  0x8c   : > { %4634 = vmatpush3.bf16.msra.mxu1 %v5038_v20  ;;  %4615 = vmatprep.subr.bf16.mxu0 %v5039_v22  ;;  %v5074_v20 = vld [vmem:[%s6114_s1 + $0x348] sm:$0xff]  }
  0x8d   : > { %4635 = vmatprep.subr.bf16.mxu1 %v5040_v23 }
  0x8f   : > { %4616 = vmatpush3.bf16.msra.mxu0 %v5039_v22  ;;  %v1916_v22 = vsel %vm216_vm0, %v1911_v18, %v5654_v19 }
  0x90   : > { %4636 = vmatpush3.bf16.msra.mxu1 %v5040_v23  ;;  %4617 = vmatprep.subr.bf16.mxu0 %v5041_v24  ;;  %v5076_v23 = vld [vmem:[%s6114_s1 + $0x350] sm:$0xff]  }
  0x91   : > { %4637 = vmatprep.subr.bf16.mxu1 %v5042_v25 }
  0x93   : > { %4618 = vmatpush3.bf16.msra.mxu0 %v5041_v24  ;;  %v5077_v24 = vld [vmem:[%s6114_s1 + $0x318] sm:$0xff]  }
  0x94   : > { %4638 = vmatpush3.bf16.msra.mxu1 %v5042_v25  ;;  %4619 = vmatprep.subr.bf16.mxu0 %v5043_v26  ;;  %v5078_v25 = vld [vmem:[%s6114_s1 + $0x358] sm:$0xff]  }
  0x95   : > { %4639 = vmatprep.subr.bf16.mxu1 %v5044_v27 }
  0x97   : > { %4620 = vmatpush3.bf16.msra.mxu0 %v5043_v26  ;;  %v5079_v26 = vld [vmem:[%s6114_s1 + $0x320] sm:$0xff]  }
  0x98   : > { %4640 = vmatpush3.bf16.msra.mxu1 %v5044_v27  ;;  %4621 = vmatprep.subr.bf16.mxu0 %v5045_v30  ;;  %v5080_v27 = vld [vmem:[%s6114_s1 + $0x360] sm:$0xff]  }
  0x99   : > { %4641 = vmatprep.subr.bf16.mxu1 %v5046_v33 }
  0x9b   : > { %4622 = vmatpush3.bf16.msra.mxu0 %v5045_v30  ;;  %v2150_v30 = vld [vmem:[%s5263_s10 + $0x8] sm:$0xc] }
  0x9c   : > { %4642 = vmatpush3.bf16.msra.mxu1 %v5046_v33  ;;  %4623 = vmatprep.subr.bf16.mxu0 %v5047_v36  ;;  %v3951_v33 = vcombine.low %v2150_v30, %v5635_v10 }
  0x9d   : > { %4643 = vmatprep.subr.bf16.mxu1 %v5048_v37 }
  0x9e   : > { %v2183_v38 = vshrl.u32 %v3951_v33, 16  ;;  %v2186_v39 = vshll.u32 %v3951_v33, 16 }
  0x9f   : > { %4624 = vmatpush3.bf16.msra.mxu0 %v5047_v36  ;;  %v5084_v36 = vld [vmem:[%s6114_s1 + $0x370] sm:$0xff]  }
  0xa0   : > { %4644 = vmatpush3.bf16.msra.mxu1 %v5048_v37  ;;  %4625 = vmatprep.subr.bf16.mxu0 %v5049_v42  ;;  %v2021_v37 = vld [vmem:[%s5263_s10 + $0x8] sm:$0xe]  ;;  %v2185_v48 = vrot.slane %v2183_v38, 2 }
  0xa1   : > { %4645 = vmatprep.subr.bf16.mxu1 %v5050_v44  ;;  %v3925_v46 = vcombine.low %v2021_v37, %v5546_v31  ;;  %v2047_v31 = vrot.slane %v5708_v47, 1  ;;  %v5115_v47 = vld [vmem:[%s6114_s1 + $0x418] sm:$0xff]  }
  0xa3   : > { %4626 = vmatpush3.bf16.msra.mxu0 %v5049_v42  ;;  %v5085_v42 = vld [vmem:[%s6114_s1 + $0x338] sm:$0xff]  }
  0xa4   : > { %4646 = vmatpush3.bf16.msra.mxu1 %v5050_v44  ;;  %4651 = vmatprep.subr.bf16.mxu0 %v5053_v49  ;;  %v5086_v44 = vld [vmem:[%s6114_s1 + $0x378] sm:$0xff]  }
  0xa5   : > { %4671 = vmatprep.subr.bf16.mxu1 %v5054_v50 }
  0xa6   : > { %4628 = vmatmul.mubr.bf16.vlgmr.msra.gmra.mrb[16].mxu0 %v1256_v17  ;;  %v5073_v17 = vld [vmem:[%s6114_s1 + $0x308] sm:$0xff]  }
  0xa7   : > { %4652 = vmatpush3.bf16.msra.mxu0 %v5053_v49  ;;  %4648 = vmatmul.mubr.bf16.vlgmr.msra.gmra.mrb[16].mxu1 %v5450_v61  ;;  %v5060_v61 = vld [vmem:[%s6114_s1 + $0x2d8] sm:$0xff]   ;;  %v2188_v49 = vrot.slane %v2186_v39, 3 }
  0xa8   : > { %4672 = vmatpush3.bf16.msra.mxu1 %v5054_v50  ;;  %4653 = vmatprep.subr.bf16.mxu0 %v5055_v55  ;;  %v2193_v50 = vrot.slane %v2191_v40, 2  ;;  %v5111_v40 = vld [vmem:[%s6114_s1 + $0x408] sm:$0xff]  }
  0xa9   : > { %4673 = vmatprep.subr.bf16.mxu1 %v5056_v56  ;;  %4667 = vmatprep.mubr.bf16.mxu0 %v1528_v57 }
  0xaa   : > { %4687 = vmatprep.mubr.bf16.mxu1 %v1663_v58  ;;  %v5718_v57 = vor.u32 %v2196_v51, %v2193_v50  ;;  %v5091_v58 = vld [vmem:[%s6114_s1 + $0x388] sm:$0xff]   ;;  %v5118_v50 = vld [vmem:[%s6114_s1 + $0x460] sm:$0xff]  }
  0xab   : > { %4654 = vmatpush3.bf16.msra.mxu0 %v5055_v55  ;;  %v1919_v55 = vor.u32 %v1917_v45, %v5654_v19  ;;  %v5113_v45 = vld [vmem:[%s6114_s1 + $0x410] sm:$0xff]   ;;  %v5119_v51 = vld [vmem:[%s6114_s1 + $0x428] sm:$0xff]  }
  0xac   : > { %4674 = vmatpush3.bf16.msra.mxu1 %v5056_v56  ;;  %4655 = vmatprep.subr.bf16.mxu0 %v5057_v59  ;;  %v2189_v56 = vor.u32 %v2188_v49, %v2185_v48  ;;  %v5116_v48 = vld [vmem:[%s6114_s1 + $0x458] sm:$0xff]   ;;  %v5117_v49 = vld [vmem:[%s6114_s1 + $0x420] sm:$0xff]  }
  0xad   : > { %4675 = vmatprep.subr.bf16.mxu1 %v5058_v43 }
  0xaf   : > { %4656 = vmatpush3.bf16.msra.mxu0 %v5057_v59  ;;  %v5092_v59 = vld [vmem:[%s6114_s1 + $0x3c8] sm:$0xff]  }
  0xb0   : > { %4676 = vmatpush3.bf16.msra.mxu1 %v5058_v43  ;;  %4657 = vmatprep.subr.bf16.mxu0 %v5059_v60 }
  0xb1   : > { %4677 = vmatprep.subr.bf16.mxu1 %v5060_v61 }
  0xb3   : > { %4658 = vmatpush3.bf16.msra.mxu0 %v5059_v60  ;;  %v2198_v60 = vsel %vm2181_vm6, %v2189_v56, %v5718_v57 }
  0xb4   : > { %4678 = vmatpush3.bf16.msra.mxu1 %v5060_v61  ;;  %4659 = vmatprep.subr.bf16.mxu0 %v5061_v62  ;;  %v5093_v61 = vld [vmem:[%s6114_s1 + $0x390] sm:$0xff]  }
  0xb5   : > { %4679 = vmatprep.subr.bf16.mxu1 %v5062_v63 }
  0xb7   : > { %4660 = vmatpush3.bf16.msra.mxu0 %v5061_v62  ;;  %v5094_v62 = vld [vmem:[%s6114_s1 + $0x3d0] sm:$0xff]  }
  0xb8   : > { %4680 = vmatpush3.bf16.msra.mxu1 %v5062_v63  ;;  %4661 = vmatprep.subr.bf16.mxu0 %v5063_v0  ;;  %v5095_v63 = vld [vmem:[%s6114_s1 + $0x398] sm:$0xff]  }
  0xb9   : > { %4681 = vmatprep.subr.bf16.mxu1 %v5064_v1 }
  0xbb   : > { %4662 = vmatpush3.bf16.msra.mxu0 %v5063_v0  ;;  %v5096_v0 = vld [vmem:[%s6114_s1 + $0x3d8] sm:$0xff]  }
  0xbc   : > { %4682 = vmatpush3.bf16.msra.mxu1 %v5064_v1  ;;  %4663 = vmatprep.subr.bf16.mxu0 %v5065_v2  ;;  %v5097_v1 = vld [vmem:[%s6114_s1 + $0x3a0] sm:$0xff]  }
  0xbd   : > { %4683 = vmatprep.subr.bf16.mxu1 %v5066_v4 }
  0xbf   : > { %4664 = vmatpush3.bf16.msra.mxu0 %v5065_v2  ;;  %v5098_v2 = vld [vmem:[%s6114_s1 + $0x3e0] sm:$0xff]  }
  0xc0   : > { %4684 = vmatpush3.bf16.msra.mxu1 %v5066_v4  ;;  %4665 = vmatprep.subr.bf16.mxu0 %v5067_v6  ;;  %v5099_v4 = vld [vmem:[%s6114_s1 + $0x3a8] sm:$0xff]  }
  0xc1   : > { %4685 = vmatprep.subr.bf16.mxu1 %v5068_v7 }
  0xc3   : > { %4666 = vmatpush3.bf16.msra.mxu0 %v5067_v6  ;;  %v5100_v6 = vld [vmem:[%s6114_s1 + $0x3e8] sm:$0xff]  }
  0xc4   : > { %4686 = vmatpush3.bf16.msra.mxu1 %v5068_v7  ;;  %4691 = vmatprep.subr.bf16.mxu0 %v5071_v15 }
  0xc5   : > { %4711 = vmatprep.subr.bf16.mxu1 %v5072_v16 }
  0xc6   : > { %4668 = vmatmul.mubr.bf16.vlgmr.msra.gmra.mrb[20].mxu0 %v1527_v52  ;;  %v5089_v52 = vld [vmem:[%s6114_s1 + $0x380] sm:$0xff]  }
  0xc7   : > { %4692 = vmatpush3.bf16.msra.mxu0 %v5071_v15  ;;  %4688 = vmatmul.mubr.bf16.vlgmr.msra.gmra.mrb[20].mxu1 %v5577_v54  ;;  %v2046_v54 = vrot.slane %v3925_v46, 1  ;;  %v5114_v46 = vld [vmem:[%s6114_s1 + $0x450] sm:$0xff]  }
  0xc8   : > { %4712 = vmatpush3.bf16.msra.mxu1 %v5072_v16  ;;  %4693 = vmatprep.subr.bf16.mxu0 %v5073_v17 }
  0xc9   : > { %4713 = vmatprep.subr.bf16.mxu1 %v5074_v20  ;;  %4707 = vmatprep.mubr.bf16.mxu0 %v3875_v3  ;;  %v2048_v43 = vsel %vm453_vm1, %v2046_v54, %v2047_v31  ;;  %v2300_v3 = vld [vmem:[%s5263_s10 + $0x8] sm:$0x8] }
  0xca   : > { %4727 = vmatprep.mubr.bf16.mxu1 %v1916_v22  ;;  %v3977_v7 = vcombine.low %v2300_v3, %v5635_v10 }
  0xcb   : > { %4694 = vmatpush3.bf16.msra.mxu0 %v5073_v17 }
  0xcc   : > { %4714 = vmatpush3.bf16.msra.mxu1 %v5074_v20  ;;  %4695 = vmatprep.subr.bf16.mxu0 %v5075_v21  ;;  %v2447_v17 = vshrl.u32 %v3977_v7, 16  ;;  %v2450_v19 = vshll.u32 %v3977_v7, 16 }
  0xcd   : > { %4715 = vmatprep.subr.bf16.mxu1 %v5076_v23 }
  0xce   : > { %v2452_v30 = vrot.slane %v2450_v19, 4  ;;  %v5131_v19 = vld [vmem:[%s6114_s1 + $0x490] sm:$0xff]  }
  0xcf   : > { %4696 = vmatpush3.bf16.msra.mxu0 %v5075_v21 }
  0xd0   : > { %4716 = vmatpush3.bf16.msra.mxu1 %v5076_v23  ;;  %4697 = vmatprep.subr.bf16.mxu0 %v5077_v24 }
  0xd1   : > { %4717 = vmatprep.subr.bf16.mxu1 %v5078_v25 }
  0xd3   : > { %4698 = vmatpush3.bf16.msra.mxu0 %v5077_v24 }
  0xd4   : > { %4718 = vmatpush3.bf16.msra.mxu1 %v5078_v25  ;;  %4699 = vmatprep.subr.bf16.mxu0 %v5079_v26  ;;  %v5103_v25 = vld [vmem:[%s6114_s1 + $0x3b8] sm:$0xff]  }
  0xd5   : > { %4719 = vmatprep.subr.bf16.mxu1 %v5080_v27 }
  0xd7   : > { %4700 = vmatpush3.bf16.msra.mxu0 %v5079_v26 }
  0xd8   : > { %4720 = vmatpush3.bf16.msra.mxu1 %v5080_v27  ;;  %4701 = vmatprep.subr.bf16.mxu0 %v5081_v28  ;;  %v5104_v27 = vld [vmem:[%s6114_s1 + $0x3f8] sm:$0xff]  }
  0xd9   : > { %4721 = vmatprep.subr.bf16.mxu1 %v5082_v29 }
  0xdb   : > { %4702 = vmatpush3.bf16.msra.mxu0 %v5081_v28 }
  0xdc   : > { %4722 = vmatpush3.bf16.msra.mxu1 %v5082_v29  ;;  %4703 = vmatprep.subr.bf16.mxu0 %v5083_v35  ;;  %v2449_v29 = vrot.slane %v2447_v17, 3 }
  0xdd   : > { %4723 = vmatprep.subr.bf16.mxu1 %v5084_v36 }
  0xde   : > { %v2453_v38 = vor.u32 %v2452_v30, %v2449_v29 }
  0xdf   : > { %4704 = vmatpush3.bf16.msra.mxu0 %v5083_v35  ;;  %v5110_v35 = vld [vmem:[%s6114_s1 + $0x440] sm:$0xff]  }
  0xe0   : > { %4724 = vmatpush3.bf16.msra.mxu1 %v5084_v36  ;;  %4705 = vmatprep.subr.bf16.mxu0 %v5085_v42  ;;  %v2325_v36 = vrot.slane %v3977_v7, 3  ;;  %v2705_v7 = vshrl.u32 %v5643_v14, 16 }
  0xe1   : > { %4725 = vmatprep.subr.bf16.mxu1 %v5086_v44 }
  0xe3   : > { %4706 = vmatpush3.bf16.msra.mxu0 %v5085_v42 }
  0xe4   : > { %4726 = vmatpush3.bf16.msra.mxu1 %v5086_v44  ;;  %4731 = vmatprep.subr.bf16.mxu0 %v5089_v52 }
  0xe5   : > { %4751 = vmatprep.subr.bf16.mxu1 %v5090_v53 }
  0xe6   : > { %4708 = vmatmul.mubr.bf16.vlgmr.msra.gmra.mrb[24].mxu0 %v5626_v5  ;;  %v2301_v5 = vld [vmem:[%s5263_s10 + $0x14] sm:$0x3] }
  0xe7   : > { %4732 = vmatpush3.bf16.msra.mxu0 %v5089_v52  ;;  %4728 = vmatmul.mubr.bf16.vlgmr.msra.gmra.mrb[24].mxu1 %v1919_v55  ;;  %v5760_v8 = vcombine.low %v5638_v11, %v2301_v5  ;;  %v5120_v52 = vld [vmem:[%s6114_s1 + $0x468] sm:$0xff]   ;;  %v5124_v5 = vld [vmem:[%s6114_s1 + $0x478] sm:$0xff]  }
  0xe8   : > { %4752 = vmatpush3.bf16.msra.mxu1 %v5090_v53  ;;  %4733 = vmatprep.subr.bf16.mxu0 %v5091_v58  ;;  %v5121_v53 = vld [vmem:[%s6114_s1 + $0x430] sm:$0xff]  }
  0xe9   : > { %4753 = vmatprep.subr.bf16.mxu1 %v5092_v59  ;;  %4747 = vmatprep.mubr.bf16.mxu0 %v2048_v43  ;;  %v2455_v20 = vshrl.u32 %v5760_v8, 16  ;;  %v2458_v21 = vshll.u32 %v5760_v8, 16  ;;  %v2326_v37 = vrot.slane %v5760_v8, 3  ;;  %v5133_v8 = vld [vmem:[%s6114_s1 + $0x498] sm:$0xff]  }
  0xea   : > { %4767 = vmatprep.mubr.bf16.mxu1 %v2198_v60  ;;  %v2707_v60 = vshll.u32 %v5643_v14, 16 }
  0xeb   : > { %4734 = vmatpush3.bf16.msra.mxu0 %v5091_v58  ;;  %v2457_v32 = vrot.slane %v2455_v20, 3  ;;  %v2460_v33 = vrot.slane %v2458_v21, 4  ;;  %v2327_v42 = vsel %vm1525_vm5, %v2325_v36, %v2326_v37  ;;  %v5132_v20 = vld [vmem:[%s6114_s1 + $0x4d0] sm:$0xff]   ;;  %v5134_v21 = vld [vmem:[%s6114_s1 + $0x4d8] sm:$0xff]  }
  0xec   : > { %4754 = vmatpush3.bf16.msra.mxu1 %v5092_v59  ;;  %4735 = vmatprep.subr.bf16.mxu0 %v5093_v61 }
  0xed   : > { %4755 = vmatprep.subr.bf16.mxu1 %v5094_v62  ;;  %v5789_v39 = vor.u32 %v2460_v33, %v2457_v32  ;;  %v5139_v32 = vld [vmem:[%s6114_s1 + $0x4b0] sm:$0xff]  }
  0xef   : > { %4736 = vmatpush3.bf16.msra.mxu0 %v5093_v61  ;;  %v2462_v44 = vsel %vm855_vm4, %v2453_v38, %v5789_v39  ;;  %v5839_v61 = vld [vmem:[%s5263_s10 + $0x14] ss:$0 sps:$4 sm:$0x77]  }
  0xf0   : > { %4756 = vmatpush3.bf16.msra.mxu1 %v5094_v62  ;;  %4737 = vmatprep.subr.bf16.mxu0 %v5095_v63 }
  0xf1   : > { %4757 = vmatprep.subr.bf16.mxu1 %v5096_v0 }
  0xf3   : > { %4738 = vmatpush3.bf16.msra.mxu0 %v5095_v63 }
  0xf4   : > { %4758 = vmatpush3.bf16.msra.mxu1 %v5096_v0  ;;  %4739 = vmatprep.subr.bf16.mxu0 %v5097_v1 }
  0xf5   : > { %4759 = vmatprep.subr.bf16.mxu1 %v5098_v2 }
  0xf7   : > { %4740 = vmatpush3.bf16.msra.mxu0 %v5097_v1  ;;  %v5123_v1 = vld [vmem:[%s6114_s1 + $0x438] sm:$0xff]  }
  0xf8   : > { %4760 = vmatpush3.bf16.msra.mxu1 %v5098_v2  ;;  %4741 = vmatprep.subr.bf16.mxu0 %v5099_v4 }
  0xf9   : > { %v4469_v12 = vpop.f32.mrb[0].mxu0  ;;  %4761 = vmatprep.subr.bf16.mxu1 %v5100_v6 }
  0xfa   : > { %v4489_v15 = vpop.f32.mrb[0].mxu1  ;;  %v316_v16 = vpop.f32.mrb[1].mxu0 }
  0xfb   : > { %v5768_v10 = vadd.f32 %v4489_v15, %v4469_v12  ;;  %v414_v18 = vpop.f32.mrb[1].mxu1  ;;  %v4470_v11 = vpop.f32.mrb[2].mxu0  ;;  %4742 = vmatpush3.bf16.msra.mxu0 %v5099_v4  ;;  %v2712_v12 = vshll.u32 %v5839_v61, 16  ;;  %v5128_v15 = vld [vmem:[%s6114_s1 + $0x4c0] sm:$0xff]  }
  0xfc   : > { %v5772_v22 = vadd.f32 %v414_v18, %v316_v16  ;;  %v4490_v23 = vpop.f32.mrb[2].mxu1  ;;  %v319_v24 = vpop.f32.mrb[3].mxu0  ;;  %4762 = vmatpush3.bf16.msra.mxu1 %v5100_v6  ;;  %4743 = vmatprep.subr.bf16.mxu0 %v5101_v9  ;;  %v5130_v18 = vld [vmem:[%s6114_s1 + $0x4c8] sm:$0xff]  }
  0xfd   : > { %v417_v26 = vpop.f32.mrb[3].mxu1  ;;  %4763 = vmatprep.subr.bf16.mxu1 %v5102_v13  ;;  %v5862_v17 = vrot.slane %v2712_v12, 1  ;;  %v2820_v23 = vld [vmem:[%s5263_s10 + $0xc] sm:$0xc]  ;;  %v5153_v12 = vld [vmem:[%s6114_s1 + $0x520] sm:$0xff]  }
  0xfe   : > { %v5780_v28 = vadd.f32 %v417_v26, %v319_v24  ;;  %v5896_v24 = vld [vmem:[%s5263_s10 + $0x10] sm:$0xf]  ;;  %v5902_v26 = vld [vmem:[%s5263_s10 + $0x14] sm:$0xf] }
  0xff   : > { %4744 = vmatpush3.bf16.msra.mxu0 %v5101_v9  ;;  %v2709_v9 = vrot.slane %v2707_v60, 1  ;;  %v4077_v29 = vcombine.low %v2820_v23, %v5896_v24 }
 0x100   : > { %4764 = vmatpush3.bf16.msra.mxu1 %v5102_v13  ;;  %4745 = vmatprep.subr.bf16.mxu0 %v5103_v25  ;;  %v5127_v13 = vld [vmem:[%s6114_s1 + $0x480] sm:$0xff]  }
 0x101   : > { %4765 = vmatprep.subr.bf16.mxu1 %v5104_v27  ;;  %v2710_v16 = vor.u32 %v2709_v9, %v2705_v7  ;;  %v2973_v38 = vshrl.u32 %v4077_v29, 16  ;;  %v2851_v60 = vrot.slane %v4077_v29, 2  ;;  %v5151_v7 = vld [vmem:[%s6114_s1 + $0x518] sm:$0xff]  }
 0x102   : > { %v5152_v9 = vld [vmem:[%s6114_s1 + $0x558] sm:$0xff]  }
 0x103   : > { %4746 = vmatpush3.bf16.msra.mxu0 %v5103_v25  ;;  %v2715_v11 = vsel %vm216_vm0, %v2710_v16, %v5862_v17  ;;  %v5137_v25 = vld [vmem:[%s6114_s1 + $0x4a8] sm:$0xff]  }
 0x104   : > { %4766 = vmatpush3.bf16.msra.mxu1 %v5104_v27  ;;  %4771 = vmatprep.subr.bf16.mxu0 %v5107_v34  ;;  %v2823_v27 = vld [vmem:[%s5263_s10 + $0x18] sm:$0x1]  ;;  %v5155_v16 = vld [vmem:[%s6114_s1 + $0x528] sm:$0xff]  }
 0x105   : > { %4791 = vmatprep.subr.bf16.mxu1 %v5110_v35  ;;  %v5910_v30 = vcombine.low %v5902_v26, %v2823_v27 }
 0x106   : > { %4748 = vmatmul.mubr.bf16.vlgmr.msra.gmra.mrb[28].mxu0 %v2047_v31  ;;  %v5122_v31 = vld [vmem:[%s6114_s1 + $0x470] sm:$0xff]  }
 0x107   : > { %4772 = vmatpush3.bf16.msra.mxu0 %v5107_v34  ;;  %4768 = vmatmul.mubr.bf16.vlgmr.msra.gmra.mrb[28].mxu1 %v5718_v57  ;;  %v5140_v34 = vld [vmem:[%s6114_s1 + $0x4f0] sm:$0xff]  }
 0x108   : > { %4792 = vmatpush3.bf16.msra.mxu1 %v5110_v35  ;;  %4773 = vmatprep.subr.bf16.mxu0 %v5111_v40 }
 0x109   : > { %4793 = vmatprep.subr.bf16.mxu1 %v5112_v41  ;;  %4787 = vmatprep.mubr.bf16.mxu0 %v2327_v42  ;;  %v2976_v42 = vshll.u32 %v4077_v29, 16 }
 0x10a   : > { %4807 = vmatprep.mubr.bf16.mxu1 %v2462_v44  ;;  %v2981_v44 = vshrl.u32 %v5910_v30, 16 }
 0x10b   : > { %4774 = vmatpush3.bf16.msra.mxu0 %v5111_v40 }
 0x10c   : > { %4794 = vmatpush3.bf16.msra.mxu1 %v5112_v41  ;;  %4775 = vmatprep.subr.bf16.mxu0 %v5113_v45 }
 0x10d   : > { %4795 = vmatprep.subr.bf16.mxu1 %v5114_v46 }
 0x10f   : > { %4776 = vmatpush3.bf16.msra.mxu0 %v5113_v45  ;;  %v2984_v45 = vshll.u32 %v5910_v30, 16 }
 0x110   : > { %4796 = vmatpush3.bf16.msra.mxu1 %v5114_v46  ;;  %4777 = vmatprep.subr.bf16.mxu0 %v5115_v47 }
 0x111   : > { %4797 = vmatprep.subr.bf16.mxu1 %v5116_v48 }
 0x113   : > { %4778 = vmatpush3.bf16.msra.mxu0 %v5115_v47 }
 0x114   : > { %4798 = vmatpush3.bf16.msra.mxu1 %v5116_v48  ;;  %4779 = vmatprep.subr.bf16.mxu0 %v5117_v49 }
 0x115   : > { %4799 = vmatprep.subr.bf16.mxu1 %v5118_v50 }
 0x117   : > { %4780 = vmatpush3.bf16.msra.mxu0 %v5117_v49  ;;  %v5141_v49 = vld [vmem:[%s6114_s1 + $0x4b8] sm:$0xff]  }
 0x118   : > { %4800 = vmatpush3.bf16.msra.mxu1 %v5118_v50  ;;  %4781 = vmatprep.subr.bf16.mxu0 %v5119_v51 }
 0x119   : > { %v4509_v54 = vpop.f32.mrb[4].mxu0  ;;  %4801 = vmatprep.subr.bf16.mxu1 %v5120_v52 }
 0x11a   : > { %v557_v55 = vadd.f32 %v4509_v54, %v5768_v10  ;;  %v541_v56 = vpop.f32.mrb[5].mxu0  ;;  %v4529_v57 = vpop.f32.mrb[4].mxu1  ;;  %v5129_v10 = vld [vmem:[%s6114_s1 + $0x488] sm:$0xff]   ;;  %v2716_v54 = vshrl.u32 %v5839_v61, 16 }
 0x11b   : > { %v555_v58 = vadd.f32 %v541_v56, %v5772_v22  ;;  %v4510_v59 = vpop.f32.mrb[6].mxu0  ;;  %4782 = vmatpush3.bf16.msra.mxu0 %v5119_v51  ;;  %v677_v43 = vpop.f32.mrb[5].mxu1  ;;  %v5136_v22 = vld [vmem:[%s6114_s1 + $0x4e0] sm:$0xff]   ;;  %v2978_v56 = vrot.slane %v2976_v42, 3 }
 0x11c   : > { %v5841_v62 = vadd.f32 %v4529_v57, %v557_v55  ;;  %v544_v63 = vpop.f32.mrb[7].mxu0  ;;  %v4530_v0 = vpop.f32.mrb[6].mxu1  ;;  %4802 = vmatpush3.bf16.msra.mxu1 %v5120_v52  ;;  %4783 = vmatprep.subr.bf16.mxu0 %v5121_v53  ;;  %v2983_v57 = vrot.slane %v2981_v44, 2  ;;  %v5145_v59 = vld [vmem:[%s6114_s1 + $0x500] sm:$0xff]  }
 0x11d   : > { %v556_v2 = vadd.f32 %v544_v63, %v5780_v28  ;;  %v5847_v3 = vadd.f32 %v677_v43, %v555_v58  ;;  %v680_v4 = vpop.f32.mrb[7].mxu1  ;;  %4803 = vmatprep.subr.bf16.mxu1 %v5122_v31  ;;  %v5138_v28 = vld [vmem:[%s6114_s1 + $0x4e8] sm:$0xff]   ;;  %v2986_v58 = vrot.slane %v2984_v45, 3  ;;  %v5146_v43 = vld [vmem:[%s6114_s1 + $0x540] sm:$0xff]   ;;  %v2718_v63 = vor.u32 %v2716_v54, %v5862_v17  ;;  %v3091_v17 = vld [vmem:[%s5263_s10 + $0x18] sm:$0x3] }
 0x11e   : > { %v5165_v54 = vld [vmem:[%s6114_s1 + $0x588] sm:$0xff]  }
 0x11f   : > { %v5852_v6 = vadd.f32 %v680_v4, %v556_v2  ;;  %4784 = vmatpush3.bf16.msra.mxu0 %v5121_v53  ;;  %v5142_v53 = vld [vmem:[%s6114_s1 + $0x4f8] sm:$0xff]   ;;  %v5147_v2 = vld [vmem:[%s6114_s1 + $0x508] sm:$0xff]  }
 0x120   : > { %4804 = vmatpush3.bf16.msra.mxu1 %v5122_v31  ;;  %4785 = vmatprep.subr.bf16.mxu0 %v5123_v1  ;;  %v2975_v31 = vrot.slane %v2973_v38, 2 }
 0x121   : > { %4805 = vmatprep.subr.bf16.mxu1 %v5124_v5 }
 0x122   : > { %v2979_v0 = vor.u32 %v2978_v56, %v2975_v31  ;;  %v5166_v31 = vld [vmem:[%s6114_s1 + $0x5c8] sm:$0xff]  }
 0x123   : > { %4786 = vmatpush3.bf16.msra.mxu0 %v5123_v1  ;;  %v5944_v1 = vor.u32 %v2986_v58, %v2983_v57  ;;  %v5167_v57 = vld [vmem:[%s6114_s1 + $0x590] sm:$0xff]   ;;  %v5169_v58 = vld [vmem:[%s6114_s1 + $0x598] sm:$0xff]  }
 0x124   : > { %4806 = vmatpush3.bf16.msra.mxu1 %v5124_v5  ;;  %4811 = vmatprep.subr.bf16.mxu0 %v5127_v13 }
 0x125   : > { %4831 = vmatprep.subr.bf16.mxu1 %v5128_v15  ;;  %v2988_v5 = vsel %vm2181_vm6, %v2979_v0, %v5944_v1  ;;  %v5175_v0 = vld [vmem:[%s6114_s1 + $0x5b0] sm:$0xff]  }
 0x126   : > { %4788 = vmatmul.mubr.bf16.vlgmr.msra.gmra.mrb[32].mxu0 %v2326_v37 }
 0x127   : > { %4812 = vmatpush3.bf16.msra.mxu0 %v5127_v13  ;;  %4808 = vmatmul.mubr.bf16.vlgmr.msra.gmra.mrb[32].mxu1 %v5789_v39  ;;  %v5154_v13 = vld [vmem:[%s6114_s1 + $0x560] sm:$0xff]  }
 0x128   : > { %4832 = vmatpush3.bf16.msra.mxu1 %v5128_v15  ;;  %4813 = vmatprep.subr.bf16.mxu0 %v5129_v10  ;;  %v3090_v15 = vld [vmem:[%s5263_s10 + $0xc] sm:$0x8] }
 0x129   : > { %4833 = vmatprep.subr.bf16.mxu1 %v5130_v18  ;;  %4827 = vmatprep.mubr.bf16.mxu0 %v5643_v14  ;;  %v5135_v14 = vld [vmem:[%s6114_s1 + $0x4a0] sm:$0xff]  }
 0x12a   : > { %4847 = vmatprep.mubr.bf16.mxu1 %v2715_v11  ;;  %v5986_v11 = vcombine.low %v5902_v26, %v3091_v17 }
 0x12b   : > { %4814 = vmatpush3.bf16.msra.mxu0 %v5129_v10  ;;  %v5156_v10 = vld [vmem:[%s6114_s1 + $0x568] sm:$0xff]  }
 0x12c   : > { %4834 = vmatpush3.bf16.msra.mxu1 %v5130_v18  ;;  %4815 = vmatprep.subr.bf16.mxu0 %v5131_v19  ;;  %v4127_v18 = vcombine.low %v3090_v15, %v5896_v24  ;;  %v5177_v15 = vld [vmem:[%s6114_s1 + $0x5b8] sm:$0xff]  }
 0x12d   : > { %4835 = vmatprep.subr.bf16.mxu1 %v5132_v20 }
 0x12e   : > { %v3237_v23 = vshrl.u32 %v4127_v18, 16  ;;  %v3240_v29 = vshll.u32 %v4127_v18, 16 }
 0x12f   : > { %4816 = vmatpush3.bf16.msra.mxu0 %v5131_v19  ;;  %v5157_v19 = vld [vmem:[%s6114_s1 + $0x530] sm:$0xff]  }
 0x130   : > { %4836 = vmatpush3.bf16.msra.mxu1 %v5132_v20  ;;  %4817 = vmatprep.subr.bf16.mxu0 %v5133_v8  ;;  %v3239_v42 = vrot.slane %v3237_v23, 3  ;;  %v3242_v45 = vrot.slane %v3240_v29, 4 }
 0x131   : > { %4837 = vmatprep.subr.bf16.mxu1 %v5134_v21 }
 0x133   : > { %4818 = vmatpush3.bf16.msra.mxu0 %v5133_v8  ;;  %v5158_v8 = vld [vmem:[%s6114_s1 + $0x570] sm:$0xff]  }
 0x134   : > { %4838 = vmatpush3.bf16.msra.mxu1 %v5134_v21  ;;  %4819 = vmatprep.subr.bf16.mxu0 %v5135_v14 }
 0x135   : > { %4839 = vmatprep.subr.bf16.mxu1 %v5136_v22 }
 0x137   : > { %4820 = vmatpush3.bf16.msra.mxu0 %v5135_v14 }
 0x138   : > { %4840 = vmatpush3.bf16.msra.mxu1 %v5136_v22  ;;  %4821 = vmatprep.subr.bf16.mxu0 %v5137_v25 }
 0x139   : > { %v4549_v33 = vpop.f32.mrb[8].mxu0  ;;  %4841 = vmatprep.subr.bf16.mxu1 %v5138_v28 }
 0x13a   : > { %v829_v35 = vadd.f32 %v4549_v33, %v5841_v62  ;;  %v813_v36 = vpop.f32.mrb[9].mxu0  ;;  %v4569_v37 = vpop.f32.mrb[8].mxu1  ;;  %v2852_v62 = vrot.slane %v5910_v30, 2  ;;  %v3248_v33 = vshll.u32 %v5986_v11, 16  ;;  %v5168_v30 = vld [vmem:[%s6114_s1 + $0x5d0] sm:$0xff]  }
 0x13b   : > { %v827_v39 = vadd.f32 %v813_v36, %v5847_v3  ;;  %v4550_v40 = vpop.f32.mrb[10].mxu0  ;;  %4822 = vmatpush3.bf16.msra.mxu0 %v5137_v25  ;;  %v957_v41 = vpop.f32.mrb[9].mxu1  ;;  %v5148_v3 = vld [vmem:[%s6114_s1 + $0x548] sm:$0xff]  }
 0x13c   : > { %v5922_v46 = vadd.f32 %v4569_v37, %v829_v35  ;;  %v816_v47 = vpop.f32.mrb[11].mxu0  ;;  %v4570_v48 = vpop.f32.mrb[10].mxu1  ;;  %4842 = vmatpush3.bf16.msra.mxu1 %v5138_v28  ;;  %4823 = vmatprep.subr.bf16.mxu0 %v5139_v32  ;;  %v2853_v4 = vsel %vm725_vm3, %v2851_v60, %v2852_v62  ;;  %v5159_v37 = vld [vmem:[%s6114_s1 + $0x538] sm:$0xff]   ;;  %v5172_v60 = vld [vmem:[%s6114_s1 + $0x5e0] sm:$0xff]  }
 0x13d   : > { %v828_v50 = vadd.f32 %v816_v47, %v5852_v6  ;;  %v5928_v51 = vadd.f32 %v957_v41, %v827_v39  ;;  %v960_v52 = vpop.f32.mrb[11].mxu1  ;;  %4843 = vmatprep.subr.bf16.mxu1 %v5140_v34  ;;  %v5149_v6 = vld [vmem:[%s6114_s1 + $0x510] sm:$0xff]   ;;  %v5160_v41 = vld [vmem:[%s6114_s1 + $0x578] sm:$0xff]   ;;  %v3250_v47 = vrot.slane %v3248_v33, 4  ;;  %v5163_v48 = vld [vmem:[%s6114_s1 + $0x580] sm:$0xff]  }
 0x13f   : > { %v5934_v55 = vadd.f32 %v960_v52, %v828_v50  ;;  %4824 = vmatpush3.bf16.msra.mxu0 %v5139_v32  ;;  %v3245_v32 = vshrl.u32 %v5986_v11, 16  ;;  %v3115_v50 = vrot.slane %v4127_v18, 3  ;;  %v3243_v52 = vor.u32 %v3242_v45, %v3239_v42  ;;  %v5178_v18 = vld [vmem:[%s6114_s1 + $0x5f8] sm:$0xff]  }
 0x140   : > { %4844 = vmatpush3.bf16.msra.mxu1 %v5140_v34  ;;  %4825 = vmatprep.subr.bf16.mxu0 %v5141_v49  ;;  %v5190_v42 = vld [vmem:[%s5263_s10 + $0x18] ss:$0 sps:$4 sm:$0x77]   ;;  %s4952_s10 = smul.u32 12, %s6118_s13 }
 0x141   : > { %4845 = vmatprep.subr.bf16.mxu1 %v5142_v53 }
 0x142   : > { %s170_s11 = scalar_lea.vmem %s6116_s3, %s4952_s10 }
 0x143   : > { %4826 = vmatpush3.bf16.msra.mxu0 %v5141_v49  ;;  %v5164_v49 = vld [vmem:[%s6114_s1 + $0x5c0] sm:$0xff]  }
 0x144   : > { %4846 = vmatpush3.bf16.msra.mxu1 %v5142_v53  ;;  %4851 = vmatprep.subr.bf16.mxu0 %v5145_v59 }
 0x145   : > { %4871 = vmatprep.subr.bf16.mxu1 %v5146_v43 }
 0x146   : > { %4828 = vmatmul.mubr.bf16.vlgmr.msra.gmra.mrb[36].mxu0 %v5839_v61  ;;  %v5150_v61 = vld [vmem:[%s6114_s1 + $0x550] sm:$0xff]  }
 0x147   : > { %4852 = vmatpush3.bf16.msra.mxu0 %v5145_v59  ;;  %4848 = vmatmul.mubr.bf16.vlgmr.msra.gmra.mrb[36].mxu1 %v2718_v63  ;;  %v5170_v59 = vld [vmem:[%s6114_s1 + $0x5d8] sm:$0xff]   ;;  %v5174_v63 = vld [vmem:[%s6114_s1 + $0x5e8] sm:$0xff]  }
 0x148   : > { %4872 = vmatpush3.bf16.msra.mxu1 %v5146_v43  ;;  %4853 = vmatprep.subr.bf16.mxu0 %v5147_v2  ;;  %v5171_v43 = vld [vmem:[%s6114_s1 + $0x5a0] sm:$0xff]  }
 0x149   : > { %4873 = vmatprep.subr.bf16.mxu1 %v5148_v3  ;;  %4867 = vmatprep.mubr.bf16.mxu0 %v2853_v4 }
 0x14a   : > { %4887 = vmatprep.mubr.bf16.mxu1 %v2988_v5 }
 0x14b   : > { %4854 = vmatpush3.bf16.msra.mxu0 %v5147_v2  ;;  %v5176_v2 = vld [vmem:[%s6114_s1 + $0x5f0] sm:$0xff]  }
 0x14c   : > { %4874 = vmatpush3.bf16.msra.mxu1 %v5148_v3  ;;  %4855 = vmatprep.subr.bf16.mxu0 %v5149_v6 }
 0x14d   : > { %4875 = vmatprep.subr.bf16.mxu1 %v5150_v61 }
 0x14f   : > { %4856 = vmatpush3.bf16.msra.mxu0 %v5149_v6 }
 0x150   : > { %4876 = vmatpush3.bf16.msra.mxu1 %v5150_v61  ;;  %4857 = vmatprep.subr.bf16.mxu0 %v5151_v7 }
 0x151   : > { %4877 = vmatprep.subr.bf16.mxu1 %v5152_v9 }
 0x153   : > { %4858 = vmatpush3.bf16.msra.mxu0 %v5151_v7 }
 0x154   : > { %4878 = vmatpush3.bf16.msra.mxu1 %v5152_v9  ;;  %4859 = vmatprep.subr.bf16.mxu0 %v5153_v12 }
 0x155   : > { %4879 = vmatprep.subr.bf16.mxu1 %v5154_v13 }
 0x157   : > { %4860 = vmatpush3.bf16.msra.mxu0 %v5153_v12 }
 0x158   : > { %4880 = vmatpush3.bf16.msra.mxu1 %v5154_v13  ;;  %4861 = vmatprep.subr.bf16.mxu0 %v5155_v16 }
 0x159   : > { %v4589_v20 = vpop.f32.mrb[12].mxu0  ;;  %4881 = vmatprep.subr.bf16.mxu1 %v5156_v10 }
 0x15a   : > { %v1096_v21 = vadd.f32 %v4589_v20, %v5922_v46  ;;  %v1080_v14 = vpop.f32.mrb[13].mxu0  ;;  %v4609_v22 = vpop.f32.mrb[12].mxu1  ;;  %v3247_v46 = vrot.slane %v3245_v32, 3  ;;  %v5181_v20 = vld [vmem:[%s6114_s1 + $0x600] sm:$0xff]  }
 0x15b   : > { %v1094_v25 = vadd.f32 %v1080_v14, %v5928_v51  ;;  %v4590_v27 = vpop.f32.mrb[14].mxu0  ;;  %4862 = vmatpush3.bf16.msra.mxu0 %v5155_v16  ;;  %v1213_v28 = vpop.f32.mrb[13].mxu1  ;;  %v3116_v51 = vrot.slane %v5986_v11, 3  ;;  %v5183_v14 = vld [vmem:[%s6114_s1 + $0x610] sm:$0xff]  }
 0x15c   : > { %v5998_v34 = vadd.f32 %v4609_v22, %v1096_v21  ;;  %v1083_v35 = vpop.f32.mrb[15].mxu0  ;;  %v4610_v36 = vpop.f32.mrb[14].mxu1  ;;  %4882 = vmatpush3.bf16.msra.mxu1 %v5156_v10  ;;  %4863 = vmatprep.subr.bf16.mxu0 %v5157_v19  ;;  %v6018_v53 = vor.u32 %v3250_v47, %v3247_v46  ;;  %v4177_v21 = vcombine.low %v5896_v24, %v5902_v26  ;;  %v5184_v22 = vld [vmem:[%s6114_s1 + $0x618] sm:$0xff]   ;;  %v5185_v24 = vld [vmem:[%s6114_s1 + $0x620] sm:$0xff]   ;;  %v5186_v26 = vld [vmem:[%s6114_s1 + $0x628] sm:$0xff]  }
 0x15d   : > { %v1095_v38 = vadd.f32 %v1083_v35, %v5934_v55  ;;  %v6004_v39 = vadd.f32 %v1213_v28, %v1094_v25  ;;  %v1216_v40 = vpop.f32.mrb[15].mxu1  ;;  %4883 = vmatprep.subr.bf16.mxu1 %v5158_v8  ;;  %v3117_v55 = vsel %vm1525_vm5, %v3115_v50, %v3116_v51  ;;  %v5187_v11 = vld [vmem:[%s6114_s1 + $0x630] sm:$0xff]  }
 0x15e   : > { %v3252_v56 = vsel %vm855_vm4, %v3243_v52, %v6018_v53 }
 0x15f   : > { %v6009_v44 = vadd.f32 %v1216_v40, %v1095_v38  ;;  %4864 = vmatpush3.bf16.msra.mxu0 %v5157_v19 }
 0x160   : > { %4884 = vmatpush3.bf16.msra.mxu1 %v5158_v8  ;;  %4865 = vmatprep.subr.bf16.mxu0 %v5159_v37  ;;  %v5182_v8 = vld [vmem:[%s6114_s1 + $0x608] sm:$0xff]  }
 0x161   : > { %4885 = vmatprep.subr.bf16.mxu1 %v5160_v41 }
 0x163   : > { %4866 = vmatpush3.bf16.msra.mxu0 %v5159_v37  ;;  %v5188_v37 = vld [vmem:[%s6114_s1 + $0x638] sm:$0xff]  }
 0x164   : > { %4886 = vmatpush3.bf16.msra.mxu1 %v5160_v41  ;;  %4891 = vmatprep.subr.bf16.mxu0 %v5163_v48 }
 0x165   : > { %4911 = vmatprep.subr.bf16.mxu1 %v5164_v49 }
 0x166   : > { %4868 = vmatmul.mubr.bf16.vlgmr.msra.gmra.mrb[40].mxu0 %v2852_v62  ;;  %v5173_v62 = vld [vmem:[%s6114_s1 + $0x5a8] sm:$0xff]  }
 0x167   : > { %4892 = vmatpush3.bf16.msra.mxu0 %v5163_v48  ;;  %4888 = vmatmul.mubr.bf16.vlgmr.msra.gmra.mrb[40].mxu1 %v5944_v1 }
 0x168   : > { %4912 = vmatpush3.bf16.msra.mxu1 %v5164_v49  ;;  %4893 = vmatprep.subr.bf16.mxu0 %v5165_v54 }
 0x169   : > { %4913 = vmatprep.subr.bf16.mxu1 %v5166_v31  ;;  %4907 = vmatprep.mubr.bf16.mxu0 %v3117_v55 }
 0x16a   : > { %4927 = vmatprep.mubr.bf16.mxu1 %v3252_v56 }
 0x16b   : > { %4894 = vmatpush3.bf16.msra.mxu0 %v5165_v54 }
 0x16c   : > { %4914 = vmatpush3.bf16.msra.mxu1 %v5166_v31  ;;  %4895 = vmatprep.subr.bf16.mxu0 %v5167_v57 }
 0x16d   : > { %4915 = vmatprep.subr.bf16.mxu1 %v5168_v30 }
 0x16f   : > { %4896 = vmatpush3.bf16.msra.mxu0 %v5167_v57 }
 0x170   : > { %4916 = vmatpush3.bf16.msra.mxu1 %v5168_v30  ;;  %4897 = vmatprep.subr.bf16.mxu0 %v5169_v58 }
 0x171   : > { %4917 = vmatprep.subr.bf16.mxu1 %v5170_v59 }
 0x173   : > { %4898 = vmatpush3.bf16.msra.mxu0 %v5169_v58 }
 0x174   : > { %4918 = vmatpush3.bf16.msra.mxu1 %v5170_v59  ;;  %4899 = vmatprep.subr.bf16.mxu0 %v5171_v43 }
 0x175   : > { %4919 = vmatprep.subr.bf16.mxu1 %v5172_v60 }
 0x177   : > { %4900 = vmatpush3.bf16.msra.mxu0 %v5171_v43 }
 0x178   : > { %4920 = vmatpush3.bf16.msra.mxu1 %v5172_v60  ;;  %4901 = vmatprep.subr.bf16.mxu0 %v5173_v62 }
 0x179   : > { %v4629_v1 = vpop.f32.mrb[16].mxu0  ;;  %4921 = vmatprep.subr.bf16.mxu1 %v5174_v63 }
 0x17a   : > { %v1358_v3 = vadd.f32 %v4629_v1, %v5998_v34  ;;  %v1342_v4 = vpop.f32.mrb[17].mxu0  ;;  %v4649_v5 = vpop.f32.mrb[16].mxu1 }
 0x17b   : > { %v1356_v6 = vadd.f32 %v1342_v4, %v6004_v39  ;;  %v4630_v61 = vpop.f32.mrb[18].mxu0  ;;  %4902 = vmatpush3.bf16.msra.mxu0 %v5173_v62  ;;  %v1477_v7 = vpop.f32.mrb[17].mxu1 }
 0x17c   : > { %v1493_v9 = vadd.f32 %v4649_v5, %v1358_v3  ;;  %v1345_v12 = vpop.f32.mrb[19].mxu0  ;;  %v4650_v13 = vpop.f32.mrb[18].mxu1  ;;  %4922 = vmatpush3.bf16.msra.mxu1 %v5174_v63  ;;  %4903 = vmatprep.subr.bf16.mxu0 %v5175_v0 }
 0x17d   : > { %v1357_v16 = vadd.f32 %v1345_v12, %v6009_v44  ;;  %v1491_v17 = vadd.f32 %v1477_v7, %v1356_v6  ;;  %v1480_v10 = vpop.f32.mrb[19].mxu1  ;;  %4923 = vmatprep.subr.bf16.mxu1 %v5176_v2 }
 0x17f   : > { %v1492_v19 = vadd.f32 %v1480_v10, %v1357_v16  ;;  %4904 = vmatpush3.bf16.msra.mxu0 %v5175_v0 }
 0x180   : > { %4924 = vmatpush3.bf16.msra.mxu1 %v5176_v2  ;;  %4905 = vmatprep.subr.bf16.mxu0 %v5177_v15 }
 0x181   : > { %4925 = vmatprep.subr.bf16.mxu1 %v5178_v18 }
 0x183   : > { %4906 = vmatpush3.bf16.msra.mxu0 %v5177_v15 }
 0x184   : > { %4926 = vmatpush3.bf16.msra.mxu1 %v5178_v18  ;;  %4931 = vmatprep.subr.bf16.mxu0 %v5181_v20 }
 0x186   : > { %4908 = vmatmul.mubr.bf16.vlgmr.msra.gmra.mrb[44].mxu0 %v3116_v51 }
 0x187   : > { %4932 = vmatpush3.bf16.msra.mxu0 %v5181_v20  ;;  %4928 = vmatmul.mubr.bf16.vlgmr.msra.gmra.mrb[44].mxu1 %v6018_v53 }
 0x188   : > { %4933 = vmatprep.subr.bf16.mxu0 %v5182_v8  ;;  %4947 = vmatprep.mubr.bf16.mxu0 %v4177_v21 }
 0x18b   : > { %4934 = vmatpush3.bf16.msra.mxu0 %v5182_v8 }
 0x18c   : > { %4935 = vmatprep.subr.bf16.mxu0 %v5183_v14 }
 0x18f   : > { %4936 = vmatpush3.bf16.msra.mxu0 %v5183_v14 }
 0x190   : > { %4937 = vmatprep.subr.bf16.mxu0 %v5184_v22 }
 0x193   : > { %4938 = vmatpush3.bf16.msra.mxu0 %v5184_v22 }
 0x194   : > { %4939 = vmatprep.subr.bf16.mxu0 %v5185_v24 }
 0x197   : > { %4940 = vmatpush3.bf16.msra.mxu0 %v5185_v24 }
 0x198   : > { %4941 = vmatprep.subr.bf16.mxu0 %v5186_v26 }
 0x199   : > { %v4669_v23 = vpop.f32.mrb[20].mxu0 }
 0x19a   : > { %v1629_v25 = vadd.f32 %v4669_v23, %v1493_v9  ;;  %v1613_v27 = vpop.f32.mrb[21].mxu0  ;;  %v4689_v28 = vpop.f32.mrb[20].mxu1 }
 0x19b   : > { %v1627_v29 = vadd.f32 %v1613_v27, %v1491_v17  ;;  %v4670_v32 = vpop.f32.mrb[22].mxu0  ;;  %4942 = vmatpush3.bf16.msra.mxu0 %v5186_v26  ;;  %v1748_v33 = vpop.f32.mrb[21].mxu1 }
 0x19c   : > { %v1764_v34 = vadd.f32 %v4689_v28, %v1629_v25  ;;  %v1616_v35 = vpop.f32.mrb[23].mxu0  ;;  %v4690_v36 = vpop.f32.mrb[22].mxu1  ;;  %4943 = vmatprep.subr.bf16.mxu0 %v5187_v11 }
 0x19d   : > { %v1628_v38 = vadd.f32 %v1616_v35, %v1492_v19  ;;  %v1762_v39 = vadd.f32 %v1748_v33, %v1627_v29  ;;  %v1751_v40 = vpop.f32.mrb[23].mxu1 }
 0x19f   : > { %v1763_v41 = vadd.f32 %v1751_v40, %v1628_v38  ;;  %4944 = vmatpush3.bf16.msra.mxu0 %v5187_v11 }
 0x1a0   : > { %4945 = vmatprep.subr.bf16.mxu0 %v5188_v37 }
 0x1a3   : > { %4946 = vmatpush3.bf16.msra.mxu0 %v5188_v37 }
 0x1a6   : > { %4948 = vmatmul.mubr.bf16.vlgmr.msra.gmra.mrb[48].mxu0 %v5190_v42 }
 0x1b9   : > { %v4709_v44 = vpop.f32.mrb[24].mxu0 }
 0x1ba   : > { %v1887_v45 = vadd.f32 %v4709_v44, %v1764_v34  ;;  %v1871_v46 = vpop.f32.mrb[25].mxu0  ;;  %v4729_v47 = vpop.f32.mrb[24].mxu1 }
 0x1bb   : > { %v1885_v48 = vadd.f32 %v1871_v46, %v1762_v39  ;;  %v4710_v49 = vpop.f32.mrb[26].mxu0  ;;  %v2004_v50 = vpop.f32.mrb[25].mxu1 }
 0x1bc   : > { %v2020_v51 = vadd.f32 %v4729_v47, %v1887_v45  ;;  %v1874_v52 = vpop.f32.mrb[27].mxu0  ;;  %v4730_v53 = vpop.f32.mrb[26].mxu1 }
 0x1bd   : > { %v1886_v54 = vadd.f32 %v1874_v52, %v1763_v41  ;;  %v2018_v31 = vadd.f32 %v2004_v50, %v1885_v48  ;;  %v2007_v55 = vpop.f32.mrb[27].mxu1 }
 0x1bf   : > { %v2019_v56 = vadd.f32 %v2007_v55, %v1886_v54 }
 0x1d9   : > { %v4749_v57 = vpop.f32.mrb[28].mxu0 }
 0x1da   : > { %v2149_v30 = vadd.f32 %v4749_v57, %v2020_v51  ;;  %v2133_v58 = vpop.f32.mrb[29].mxu0  ;;  %v4769_v59 = vpop.f32.mrb[28].mxu1 }
 0x1db   : > { %v2147_v43 = vadd.f32 %v2133_v58, %v2018_v31  ;;  %v4750_v60 = vpop.f32.mrb[30].mxu0  ;;  %v2283_v62 = vpop.f32.mrb[29].mxu1 }
 0x1dc   : > { %v2299_v63 = vadd.f32 %v4769_v59, %v2149_v30  ;;  %v2136_v0 = vpop.f32.mrb[31].mxu0  ;;  %v4770_v1 = vpop.f32.mrb[30].mxu1 }
 0x1dd   : > { %v2148_v2 = vadd.f32 %v2136_v0, %v2019_v56  ;;  %v2297_v3 = vadd.f32 %v2283_v62, %v2147_v43  ;;  %v2286_v4 = vpop.f32.mrb[31].mxu1 }
 0x1df   : > { %v2298_v5 = vadd.f32 %v2286_v4, %v2148_v2 }
 0x1f9   : > { %v4789_v6 = vpop.f32.mrb[32].mxu0 }
 0x1fa   : > { %v2428_v61 = vadd.f32 %v4789_v6, %v2299_v63  ;;  %v2412_v7 = vpop.f32.mrb[33].mxu0  ;;  %v4809_v9 = vpop.f32.mrb[32].mxu1  ;;  %v4187_v63 = vld [vmem:[%s6115_s2] ss:$0 sm:$0xff] }
 0x1fb   : > { %v2426_v12 = vadd.f32 %v2412_v7, %v2297_v3  ;;  %v4790_v13 = vpop.f32.mrb[34].mxu0  ;;  %v2547_v15 = vpop.f32.mrb[33].mxu1 }
 0x1fc   : > { %v2563_v16 = vadd.f32 %v4809_v9, %v2428_v61  ;;  %v2415_v17 = vpop.f32.mrb[35].mxu0  ;;  %v4810_v10 = vpop.f32.mrb[34].mxu1  ;;  %v3508_v9 = vld [vmem:[%s170_s11 + $0x8] sm:$0x7] }
 0x1fd   : > { %v2427_v18 = vadd.f32 %v2415_v17, %v2298_v5  ;;  %v2561_v19 = vadd.f32 %v2547_v15, %v2426_v12  ;;  %v2550_v20 = vpop.f32.mrb[35].mxu1 }
 0x1ff   : > { %v2562_v8 = vadd.f32 %v2550_v20, %v2427_v18 }
 0x219   : > { %v4829_v21 = vpop.f32.mrb[36].mxu0 }
 0x21a   : > { %v2686_v14 = vadd.f32 %v4829_v21, %v2563_v16  ;;  %v2670_v22 = vpop.f32.mrb[37].mxu0  ;;  %v4849_v24 = vpop.f32.mrb[36].mxu1 }
 0x21b   : > { %v2684_v26 = vadd.f32 %v2670_v22, %v2561_v19  ;;  %v4830_v11 = vpop.f32.mrb[38].mxu0  ;;  %v2803_v23 = vpop.f32.mrb[37].mxu1 }
 0x21c   : > { %v2819_v25 = vadd.f32 %v4849_v24, %v2686_v14  ;;  %v2673_v27 = vpop.f32.mrb[39].mxu0  ;;  %v4850_v28 = vpop.f32.mrb[38].mxu1 }
 0x21d   : > { %v2685_v29 = vadd.f32 %v2673_v27, %v2562_v8  ;;  %v2817_v32 = vadd.f32 %v2803_v23, %v2684_v26  ;;  %v2806_v33 = vpop.f32.mrb[39].mxu1 }
 0x21f   : > { %v2818_v34 = vadd.f32 %v2806_v33, %v2685_v29 }
 0x239   : > { %v4869_v35 = vpop.f32.mrb[40].mxu0 }
 0x23a   : > { %v2954_v36 = vadd.f32 %v4869_v35, %v2819_v25  ;;  %v2938_v37 = vpop.f32.mrb[41].mxu0  ;;  %v4889_v38 = vpop.f32.mrb[40].mxu1 }
 0x23b   : > { %v2952_v39 = vadd.f32 %v2938_v37, %v2817_v32  ;;  %v4870_v40 = vpop.f32.mrb[42].mxu0  ;;  %v3073_v41 = vpop.f32.mrb[41].mxu1 }
 0x23c   : > { %v3089_v42 = vadd.f32 %v4889_v38, %v2954_v36  ;;  %v2941_v44 = vpop.f32.mrb[43].mxu0  ;;  %v4890_v45 = vpop.f32.mrb[42].mxu1 }
 0x23d   : > { %v2953_v46 = vadd.f32 %v2941_v44, %v2818_v34  ;;  %v3087_v47 = vadd.f32 %v3073_v41, %v2952_v39  ;;  %v3076_v48 = vpop.f32.mrb[43].mxu1 }
 0x23f   : > { %v3088_v49 = vadd.f32 %v3076_v48, %v2953_v46 }
 0x259   : > { %v4909_v50 = vpop.f32.mrb[44].mxu0 }
 0x25a   : > { %v3218_v51 = vadd.f32 %v4909_v50, %v3089_v42  ;;  %v3202_v52 = vpop.f32.mrb[45].mxu0  ;;  %v4929_v53 = vpop.f32.mrb[44].mxu1 }
 0x25b   : > { %v3216_v54 = vadd.f32 %v3202_v52, %v3087_v47  ;;  %v4910_v31 = vpop.f32.mrb[46].mxu0  ;;  %v3337_v55 = vpop.f32.mrb[45].mxu1 }
 0x25c   : > { %v3353_v56 = vadd.f32 %v4929_v53, %v3218_v51  ;;  %v3205_v57 = vpop.f32.mrb[47].mxu0  ;;  %v4930_v30 = vpop.f32.mrb[46].mxu1 }
 0x25d   : > { %v3217_v58 = vadd.f32 %v3205_v57, %v3088_v49  ;;  %v3351_v59 = vadd.f32 %v3337_v55, %v3216_v54  ;;  %v3340_v43 = vpop.f32.mrb[47].mxu1 }
 0x25f   : > { %v3352_v60 = vadd.f32 %v3340_v43, %v3217_v58 }
 0x279   : > { %v4949_v62 = vpop.f32.mrb[48].mxu0 }
 0x27a   : > { %v3476_v0 = vadd.f32 %v4949_v62, %v3353_v56  ;;  %v3460_v1 = vpop.f32.mrb[49].mxu0 }
 0x27b   : > { %v3474_v2 = vadd.f32 %v3460_v1, %v3351_v59  ;;  %v4950_v3 = vpop.f32.mrb[50].mxu0 }
 0x27c   : > { %v3486_v4 = vadd.f32 %v4187_v63, %v3476_v0  ;;  %v3463_v5 = vpop.f32.mrb[51].mxu0 }
 0x27d   : > { %v3484_v6 = vadd.f32 %v4187_v63, %v3474_v2  ;;  %v3475_v61 = vadd.f32 %v3463_v5, %v3352_v60 }
 0x27e   : > { %v3489_v7 = vmax.f32 %v3486_v4, 0.0 }
 0x27f   : > { %v3485_v12 = vadd.f32 %v4187_v63, %v3475_v61  ;;  %v3487_v15 = vmax.f32 %v3484_v6, 0.0 }
 0x280   : > { %v4195_v13 = vpack.c.bf16 %v3489_v7, %v3489_v7 }
 0x281   : > { %v3488_v16 = vmax.f32 %v3485_v12, 0.0 }
 0x282   : > { %v3509_v17 = vsel %vm3507_vm9, %v4195_v13, %v3508_v9 }
 0x283   : > { %3510 = vst [vmem:[%s170_s11 + $0x8] sm:$0x7] %v3509_v17  ;;  %v4199_v10 = vpack.c.bf16 %v3488_v16, %v3487_v15 }
 0x285   : > { %4200 = vst [vmem:[%s170_s11] sm:$0xff] %v4199_v10  }
 0x286 PF: > { %s13_s12 = sadd.s32 1, %s5197_s12  }
 0x287   : > { %p10_p4 = scmp.ge.s32.totalorder %s13_s12, 4  }
 0x289   :  { %12 = sbr.rel (!%p10_p4) target bundleno = 1 (0x1), region = 86 }

// kernel: alexnetmap_v3_forward.20
= control target key start
LH: loop header
LB: loop body
LE: loop exit
PB: predicated region body
PF: predicated region fallthrough
CT: control target
= control target key end

     0   :  { %s1025_s12 = smov 0   ;;  %s1193_s0 = inlined_call_operand.vmem [shape: bf16[2,17,128], index: 0, kind: input, shape index: {}]   ;;  %s1194_s1 = inlined_call_operand.vmem [shape: bf16[4,128,128], index: 1, kind: input, shape index: {}]   ;;  %s1195_s2 = inlined_call_operand.vmem [shape: f32[1,128], index: 2, kind: input, shape index: {}]   ;;  %s1196_s3 = inlined_call_operand.vmem [shape: bf16[2,12,128], index: 3, kind: output, shape index: {}]  }
   0x1 LB: > { %s730_s13 = sadd.s32 4294967295, %s1001_s12   ;;  %p734_p0 = scmp.ge.s32.totalorder %s1001_s12, 1  ;;  %s1001_s12 = sphi %s1025_s12, %s13_s12  }
   0x2   : > { %p137_p1 = scmp.lt.s32.totalorder %s1001_s12, 3 }
   0x4   : > { %p138_p2 = pnand %p734_p0, %p137_p1 }
   0x5   : > { %v958_v0 = vld [vmem:[%s1194_s1 + $0x40] sm:$0xff] (!%p138_p2)   ;;  %v1003_v1 = vmov (!%p138_p2), 0.0   ;;  %v960_v3 = vld [vmem:[%s1194_s1 + $0x48] sm:$0xff] (!%p138_p2)   ;;  %vm1004_vm0 = vmmov (!%p138_p2), 0   ;;  %p161_p3 = scmp.lt.s32.totalorder (!%p138_p2), %s730_s13, 1  ;;  %v962_v5 = vld [vmem:[%s1194_s1 + $0x50] sm:$0xff] (!%p138_p2)  }
   0x6   : > { %141 = sbr.rel (%p138_p2) target bundleno = 295 (0x127), region = 32  ;;  %867 = vmatprep.subr.bf16.mxu0 (!%p138_p2), %v1003_v1  ;;  %887 = vmatprep.subr.bf16.mxu1 (!%p138_p2), %v1003_v1  ;;  %v959_v2 = vld [vmem:[%s1194_s1] sm:$0xff] (!%p138_p2)   ;;  %v961_v4 = vld [vmem:[%s1194_s1 + $0x8] sm:$0xff] (!%p138_p2)   ;;  %v963_v6 = vld [vmem:[%s1194_s1 + $0x10] sm:$0xff] (!%p138_p2)   ;;  %vm548_vm1 = vsmask.f32 (!%p138_p2), 5376 }
   0x7   : > { %868 = vmatpush3.bf16.msra.mxu0 (!%p138_p2), %v958_v0  ;;  %883 = vmatprep.mubr.msk.bf16.mxu0 (!%p138_p2), %vm1004_vm0, %v1003_v1  ;;  %v964_v7 = vld [vmem:[%s1194_s1 + $0x58] sm:$0xff] (!%p138_p2)   ;;  %v966_v9 = vld [vmem:[%s1194_s1 + $0x60] sm:$0xff] (!%p138_p2)   ;;  %v968_v14 = vld [vmem:[%s1194_s1 + $0x68] sm:$0xff] (!%p138_p2)  }
   0x8   : > { %888 = vmatpush3.bf16.msra.mxu1 (!%p138_p2), %v959_v2  ;;  %869 = vmatprep.subr.bf16.mxu0 (!%p138_p2), %v1003_v1  ;;  %v965_v8 = vld [vmem:[%s1194_s1 + $0x18] sm:$0xff] (!%p138_p2)   ;;  %v967_v10 = vld [vmem:[%s1194_s1 + $0x20] sm:$0xff] (!%p138_p2)   ;;  %v969_v15 = vld [vmem:[%s1194_s1 + $0x28] sm:$0xff] (!%p138_p2)  }
   0x9   : > { %889 = vmatprep.subr.bf16.mxu1 (!%p138_p2), %v1003_v1  ;;  %903 = vmatprep.mubr.msk.bf16.mxu1 (!%p138_p2), %vm1004_vm0, %v1003_v1  ;;  %v970_v17 = vld [vmem:[%s1194_s1 + $0x70] sm:$0xff] (!%p138_p2)   ;;  %v972_v19 = vld [vmem:[%s1194_s1 + $0x78] sm:$0xff] (!%p138_p2)   ;;  %v976_v26 = vld [vmem:[%s1194_s1 + $0x80] sm:$0xff] (!%p138_p2)  }
   0xa   : > { %v971_v18 = vld [vmem:[%s1194_s1 + $0x30] sm:$0xff] (!%p138_p2)   ;;  %v973_v22 = vld [vmem:[%s1194_s1 + $0x38] sm:$0xff] (!%p138_p2)   ;;  %v977_v27 = vld [vmem:[%s1194_s1 + $0xc0] sm:$0xff] (!%p138_p2)  }
   0xb   : > { %870 = vmatpush3.bf16.msra.mxu0 (!%p138_p2), %v960_v3  ;;  %v978_v28 = vld [vmem:[%s1194_s1 + $0x88] sm:$0xff] (!%p138_p2)   ;;  %v980_v30 = vld [vmem:[%s1194_s1 + $0x90] sm:$0xff] (!%p138_p2)   ;;  %v982_v32 = vld [vmem:[%s1194_s1 + $0x98] sm:$0xff] (!%p138_p2)  }
   0xc   : > { %890 = vmatpush3.bf16.msra.mxu1 (!%p138_p2), %v961_v4  ;;  %871 = vmatprep.subr.bf16.mxu0 (!%p138_p2), %v1003_v1  ;;  %v979_v29 = vld [vmem:[%s1194_s1 + $0xc8] sm:$0xff] (!%p138_p2)   ;;  %v981_v31 = vld [vmem:[%s1194_s1 + $0xd0] sm:$0xff] (!%p138_p2)   ;;  %v983_v33 = vld [vmem:[%s1194_s1 + $0xd8] sm:$0xff] (!%p138_p2)  }
   0xd   : > { %s1198_s13 = smov (!%p161_p3, %s730_s13), 1  ;;  %891 = vmatprep.subr.bf16.mxu1 %v1003_v1  ;;  %v984_v34 = vld [vmem:[%s1194_s1 + $0xa0] sm:$0xff]   ;;  %v986_v37 = vld [vmem:[%s1194_s1 + $0xa8] sm:$0xff]   ;;  %v988_v42 = vld [vmem:[%s1194_s1 + $0xb0] sm:$0xff]  }
   0xe   : > { %s947_s26 = smul.u32 12, %s1198_s13  ;;  %v985_v35 = vld [vmem:[%s1194_s1 + $0xe0] sm:$0xff]   ;;  %v987_v38 = vld [vmem:[%s1194_s1 + $0xe8] sm:$0xff]   ;;  %v989_v43 = vld [vmem:[%s1194_s1 + $0xf0] sm:$0xff]   ;;  %s828_s8 = sshll.u32 %s1198_s13, 3 }
   0xf   : > { %872 = vmatpush3.bf16.msra.mxu0 %v962_v5  ;;  %v990_v48 = vld [vmem:[%s1194_s1 + $0xb8] sm:$0xff]   ;;  %v823_v4 = vld [vmem:[%s1195_s2] ss:$0 sm:$0xff]  ;;  %s170_s11 = scalar_lea.vmem %s1196_s3, %s828_s8 }
  0x10   : > { %892 = vmatpush3.bf16.msra.mxu1 %v963_v6  ;;  %873 = vmatprep.subr.bf16.mxu0 %v1003_v1  ;;  %s1075_s6 = scalar_lea.vmem %s1193_s0, %s947_s26  ;;  %v991_v49 = vld [vmem:[%s1194_s1 + $0xf8] sm:$0xff]  }
  0x11   : > { %893 = vmatprep.subr.bf16.mxu1 %v1003_v1  ;;  %v172_v11 = vld [vmem:[%s1075_s6] sm:$0xf]  ;;  %v190_v12 = vld [vmem:[%s1075_s6 + $0x4] sm:$0x7] }
  0x12   : > { %v754_v13 = vcombine.low %v172_v11, %v190_v12  ;;  %v173_v23 = vld [vmem:[%s1075_s6 + $0x4] sm:$0x3]  ;;  %v994_v39 = vld [vmem:[%s1075_s6 + $0x8] ss:$0 sps:$4 sm:$0x11]  }
  0x13   : > { %874 = vmatpush3.bf16.msra.mxu0 %v964_v7  ;;  %v763_v25 = vcombine.low %v172_v11, %v173_v23  ;;  %v993_v36 = vld [vmem:[%s1075_s6] sm:$0xfc]   ;;  %v558_v46 = vshll.u32 %v994_v39, 16 }
  0x14   : > { %894 = vmatpush3.bf16.msra.mxu1 %v965_v8  ;;  %875 = vmatprep.subr.bf16.mxu0 %v1003_v1  ;;  %v216_v16 = vshll.u32 %v754_v13, 16  ;;  %v214_v20 = vshrl.u32 %v754_v13, 16  ;;  %v550_v40 = vshrl.u32 %v993_v36, 16  ;;  %v553_v41 = vshll.u32 %v993_v36, 16  ;;  %v992_v47 = vld [vmem:[%s1075_s6] sm:$0xfc]  }
  0x15   : > { %895 = vmatprep.subr.bf16.mxu1 %v1003_v1  ;;  %v560_v51 = vrot.slane %v558_v46, 3  ;;  %v427_v52 = vrot.slane %v992_v47, 2 }
  0x16   : > { %v218_v21 = vrot.slane %v216_v16, 1  ;;  %v552_v44 = vrot.slane %v550_v40, 2  ;;  %v555_v45 = vrot.slane %v553_v41, 3 }
  0x17   : > { %876 = vmatpush3.bf16.msra.mxu0 %v966_v9 }
  0x18   : > { %896 = vmatpush3.bf16.msra.mxu1 %v967_v10  ;;  %877 = vmatprep.subr.bf16.mxu0 %v1003_v1  ;;  %v219_v24 = vor.u32 %v218_v21, %v214_v20  ;;  %v556_v50 = vor.u32 %v555_v45, %v552_v44 }
  0x19   : > { %897 = vmatprep.subr.bf16.mxu1 %v1003_v1 }
  0x1a   : > { %v561_v53 = vsel %vm548_vm1, %v556_v50, %v560_v51 }
  0x1b   : > { %878 = vmatpush3.bf16.msra.mxu0 %v968_v14 }
  0x1c   : > { %898 = vmatpush3.bf16.msra.mxu1 %v969_v15  ;;  %879 = vmatprep.subr.bf16.mxu0 %v1003_v1 }
  0x1d   : > { %899 = vmatprep.subr.bf16.mxu1 %v1003_v1 }
  0x1f   : > { %880 = vmatpush3.bf16.msra.mxu0 %v970_v17 }
  0x20   : > { %900 = vmatpush3.bf16.msra.mxu1 %v971_v18  ;;  %881 = vmatprep.subr.bf16.mxu0 %v1003_v1 }
  0x21   : > { %901 = vmatprep.subr.bf16.mxu1 %v1003_v1 }
  0x23   : > { %882 = vmatpush3.bf16.msra.mxu0 %v972_v19 }
  0x24   : > { %902 = vmatpush3.bf16.msra.mxu1 %v973_v22  ;;  %907 = vmatprep.subr.bf16.mxu0 %v1003_v1 }
  0x25   : > { %927 = vmatprep.subr.bf16.mxu1 %v1003_v1 }
  0x26   : > { %884 = vmatmul.mubr.bf16.vlgmr.msra.gmra.mrb[0].mxu0 %v219_v24 }
  0x27   : > { %904 = vmatmul.mubr.bf16.vlgmr.msra.gmra.mrb[0].mxu1 %v763_v25  ;;  %908 = vmatpush3.bf16.msra.mxu0 %v976_v26 }
  0x28   : > { %928 = vmatpush3.bf16.msra.mxu1 %v977_v27  ;;  %909 = vmatprep.subr.bf16.mxu0 %v1003_v1 }
  0x29   : > { %929 = vmatprep.subr.bf16.mxu1 %v1003_v1  ;;  %923 = vmatprep.mubr.msk.bf16.mxu0 %vm1004_vm0, %v1003_v1 }
  0x2a   : > { %943 = vmatprep.mubr.msk.bf16.mxu1 %vm1004_vm0, %v1003_v1 }
  0x2b   : > { %910 = vmatpush3.bf16.msra.mxu0 %v978_v28 }
  0x2c   : > { %930 = vmatpush3.bf16.msra.mxu1 %v979_v29  ;;  %911 = vmatprep.subr.bf16.mxu0 %v1003_v1 }
  0x2d   : > { %931 = vmatprep.subr.bf16.mxu1 %v1003_v1 }
  0x2f   : > { %912 = vmatpush3.bf16.msra.mxu0 %v980_v30 }
  0x30   : > { %932 = vmatpush3.bf16.msra.mxu1 %v981_v31  ;;  %913 = vmatprep.subr.bf16.mxu0 %v1003_v1 }
  0x31   : > { %933 = vmatprep.subr.bf16.mxu1 %v1003_v1 }
  0x33   : > { %914 = vmatpush3.bf16.msra.mxu0 %v982_v32 }
  0x34   : > { %934 = vmatpush3.bf16.msra.mxu1 %v983_v33  ;;  %915 = vmatprep.subr.bf16.mxu0 %v1003_v1 }
  0x35   : > { %935 = vmatprep.subr.bf16.mxu1 %v1003_v1 }
  0x37   : > { %916 = vmatpush3.bf16.msra.mxu0 %v984_v34 }
  0x38   : > { %936 = vmatpush3.bf16.msra.mxu1 %v985_v35  ;;  %917 = vmatprep.subr.bf16.mxu0 %v1003_v1 }
  0x39   : > { %937 = vmatprep.subr.bf16.mxu1 %v1003_v1 }
  0x3b   : > { %918 = vmatpush3.bf16.msra.mxu0 %v986_v37 }
  0x3c   : > { %938 = vmatpush3.bf16.msra.mxu1 %v987_v38  ;;  %919 = vmatprep.subr.bf16.mxu0 %v1003_v1 }
  0x3d   : > { %939 = vmatprep.subr.bf16.mxu1 %v1003_v1 }
  0x3f   : > { %920 = vmatpush3.bf16.msra.mxu0 %v988_v42 }
  0x40   : > { %940 = vmatpush3.bf16.msra.mxu1 %v989_v43  ;;  %921 = vmatprep.subr.bf16.mxu0 %v1003_v1 }
  0x41   : > { %941 = vmatprep.subr.bf16.mxu1 %v1003_v1 }
  0x43   : > { %922 = vmatpush3.bf16.msra.mxu0 %v990_v48 }
  0x44   : > { %942 = vmatpush3.bf16.msra.mxu1 %v991_v49 }
  0x46   : > { %924 = vmatmul.mubr.bf16.vlgmr.msra.gmra.mrb[4].mxu0 %v427_v52 }
  0x47   : > { %944 = vmatmul.mubr.bf16.vlgmr.msra.gmra.mrb[4].mxu1 %v561_v53 }
  0xf9   : > { %v303_v54 = vpop.f32.mrb[0].mxu0 }
  0xfa   : > { %v396_v55 = vpop.f32.mrb[0].mxu1  ;;  %v885_v56 = vpop.f32.mrb[1].mxu0 }
  0xfb   : > { %v397_v57 = vadd.f32 %v396_v55, %v303_v54  ;;  %v905_v58 = vpop.f32.mrb[1].mxu1  ;;  %v306_v59 = vpop.f32.mrb[2].mxu0 }
  0xfc   : > { %v399_v60 = vpop.f32.mrb[2].mxu1  ;;  %v886_v61 = vpop.f32.mrb[3].mxu0 }
  0xfd   : > { %v400_v62 = vadd.f32 %v399_v60, %v306_v59  ;;  %v906_v63 = vpop.f32.mrb[3].mxu1 }
 0x119   : > { %v511_v0 = vpop.f32.mrb[4].mxu0 }
 0x11a   : > { %v518_v1 = vadd.f32 %v511_v0, %v397_v57  ;;  %v645_v2 = vpop.f32.mrb[4].mxu1  ;;  %v925_v3 = vpop.f32.mrb[5].mxu0 }
 0x11b   : > { %v945_v5 = vpop.f32.mrb[5].mxu1  ;;  %v514_v6 = vpop.f32.mrb[6].mxu0 }
 0x11c   : > { %v652_v7 = vadd.f32 %v645_v2, %v518_v1  ;;  %v519_v8 = vadd.f32 %v514_v6, %v400_v62  ;;  %v648_v9 = vpop.f32.mrb[6].mxu1  ;;  %v926_v10 = vpop.f32.mrb[7].mxu0 }
 0x11d   : > { %v946_v11 = vpop.f32.mrb[7].mxu1 }
 0x11e   : > { %v661_v12 = vadd.f32 %v823_v4, %v652_v7  ;;  %v653_v13 = vadd.f32 %v648_v9, %v519_v8 }
 0x120   : > { %v663_v14 = vmax.f32 %v661_v12, 0.0  ;;  %v662_v15 = vadd.f32 %v823_v4, %v653_v13 }
 0x122   : > { %v829_v16 = vpack.c.bf16 %v663_v14, %v663_v14  ;;  %v664_v17 = vmax.f32 %v662_v15, 0.0 }
 0x124   : > { %673 = vst [vmem:[%s170_s11] sm:$0xf] %v829_v16  ;;  %v830_v18 = vpack.c.bf16 %v664_v17, %v664_v17 }
 0x126   : > { %674 = vst [vmem:[%s170_s11 + $0x4] sm:$0x3] %v830_v18 }
 0x127 PF: > { %s13_s12 = sadd.s32 1, %s1001_s12  }
 0x128   : > { %p10_p4 = scmp.ge.s32.totalorder %s13_s12, 4  }
 0x12a   :  { %12 = sbr.rel (!%p10_p4) target bundleno = 1 (0x1), region = 65 }

// kernel: alexnetmap_v3_forward.21
= control target key start
LH: loop header
LB: loop body
LE: loop exit
PB: predicated region body
PF: predicated region fallthrough
CT: control target
= control target key end

     0   :  { %s2874_s12 = smov 0   ;;  %s3469_s0 = inlined_call_operand.vmem [shape: bf16[2,102,128], index: 0, kind: input, shape index: {}]   ;;  %s3470_s1 = inlined_call_operand.vmem [shape: bf16[9,128,128], index: 1, kind: input, shape index: {}]   ;;  %s3471_s2 = inlined_call_operand.vmem [shape: f32[1,128], index: 2, kind: input, shape index: {}]   ;;  %s3472_s3 = inlined_call_operand.vmem [shape: bf16[2,80,128], index: 3, kind: output, shape index: {}]  }
   0x1 LB: > { %s1998_s13 = sadd.s32 4294967295, %s2850_s12   ;;  %p2002_p0 = scmp.ge.s32.totalorder %s2850_s12, 1  ;;  %s2850_s12 = sphi %s2874_s12, %s13_s12  }
   0x2   : > { %p137_p1 = scmp.lt.s32.totalorder %s2850_s12, 3 }
   0x4   : > { %p138_p2 = pnand %p2002_p0, %p137_p1 }
   0x5   : > { %v2749_v0 = vld [vmem:[%s3470_s1 + $0x40] sm:$0xff] (!%p138_p2)   ;;  %v2852_v1 = vmov (!%p138_p2), 0.0   ;;  %v2751_v3 = vld [vmem:[%s3470_s1 + $0x48] sm:$0xff] (!%p138_p2)   ;;  %vm2853_vm0 = vmmov (!%p138_p2), 0   ;;  %p161_p3 = scmp.lt.s32.totalorder (!%p138_p2), %s1998_s13, 1  ;;  %v2753_v5 = vld [vmem:[%s3470_s1 + $0x50] sm:$0xff] (!%p138_p2)  }
   0x6   : > { %141 = sbr.rel (%p138_p2) target bundleno = 435 (0x1b3), region = 32  ;;  %2397 = vmatprep.subr.bf16.mxu0 (!%p138_p2), %v2852_v1  ;;  %2433 = vmatprep.subr.bf16.mxu1 (!%p138_p2), %v2852_v1  ;;  %v2750_v2 = vld [vmem:[%s3470_s1] sm:$0xff] (!%p138_p2)   ;;  %v2752_v4 = vld [vmem:[%s3470_s1 + $0x8] sm:$0xff] (!%p138_p2)   ;;  %v2754_v6 = vld [vmem:[%s3470_s1 + $0x10] sm:$0xff] (!%p138_p2)   ;;  %vm244_vm1 = vsmask.f32 (!%p138_p2), 7424 }
   0x7   : > { %2398 = vmatpush3.bf16.msra.mxu0 (!%p138_p2), %v2749_v0  ;;  %2413 = vmatprep.mubr.msk.bf16.mxu0 (!%p138_p2), %vm2853_vm0, %v2852_v1  ;;  %v2755_v7 = vld [vmem:[%s3470_s1 + $0x58] sm:$0xff] (!%p138_p2)   ;;  %v2757_v9 = vld [vmem:[%s3470_s1 + $0x60] sm:$0xff] (!%p138_p2)   ;;  %v2759_v13 = vld [vmem:[%s3470_s1 + $0x68] sm:$0xff] (!%p138_p2)   ;;  %vm562_vm2 = vcmask (!%p138_p2), 1046528   ;;  %vm934_vm3 = vsmask.f32 (!%p138_p2), 6400 }
   0x8   : > { %2434 = vmatpush3.bf16.msra.mxu1 (!%p138_p2), %v2750_v2  ;;  %2399 = vmatprep.subr.bf16.mxu0 (!%p138_p2), %v2852_v1  ;;  %v2756_v8 = vld [vmem:[%s3470_s1 + $0x18] sm:$0xff] (!%p138_p2)   ;;  %v2758_v10 = vld [vmem:[%s3470_s1 + $0x20] sm:$0xff] (!%p138_p2)   ;;  %v2760_v16 = vld [vmem:[%s3470_s1 + $0x28] sm:$0xff] (!%p138_p2)   ;;  %vm1145_vm4 = vcmask (!%p138_p2), 1045504   ;;  %vm1517_vm5 = vsmask.f32 (!%p138_p2), 5376 }
   0x9   : > { %2435 = vmatprep.subr.bf16.mxu1 (!%p138_p2), %v2852_v1  ;;  %2449 = vmatprep.mubr.msk.bf16.mxu1 (!%p138_p2), %vm2853_vm0, %v2852_v1  ;;  %v2761_v18 = vld [vmem:[%s3470_s1 + $0x70] sm:$0xff] (!%p138_p2)   ;;  %v2763_v23 = vld [vmem:[%s3470_s1 + $0x78] sm:$0xff] (!%p138_p2)   ;;  %v2767_v28 = vld [vmem:[%s3470_s1 + $0x80] sm:$0xff] (!%p138_p2)   ;;  %vm1728_vm6 = vcmask (!%p138_p2), 1044480  }
   0xa   : > { %v2762_v22 = vld [vmem:[%s3470_s1 + $0x30] sm:$0xff] (!%p138_p2)   ;;  %v2764_v24 = vld [vmem:[%s3470_s1 + $0x38] sm:$0xff] (!%p138_p2)   ;;  %v2770_v32 = vld [vmem:[%s3470_s1 + $0xc0] sm:$0xff] (!%p138_p2)  }
   0xb   : > { %2400 = vmatpush3.bf16.msra.mxu0 (!%p138_p2), %v2751_v3  ;;  %v2768_v34 = vld [vmem:[%s3470_s1 + $0x88] sm:$0xff] (!%p138_p2)   ;;  %v2771_v40 = vld [vmem:[%s3470_s1 + $0x90] sm:$0xff] (!%p138_p2)   ;;  %v2774_v44 = vld [vmem:[%s3470_s1 + $0x98] sm:$0xff] (!%p138_p2)  }
   0xc   : > { %2436 = vmatpush3.bf16.msra.mxu1 (!%p138_p2), %v2752_v4  ;;  %2401 = vmatprep.subr.bf16.mxu0 (!%p138_p2), %v2852_v1  ;;  %v2772_v37 = vld [vmem:[%s3470_s1 + $0xc8] sm:$0xff] (!%p138_p2)   ;;  %v2775_v42 = vld [vmem:[%s3470_s1 + $0xd0] sm:$0xff] (!%p138_p2)   ;;  %v2777_v47 = vld [vmem:[%s3470_s1 + $0xd8] sm:$0xff] (!%p138_p2)  }
   0xd   : > { %s3474_s13 = smov (!%p161_p3, %s1998_s13), 1  ;;  %2437 = vmatprep.subr.bf16.mxu1 %v2852_v1  ;;  %v2776_v48 = vld [vmem:[%s3470_s1 + $0xa0] sm:$0xff]   ;;  %v2780_v56 = vld [vmem:[%s3470_s1 + $0xa8] sm:$0xff]   ;;  %v2782_v61 = vld [vmem:[%s3470_s1 + $0xb0] sm:$0xff]  }
   0xe   : > { %s2737_s26 = smul.u32 52, %s3474_s13  ;;  %v2779_v52 = vld [vmem:[%s3470_s1 + $0xe0] sm:$0xff]   ;;  %v2781_v57 = vld [vmem:[%s3470_s1 + $0xe8] sm:$0xff]   ;;  %v2784_v62 = vld [vmem:[%s3470_s1 + $0xf0] sm:$0xff]  }
   0xf   : > { %2402 = vmatpush3.bf16.msra.mxu0 %v2753_v5  ;;  %v2785_v63 = vld [vmem:[%s3470_s1 + $0xb8] sm:$0xff]   ;;  %s2738_s18 = smul.u32 40, %s3474_s13 }
  0x10   : > { %2438 = vmatpush3.bf16.msra.mxu1 %v2754_v6  ;;  %2403 = vmatprep.subr.bf16.mxu0 %v2852_v1  ;;  %s2924_s6 = scalar_lea.vmem %s3469_s0, %s2737_s26  ;;  %v2786_v3 = vld [vmem:[%s3470_s1 + $0xf8] sm:$0xff]  }
  0x11   : > { %2439 = vmatprep.subr.bf16.mxu1 %v2852_v1  ;;  %v172_v11 = vld [vmem:[%s2924_s6] sm:$0xf]  ;;  %v2936_v12 = vld [vmem:[%s2924_s6 + $0x4] sm:$0xf]  ;;  %v2943_v15 = vld [vmem:[%s2924_s6 + $0x8] sm:$0xff]   ;;  %s3455_s21 = scalar_lea.vmem %s3472_s3, %s2738_s18 }
  0x12   : > { %v2021_v14 = vcombine.low %v172_v11, %v2936_v12  ;;  %v253_v21 = vshll.u32 %v2943_v15, 16  ;;  %v2966_v27 = vld [vmem:[%s2924_s6 + $0x10] sm:$0xff]   ;;  %v257_v30 = vshrl.u32 %v2943_v15, 16  ;;  %v2982_v33 = vld [vmem:[%s2924_s6 + $0x18] sm:$0xff]   ;;  %v3011_v45 = vld [vmem:[%s2924_s6 + $0x20] sm:$0xff]  }
  0x13   : > { %2404 = vmatpush3.bf16.msra.mxu0 %v2755_v7  ;;  %v261_v31 = vshll.u32 %v2966_v27, 16  ;;  %v269_v38 = vshll.u32 %v2982_v33, 16  ;;  %v265_v41 = vshrl.u32 %v2966_v27, 16  ;;  %v273_v50 = vshrl.u32 %v2982_v33, 16  ;;  %v541_v4 = vld [vmem:[%s2924_s6] sm:$0xe] }
  0x14   : > { %2440 = vmatpush3.bf16.msra.mxu1 %v2756_v8  ;;  %2405 = vmatprep.subr.bf16.mxu0 %v2852_v1  ;;  %v248_v17 = vshll.u32 %v2021_v14, 16  ;;  %v246_v19 = vshrl.u32 %v2021_v14, 16  ;;  %v255_v26 = vrot.slane %v253_v21, 1  ;;  %v277_v51 = vshll.u32 %v3011_v45, 16  ;;  %v710_v5 = vld [vmem:[%s2924_s6 + $0x4] sm:$0xe] }
  0x15   : > { %2441 = vmatprep.subr.bf16.mxu1 %v2852_v1  ;;  %v263_v36 = vrot.slane %v261_v31, 1  ;;  %v271_v43 = vrot.slane %v269_v38, 1  ;;  %v3034_v53 = vld [vmem:[%s2924_s6 + $0x28] ss:$0 sps:$4 sm:$0x11]   ;;  %v281_v59 = vshrl.u32 %v3011_v45, 16  ;;  %v2059_v8 = vcombine.low %v541_v4, %v2936_v12 }
  0x16   : > { %v250_v20 = vrot.slane %v248_v17, 1  ;;  %v259_v35 = vor.u32 %v257_v30, %v255_v26  ;;  %v279_v55 = vrot.slane %v277_v51, 1  ;;  %v285_v60 = vshll.u32 %v3034_v53, 16  ;;  %v3076_v6 = vld [vmem:[%s2924_s6 + $0x8] sm:$0xf]  ;;  %v2790_v17 = vld [vmem:[%s3470_s1 + $0x100] sm:$0xff]  }
  0x17   : > { %2406 = vmatpush3.bf16.msra.mxu0 %v2757_v9  ;;  %v267_v46 = vor.u32 %v265_v41, %v263_v36  ;;  %v275_v54 = vor.u32 %v273_v50, %v271_v43  ;;  %v3082_v9 = vcombine.low %v710_v5, %v3076_v6  ;;  %v563_v11 = vrot.slane %v2059_v8, 1  ;;  %v2797_v30 = vld [vmem:[%s3470_s1 + $0x118] sm:$0xff]   ;;  %v2804_v41 = vld [vmem:[%s3470_s1 + $0x168] sm:$0xff]  }
  0x18   : > { %2442 = vmatpush3.bf16.msra.mxu1 %v2758_v10  ;;  %2407 = vmatprep.subr.bf16.mxu0 %v2852_v1  ;;  %v251_v25 = vor.u32 %v250_v20, %v246_v19  ;;  %v264_v39 = vsel %vm244_vm1, %v259_v35, %v263_v36  ;;  %v283_v0 = vor.u32 %v281_v59, %v279_v55  ;;  %v287_v2 = vrot.slane %v285_v60, 1  ;;  %v3085_v10 = vld [vmem:[%s2924_s6 + $0xc] sm:$0xff]   ;;  %v3103_v19 = vld [vmem:[%s2924_s6 + $0x14] sm:$0xff]   ;;  %v3156_v36 = vld [vmem:[%s2924_s6 + $0x24] sm:$0xff]  }
  0x19   : > { %2443 = vmatprep.subr.bf16.mxu1 %v2852_v1  ;;  %v272_v49 = vsel %vm244_vm1, %v267_v46, %v271_v43  ;;  %v280_v58 = vsel %vm244_vm1, %v275_v54, %v279_v55  ;;  %v564_v12 = vrot.slane %v2943_v15, 1  ;;  %v2791_v20 = vld [vmem:[%s3470_s1 + $0x108] sm:$0xff]   ;;  %v566_v21 = vrot.slane %v2966_v27, 1  ;;  %v2807_v46 = vld [vmem:[%s3470_s1 + $0x170] sm:$0xff]   ;;  %v2809_v54 = vld [vmem:[%s3470_s1 + $0x178] sm:$0xff]  }
  0x1a   : > { %v256_v29 = vsel %vm244_vm1, %v251_v25, %v255_v26  ;;  %v288_v7 = vsel %vm244_vm1, %v283_v0, %v287_v2  ;;  %v2794_v25 = vld [vmem:[%s3470_s1 + $0x110] sm:$0xff]   ;;  %v570_v38 = vrot.slane %v3011_v45, 1  ;;  %v2806_v43 = vld [vmem:[%s2924_s6 + $0x2c] ss:$0 sps:$4 sm:$0x11]   ;;  %v944_v50 = vshrl.u32 %v3085_v10, 16 }
  0x1b   : > { %2408 = vmatpush3.bf16.msra.mxu0 %v2759_v13  ;;  %v766_v13 = vrot.slane %v3082_v9, 1  ;;  %v947_v51 = vshll.u32 %v3085_v10, 16  ;;  %v1124_v55 = vld [vmem:[%s2924_s6 + $0x4] sm:$0xc]  ;;  %v953_v2 = vshrl.u32 %v3103_v19, 16  ;;  %v1147_v5 = vrot.slane %v3085_v10, 2 }
  0x1c   : > { %2444 = vmatpush3.bf16.msra.mxu1 %v2760_v16  ;;  %2409 = vmatprep.subr.bf16.mxu0 %v2852_v1  ;;  %v565_v16 = vsel %vm562_vm2, %v563_v11, %v564_v12  ;;  %v946_v59 = vrot.slane %v944_v50, 1 }
  0x1d   : > { %2445 = vmatprep.subr.bf16.mxu1 %v2852_v1  ;;  %v949_v60 = vrot.slane %v947_v51, 2  ;;  %v955_v8 = vrot.slane %v953_v2, 1  ;;  %v3301_v51 = vld [vmem:[%s2924_s6 + $0x10] sm:$0xff]  }
  0x1f   : > { %2410 = vmatpush3.bf16.msra.mxu0 %v2761_v18  ;;  %v950_v0 = vor.u32 %v949_v60, %v946_v59  ;;  %v1530_v59 = vshll.u32 %v3301_v51, 16  ;;  %v2827_v60 = vld [vmem:[%s3470_s1 + $0x1f8] sm:$0xff]  }
  0x20   : > { %2446 = vmatpush3.bf16.msra.mxu1 %v2762_v22  ;;  %2411 = vmatprep.subr.bf16.mxu0 %v2852_v1  ;;  %v769_v22 = vrot.slane %v3103_v19, 1 }
  0x21   : > { %2447 = vmatprep.subr.bf16.mxu1 %v2852_v1 }
  0x23   : > { %2412 = vmatpush3.bf16.msra.mxu0 %v2763_v23  ;;  %v2795_v23 = vld [vmem:[%s3470_s1 + $0x148] sm:$0xff]  }
  0x24   : > { %2448 = vmatpush3.bf16.msra.mxu1 %v2764_v24  ;;  %2469 = vmatprep.subr.bf16.mxu0 %v2852_v1  ;;  %v567_v24 = vsel %vm562_vm2, %v564_v12, %v566_v21  ;;  %v2813_v12 = vld [vmem:[%s3470_s1 + $0x1c0] sm:$0xff]  }
  0x25   : > { %2505 = vmatprep.subr.bf16.mxu1 %v2852_v1 }
  0x26   : > { %2414 = vmatmul.mubr.bf16.vlgmr.msra.gmra.mrb[0].mxu0 %v256_v29  ;;  %v568_v29 = vrot.slane %v2982_v33, 1 }
  0x27   : > { %2450 = vmatmul.mubr.bf16.vlgmr.msra.gmra.mrb[0].mxu1 %v2021_v14  ;;  %2470 = vmatpush3.bf16.msra.mxu0 %v2767_v28  ;;  %v767_v14 = vrot.slane %v3085_v10, 1  ;;  %v2798_v28 = vld [vmem:[%s3470_s1 + $0x150] sm:$0xff]   ;;  %v2812_v10 = vld [vmem:[%s3470_s1 + $0x188] sm:$0xff]  }
  0x28   : > { %2471 = vmatprep.subr.bf16.mxu0 %v2852_v1  ;;  %2417 = vmatprep.mubr.msk.bf16.mxu0 %vm2853_vm0, %v2852_v1 }
  0x29   : > { %2453 = vmatprep.mubr.msk.bf16.mxu1 %vm2853_vm0, %v2852_v1  ;;  %2506 = vmatpush3.bf16.msra.mxu1 %v2770_v32  ;;  %v768_v18 = vsel %vm562_vm2, %v766_v13, %v767_v14  ;;  %v770_v26 = vsel %vm562_vm2, %v767_v14, %v769_v22  ;;  %v2800_v32 = vld [vmem:[%s3470_s1 + $0x158] sm:$0xff]  }
  0x2a   : > { %2507 = vmatprep.subr.bf16.mxu1 %v2852_v1 }
  0x2b   : > { %2472 = vmatpush3.bf16.msra.mxu0 %v2768_v34  ;;  %v2799_v34 = vld [vmem:[%s3470_s1 + $0x120] sm:$0xff]  }
  0x2c   : > { %2473 = vmatprep.subr.bf16.mxu0 %v2852_v1 }
  0x2d   : > { %2508 = vmatpush3.bf16.msra.mxu1 %v2772_v37  ;;  %v2802_v37 = vld [vmem:[%s3470_s1 + $0x160] sm:$0xff]  }
  0x2e   : > { %2418 = vmatmul.mubr.bf16.gmra.mrb[4].mxu0 %v264_v39  ;;  %2509 = vmatprep.subr.bf16.mxu1 %v2852_v1  ;;  %v2803_v39 = vld [vmem:[%s3470_s1 + $0x128] sm:$0xff]  }
  0x2f   : > { %2454 = vmatmul.mubr.bf16.gmra.mrb[4].mxu1 %v2943_v15  ;;  %2474 = vmatpush3.bf16.msra.mxu0 %v2771_v40  ;;  %v2793_v15 = vld [vmem:[%s3470_s1 + $0x140] sm:$0xff]   ;;  %v773_v40 = vrot.slane %v3156_v36, 1 }
  0x30   : > { %2421 = vmatprep.mubr.msk.bf16.mxu0 %vm2853_vm0, %v2852_v1  ;;  %2457 = vmatprep.mubr.msk.bf16.mxu1 %vm2853_vm0, %v2852_v1 }
  0x31   : > { %2475 = vmatprep.subr.bf16.mxu0 %v2852_v1  ;;  %2510 = vmatpush3.bf16.msra.mxu1 %v2775_v42  ;;  %v571_v42 = vsel %vm562_vm2, %v568_v29, %v570_v38 }
  0x32   : > { %2511 = vmatprep.subr.bf16.mxu1 %v2852_v1 }
  0x33   : > { %2476 = vmatpush3.bf16.msra.mxu0 %v2774_v44 }
  0x34   : > { %2477 = vmatprep.subr.bf16.mxu0 %v2852_v1 }
  0x35   : > { %2512 = vmatpush3.bf16.msra.mxu1 %v2777_v47  ;;  %v572_v47 = vrot.slane %v3034_v53, 1  ;;  %v2808_v53 = vld [vmem:[%s3470_s1 + $0x138] sm:$0xff]  }
  0x36   : > { %2422 = vmatmul.mubr.bf16.gmra.mrb[8].mxu0 %v272_v49  ;;  %2513 = vmatprep.subr.bf16.mxu1 %v2852_v1  ;;  %v939_v49 = vshll.u32 %v3082_v9, 16 }
  0x37   : > { %2458 = vmatmul.mubr.bf16.gmra.mrb[8].mxu1 %v2966_v27  ;;  %2478 = vmatpush3.bf16.msra.mxu0 %v2776_v48  ;;  %v3129_v27 = vld [vmem:[%s2924_s6 + $0x1c] sm:$0xff]   ;;  %v936_v48 = vshrl.u32 %v3082_v9, 16 }
  0x38   : > { %2425 = vmatprep.mubr.msk.bf16.mxu0 %vm2853_vm0, %v2852_v1  ;;  %2461 = vmatprep.mubr.msk.bf16.mxu1 %vm2853_vm0, %v2852_v1  ;;  %v771_v31 = vrot.slane %v3129_v27, 1  ;;  %v962_v14 = vshrl.u32 %v3129_v27, 16 }
  0x39   : > { %2479 = vmatprep.subr.bf16.mxu0 %v2852_v1  ;;  %2514 = vmatpush3.bf16.msra.mxu1 %v2779_v52  ;;  %v775_v52 = vrot.slane %v2806_v43, 1  ;;  %v2822_v43 = vld [vmem:[%s3470_s1 + $0x1e8] sm:$0xff]  }
  0x3a   : > { %2515 = vmatprep.subr.bf16.mxu1 %v2852_v1  ;;  %v772_v35 = vsel %vm562_vm2, %v769_v22, %v771_v31  ;;  %v774_v44 = vsel %vm562_vm2, %v771_v31, %v773_v40 }
  0x3b   : > { %2480 = vmatpush3.bf16.msra.mxu0 %v2780_v56  ;;  %v573_v56 = vsel %vm562_vm2, %v570_v38, %v572_v47 }
  0x3c   : > { %2481 = vmatprep.subr.bf16.mxu0 %v2852_v1 }
  0x3d   : > { %2516 = vmatpush3.bf16.msra.mxu1 %v2781_v57  ;;  %v938_v57 = vrot.slane %v936_v48, 1 }
  0x3e   : > { %2426 = vmatmul.mubr.bf16.gmra.mrb[12].mxu0 %v280_v58  ;;  %2517 = vmatprep.subr.bf16.mxu1 %v2852_v1  ;;  %v941_v58 = vrot.slane %v939_v49, 2 }
  0x3f   : > { %2462 = vmatmul.mubr.bf16.gmra.mrb[12].mxu1 %v2982_v33  ;;  %2429 = vmatprep.mubr.msk.bf16.mxu0 %vm2853_vm0, %v2852_v1  ;;  %v569_v33 = vsel %vm562_vm2, %v566_v21, %v568_v29  ;;  %v964_v21 = vrot.slane %v962_v14, 1  ;;  %v1151_v29 = vrot.slane %v3129_v27, 2 }
  0x40   : > { %2465 = vmatprep.mubr.msk.bf16.mxu1 %vm2853_vm0, %v2852_v1  ;;  %2482 = vmatpush3.bf16.msra.mxu0 %v2782_v61  ;;  %v776_v61 = vsel %vm562_vm2, %v773_v40, %v775_v52  ;;  %v2825_v52 = vld [vmem:[%s3470_s1 + $0x1f0] sm:$0xff]  }
  0x41   : > { %2518 = vmatpush3.bf16.msra.mxu1 %v2784_v62  ;;  %2483 = vmatprep.subr.bf16.mxu0 %v2852_v1  ;;  %v2139_v62 = vcombine.low %v1124_v55, %v3076_v6  ;;  %v2826_v55 = vld [vmem:[%s3470_s1 + $0x1b8] sm:$0xff]  }
  0x42   : > { %2519 = vmatprep.subr.bf16.mxu1 %v2852_v1 }
  0x43   : > { %v1146_v4 = vrot.slane %v2139_v62, 2 }
  0x44   : > { %2484 = vmatpush3.bf16.msra.mxu0 %v2785_v63  ;;  %v942_v63 = vor.u32 %v941_v58, %v938_v57  ;;  %v1527_v58 = vshrl.u32 %v3301_v51, 16 }
  0x45   : > { %2520 = vmatpush3.bf16.msra.mxu1 %v2786_v3  ;;  %2541 = vmatprep.subr.bf16.mxu0 %v2852_v1  ;;  %v956_v3 = vshll.u32 %v3103_v19, 16  ;;  %v1148_v11 = vsel %vm1145_vm4, %v1146_v4, %v1147_v5  ;;  %v3324_v4 = vld [vmem:[%s2924_s6 + $0x18] sm:$0xff]  }
  0x46   : > { %2430 = vmatmul.mubr.bf16.gmra.mrb[16].mxu0 %v288_v7  ;;  %2577 = vmatprep.subr.bf16.mxu1 %v2852_v1  ;;  %v951_v6 = vsel %vm934_vm3, %v942_v63, %v950_v0  ;;  %v2811_v7 = vld [vmem:[%s3470_s1 + $0x180] sm:$0xff]   ;;  %v1529_v2 = vrot.slane %v1527_v58, 2 }
  0x47   : > { %2466 = vmatmul.mubr.bf16.gmra.mrb[16].mxu1 %v3011_v45  ;;  %2485 = vmatprep.mubr.msk.bf16.mxu0 %vm2853_vm0, %v2852_v1  ;;  %v2805_v45 = vld [vmem:[%s3470_s1 + $0x130] sm:$0xff]   ;;  %v958_v9 = vrot.slane %v956_v3, 2  ;;  %v1532_v3 = vrot.slane %v1530_v59, 3 }
  0x48   : > { %2521 = vmatprep.mubr.msk.bf16.mxu1 %vm2853_vm0, %v2852_v1 }
  0x49   : > { %v959_v13 = vor.u32 %v958_v9, %v955_v8  ;;  %v1533_v8 = vor.u32 %v1532_v3, %v1529_v2  ;;  %v1536_v9 = vshrl.u32 %v3324_v4, 16 }
  0x4b   : > { %v1538_v14 = vrot.slane %v1536_v9, 2 }
  0x4e   : > { %2486 = vmatmul.mubr.bf16.vlgmr.msra.gmra.mrb[20].mxu0 %v565_v16  ;;  %v965_v16 = vshll.u32 %v3129_v27, 16 }
  0x4f   : > { %2522 = vmatmul.mubr.bf16.vlgmr.msra.gmra.mrb[20].mxu1 %v768_v18  ;;  %2542 = vmatpush3.bf16.msra.mxu0 %v2790_v17  ;;  %v1149_v17 = vrot.slane %v3103_v19, 2  ;;  %v2815_v18 = vld [vmem:[%s3470_s1 + $0x1c8] sm:$0xff]  }
  0x50   : > { %2543 = vmatprep.subr.bf16.mxu0 %v2852_v1  ;;  %2489 = vmatprep.mubr.msk.bf16.mxu0 %vm2853_vm0, %v2852_v1  ;;  %v967_v22 = vrot.slane %v965_v16, 2 }
  0x51   : > { %2525 = vmatprep.mubr.msk.bf16.mxu1 %vm2853_vm0, %v2852_v1  ;;  %2578 = vmatpush3.bf16.msra.mxu1 %v2793_v15  ;;  %v960_v15 = vsel %vm934_vm3, %v950_v0, %v959_v13  ;;  %v1150_v19 = vsel %vm1145_vm4, %v1147_v5, %v1149_v17  ;;  %v1152_v27 = vsel %vm1145_vm4, %v1149_v17, %v1151_v29  ;;  %v3341_v17 = vld [vmem:[%s2924_s6 + $0x20] sm:$0xff]  }
  0x52   : > { %2579 = vmatprep.subr.bf16.mxu1 %v2852_v1 }
  0x53   : > { %2544 = vmatpush3.bf16.msra.mxu0 %v2791_v20  ;;  %v2814_v20 = vld [vmem:[%s3470_s1 + $0x190] sm:$0xff]  }
  0x54   : > { %2545 = vmatprep.subr.bf16.mxu0 %v2852_v1 }
  0x55   : > { %2580 = vmatpush3.bf16.msra.mxu1 %v2795_v23  ;;  %v2817_v23 = vld [vmem:[%s3470_s1 + $0x1d0] sm:$0xff]  }
  0x56   : > { %2490 = vmatmul.mubr.bf16.gmra.mrb[24].mxu0 %v567_v24  ;;  %2581 = vmatprep.subr.bf16.mxu1 %v2852_v1  ;;  %v968_v24 = vor.u32 %v967_v22, %v964_v21  ;;  %v1545_v21 = vshrl.u32 %v3341_v17, 16  ;;  %v1548_v22 = vshll.u32 %v3341_v17, 16 }
  0x57   : > { %2526 = vmatmul.mubr.bf16.gmra.mrb[24].mxu1 %v770_v26  ;;  %2546 = vmatpush3.bf16.msra.mxu0 %v2794_v25  ;;  %v2816_v25 = vld [vmem:[%s3470_s1 + $0x198] sm:$0xff]   ;;  %v971_v26 = vshrl.u32 %v3156_v36, 16 }
  0x58   : > { %2493 = vmatprep.mubr.msk.bf16.mxu0 %vm2853_vm0, %v2852_v1  ;;  %2529 = vmatprep.mubr.msk.bf16.mxu1 %vm2853_vm0, %v2852_v1  ;;  %v969_v31 = vsel %vm934_vm3, %v959_v13, %v968_v24 }
  0x59   : > { %2547 = vmatprep.subr.bf16.mxu0 %v2852_v1  ;;  %2582 = vmatpush3.bf16.msra.mxu1 %v2798_v28  ;;  %v974_v28 = vshll.u32 %v3156_v36, 16 }
  0x5a   : > { %2583 = vmatprep.subr.bf16.mxu1 %v2852_v1 }
  0x5b   : > { %2548 = vmatpush3.bf16.msra.mxu0 %v2797_v30  ;;  %v2819_v30 = vld [vmem:[%s3470_s1 + $0x1d8] sm:$0xff]  }
  0x5c   : > { %2549 = vmatprep.subr.bf16.mxu0 %v2852_v1 }
  0x5d   : > { %2584 = vmatpush3.bf16.msra.mxu1 %v2800_v32  ;;  %v2818_v32 = vld [vmem:[%s3470_s1 + $0x1a0] sm:$0xff]  }
  0x5e   : > { %2494 = vmatmul.mubr.bf16.gmra.mrb[28].mxu0 %v569_v33  ;;  %2585 = vmatprep.subr.bf16.mxu1 %v2852_v1  ;;  %v973_v33 = vrot.slane %v971_v26, 1  ;;  %v1550_v26 = vrot.slane %v1548_v22, 3 }
  0x5f   : > { %2530 = vmatmul.mubr.bf16.gmra.mrb[28].mxu1 %v772_v35  ;;  %2550 = vmatpush3.bf16.msra.mxu0 %v2799_v34  ;;  %v976_v34 = vrot.slane %v974_v28, 2  ;;  %v2824_v35 = vld [vmem:[%s2924_s6 + $0x2c] ss:$0 sps:$4 sm:$0x33]  }
  0x60   : > { %2497 = vmatprep.mubr.msk.bf16.mxu0 %vm2853_vm0, %v2852_v1  ;;  %2533 = vmatprep.mubr.msk.bf16.mxu1 %vm2853_vm0, %v2852_v1  ;;  %v980_v40 = vshrl.u32 %v2824_v35, 16  ;;  %v3362_v28 = vld [vmem:[%s2924_s6 + $0x28] sm:$0xff]  }
  0x61   : > { %2551 = vmatprep.subr.bf16.mxu0 %v2852_v1  ;;  %2586 = vmatpush3.bf16.msra.mxu1 %v2802_v37  ;;  %v2820_v37 = vld [vmem:[%s3470_s1 + $0x1e0] sm:$0xff]   ;;  %v977_v38 = vor.u32 %v976_v34, %v973_v33  ;;  %v1557_v33 = vshll.u32 %v3362_v28, 16 }
  0x62   : > { %2587 = vmatprep.subr.bf16.mxu1 %v2852_v1  ;;  %v982_v47 = vrot.slane %v980_v40, 1  ;;  %v1356_v40 = vrot.slane %v3362_v28, 2 }
  0x63   : > { %2552 = vmatpush3.bf16.msra.mxu0 %v2803_v39  ;;  %v2821_v39 = vld [vmem:[%s3470_s1 + $0x1a8] sm:$0xff]  }
  0x64   : > { %2553 = vmatprep.subr.bf16.mxu0 %v2852_v1 }
  0x65   : > { %2588 = vmatpush3.bf16.msra.mxu1 %v2804_v41  ;;  %v983_v41 = vshll.u32 %v2824_v35, 16 }
  0x66   : > { %2498 = vmatmul.mubr.bf16.gmra.mrb[32].mxu0 %v571_v42  ;;  %2589 = vmatprep.subr.bf16.mxu1 %v2852_v1  ;;  %v1153_v42 = vrot.slane %v3156_v36, 2  ;;  %v2823_v36 = vld [vmem:[%s3470_s1 + $0x1b0] sm:$0xff]  }
  0x67   : > { %2534 = vmatmul.mubr.bf16.gmra.mrb[32].mxu1 %v774_v44  ;;  %2501 = vmatprep.mubr.msk.bf16.mxu0 %vm2853_vm0, %v2852_v1  ;;  %v1293_v44 = vld [vmem:[%s2924_s6 + $0x8] sm:$0xc]  ;;  %v985_v48 = vrot.slane %v983_v41, 2 }
  0x68   : > { %2537 = vmatprep.mubr.msk.bf16.mxu1 %vm2853_vm0, %v2852_v1  ;;  %2554 = vmatpush3.bf16.msra.mxu0 %v2805_v45  ;;  %v3290_v45 = vld [vmem:[%s2924_s6 + $0xc] sm:$0xf]  ;;  %v1154_v49 = vsel %vm1145_vm4, %v1151_v29, %v1153_v42  ;;  %v1354_v29 = vrot.slane %v3341_v17, 2 }
  0x69   : > { %2590 = vmatpush3.bf16.msra.mxu1 %v2807_v46  ;;  %2555 = vmatprep.subr.bf16.mxu0 %v2852_v1  ;;  %v978_v46 = vsel %vm934_vm3, %v968_v24, %v977_v38  ;;  %v2164_v50 = vcombine.low %v1293_v44, %v3290_v45  ;;  %v2838_v41 = vld [vmem:[%s3470_s1 + $0x228] sm:$0xff]  }
  0x6a   : > { %2591 = vmatprep.subr.bf16.mxu1 %v2852_v1 }
  0x6b   : > { %v1522_v57 = vshll.u32 %v2164_v50, 16  ;;  %v1349_v5 = vrot.slane %v2164_v50, 2 }
  0x6c   : > { %2556 = vmatpush3.bf16.msra.mxu0 %v2808_v53  ;;  %v986_v53 = vor.u32 %v985_v48, %v982_v47  ;;  %v2840_v47 = vld [vmem:[%s2924_s6 + $0x30] ss:$0 sps:$4 sm:$0x33]  }
  0x6d   : > { %2592 = vmatpush3.bf16.msra.mxu1 %v2809_v54  ;;  %2613 = vmatprep.subr.bf16.mxu0 %v2852_v1  ;;  %v1155_v54 = vrot.slane %v2824_v35, 2  ;;  %v1524_v0 = vrot.slane %v1522_v57, 3  ;;  %v2836_v35 = vld [vmem:[%s3470_s1 + $0x220] sm:$0xff]  }
  0x6e   : > { %2502 = vmatmul.mubr.bf16.gmra.mrb[36].mxu0 %v573_v56  ;;  %2649 = vmatprep.subr.bf16.mxu1 %v2852_v1  ;;  %v1519_v56 = vshrl.u32 %v2164_v50, 16 }
  0x6f   : > { %2538 = vmatmul.mubr.bf16.gmra.mrb[36].mxu1 %v776_v61  ;;  %2557 = vmatprep.mubr.msk.bf16.mxu0 %vm2853_vm0, %v2852_v1  ;;  %v987_v61 = vsel %vm934_vm3, %v977_v38, %v986_v53  ;;  %v1156_v62 = vsel %vm1145_vm4, %v1153_v42, %v1155_v54  ;;  %v1559_v38 = vrot.slane %v1557_v33, 3  ;;  %v2842_v54 = vld [vmem:[%s3470_s1 + $0x238] sm:$0xff]  }
  0x70   : > { %2593 = vmatprep.mubr.msk.bf16.mxu1 %vm2853_vm0, %v2852_v1  ;;  %v1521_v63 = vrot.slane %v1519_v56, 2 }
  0x76   : > { %2558 = vmatmul.mubr.bf16.vlgmr.msra.gmra.mrb[40].mxu0 %v951_v6  ;;  %v1350_v6 = vrot.slane %v3301_v51, 2 }
  0x77   : > { %2594 = vmatmul.mubr.bf16.vlgmr.msra.gmra.mrb[40].mxu1 %v1148_v11  ;;  %2614 = vmatpush3.bf16.msra.mxu0 %v2811_v7  ;;  %v1525_v7 = vor.u32 %v1524_v0, %v1521_v63  ;;  %v1539_v11 = vshll.u32 %v3324_v4, 16  ;;  %v1732_v0 = vrot.slane %v3324_v4, 3 }
  0x78   : > { %2615 = vmatprep.subr.bf16.mxu0 %v2852_v1  ;;  %2561 = vmatprep.mubr.msk.bf16.mxu0 %vm2853_vm0, %v2852_v1 }
  0x79   : > { %2597 = vmatprep.mubr.msk.bf16.mxu1 %vm2853_vm0, %v2852_v1  ;;  %2650 = vmatpush3.bf16.msra.mxu1 %v2813_v12  ;;  %v1351_v12 = vsel %vm1145_vm4, %v1349_v5, %v1350_v6  ;;  %v1534_v13 = vsel %vm1517_vm5, %v1525_v7, %v1533_v8  ;;  %v1541_v16 = vrot.slane %v1539_v11, 3 }
  0x7a   : > { %2651 = vmatprep.subr.bf16.mxu1 %v2852_v1 }
  0x7b   : > { %2616 = vmatpush3.bf16.msra.mxu0 %v2812_v10  ;;  %v2830_v10 = vld [vmem:[%s3470_s1 + $0x200] sm:$0xff]  }
  0x7c   : > { %2617 = vmatprep.subr.bf16.mxu0 %v2852_v1 }
  0x7d   : > { %2652 = vmatpush3.bf16.msra.mxu1 %v2815_v18  ;;  %v2831_v18 = vld [vmem:[%s3470_s1 + $0x208] sm:$0xff]  }
  0x7e   : > { %2562 = vmatmul.mubr.bf16.gmra.mrb[44].mxu0 %v960_v15  ;;  %2653 = vmatprep.subr.bf16.mxu1 %v2852_v1  ;;  %v1352_v15 = vrot.slane %v3324_v4, 2 }
  0x7f   : > { %2598 = vmatmul.mubr.bf16.gmra.mrb[44].mxu1 %v1150_v19  ;;  %2618 = vmatpush3.bf16.msra.mxu0 %v2814_v20  ;;  %v1542_v20 = vor.u32 %v1541_v16, %v1538_v14 }
  0x80   : > { %2565 = vmatprep.mubr.msk.bf16.mxu0 %vm2853_vm0, %v2852_v1  ;;  %2601 = vmatprep.mubr.msk.bf16.mxu1 %vm2853_vm0, %v2852_v1  ;;  %v1353_v19 = vsel %vm1145_vm4, %v1350_v6, %v1352_v15  ;;  %v1355_v34 = vsel %vm1145_vm4, %v1352_v15, %v1354_v29 }
  0x81   : > { %2619 = vmatprep.subr.bf16.mxu0 %v2852_v1  ;;  %2654 = vmatpush3.bf16.msra.mxu1 %v2817_v23  ;;  %v2833_v23 = vld [vmem:[%s3470_s1 + $0x210] sm:$0xff]   ;;  %v1543_v24 = vsel %vm1517_vm5, %v1533_v8, %v1542_v20 }
  0x82   : > { %2655 = vmatprep.subr.bf16.mxu1 %v2852_v1 }
  0x83   : > { %2620 = vmatpush3.bf16.msra.mxu0 %v2816_v25  ;;  %v1547_v25 = vrot.slane %v1545_v21, 2 }
  0x84   : > { %2621 = vmatprep.subr.bf16.mxu0 %v2852_v1 }
  0x85   : > { %2656 = vmatpush3.bf16.msra.mxu1 %v2819_v30  ;;  %v2835_v30 = vld [vmem:[%s3470_s1 + $0x218] sm:$0xff]  }
  0x86   : > { %2566 = vmatmul.mubr.bf16.gmra.mrb[48].mxu0 %v969_v31  ;;  %2657 = vmatprep.subr.bf16.mxu1 %v2852_v1  ;;  %v1551_v31 = vor.u32 %v1550_v26, %v1547_v25 }
  0x87   : > { %2602 = vmatmul.mubr.bf16.gmra.mrb[48].mxu1 %v1152_v27  ;;  %2622 = vmatpush3.bf16.msra.mxu0 %v2818_v32  ;;  %v1554_v32 = vshrl.u32 %v3362_v28, 16 }
  0x88   : > { %2569 = vmatprep.mubr.msk.bf16.mxu0 %vm2853_vm0, %v2852_v1  ;;  %2605 = vmatprep.mubr.msk.bf16.mxu1 %vm2853_vm0, %v2852_v1  ;;  %v1552_v27 = vsel %vm1517_vm5, %v1542_v20, %v1551_v31 }
  0x89   : > { %2623 = vmatprep.subr.bf16.mxu0 %v2852_v1  ;;  %2658 = vmatpush3.bf16.msra.mxu1 %v2820_v37  ;;  %v1556_v37 = vrot.slane %v1554_v32, 2 }
  0x8a   : > { %2659 = vmatprep.subr.bf16.mxu1 %v2852_v1 }
  0x8b   : > { %2624 = vmatpush3.bf16.msra.mxu0 %v2821_v39  ;;  %v3384_v39 = vld [vmem:[%s2924_s6 + $0x30] ss:$0 sps:$4 sm:$0x77]   ;;  %v1560_v42 = vor.u32 %v1559_v38, %v1556_v37 }
  0x8c   : > { %2625 = vmatprep.subr.bf16.mxu0 %v2852_v1  ;;  %v1566_v44 = vshll.u32 %v3384_v39, 16 }
  0x8d   : > { %2660 = vmatpush3.bf16.msra.mxu1 %v2822_v43  ;;  %v1563_v43 = vshrl.u32 %v3384_v39, 16  ;;  %v1561_v48 = vsel %vm1517_vm5, %v1551_v31, %v1560_v42 }
  0x8e   : > { %2570 = vmatmul.mubr.bf16.gmra.mrb[52].mxu0 %v978_v46  ;;  %2661 = vmatprep.subr.bf16.mxu1 %v2852_v1  ;;  %v1357_v46 = vsel %vm1145_vm4, %v1354_v29, %v1356_v40  ;;  %v1568_v50 = vrot.slane %v1566_v44, 3 }
  0x8f   : > { %2606 = vmatmul.mubr.bf16.gmra.mrb[52].mxu1 %v1154_v49  ;;  %2573 = vmatprep.mubr.msk.bf16.mxu0 %vm2853_vm0, %v2852_v1  ;;  %v2839_v49 = vld [vmem:[%s3470_s1 + $0x230] sm:$0xff]  }
  0x90   : > { %2609 = vmatprep.mubr.msk.bf16.mxu1 %vm2853_vm0, %v2852_v1  ;;  %2626 = vmatpush3.bf16.msra.mxu0 %v2823_v36  ;;  %v1565_v36 = vrot.slane %v1563_v43, 2 }
  0x91   : > { %2662 = vmatpush3.bf16.msra.mxu1 %v2825_v52  ;;  %2627 = vmatprep.subr.bf16.mxu0 %v2852_v1  ;;  %v1358_v52 = vrot.slane %v2840_v47, 2 }
  0x92   : > { %2663 = vmatprep.subr.bf16.mxu1 %v2852_v1  ;;  %v1569_v53 = vor.u32 %v1568_v50, %v1565_v36 }
  0x93   : > { %v1359_v56 = vsel %vm1145_vm4, %v1356_v40, %v1358_v52 }
  0x94   : > { %2628 = vmatpush3.bf16.msra.mxu0 %v2826_v55  ;;  %v1707_v55 = vld [vmem:[%s2924_s6 + $0x8] sm:$0x8]  ;;  %v1570_v58 = vsel %vm1517_vm5, %v1560_v42, %v1569_v53 }
  0x95   : > { %2664 = vmatpush3.bf16.msra.mxu1 %v2827_v60  ;;  %2685 = vmatprep.subr.bf16.mxu0 %v2852_v1  ;;  %v2219_v57 = vcombine.low %v1707_v55, %v3290_v45  ;;  %v1730_v60 = vrot.slane %v3301_v51, 3  ;;  %v1736_v45 = vrot.slane %v3362_v28, 3  ;;  %v1738_v51 = vrot.slane %v3384_v39, 3 }
  0x96   : > { %2574 = vmatmul.mubr.bf16.gmra.mrb[56].mxu0 %v987_v61  ;;  %2721 = vmatprep.subr.bf16.mxu1 %v2852_v1  ;;  %v1734_v61 = vrot.slane %v3341_v17, 3 }
  0x97   : > { %2610 = vmatmul.mubr.bf16.gmra.mrb[56].mxu1 %v1156_v62  ;;  %2629 = vmatprep.mubr.msk.bf16.mxu0 %vm2853_vm0, %v2852_v1  ;;  %v1729_v59 = vrot.slane %v2219_v57, 3  ;;  %v1733_v2 = vsel %vm1728_vm6, %v1730_v60, %v1732_v0  ;;  %v1739_v3 = vsel %vm1728_vm6, %v1736_v45, %v1738_v51 }
  0x98   : > { %2665 = vmatprep.mubr.msk.bf16.mxu1 %vm2853_vm0, %v2852_v1  ;;  %v1737_v63 = vsel %vm1728_vm6, %v1734_v61, %v1736_v45  ;;  %v1735_v5 = vsel %vm1728_vm6, %v1732_v0, %v1734_v61 }
  0x99   : > { %v1731_v62 = vsel %vm1728_vm6, %v1729_v59, %v1730_v60 }
  0x9e   : > { %2630 = vmatmul.mubr.bf16.vlgmr.msra.gmra.mrb[60].mxu0 %v1351_v12 }
  0x9f   : > { %2666 = vmatmul.mubr.bf16.vlgmr.msra.gmra.mrb[60].mxu1 %v1534_v13  ;;  %2686 = vmatpush3.bf16.msra.mxu0 %v2830_v10 }
  0xa0   : > { %2687 = vmatprep.subr.bf16.mxu0 %v2852_v1  ;;  %2633 = vmatprep.mubr.msk.bf16.mxu0 %vm2853_vm0, %v2852_v1 }
  0xa1   : > { %2669 = vmatprep.mubr.msk.bf16.mxu1 %vm2853_vm0, %v2852_v1  ;;  %2729 = vmatpush3.bf16.msra.mxu1 %v2830_v10 }
  0xa2   : > { %2722 = vmatprep.subr.bf16.mxu1 %v2852_v1 }
  0xa3   : > { %2688 = vmatpush3.bf16.msra.mxu0 %v2831_v18 }
  0xa4   : > { %2689 = vmatprep.subr.bf16.mxu0 %v2852_v1 }
  0xa5   : > { %2730 = vmatpush3.bf16.msra.mxu1 %v2831_v18 }
  0xa6   : > { %2634 = vmatmul.mubr.bf16.gmra.mrb[64].mxu0 %v1353_v19  ;;  %2723 = vmatprep.subr.bf16.mxu1 %v2852_v1 }
  0xa7   : > { %2670 = vmatmul.mubr.bf16.gmra.mrb[64].mxu1 %v1543_v24  ;;  %2690 = vmatpush3.bf16.msra.mxu0 %v2833_v23 }
  0xa8   : > { %2637 = vmatprep.mubr.msk.bf16.mxu0 %vm2853_vm0, %v2852_v1  ;;  %2673 = vmatprep.mubr.msk.bf16.mxu1 %vm2853_vm0, %v2852_v1 }
  0xa9   : > { %2691 = vmatprep.subr.bf16.mxu0 %v2852_v1  ;;  %2731 = vmatpush3.bf16.msra.mxu1 %v2833_v23 }
  0xaa   : > { %2724 = vmatprep.subr.bf16.mxu1 %v2852_v1 }
  0xab   : > { %2692 = vmatpush3.bf16.msra.mxu0 %v2835_v30 }
  0xac   : > { %2693 = vmatprep.subr.bf16.mxu0 %v2852_v1 }
  0xad   : > { %2732 = vmatpush3.bf16.msra.mxu1 %v2835_v30 }
  0xae   : > { %2638 = vmatmul.mubr.bf16.gmra.mrb[68].mxu0 %v1355_v34  ;;  %2725 = vmatprep.subr.bf16.mxu1 %v2852_v1 }
  0xaf   : > { %2674 = vmatmul.mubr.bf16.gmra.mrb[68].mxu1 %v1552_v27  ;;  %2694 = vmatpush3.bf16.msra.mxu0 %v2836_v35 }
  0xb0   : > { %2641 = vmatprep.mubr.msk.bf16.mxu0 %vm2853_vm0, %v2852_v1  ;;  %2677 = vmatprep.mubr.msk.bf16.mxu1 %vm2853_vm0, %v2852_v1 }
  0xb1   : > { %2733 = vmatpush3.bf16.msra.mxu1 %v2836_v35  ;;  %2695 = vmatprep.subr.bf16.mxu0 %v2852_v1 }
  0xb2   : > { %2726 = vmatprep.subr.bf16.mxu1 %v2852_v1 }
  0xb3   : > { %2696 = vmatpush3.bf16.msra.mxu0 %v2838_v41 }
  0xb4   : > { %2697 = vmatprep.subr.bf16.mxu0 %v2852_v1 }
  0xb5   : > { %2734 = vmatpush3.bf16.msra.mxu1 %v2838_v41 }
  0xb6   : > { %2642 = vmatmul.mubr.bf16.gmra.mrb[72].mxu0 %v1357_v46  ;;  %2727 = vmatprep.subr.bf16.mxu1 %v2852_v1 }
  0xb7   : > { %2678 = vmatmul.mubr.bf16.gmra.mrb[72].mxu1 %v1561_v48  ;;  %2645 = vmatprep.mubr.msk.bf16.mxu0 %vm2853_vm0, %v2852_v1 }
  0xb8   : > { %2681 = vmatprep.mubr.msk.bf16.mxu1 %vm2853_vm0, %v2852_v1  ;;  %2698 = vmatpush3.bf16.msra.mxu0 %v2839_v49 }
  0xb9   : > { %2735 = vmatpush3.bf16.msra.mxu1 %v2839_v49  ;;  %2699 = vmatprep.subr.bf16.mxu0 %v2852_v1 }
  0xba   : > { %2728 = vmatprep.subr.bf16.mxu1 %v2852_v1 }
  0xbc   : > { %2700 = vmatpush3.bf16.msra.mxu0 %v2842_v54 }
  0xbd   : > { %2736 = vmatpush3.bf16.msra.mxu1 %v2842_v54 }
  0xbe   : > { %2646 = vmatmul.mubr.bf16.gmra.mrb[76].mxu0 %v1359_v56 }
  0xbf   : > { %2682 = vmatmul.mubr.bf16.gmra.mrb[76].mxu1 %v1570_v58  ;;  %2701 = vmatprep.mubr.msk.bf16.mxu0 %vm2853_vm0, %v2852_v1 }
  0xc0   : > { %2713 = vmatprep.mubr.msk.bf16.mxu1 %vm2853_vm0, %v2852_v1 }
  0xc6   : > { %2702 = vmatmul.mubr.bf16.vlgmr.msra.gmra.mrb[80].mxu0 %v1731_v62 }
  0xc7   : > { %2714 = vmatmul.mubr.bf16.vlgmr.msra.gmra.mrb[80].mxu1 %v1737_v63  ;;  %2705 = vmatprep.mubr.msk.bf16.mxu0 %vm2853_vm0, %v2852_v1 }
  0xc8   : > { %2717 = vmatprep.mubr.msk.bf16.mxu1 %vm2853_vm0, %v2852_v1 }
  0xce   : > { %2706 = vmatmul.mubr.bf16.gmra.mrb[84].mxu0 %v1733_v2 }
  0xcf   : > { %2718 = vmatmul.mubr.bf16.gmra.mrb[84].mxu1 %v1739_v3  ;;  %2709 = vmatprep.mubr.msk.bf16.mxu0 %vm2853_vm0, %v2852_v1 }
  0xd6   : > { %2710 = vmatmul.mubr.bf16.gmra.mrb[88].mxu0 %v1735_v5 }
  0xf9   : > { %v376_v6 = vpop.f32.mrb[0].mxu0 }
  0xfa   : > { %v502_v7 = vpop.f32.mrb[0].mxu1  ;;  %v2415_v4 = vpop.f32.mrb[1].mxu0 }
  0xfb   : > { %v503_v8 = vadd.f32 %v502_v7, %v376_v6  ;;  %v2451_v9 = vpop.f32.mrb[1].mxu1  ;;  %v379_v11 = vpop.f32.mrb[2].mxu0 }
  0xfc   : > { %v505_v12 = vpop.f32.mrb[2].mxu1  ;;  %v2416_v10 = vpop.f32.mrb[3].mxu0 }
  0xfd   : > { %v506_v13 = vadd.f32 %v505_v12, %v379_v11  ;;  %v2452_v14 = vpop.f32.mrb[3].mxu1 }
 0x101   : > { %v384_v16 = vpop.f32.mrb[4].mxu0 }
 0x102   : > { %v510_v17 = vpop.f32.mrb[4].mxu1  ;;  %v2419_v18 = vpop.f32.mrb[5].mxu0 }
 0x103   : > { %v511_v15 = vadd.f32 %v510_v17, %v384_v16  ;;  %v2455_v20 = vpop.f32.mrb[5].mxu1  ;;  %v387_v21 = vpop.f32.mrb[6].mxu0 }
 0x104   : > { %v513_v1 = vpop.f32.mrb[6].mxu1  ;;  %v2420_v22 = vpop.f32.mrb[7].mxu0 }
 0x105   : > { %v514_v19 = vadd.f32 %v513_v1, %v387_v21  ;;  %v2456_v23 = vpop.f32.mrb[7].mxu1 }
 0x109   : > { %v392_v24 = vpop.f32.mrb[8].mxu0 }
 0x10a   : > { %v518_v25 = vpop.f32.mrb[8].mxu1  ;;  %v2423_v26 = vpop.f32.mrb[9].mxu0 }
 0x10b   : > { %v519_v28 = vadd.f32 %v518_v25, %v392_v24  ;;  %v2459_v29 = vpop.f32.mrb[9].mxu1  ;;  %v395_v30 = vpop.f32.mrb[10].mxu0 }
 0x10c   : > { %v521_v31 = vpop.f32.mrb[10].mxu1  ;;  %v2424_v32 = vpop.f32.mrb[11].mxu0 }
 0x10d   : > { %v522_v33 = vadd.f32 %v521_v31, %v395_v30  ;;  %v2460_v34 = vpop.f32.mrb[11].mxu1 }
 0x111   : > { %v400_v35 = vpop.f32.mrb[12].mxu0 }
 0x112   : > { %v526_v27 = vpop.f32.mrb[12].mxu1  ;;  %v2427_v37 = vpop.f32.mrb[13].mxu0 }
 0x113   : > { %v527_v38 = vadd.f32 %v526_v27, %v400_v35  ;;  %v2463_v39 = vpop.f32.mrb[13].mxu1  ;;  %v403_v40 = vpop.f32.mrb[14].mxu0 }
 0x114   : > { %v529_v41 = vpop.f32.mrb[14].mxu1  ;;  %v2428_v42 = vpop.f32.mrb[15].mxu0 }
 0x115   : > { %v530_v43 = vadd.f32 %v529_v41, %v403_v40  ;;  %v2464_v44 = vpop.f32.mrb[15].mxu1 }
 0x119   : > { %v408_v46 = vpop.f32.mrb[16].mxu0 }
 0x11a   : > { %v534_v47 = vpop.f32.mrb[16].mxu1  ;;  %v2431_v48 = vpop.f32.mrb[17].mxu0 }
 0x11b   : > { %v535_v49 = vadd.f32 %v534_v47, %v408_v46  ;;  %v2467_v36 = vpop.f32.mrb[17].mxu1  ;;  %v411_v50 = vpop.f32.mrb[18].mxu0 }
 0x11c   : > { %v537_v52 = vpop.f32.mrb[18].mxu1  ;;  %v2432_v53 = vpop.f32.mrb[19].mxu0 }
 0x11d   : > { %v538_v54 = vadd.f32 %v537_v52, %v411_v50  ;;  %v2468_v55 = vpop.f32.mrb[19].mxu1 }
 0x121   : > { %v661_v56 = vpop.f32.mrb[20].mxu0 }
 0x122   : > { %v700_v57 = vadd.f32 %v661_v56, %v503_v8  ;;  %v2487_v58 = vpop.f32.mrb[21].mxu0  ;;  %v864_v59 = vpop.f32.mrb[20].mxu1 }
 0x123   : > { %v664_v60 = vpop.f32.mrb[22].mxu0  ;;  %v2523_v61 = vpop.f32.mrb[21].mxu1 }
 0x124   : > { %v701_v45 = vadd.f32 %v664_v60, %v506_v13  ;;  %v903_v62 = vadd.f32 %v864_v59, %v700_v57  ;;  %v2488_v63 = vpop.f32.mrb[23].mxu0  ;;  %v867_v0 = vpop.f32.mrb[22].mxu1 }
 0x125   : > { %v2524_v51 = vpop.f32.mrb[23].mxu1 }
 0x126   : > { %v904_v2 = vadd.f32 %v867_v0, %v701_v45 }
 0x129   : > { %v669_v3 = vpop.f32.mrb[24].mxu0 }
 0x12a   : > { %v702_v5 = vadd.f32 %v669_v3, %v511_v15  ;;  %v2491_v6 = vpop.f32.mrb[25].mxu0  ;;  %v872_v7 = vpop.f32.mrb[24].mxu1 }
 0x12b   : > { %v672_v4 = vpop.f32.mrb[26].mxu0  ;;  %v2527_v9 = vpop.f32.mrb[25].mxu1 }
 0x12c   : > { %v703_v11 = vadd.f32 %v672_v4, %v514_v19  ;;  %v905_v12 = vadd.f32 %v872_v7, %v702_v5  ;;  %v2492_v10 = vpop.f32.mrb[27].mxu0  ;;  %v875_v8 = vpop.f32.mrb[26].mxu1 }
 0x12d   : > { %v2528_v14 = vpop.f32.mrb[27].mxu1 }
 0x12e   : > { %v906_v16 = vadd.f32 %v875_v8, %v703_v11 }
 0x131   : > { %v677_v17 = vpop.f32.mrb[28].mxu0 }
 0x132   : > { %v704_v18 = vadd.f32 %v677_v17, %v519_v28  ;;  %v2495_v13 = vpop.f32.mrb[29].mxu0  ;;  %v880_v20 = vpop.f32.mrb[28].mxu1 }
 0x133   : > { %v680_v21 = vpop.f32.mrb[30].mxu0  ;;  %v2531_v1 = vpop.f32.mrb[29].mxu1 }
 0x134   : > { %v705_v22 = vadd.f32 %v680_v21, %v522_v33  ;;  %v907_v23 = vadd.f32 %v880_v20, %v704_v18  ;;  %v2496_v24 = vpop.f32.mrb[31].mxu0  ;;  %v883_v15 = vpop.f32.mrb[30].mxu1 }
 0x135   : > { %v2532_v25 = vpop.f32.mrb[31].mxu1 }
 0x136   : > { %v908_v26 = vadd.f32 %v883_v15, %v705_v22 }
 0x139   : > { %v685_v29 = vpop.f32.mrb[32].mxu0 }
 0x13a   : > { %v706_v30 = vadd.f32 %v685_v29, %v527_v38  ;;  %v2499_v19 = vpop.f32.mrb[33].mxu0  ;;  %v888_v31 = vpop.f32.mrb[32].mxu1 }
 0x13b   : > { %v688_v32 = vpop.f32.mrb[34].mxu0  ;;  %v2535_v34 = vpop.f32.mrb[33].mxu1 }
 0x13c   : > { %v707_v35 = vadd.f32 %v688_v32, %v530_v43  ;;  %v909_v27 = vadd.f32 %v888_v31, %v706_v30  ;;  %v2500_v37 = vpop.f32.mrb[35].mxu0  ;;  %v891_v28 = vpop.f32.mrb[34].mxu1 }
 0x13d   : > { %v2536_v39 = vpop.f32.mrb[35].mxu1 }
 0x13e   : > { %v910_v40 = vadd.f32 %v891_v28, %v707_v35 }
 0x141   : > { %v693_v41 = vpop.f32.mrb[36].mxu0 }
 0x142   : > { %v708_v42 = vadd.f32 %v693_v41, %v535_v49  ;;  %v2503_v33 = vpop.f32.mrb[37].mxu0  ;;  %v896_v44 = vpop.f32.mrb[36].mxu1 }
 0x143   : > { %v696_v46 = vpop.f32.mrb[38].mxu0  ;;  %v2539_v47 = vpop.f32.mrb[37].mxu1 }
 0x144   : > { %v709_v48 = vadd.f32 %v696_v46, %v538_v54  ;;  %v911_v36 = vadd.f32 %v896_v44, %v708_v42  ;;  %v2504_v50 = vpop.f32.mrb[39].mxu0  ;;  %v899_v38 = vpop.f32.mrb[38].mxu1 }
 0x145   : > { %v2540_v52 = vpop.f32.mrb[39].mxu1 }
 0x146   : > { %v912_v53 = vadd.f32 %v899_v38, %v709_v48 }
 0x149   : > { %v1075_v55 = vpop.f32.mrb[40].mxu0 }
 0x14a   : > { %v1114_v56 = vadd.f32 %v1075_v55, %v903_v62  ;;  %v2559_v43 = vpop.f32.mrb[41].mxu0  ;;  %v1244_v57 = vpop.f32.mrb[40].mxu1 }
 0x14b   : > { %v1078_v58 = vpop.f32.mrb[42].mxu0  ;;  %v2595_v59 = vpop.f32.mrb[41].mxu1 }
 0x14c   : > { %v1115_v60 = vadd.f32 %v1078_v58, %v904_v2  ;;  %v1283_v61 = vadd.f32 %v1244_v57, %v1114_v56  ;;  %v2560_v45 = vpop.f32.mrb[43].mxu0  ;;  %v1247_v49 = vpop.f32.mrb[42].mxu1 }
 0x14d   : > { %v2596_v63 = vpop.f32.mrb[43].mxu1 }
 0x14e   : > { %v1284_v0 = vadd.f32 %v1247_v49, %v1115_v60 }
 0x151   : > { %v1083_v51 = vpop.f32.mrb[44].mxu0 }
 0x152   : > { %v1116_v3 = vadd.f32 %v1083_v51, %v905_v12  ;;  %v2563_v54 = vpop.f32.mrb[45].mxu0  ;;  %v1252_v5 = vpop.f32.mrb[44].mxu1 }
 0x153   : > { %v1086_v6 = vpop.f32.mrb[46].mxu0  ;;  %v2599_v7 = vpop.f32.mrb[45].mxu1 }
 0x154   : > { %v1117_v4 = vadd.f32 %v1086_v6, %v906_v16  ;;  %v1285_v9 = vadd.f32 %v1252_v5, %v1116_v3  ;;  %v2564_v11 = vpop.f32.mrb[47].mxu0  ;;  %v1255_v62 = vpop.f32.mrb[46].mxu1 }
 0x155   : > { %v2600_v10 = vpop.f32.mrb[47].mxu1 }
 0x156   : > { %v1286_v8 = vadd.f32 %v1255_v62, %v1117_v4 }
 0x159   : > { %v1091_v14 = vpop.f32.mrb[48].mxu0 }
 0x15a   : > { %v1118_v17 = vadd.f32 %v1091_v14, %v907_v23  ;;  %v2567_v2 = vpop.f32.mrb[49].mxu0  ;;  %v1260_v18 = vpop.f32.mrb[48].mxu1 }
 0x15b   : > { %v1094_v13 = vpop.f32.mrb[50].mxu0  ;;  %v2603_v20 = vpop.f32.mrb[49].mxu1 }
 0x15c   : > { %v1119_v21 = vadd.f32 %v1094_v13, %v908_v26  ;;  %v1287_v1 = vadd.f32 %v1260_v18, %v1118_v17  ;;  %v2568_v22 = vpop.f32.mrb[51].mxu0  ;;  %v1263_v12 = vpop.f32.mrb[50].mxu1 }
 0x15d   : > { %v2604_v24 = vpop.f32.mrb[51].mxu1 }
 0x15e   : > { %v1288_v15 = vadd.f32 %v1263_v12, %v1119_v21 }
 0x161   : > { %v1099_v25 = vpop.f32.mrb[52].mxu0 }
 0x162   : > { %v1120_v29 = vadd.f32 %v1099_v25, %v909_v27  ;;  %v2571_v16 = vpop.f32.mrb[53].mxu0  ;;  %v1268_v30 = vpop.f32.mrb[52].mxu1 }
 0x163   : > { %v1102_v19 = vpop.f32.mrb[54].mxu0  ;;  %v2607_v31 = vpop.f32.mrb[53].mxu1 }
 0x164   : > { %v1121_v32 = vadd.f32 %v1102_v19, %v910_v40  ;;  %v1289_v34 = vadd.f32 %v1268_v30, %v1120_v29  ;;  %v2572_v35 = vpop.f32.mrb[55].mxu0  ;;  %v1271_v23 = vpop.f32.mrb[54].mxu1 }
 0x165   : > { %v2608_v37 = vpop.f32.mrb[55].mxu1 }
 0x166   : > { %v1290_v28 = vadd.f32 %v1271_v23, %v1121_v32 }
 0x169   : > { %v1107_v39 = vpop.f32.mrb[56].mxu0 }
 0x16a   : > { %v1122_v41 = vadd.f32 %v1107_v39, %v911_v36  ;;  %v2575_v26 = vpop.f32.mrb[57].mxu0  ;;  %v1276_v42 = vpop.f32.mrb[56].mxu1 }
 0x16b   : > { %v1110_v33 = vpop.f32.mrb[58].mxu0  ;;  %v2611_v44 = vpop.f32.mrb[57].mxu1 }
 0x16c   : > { %v1123_v46 = vadd.f32 %v1110_v33, %v912_v53  ;;  %v1291_v47 = vadd.f32 %v1276_v42, %v1122_v41  ;;  %v2576_v48 = vpop.f32.mrb[59].mxu0  ;;  %v1279_v27 = vpop.f32.mrb[58].mxu1 }
 0x16d   : > { %v2612_v50 = vpop.f32.mrb[59].mxu1 }
 0x16e   : > { %v1292_v38 = vadd.f32 %v1279_v27, %v1123_v46 }
 0x171   : > { %v1447_v52 = vpop.f32.mrb[60].mxu0 }
 0x172   : > { %v1486_v55 = vadd.f32 %v1447_v52, %v1283_v61  ;;  %v2631_v40 = vpop.f32.mrb[61].mxu0  ;;  %v1658_v56 = vpop.f32.mrb[60].mxu1 }
 0x173   : > { %v1450_v43 = vpop.f32.mrb[62].mxu0  ;;  %v2667_v57 = vpop.f32.mrb[61].mxu1  ;;  %v2228_v40 = vld [vmem:[%s3471_s2] ss:$0 sm:$0xff] }
 0x174   : > { %v1487_v58 = vadd.f32 %v1450_v43, %v1284_v0  ;;  %v1697_v59 = vadd.f32 %v1658_v56, %v1486_v55  ;;  %v2632_v60 = vpop.f32.mrb[63].mxu0  ;;  %v1661_v36 = vpop.f32.mrb[62].mxu1 }
 0x175   : > { %v2668_v45 = vpop.f32.mrb[63].mxu1 }
 0x176   : > { %v1698_v49 = vadd.f32 %v1661_v36, %v1487_v58 }
 0x179   : > { %v1455_v63 = vpop.f32.mrb[64].mxu0 }
 0x17a   : > { %v1488_v51 = vadd.f32 %v1455_v63, %v1285_v9  ;;  %v2635_v53 = vpop.f32.mrb[65].mxu0  ;;  %v1666_v3 = vpop.f32.mrb[64].mxu1 }
 0x17b   : > { %v1458_v54 = vpop.f32.mrb[66].mxu0  ;;  %v2671_v5 = vpop.f32.mrb[65].mxu1 }
 0x17c   : > { %v1489_v6 = vadd.f32 %v1458_v54, %v1286_v8  ;;  %v3440_v7 = vadd.f32 %v1666_v3, %v1488_v51  ;;  %v2636_v61 = vpop.f32.mrb[67].mxu0  ;;  %v1669_v4 = vpop.f32.mrb[66].mxu1 }
 0x17d   : > { %v2672_v11 = vpop.f32.mrb[67].mxu1 }
 0x17e   : > { %v3442_v62 = vadd.f32 %v1669_v4, %v1489_v6 }
 0x181   : > { %v1463_v0 = vpop.f32.mrb[68].mxu0 }
 0x182   : > { %v1490_v10 = vadd.f32 %v1463_v0, %v1287_v1  ;;  %v2639_v14 = vpop.f32.mrb[69].mxu0  ;;  %v1674_v17 = vpop.f32.mrb[68].mxu1 }
 0x183   : > { %v1466_v2 = vpop.f32.mrb[70].mxu0  ;;  %v2675_v18 = vpop.f32.mrb[69].mxu1 }
 0x184   : > { %v1491_v13 = vadd.f32 %v1466_v2, %v1288_v15  ;;  %v3444_v9 = vadd.f32 %v1674_v17, %v1490_v10  ;;  %v2640_v20 = vpop.f32.mrb[71].mxu0  ;;  %v1677_v21 = vpop.f32.mrb[70].mxu1 }
 0x185   : > { %v2676_v22 = vpop.f32.mrb[71].mxu1 }
 0x186   : > { %v3446_v8 = vadd.f32 %v1677_v21, %v1491_v13 }
 0x189   : > { %v1471_v12 = vpop.f32.mrb[72].mxu0 }
 0x18a   : > { %v1492_v24 = vadd.f32 %v1471_v12, %v1289_v34  ;;  %v2643_v25 = vpop.f32.mrb[73].mxu0  ;;  %v1682_v29 = vpop.f32.mrb[72].mxu1 }
 0x18b   : > { %v1474_v16 = vpop.f32.mrb[74].mxu0  ;;  %v2679_v30 = vpop.f32.mrb[73].mxu1 }
 0x18c   : > { %v1493_v19 = vadd.f32 %v1474_v16, %v1290_v28  ;;  %v1703_v1 = vadd.f32 %v1682_v29, %v1492_v24  ;;  %v2644_v31 = vpop.f32.mrb[75].mxu0  ;;  %v1685_v32 = vpop.f32.mrb[74].mxu1 }
 0x18d   : > { %v2680_v35 = vpop.f32.mrb[75].mxu1 }
 0x18e   : > { %v1704_v23 = vadd.f32 %v1685_v32, %v1493_v19 }
 0x191   : > { %v1479_v15 = vpop.f32.mrb[76].mxu0 }
 0x192   : > { %v1494_v37 = vadd.f32 %v1479_v15, %v1291_v47  ;;  %v2647_v39 = vpop.f32.mrb[77].mxu0  ;;  %v1690_v41 = vpop.f32.mrb[76].mxu1 }
 0x193   : > { %v1482_v26 = vpop.f32.mrb[78].mxu0  ;;  %v2683_v42 = vpop.f32.mrb[77].mxu1 }
 0x194   : > { %v1495_v33 = vadd.f32 %v1482_v26, %v1292_v38  ;;  %v1705_v44 = vadd.f32 %v1690_v41, %v1494_v37  ;;  %v2648_v34 = vpop.f32.mrb[79].mxu0  ;;  %v1693_v46 = vpop.f32.mrb[78].mxu1 }
 0x195   : > { %v2684_v48 = vpop.f32.mrb[79].mxu1 }
 0x196   : > { %v1706_v27 = vadd.f32 %v1693_v46, %v1495_v33 }
 0x199   : > { %v1827_v50 = vpop.f32.mrb[80].mxu0 }
 0x19a   : > { %v1866_v28 = vadd.f32 %v1827_v50, %v1697_v59  ;;  %v1851_v52 = vpop.f32.mrb[80].mxu1  ;;  %v2703_v55 = vpop.f32.mrb[81].mxu0 }
 0x19b   : > { %v1872_v47 = vadd.f32 %v1851_v52, %v1703_v1  ;;  %v2715_v56 = vpop.f32.mrb[81].mxu1  ;;  %v1830_v43 = vpop.f32.mrb[82].mxu0 }
 0x19c   : > { %v1867_v57 = vadd.f32 %v1830_v43, %v1698_v49  ;;  %v1854_v58 = vpop.f32.mrb[82].mxu1  ;;  %v2704_v38 = vpop.f32.mrb[83].mxu0  ;;  %v1883_v45 = vadd.f32 %v2228_v40, %v1866_v28 }
 0x19d   : > { %v1873_v60 = vadd.f32 %v1854_v58, %v1704_v23  ;;  %v2716_v36 = vpop.f32.mrb[83].mxu1  ;;  %v1889_v51 = vadd.f32 %v2228_v40, %v1872_v47 }
 0x19e   : > { %v1884_v63 = vadd.f32 %v2228_v40, %v1867_v57 }
 0x19f   : > { %v1890_v59 = vadd.f32 %v2228_v40, %v1873_v60 }
 0x1a0   : > { %v2254_v53 = vpack.c.bf16 %v1884_v63, %v1883_v45 }
 0x1a1   : > { %v2269_v3 = vpack.c.bf16 %v1890_v59, %v1889_v51  ;;  %v1835_v54 = vpop.f32.mrb[84].mxu0 }
 0x1a2   : > { %2255 = vst [vmem:[%s3455_s21] sm:$0xff] %v2254_v53   ;;  %v1868_v49 = vadd.f32 %v1835_v54, %v3440_v7  ;;  %v1859_v5 = vpop.f32.mrb[84].mxu1  ;;  %v2707_v6 = vpop.f32.mrb[85].mxu0 }
 0x1a3   : > { %2278 = vst [vmem:[%s3455_s21 + $0x18] sm:$0xff] %v2269_v3   ;;  %v1874_v61 = vadd.f32 %v1859_v5, %v1705_v44  ;;  %v2719_v4 = vpop.f32.mrb[85].mxu1  ;;  %v1838_v11 = vpop.f32.mrb[86].mxu0 }
 0x1a4   : > { %v1869_v0 = vadd.f32 %v1838_v11, %v3442_v62  ;;  %v1862_v10 = vpop.f32.mrb[86].mxu1  ;;  %v2708_v14 = vpop.f32.mrb[87].mxu0  ;;  %v1885_v18 = vadd.f32 %v2228_v40, %v1868_v49 }
 0x1a5   : > { %v1875_v17 = vadd.f32 %v1862_v10, %v1706_v27  ;;  %v2720_v2 = vpop.f32.mrb[87].mxu1  ;;  %v1891_v20 = vadd.f32 %v2228_v40, %v1874_v61 }
 0x1a6   : > { %v1886_v13 = vadd.f32 %v2228_v40, %v1869_v0 }
 0x1a7   : > { %v1892_v21 = vadd.f32 %v2228_v40, %v1875_v17 }
 0x1a8   : > { %v2259_v7 = vpack.c.bf16 %v1886_v13, %v1885_v18 }
 0x1a9   : > { %v2274_v22 = vpack.c.bf16 %v1892_v21, %v1891_v20  ;;  %v1843_v12 = vpop.f32.mrb[88].mxu0 }
 0x1aa   : > { %2276 = vst [vmem:[%s3455_s21 + $0x8] sm:$0xff] %v2259_v7   ;;  %v1870_v24 = vadd.f32 %v1843_v12, %v3444_v9  ;;  %v2711_v25 = vpop.f32.mrb[89].mxu0 }
 0x1ab   : > { %2279 = vst [vmem:[%s3455_s21 + $0x20] sm:$0xff] %v2274_v22   ;;  %v1846_v29 = vpop.f32.mrb[90].mxu0 }
 0x1ac   : > { %v1871_v62 = vadd.f32 %v1846_v29, %v3446_v8  ;;  %v2712_v16 = vpop.f32.mrb[91].mxu0  ;;  %v1887_v30 = vadd.f32 %v2228_v40, %v1870_v24 }
 0x1ae   : > { %v1888_v19 = vadd.f32 %v2228_v40, %v1871_v62 }
 0x1b0   : > { %v2264_v1 = vpack.c.bf16 %v1888_v19, %v1887_v30 }
 0x1b2   : > { %2277 = vst [vmem:[%s3455_s21 + $0x10] sm:$0xff] %v2264_v1  }
 0x1b3 PF: > { %s13_s12 = sadd.s32 1, %s2850_s12  }
 0x1b4   : > { %p10_p4 = scmp.ge.s32.totalorder %s13_s12, 4  }
 0x1b6   :  { %12 = sbr.rel (!%p10_p4) target bundleno = 1 (0x1), region = 70 }

</bundles_post_ra>
